<compile_context>
chip_gen: v6e
topology: v6e:2x2x1
jax: 0.10.0
libtpu: 0.0.40
codegen_flags: <defaults>
</compile_context>

<pallas_src>
import numpy as np
import jax
import jax.numpy as jnp
from jax import lax
from jax.experimental import pallas as pl
from jax.experimental.pallas import tpu as pltpu

VMEM = pltpu.MemorySpace.VMEM
NEG_SLOPE = 0.01          # nn.LeakyReLU default negative_slope
BN_EPS = 1e-5             # nn.BatchNorm2d default eps


def _leaky(y):
    return jnp.where(y > 0.0, y, NEG_SLOPE * y)


def _sigmoid(z):
    # EUP exp + EUP approx reciprocal keeps the serial LSTM path off the VPU divide
    return pl.reciprocal(1.0 + jnp.exp(-z), approx=True)


def make_fused_kernel(N, H, W, S, B, hidden):
    """Builds the fused forward kernel for N = B*S chunks of size HxW."""
    HW = H * W
    conv_off = [dh * W + dw for dh in range(3) for dw in range(3)]
    c_shrink = conv_off[-1]              # 2*W + 2
    p_shrink = W + 1                     # 2x2 max-pool taps {0, 1, W, W+1}

    L0 = N * HW                          # input: flat (chunk, h, w) on the lane axis
    L1 = L0 - c_shrink                   # after conv1
    L2 = L1 - c_shrink                   # after conv2
    L3 = L2 - c_shrink                   # after conv3
    Lp = L3 - p_shrink                   # after adaptive max pool (10x10 -> 9x9)
    L4 = Lp - c_shrink                   # after conv4
    L5 = L4 - c_shrink                   # after conv5
    Hh = hidden

    def kernel(x_ref,
               w1_ref, b1_ref, w2_ref, b2_ref, w3_ref, b3_ref,
               w4_ref, b4_ref, w5_ref, b5_ref,
               m_ref,
               wih0_ref, whh0_ref, bg0_ref, wcat1_ref, bg1_ref,
               wl_ref, bl_ref,
               o_ref):
        # ---------------- conv1 (Cin=1): 9-tap broadcast FMA ----------------
        x = x_ref[...]                                   # (1, L0)
        w1 = w1_ref[...]                                 # (C1, 9)
        y = None
        for t, off in enumerate(conv_off):
            contrib = w1[:, t:t + 1] * x[:, off:off + L1]
            y = contrib if y is None else y + contrib
        a1 = _leaky(y + b1_ref[...])                     # (4, L1) lane-dense

        # ------------ conv2..conv5: 9 shifted-tap matmuls per layer ----------
        def conv3x3(a_prev, w, b, l_out):
            cin = a_prev.shape[0]
            acc = None
            for t, off in enumerate(conv_off):
                wt = w[:, t * cin:(t + 1) * cin]          # (Cout, Cin)
                st = a_prev[:, off:off + l_out]           # (Cin, l_out) lane-dense
                d = jnp.dot(wt, st, preferred_element_type=jnp.float32)
                acc = d if acc is None else acc + d
            return _leaky(acc + b)

        a2 = conv3x3(a1, w2_ref[...], b2_ref[...], L2)    # (4, L2)
        a3 = conv3x3(a2, w3_ref[...], b3_ref[...], L3)    # (4, L3)

        # -- AdaptiveMaxPool2d((9,9)) on 10x10 == MaxPool(2,1): separable max --
        mw = jnp.maximum(a3[:, 0:Lp + W], a3[:, 1:Lp + W + 1])   # max over width
        ap = jnp.maximum(mw[:, 0:Lp], mw[:, W:W + Lp])           # max over height

        a4 = conv3x3(ap, w4_ref[...], b4_ref[...], L4)    # (8, L4)
        a5 = conv3x3(a4, w5_ref[...], b5_ref[...], L5)    # (8, L5)

        # -- AvgPool2d(3) + feature gather (lane -> sublane) as one matmul ----
        # feat[n, c] = sum_l M[n, l] * a5[c, l]; M holds 1/9 at the 9 window taps
        feat = lax.dot_general(m_ref[...], a5,
                               (((1,), (1,)), ((), ())),
                               preferred_element_type=jnp.float32)   # (N, 8)

        # -------- 2-layer LSTM (PyTorch gate order i,f,g,o) + Linear ---------
        # Hoisted layer-0 input projection for all timesteps (one matmul).
        xp0 = (jnp.dot(feat, wih0_ref[...], preferred_element_type=jnp.float32)
               + bg0_ref[...])                            # (N, 4H), rows time-major

        def gate_update(g, c_prev):
            i = _sigmoid(g[:, 0:Hh])
            f = _sigmoid(g[:, Hh:2 * Hh])
            gg = jnp.tanh(g[:, 2 * Hh:3 * Hh])
            o = _sigmoid(g[:, 3 * Hh:4 * Hh])
            c_new = f * c_prev + i * gg
            return o * jnp.tanh(c_new), c_new

        z = jnp.zeros((B, Hh), jnp.float32)
        h0, c0, h1, c1 = z, z, z, z
        for t in range(S):    # S is small & static: unroll for LLO visibility
            g0 = xp0[t * B:(t + 1) * B, :] + jnp.dot(
                h0, whh0_ref[...], preferred_element_type=jnp.float32)
            h0, c0 = gate_update(g0, c0)
            g1 = (jnp.dot(jnp.concatenate([h0, h1], axis=1), wcat1_ref[...],
                          preferred_element_type=jnp.float32) + bg1_ref[...])
            h1, c1 = gate_update(g1, c1)

        o_ref[...] = (jnp.dot(h1, wl_ref[...], preferred_element_type=jnp.float32)
                      + bl_ref[...])

    return kernel, L5


# ------------------------------- glue (JAX) -------------------------------

def ragam_forward(x, params):
    """x: (B, S, H, W) float32 -> (B, num_ragas)."""
    B, S, H, W = x.shape
    # TODO(synk): generic AdaptiveMaxPool2d bins (non-uniform windows) for chunk
    # sizes other than 16x16 are not implemented; 16x16 gives 10->9 = MaxPool(2,1).
    assert (H, W) == (16, 16), "fused kernel assumes 16x16 chunks"
    N = B * S
    hidden = params["hidden"]
    num_ragas = params["num_ragas"]

    kernel, L5 = make_fused_kernel(N, H, W, S, B, hidden)

    # chunk order n = s*B + b (time-major) so each LSTM step reads a contiguous
    # row pair of the hoisted input projection
    x_flat = jnp.transpose(x, (1, 0, 2, 3)).reshape(1, N * H * W)

    # constant AvgPool2d(3)+gather matrix: M[n, n*H*W + hh*W + ww] = 1/9, hh,ww < 3
    m = np.zeros((N, L5), np.float32)
    for n in range(N):
        for hh in range(3):
            for ww in range(3):
                m[n, n * H * W + hh * W + ww] = 1.0 / 9.0
    m = jnp.asarray(m)

    args = (x_flat,
            params["conv1_w"], params["conv1_b"],
            params["conv2_w"], params["conv2_b"],
            params["conv3_w"], params["conv3_b"],
            params["conv4_w"], params["conv4_b"],
            params["conv5_w"], params["conv5_b"],
            m,
            params["wih0"], params["whh0"], params["bg0"],
            params["wcat1"], params["bg1"],
            params["wl"], params["bl"])

    # Single launch, everything VMEM-resident (total working set << 1 MiB).
    # TODO(synk): on v7x the CNN part could additionally be split across the two
    # TensorCores (grid over chunks, "parallel" semantics); single-core here.
    return pl.pallas_call(
        kernel,
        out_shape=jax.ShapeDtypeStruct((B, num_ragas), jnp.float32),
        in_specs=[pl.BlockSpec(memory_space=VMEM)] * len(args),
        out_specs=pl.BlockSpec(memory_space=VMEM),
    )(*args)


# ------------------------- deterministic parameters -------------------------

def init_params(key, num_ragas=5, hidden=32, lstm_in=8):
    keys = iter(jax.random.split(key, 64))

    def nrm(shape, scale=0.1):
        return scale * jax.random.normal(next(keys), shape, jnp.float32)

    # Conv2d weights in PyTorch layout (Cout, Cin, 3, 3) + biases
    conv_defs = [(4, 1), (4, 4), (4, 4), (8, 4), (8, 8)]
    conv_w = [nrm((co, ci, 3, 3), 0.3) for (co, ci) in conv_defs]
    conv_b = [nrm((co,), 0.1) for (co, _) in conv_defs]

    # BatchNorm2d (gamma, beta, running_mean, running_var) for norm0..norm5 (eval mode)
    bn = []
    for c in [1, 4, 4, 4, 8, 8]:
        bn.append((1.0 + nrm((c,), 0.1), nrm((c,), 0.1),
                   nrm((c,), 0.1), jnp.abs(nrm((c,), 0.3)) + 0.5))

    def bn_scale_shift(p):
        g, b, rm, rv = p
        s = g / jnp.sqrt(rv + BN_EPS)
        return s, b - rm * s

    # Fold norm0 (input BN, eval) exactly into conv1
    s0, sh0 = bn_scale_shift(bn[0])
    w_eff = [conv_w[0] * s0[0]] + conv_w[1:]
    b_eff = [conv_b[0] + sh0[0] * conv_w[0].sum(axis=(1, 2, 3))] + conv_b[1:]

    params = {"hidden": hidden, "num_ragas": num_ragas}
    # Fold each conv's following BatchNorm (eval) into the weights; kernel layout:
    #   conv1: (Cout, tap);   conv2..5: (Cout, tap*Cin + ci), tap = 3*dh + dw
    for i in range(5):
        s, sh = bn_scale_shift(bn[i + 1])
        co, ci = conv_defs[i]
        w = w_eff[i] * s[:, None, None, None]            # scale per output channel
        bv = (b_eff[i] * s + sh).reshape(co, 1)
        if ci == 1:
            wk = w[:, 0, :, :].reshape(co, 9)
        else:
            wk = jnp.transpose(w, (0, 2, 3, 1)).reshape(co, 9 * ci)
        params[f"conv{i + 1}_w"] = wk.astype(jnp.float32)
        params[f"conv{i + 1}_b"] = bv.astype(jnp.float32)

    # 2-layer LSTM (PyTorch gate order i,f,g,o) + Linear head
    sc = 1.0 / (hidden ** 0.5)

    def lstm_layer(in_dim):
        wih = nrm((4 * hidden, in_dim), sc)
        whh = nrm((4 * hidden, hidden), sc)
        bih = nrm((4 * hidden,), sc)
        bhh = nrm((4 * hidden,), sc)
        return wih, whh, (bih + bhh).reshape(1, 4 * hidden)

    wih0, whh0, bg0 = lstm_layer(lstm_in)
    wih1, whh1, bg1 = lstm_layer(hidden)
    params["wih0"] = wih0.T                              # (in, 4H)
    params["whh0"] = whh0.T                              # (H, 4H)
    params["bg0"] = bg0                                  # (1, 4H)
    params["wcat1"] = jnp.concatenate([wih1.T, whh1.T], axis=0)   # (2H, 4H)
    params["bg1"] = bg1                                  # (1, 4H)
    wl = nrm((num_ragas, hidden), sc)
    bl = nrm((num_ragas,), sc)
    params["wl"] = wl.T                                  # (H, num_ragas)
    params["bl"] = bl.reshape(1, num_ragas)
    return params


# ----------------------------------- main -----------------------------------

if __name__ == "__main__":
    key = jax.random.PRNGKey(0)
    kx, kp = jax.random.split(key)
    B, S, H, W = 2, 4, 16, 16
    NUM_RAGAS = 5

    x = jax.random.normal(kx, (B, S, H, W), jnp.float32)
    params = init_params(kp, num_ragas=NUM_RAGAS, hidden=32, lstm_in=8)

    fwd = jax.jit(lambda inp: ragam_forward(inp, params))
    out = jax.block_until_ready(fwd(x))

    assert out.shape == (B, NUM_RAGAS), out.shape
    assert bool(jnp.all(jnp.isfinite(out)))
    print("KERNEL_OK")
</pallas_src>

<mosaic_0001>
module attributes {stable_mosaic.version = 11 : i64} {
  func.func @kernel(%arg0: memref<1x2048xf32, #tpu.memory_space<vmem>>, %arg1: memref<4x9xf32, #tpu.memory_space<vmem>>, %arg2: memref<4x1xf32, #tpu.memory_space<vmem>>, %arg3: memref<4x36xf32, #tpu.memory_space<vmem>>, %arg4: memref<4x1xf32, #tpu.memory_space<vmem>>, %arg5: memref<4x36xf32, #tpu.memory_space<vmem>>, %arg6: memref<4x1xf32, #tpu.memory_space<vmem>>, %arg7: memref<8x36xf32, #tpu.memory_space<vmem>>, %arg8: memref<8x1xf32, #tpu.memory_space<vmem>>, %arg9: memref<8x72xf32, #tpu.memory_space<vmem>>, %arg10: memref<8x1xf32, #tpu.memory_space<vmem>>, %arg11: memref<8x1861xf32, #tpu.memory_space<vmem>>, %arg12: memref<8x128xf32, #tpu.memory_space<vmem>>, %arg13: memref<32x128xf32, #tpu.memory_space<vmem>>, %arg14: memref<1x128xf32, #tpu.memory_space<vmem>>, %arg15: memref<64x128xf32, #tpu.memory_space<vmem>>, %arg16: memref<1x128xf32, #tpu.memory_space<vmem>>, %arg17: memref<32x5xf32, #tpu.memory_space<vmem>>, %arg18: memref<1x5xf32, #tpu.memory_space<vmem>>, %arg19: memref<2x5xf32, #tpu.memory_space<vmem>>) attributes {dimension_semantics = [], scalar_prefetch = 0 : i64, scratch_operands = 0 : i64, tpu.core_type = #tpu.core_type<tc>} {
    %c0 = arith.constant 0 : index
    %c0_0 = arith.constant 0 : index
    %0 = vector.load %arg0[%c0, %c0_0] : memref<1x2048xf32, #tpu.memory_space<vmem>>, vector<1x2048xf32>
    %c0_1 = arith.constant 0 : index
    %c0_2 = arith.constant 0 : index
    %1 = vector.load %arg1[%c0_1, %c0_2] : memref<4x9xf32, #tpu.memory_space<vmem>>, vector<4x9xf32>
    %2 = vector.extract_strided_slice %1 {offsets = [0, 0], sizes = [4, 1], strides = [1, 1]} : vector<4x9xf32> to vector<4x1xf32>
    %3 = vector.extract_strided_slice %0 {offsets = [0, 0], sizes = [1, 2014], strides = [1, 1]} : vector<1x2048xf32> to vector<1x2014xf32>
    %4 = vector.broadcast %2 : vector<4x1xf32> to vector<4x2014xf32>
    %5 = vector.broadcast %3 : vector<1x2014xf32> to vector<4x2014xf32>
    %6 = arith.mulf %4, %5 : vector<4x2014xf32>
    %7 = vector.extract_strided_slice %1 {offsets = [0, 1], sizes = [4, 1], strides = [1, 1]} : vector<4x9xf32> to vector<4x1xf32>
    %8 = vector.extract_strided_slice %0 {offsets = [0, 1], sizes = [1, 2014], strides = [1, 1]} : vector<1x2048xf32> to vector<1x2014xf32>
    %9 = vector.broadcast %7 : vector<4x1xf32> to vector<4x2014xf32>
    %10 = vector.broadcast %8 : vector<1x2014xf32> to vector<4x2014xf32>
    %11 = arith.mulf %9, %10 : vector<4x2014xf32>
    %12 = arith.addf %6, %11 : vector<4x2014xf32>
    %13 = vector.extract_strided_slice %1 {offsets = [0, 2], sizes = [4, 1], strides = [1, 1]} : vector<4x9xf32> to vector<4x1xf32>
    %14 = vector.extract_strided_slice %0 {offsets = [0, 2], sizes = [1, 2014], strides = [1, 1]} : vector<1x2048xf32> to vector<1x2014xf32>
    %15 = vector.broadcast %13 : vector<4x1xf32> to vector<4x2014xf32>
    %16 = vector.broadcast %14 : vector<1x2014xf32> to vector<4x2014xf32>
    %17 = arith.mulf %15, %16 : vector<4x2014xf32>
    %18 = arith.addf %12, %17 : vector<4x2014xf32>
    %19 = vector.extract_strided_slice %1 {offsets = [0, 3], sizes = [4, 1], strides = [1, 1]} : vector<4x9xf32> to vector<4x1xf32>
    %20 = vector.extract_strided_slice %0 {offsets = [0, 16], sizes = [1, 2014], strides = [1, 1]} : vector<1x2048xf32> to vector<1x2014xf32>
    %21 = vector.broadcast %19 : vector<4x1xf32> to vector<4x2014xf32>
    %22 = vector.broadcast %20 : vector<1x2014xf32> to vector<4x2014xf32>
    %23 = arith.mulf %21, %22 : vector<4x2014xf32>
    %24 = arith.addf %18, %23 : vector<4x2014xf32>
    %25 = vector.extract_strided_slice %1 {offsets = [0, 4], sizes = [4, 1], strides = [1, 1]} : vector<4x9xf32> to vector<4x1xf32>
    %26 = vector.extract_strided_slice %0 {offsets = [0, 17], sizes = [1, 2014], strides = [1, 1]} : vector<1x2048xf32> to vector<1x2014xf32>
    %27 = vector.broadcast %25 : vector<4x1xf32> to vector<4x2014xf32>
    %28 = vector.broadcast %26 : vector<1x2014xf32> to vector<4x2014xf32>
    %29 = arith.mulf %27, %28 : vector<4x2014xf32>
    %30 = arith.addf %24, %29 : vector<4x2014xf32>
    %31 = vector.extract_strided_slice %1 {offsets = [0, 5], sizes = [4, 1], strides = [1, 1]} : vector<4x9xf32> to vector<4x1xf32>
    %32 = vector.extract_strided_slice %0 {offsets = [0, 18], sizes = [1, 2014], strides = [1, 1]} : vector<1x2048xf32> to vector<1x2014xf32>
    %33 = vector.broadcast %31 : vector<4x1xf32> to vector<4x2014xf32>
    %34 = vector.broadcast %32 : vector<1x2014xf32> to vector<4x2014xf32>
    %35 = arith.mulf %33, %34 : vector<4x2014xf32>
    %36 = arith.addf %30, %35 : vector<4x2014xf32>
    %37 = vector.extract_strided_slice %1 {offsets = [0, 6], sizes = [4, 1], strides = [1, 1]} : vector<4x9xf32> to vector<4x1xf32>
    %38 = vector.extract_strided_slice %0 {offsets = [0, 32], sizes = [1, 2014], strides = [1, 1]} : vector<1x2048xf32> to vector<1x2014xf32>
    %39 = vector.broadcast %37 : vector<4x1xf32> to vector<4x2014xf32>
    %40 = vector.broadcast %38 : vector<1x2014xf32> to vector<4x2014xf32>
    %41 = arith.mulf %39, %40 : vector<4x2014xf32>
    %42 = arith.addf %36, %41 : vector<4x2014xf32>
    %43 = vector.extract_strided_slice %1 {offsets = [0, 7], sizes = [4, 1], strides = [1, 1]} : vector<4x9xf32> to vector<4x1xf32>
    %44 = vector.extract_strided_slice %0 {offsets = [0, 33], sizes = [1, 2014], strides = [1, 1]} : vector<1x2048xf32> to vector<1x2014xf32>
    %45 = vector.broadcast %43 : vector<4x1xf32> to vector<4x2014xf32>
    %46 = vector.broadcast %44 : vector<1x2014xf32> to vector<4x2014xf32>
    %47 = arith.mulf %45, %46 : vector<4x2014xf32>
    %48 = arith.addf %42, %47 : vector<4x2014xf32>
    %49 = vector.extract_strided_slice %1 {offsets = [0, 8], sizes = [4, 1], strides = [1, 1]} : vector<4x9xf32> to vector<4x1xf32>
    %50 = vector.extract_strided_slice %0 {offsets = [0, 34], sizes = [1, 2014], strides = [1, 1]} : vector<1x2048xf32> to vector<1x2014xf32>
    %51 = vector.broadcast %49 : vector<4x1xf32> to vector<4x2014xf32>
    %52 = vector.broadcast %50 : vector<1x2014xf32> to vector<4x2014xf32>
    %53 = arith.mulf %51, %52 : vector<4x2014xf32>
    %54 = arith.addf %48, %53 : vector<4x2014xf32>
    %c0_3 = arith.constant 0 : index
    %c0_4 = arith.constant 0 : index
    %55 = vector.load %arg2[%c0_3, %c0_4] : memref<4x1xf32, #tpu.memory_space<vmem>>, vector<4x1xf32>
    %56 = vector.broadcast %55 : vector<4x1xf32> to vector<4x2014xf32>
    %57 = arith.addf %54, %56 : vector<4x2014xf32>
    %cst = arith.constant 0.000000e+00 : f32
    %58 = vector.broadcast %cst : f32 to vector<4x2014xf32>
    %59 = arith.cmpf ogt, %57, %58 : vector<4x2014xf32>
    %cst_5 = arith.constant 0.00999999977 : f32
    %60 = vector.broadcast %cst_5 : f32 to vector<4x2014xf32>
    %61 = arith.mulf %60, %57 : vector<4x2014xf32>
    %62 = arith.select %59, %57, %61 : vector<4x2014xi1>, vector<4x2014xf32>
    %c0_6 = arith.constant 0 : index
    %c0_7 = arith.constant 0 : index
    %63 = vector.load %arg3[%c0_6, %c0_7] : memref<4x36xf32, #tpu.memory_space<vmem>>, vector<4x36xf32>
    %c0_8 = arith.constant 0 : index
    %c0_9 = arith.constant 0 : index
    %64 = vector.load %arg4[%c0_8, %c0_9] : memref<4x1xf32, #tpu.memory_space<vmem>>, vector<4x1xf32>
    %65 = vector.extract_strided_slice %63 {offsets = [0, 0], sizes = [4, 4], strides = [1, 1]} : vector<4x36xf32> to vector<4x4xf32>
    %66 = vector.extract_strided_slice %62 {offsets = [0, 0], sizes = [4, 1980], strides = [1, 1]} : vector<4x2014xf32> to vector<4x1980xf32>
    %cst_10 = arith.constant dense<0.000000e+00> : vector<4x1980xf32>
    %67 = tpu.matmul %65, %66, %cst_10 {dimension_numbers = #tpu.dot_dimension_numbers<[1], [0], [0], [1], [0, 0, 1, 1], [], []>} : vector<4x4xf32>, vector<4x1980xf32>, vector<4x1980xf32> -> vector<4x1980xf32>
    %68 = vector.extract_strided_slice %63 {offsets = [0, 4], sizes = [4, 4], strides = [1, 1]} : vector<4x36xf32> to vector<4x4xf32>
    %69 = vector.extract_strided_slice %62 {offsets = [0, 1], sizes = [4, 1980], strides = [1, 1]} : vector<4x2014xf32> to vector<4x1980xf32>
    %cst_11 = arith.constant dense<0.000000e+00> : vector<4x1980xf32>
    %70 = tpu.matmul %68, %69, %cst_11 {dimension_numbers = #tpu.dot_dimension_numbers<[1], [0], [0], [1], [0, 0, 1, 1], [], []>} : vector<4x4xf32>, vector<4x1980xf32>, vector<4x1980xf32> -> vector<4x1980xf32>
    %71 = arith.addf %67, %70 : vector<4x1980xf32>
    %72 = vector.extract_strided_slice %63 {offsets = [0, 8], sizes = [4, 4], strides = [1, 1]} : vector<4x36xf32> to vector<4x4xf32>
    %73 = vector.extract_strided_slice %62 {offsets = [0, 2], sizes = [4, 1980], strides = [1, 1]} : vector<4x2014xf32> to vector<4x1980xf32>
    %cst_12 = arith.constant dense<0.000000e+00> : vector<4x1980xf32>
    %74 = tpu.matmul %72, %73, %cst_12 {dimension_numbers = #tpu.dot_dimension_numbers<[1], [0], [0], [1], [0, 0, 1, 1], [], []>} : vector<4x4xf32>, vector<4x1980xf32>, vector<4x1980xf32> -> vector<4x1980xf32>
    %75 = arith.addf %71, %74 : vector<4x1980xf32>
    %76 = vector.extract_strided_slice %63 {offsets = [0, 12], sizes = [4, 4], strides = [1, 1]} : vector<4x36xf32> to vector<4x4xf32>
    %77 = vector.extract_strided_slice %62 {offsets = [0, 16], sizes = [4, 1980], strides = [1, 1]} : vector<4x2014xf32> to vector<4x1980xf32>
    %cst_13 = arith.constant dense<0.000000e+00> : vector<4x1980xf32>
    %78 = tpu.matmul %76, %77, %cst_13 {dimension_numbers = #tpu.dot_dimension_numbers<[1], [0], [0], [1], [0, 0, 1, 1], [], []>} : vector<4x4xf32>, vector<4x1980xf32>, vector<4x1980xf32> -> vector<4x1980xf32>
    %79 = arith.addf %75, %78 : vector<4x1980xf32>
    %80 = vector.extract_strided_slice %63 {offsets = [0, 16], sizes = [4, 4], strides = [1, 1]} : vector<4x36xf32> to vector<4x4xf32>
    %81 = vector.extract_strided_slice %62 {offsets = [0, 17], sizes = [4, 1980], strides = [1, 1]} : vector<4x2014xf32> to vector<4x1980xf32>
    %cst_14 = arith.constant dense<0.000000e+00> : vector<4x1980xf32>
    %82 = tpu.matmul %80, %81, %cst_14 {dimension_numbers = #tpu.dot_dimension_numbers<[1], [0], [0], [1], [0, 0, 1, 1], [], []>} : vector<4x4xf32>, vector<4x1980xf32>, vector<4x1980xf32> -> vector<4x1980xf32>
    %83 = arith.addf %79, %82 : vector<4x1980xf32>
    %84 = vector.extract_strided_slice %63 {offsets = [0, 20], sizes = [4, 4], strides = [1, 1]} : vector<4x36xf32> to vector<4x4xf32>
    %85 = vector.extract_strided_slice %62 {offsets = [0, 18], sizes = [4, 1980], strides = [1, 1]} : vector<4x2014xf32> to vector<4x1980xf32>
    %cst_15 = arith.constant dense<0.000000e+00> : vector<4x1980xf32>
    %86 = tpu.matmul %84, %85, %cst_15 {dimension_numbers = #tpu.dot_dimension_numbers<[1], [0], [0], [1], [0, 0, 1, 1], [], []>} : vector<4x4xf32>, vector<4x1980xf32>, vector<4x1980xf32> -> vector<4x1980xf32>
    %87 = arith.addf %83, %86 : vector<4x1980xf32>
    %88 = vector.extract_strided_slice %63 {offsets = [0, 24], sizes = [4, 4], strides = [1, 1]} : vector<4x36xf32> to vector<4x4xf32>
    %89 = vector.extract_strided_slice %62 {offsets = [0, 32], sizes = [4, 1980], strides = [1, 1]} : vector<4x2014xf32> to vector<4x1980xf32>
    %cst_16 = arith.constant dense<0.000000e+00> : vector<4x1980xf32>
    %90 = tpu.matmul %88, %89, %cst_16 {dimension_numbers = #tpu.dot_dimension_numbers<[1], [0], [0], [1], [0, 0, 1, 1], [], []>} : vector<4x4xf32>, vector<4x1980xf32>, vector<4x1980xf32> -> vector<4x1980xf32>
    %91 = arith.addf %87, %90 : vector<4x1980xf32>
    %92 = vector.extract_strided_slice %63 {offsets = [0, 28], sizes = [4, 4], strides = [1, 1]} : vector<4x36xf32> to vector<4x4xf32>
    %93 = vector.extract_strided_slice %62 {offsets = [0, 33], sizes = [4, 1980], strides = [1, 1]} : vector<4x2014xf32> to vector<4x1980xf32>
    %cst_17 = arith.constant dense<0.000000e+00> : vector<4x1980xf32>
    %94 = tpu.matmul %92, %93, %cst_17 {dimension_numbers = #tpu.dot_dimension_numbers<[1], [0], [0], [1], [0, 0, 1, 1], [], []>} : vector<4x4xf32>, vector<4x1980xf32>, vector<4x1980xf32> -> vector<4x1980xf32>
    %95 = arith.addf %91, %94 : vector<4x1980xf32>
    %96 = vector.extract_strided_slice %63 {offsets = [0, 32], sizes = [4, 4], strides = [1, 1]} : vector<4x36xf32> to vector<4x4xf32>
    %97 = vector.extract_strided_slice %62 {offsets = [0, 34], sizes = [4, 1980], strides = [1, 1]} : vector<4x2014xf32> to vector<4x1980xf32>
    %cst_18 = arith.constant dense<0.000000e+00> : vector<4x1980xf32>
    %98 = tpu.matmul %96, %97, %cst_18 {dimension_numbers = #tpu.dot_dimension_numbers<[1], [0], [0], [1], [0, 0, 1, 1], [], []>} : vector<4x4xf32>, vector<4x1980xf32>, vector<4x1980xf32> -> vector<4x1980xf32>
    %99 = arith.addf %95, %98 : vector<4x1980xf32>
    %100 = vector.broadcast %64 : vector<4x1xf32> to vector<4x1980xf32>
    %101 = arith.addf %99, %100 : vector<4x1980xf32>
    %cst_19 = arith.constant 0.000000e+00 : f32
    %102 = vector.broadcast %cst_19 : f32 to vector<4x1980xf32>
    %103 = arith.cmpf ogt, %101, %102 : vector<4x1980xf32>
    %cst_20 = arith.constant 0.00999999977 : f32
    %104 = vector.broadcast %cst_20 : f32 to vector<4x1980xf32>
    %105 = arith.mulf %104, %101 : vector<4x1980xf32>
    %106 = arith.select %103, %101, %105 : vector<4x1980xi1>, vector<4x1980xf32>
    %c0_21 = arith.constant 0 : index
    %c0_22 = arith.constant 0 : index
    %107 = vector.load %arg5[%c0_21, %c0_22] : memref<4x36xf32, #tpu.memory_space<vmem>>, vector<4x36xf32>
    %c0_23 = arith.constant 0 : index
    %c0_24 = arith.constant 0 : index
    %108 = vector.load %arg6[%c0_23, %c0_24] : memref<4x1xf32, #tpu.memory_space<vmem>>, vector<4x1xf32>
    %109 = vector.extract_strided_slice %107 {offsets = [0, 0], sizes = [4, 4], strides = [1, 1]} : vector<4x36xf32> to vector<4x4xf32>
    %110 = vector.extract_strided_slice %106 {offsets = [0, 0], sizes = [4, 1946], strides = [1, 1]} : vector<4x1980xf32> to vector<4x1946xf32>
    %cst_25 = arith.constant dense<0.000000e+00> : vector<4x1946xf32>
    %111 = tpu.matmul %109, %110, %cst_25 {dimension_numbers = #tpu.dot_dimension_numbers<[1], [0], [0], [1], [0, 0, 1, 1], [], []>} : vector<4x4xf32>, vector<4x1946xf32>, vector<4x1946xf32> -> vector<4x1946xf32>
    %112 = vector.extract_strided_slice %107 {offsets = [0, 4], sizes = [4, 4], strides = [1, 1]} : vector<4x36xf32> to vector<4x4xf32>
    %113 = vector.extract_strided_slice %106 {offsets = [0, 1], sizes = [4, 1946], strides = [1, 1]} : vector<4x1980xf32> to vector<4x1946xf32>
    %cst_26 = arith.constant dense<0.000000e+00> : vector<4x1946xf32>
    %114 = tpu.matmul %112, %113, %cst_26 {dimension_numbers = #tpu.dot_dimension_numbers<[1], [0], [0], [1], [0, 0, 1, 1], [], []>} : vector<4x4xf32>, vector<4x1946xf32>, vector<4x1946xf32> -> vector<4x1946xf32>
    %115 = arith.addf %111, %114 : vector<4x1946xf32>
    %116 = vector.extract_strided_slice %107 {offsets = [0, 8], sizes = [4, 4], strides = [1, 1]} : vector<4x36xf32> to vector<4x4xf32>
    %117 = vector.extract_strided_slice %106 {offsets = [0, 2], sizes = [4, 1946], strides = [1, 1]} : vector<4x1980xf32> to vector<4x1946xf32>
    %cst_27 = arith.constant dense<0.000000e+00> : vector<4x1946xf32>
    %118 = tpu.matmul %116, %117, %cst_27 {dimension_numbers = #tpu.dot_dimension_numbers<[1], [0], [0], [1], [0, 0, 1, 1], [], []>} : vector<4x4xf32>, vector<4x1946xf32>, vector<4x1946xf32> -> vector<4x1946xf32>
    %119 = arith.addf %115, %118 : vector<4x1946xf32>
    %120 = vector.extract_strided_slice %107 {offsets = [0, 12], sizes = [4, 4], strides = [1, 1]} : vector<4x36xf32> to vector<4x4xf32>
    %121 = vector.extract_strided_slice %106 {offsets = [0, 16], sizes = [4, 1946], strides = [1, 1]} : vector<4x1980xf32> to vector<4x1946xf32>
    %cst_28 = arith.constant dense<0.000000e+00> : vector<4x1946xf32>
    %122 = tpu.matmul %120, %121, %cst_28 {dimension_numbers = #tpu.dot_dimension_numbers<[1], [0], [0], [1], [0, 0, 1, 1], [], []>} : vector<4x4xf32>, vector<4x1946xf32>, vector<4x1946xf32> -> vector<4x1946xf32>
    %123 = arith.addf %119, %122 : vector<4x1946xf32>
    %124 = vector.extract_strided_slice %107 {offsets = [0, 16], sizes = [4, 4], strides = [1, 1]} : vector<4x36xf32> to vector<4x4xf32>
    %125 = vector.extract_strided_slice %106 {offsets = [0, 17], sizes = [4, 1946], strides = [1, 1]} : vector<4x1980xf32> to vector<4x1946xf32>
    %cst_29 = arith.constant dense<0.000000e+00> : vector<4x1946xf32>
    %126 = tpu.matmul %124, %125, %cst_29 {dimension_numbers = #tpu.dot_dimension_numbers<[1], [0], [0], [1], [0, 0, 1, 1], [], []>} : vector<4x4xf32>, vector<4x1946xf32>, vector<4x1946xf32> -> vector<4x1946xf32>
    %127 = arith.addf %123, %126 : vector<4x1946xf32>
    %128 = vector.extract_strided_slice %107 {offsets = [0, 20], sizes = [4, 4], strides = [1, 1]} : vector<4x36xf32> to vector<4x4xf32>
    %129 = vector.extract_strided_slice %106 {offsets = [0, 18], sizes = [4, 1946], strides = [1, 1]} : vector<4x1980xf32> to vector<4x1946xf32>
    %cst_30 = arith.constant dense<0.000000e+00> : vector<4x1946xf32>
    %130 = tpu.matmul %128, %129, %cst_30 {dimension_numbers = #tpu.dot_dimension_numbers<[1], [0], [0], [1], [0, 0, 1, 1], [], []>} : vector<4x4xf32>, vector<4x1946xf32>, vector<4x1946xf32> -> vector<4x1946xf32>
    %131 = arith.addf %127, %130 : vector<4x1946xf32>
    %132 = vector.extract_strided_slice %107 {offsets = [0, 24], sizes = [4, 4], strides = [1, 1]} : vector<4x36xf32> to vector<4x4xf32>
    %133 = vector.extract_strided_slice %106 {offsets = [0, 32], sizes = [4, 1946], strides = [1, 1]} : vector<4x1980xf32> to vector<4x1946xf32>
    %cst_31 = arith.constant dense<0.000000e+00> : vector<4x1946xf32>
    %134 = tpu.matmul %132, %133, %cst_31 {dimension_numbers = #tpu.dot_dimension_numbers<[1], [0], [0], [1], [0, 0, 1, 1], [], []>} : vector<4x4xf32>, vector<4x1946xf32>, vector<4x1946xf32> -> vector<4x1946xf32>
    %135 = arith.addf %131, %134 : vector<4x1946xf32>
    %136 = vector.extract_strided_slice %107 {offsets = [0, 28], sizes = [4, 4], strides = [1, 1]} : vector<4x36xf32> to vector<4x4xf32>
    %137 = vector.extract_strided_slice %106 {offsets = [0, 33], sizes = [4, 1946], strides = [1, 1]} : vector<4x1980xf32> to vector<4x1946xf32>
    %cst_32 = arith.constant dense<0.000000e+00> : vector<4x1946xf32>
    %138 = tpu.matmul %136, %137, %cst_32 {dimension_numbers = #tpu.dot_dimension_numbers<[1], [0], [0], [1], [0, 0, 1, 1], [], []>} : vector<4x4xf32>, vector<4x1946xf32>, vector<4x1946xf32> -> vector<4x1946xf32>
    %139 = arith.addf %135, %138 : vector<4x1946xf32>
    %140 = vector.extract_strided_slice %107 {offsets = [0, 32], sizes = [4, 4], strides = [1, 1]} : vector<4x36xf32> to vector<4x4xf32>
    %141 = vector.extract_strided_slice %106 {offsets = [0, 34], sizes = [4, 1946], strides = [1, 1]} : vector<4x1980xf32> to vector<4x1946xf32>
    %cst_33 = arith.constant dense<0.000000e+00> : vector<4x1946xf32>
    %142 = tpu.matmul %140, %141, %cst_33 {dimension_numbers = #tpu.dot_dimension_numbers<[1], [0], [0], [1], [0, 0, 1, 1], [], []>} : vector<4x4xf32>, vector<4x1946xf32>, vector<4x1946xf32> -> vector<4x1946xf32>
    %143 = arith.addf %139, %142 : vector<4x1946xf32>
    %144 = vector.broadcast %108 : vector<4x1xf32> to vector<4x1946xf32>
    %145 = arith.addf %143, %144 : vector<4x1946xf32>
    %cst_34 = arith.constant 0.000000e+00 : f32
    %146 = vector.broadcast %cst_34 : f32 to vector<4x1946xf32>
    %147 = arith.cmpf ogt, %145, %146 : vector<4x1946xf32>
    %cst_35 = arith.constant 0.00999999977 : f32
    %148 = vector.broadcast %cst_35 : f32 to vector<4x1946xf32>
    %149 = arith.mulf %148, %145 : vector<4x1946xf32>
    %150 = arith.select %147, %145, %149 : vector<4x1946xi1>, vector<4x1946xf32>
    %151 = vector.extract_strided_slice %150 {offsets = [0, 0], sizes = [4, 1945], strides = [1, 1]} : vector<4x1946xf32> to vector<4x1945xf32>
    %152 = vector.extract_strided_slice %150 {offsets = [0, 1], sizes = [4, 1945], strides = [1, 1]} : vector<4x1946xf32> to vector<4x1945xf32>
    %153 = arith.maximumf %151, %152 : vector<4x1945xf32>
    %154 = vector.extract_strided_slice %153 {offsets = [0, 0], sizes = [4, 1929], strides = [1, 1]} : vector<4x1945xf32> to vector<4x1929xf32>
    %155 = vector.extract_strided_slice %153 {offsets = [0, 16], sizes = [4, 1929], strides = [1, 1]} : vector<4x1945xf32> to vector<4x1929xf32>
    %156 = arith.maximumf %154, %155 : vector<4x1929xf32>
    %c0_36 = arith.constant 0 : index
    %c0_37 = arith.constant 0 : index
    %157 = vector.load %arg7[%c0_36, %c0_37] : memref<8x36xf32, #tpu.memory_space<vmem>>, vector<8x36xf32>
    %c0_38 = arith.constant 0 : index
    %c0_39 = arith.constant 0 : index
    %158 = vector.load %arg8[%c0_38, %c0_39] : memref<8x1xf32, #tpu.memory_space<vmem>>, vector<8x1xf32>
    %159 = vector.extract_strided_slice %157 {offsets = [0, 0], sizes = [8, 4], strides = [1, 1]} : vector<8x36xf32> to vector<8x4xf32>
    %160 = vector.extract_strided_slice %156 {offsets = [0, 0], sizes = [4, 1895], strides = [1, 1]} : vector<4x1929xf32> to vector<4x1895xf32>
    %cst_40 = arith.constant dense<0.000000e+00> : vector<8x1895xf32>
    %161 = tpu.matmul %159, %160, %cst_40 {dimension_numbers = #tpu.dot_dimension_numbers<[1], [0], [0], [1], [0, 0, 1, 1], [], []>} : vector<8x4xf32>, vector<4x1895xf32>, vector<8x1895xf32> -> vector<8x1895xf32>
    %162 = vector.extract_strided_slice %157 {offsets = [0, 4], sizes = [8, 4], strides = [1, 1]} : vector<8x36xf32> to vector<8x4xf32>
    %163 = vector.extract_strided_slice %156 {offsets = [0, 1], sizes = [4, 1895], strides = [1, 1]} : vector<4x1929xf32> to vector<4x1895xf32>
    %cst_41 = arith.constant dense<0.000000e+00> : vector<8x1895xf32>
    %164 = tpu.matmul %162, %163, %cst_41 {dimension_numbers = #tpu.dot_dimension_numbers<[1], [0], [0], [1], [0, 0, 1, 1], [], []>} : vector<8x4xf32>, vector<4x1895xf32>, vector<8x1895xf32> -> vector<8x1895xf32>
    %165 = arith.addf %161, %164 : vector<8x1895xf32>
    %166 = vector.extract_strided_slice %157 {offsets = [0, 8], sizes = [8, 4], strides = [1, 1]} : vector<8x36xf32> to vector<8x4xf32>
    %167 = vector.extract_strided_slice %156 {offsets = [0, 2], sizes = [4, 1895], strides = [1, 1]} : vector<4x1929xf32> to vector<4x1895xf32>
    %cst_42 = arith.constant dense<0.000000e+00> : vector<8x1895xf32>
    %168 = tpu.matmul %166, %167, %cst_42 {dimension_numbers = #tpu.dot_dimension_numbers<[1], [0], [0], [1], [0, 0, 1, 1], [], []>} : vector<8x4xf32>, vector<4x1895xf32>, vector<8x1895xf32> -> vector<8x1895xf32>
    %169 = arith.addf %165, %168 : vector<8x1895xf32>
    %170 = vector.extract_strided_slice %157 {offsets = [0, 12], sizes = [8, 4], strides = [1, 1]} : vector<8x36xf32> to vector<8x4xf32>
    %171 = vector.extract_strided_slice %156 {offsets = [0, 16], sizes = [4, 1895], strides = [1, 1]} : vector<4x1929xf32> to vector<4x1895xf32>
    %cst_43 = arith.constant dense<0.000000e+00> : vector<8x1895xf32>
    %172 = tpu.matmul %170, %171, %cst_43 {dimension_numbers = #tpu.dot_dimension_numbers<[1], [0], [0], [1], [0, 0, 1, 1], [], []>} : vector<8x4xf32>, vector<4x1895xf32>, vector<8x1895xf32> -> vector<8x1895xf32>
    %173 = arith.addf %169, %172 : vector<8x1895xf32>
    %174 = vector.extract_strided_slice %157 {offsets = [0, 16], sizes = [8, 4], strides = [1, 1]} : vector<8x36xf32> to vector<8x4xf32>
    %175 = vector.extract_strided_slice %156 {offsets = [0, 17], sizes = [4, 1895], strides = [1, 1]} : vector<4x1929xf32> to vector<4x1895xf32>
    %cst_44 = arith.constant dense<0.000000e+00> : vector<8x1895xf32>
    %176 = tpu.matmul %174, %175, %cst_44 {dimension_numbers = #tpu.dot_dimension_numbers<[1], [0], [0], [1], [0, 0, 1, 1], [], []>} : vector<8x4xf32>, vector<4x1895xf32>, vector<8x1895xf32> -> vector<8x1895xf32>
    %177 = arith.addf %173, %176 : vector<8x1895xf32>
    %178 = vector.extract_strided_slice %157 {offsets = [0, 20], sizes = [8, 4], strides = [1, 1]} : vector<8x36xf32> to vector<8x4xf32>
    %179 = vector.extract_strided_slice %156 {offsets = [0, 18], sizes = [4, 1895], strides = [1, 1]} : vector<4x1929xf32> to vector<4x1895xf32>
    %cst_45 = arith.constant dense<0.000000e+00> : vector<8x1895xf32>
    %180 = tpu.matmul %178, %179, %cst_45 {dimension_numbers = #tpu.dot_dimension_numbers<[1], [0], [0], [1], [0, 0, 1, 1], [], []>} : vector<8x4xf32>, vector<4x1895xf32>, vector<8x1895xf32> -> vector<8x1895xf32>
    %181 = arith.addf %177, %180 : vector<8x1895xf32>
    %182 = vector.extract_strided_slice %157 {offsets = [0, 24], sizes = [8, 4], strides = [1, 1]} : vector<8x36xf32> to vector<8x4xf32>
    %183 = vector.extract_strided_slice %156 {offsets = [0, 32], sizes = [4, 1895], strides = [1, 1]} : vector<4x1929xf32> to vector<4x1895xf32>
    %cst_46 = arith.constant dense<0.000000e+00> : vector<8x1895xf32>
    %184 = tpu.matmul %182, %183, %cst_46 {dimension_numbers = #tpu.dot_dimension_numbers<[1], [0], [0], [1], [0, 0, 1, 1], [], []>} : vector<8x4xf32>, vector<4x1895xf32>, vector<8x1895xf32> -> vector<8x1895xf32>
    %185 = arith.addf %181, %184 : vector<8x1895xf32>
    %186 = vector.extract_strided_slice %157 {offsets = [0, 28], sizes = [8, 4], strides = [1, 1]} : vector<8x36xf32> to vector<8x4xf32>
    %187 = vector.extract_strided_slice %156 {offsets = [0, 33], sizes = [4, 1895], strides = [1, 1]} : vector<4x1929xf32> to vector<4x1895xf32>
    %cst_47 = arith.constant dense<0.000000e+00> : vector<8x1895xf32>
    %188 = tpu.matmul %186, %187, %cst_47 {dimension_numbers = #tpu.dot_dimension_numbers<[1], [0], [0], [1], [0, 0, 1, 1], [], []>} : vector<8x4xf32>, vector<4x1895xf32>, vector<8x1895xf32> -> vector<8x1895xf32>
    %189 = arith.addf %185, %188 : vector<8x1895xf32>
    %190 = vector.extract_strided_slice %157 {offsets = [0, 32], sizes = [8, 4], strides = [1, 1]} : vector<8x36xf32> to vector<8x4xf32>
    %191 = vector.extract_strided_slice %156 {offsets = [0, 34], sizes = [4, 1895], strides = [1, 1]} : vector<4x1929xf32> to vector<4x1895xf32>
    %cst_48 = arith.constant dense<0.000000e+00> : vector<8x1895xf32>
    %192 = tpu.matmul %190, %191, %cst_48 {dimension_numbers = #tpu.dot_dimension_numbers<[1], [0], [0], [1], [0, 0, 1, 1], [], []>} : vector<8x4xf32>, vector<4x1895xf32>, vector<8x1895xf32> -> vector<8x1895xf32>
    %193 = arith.addf %189, %192 : vector<8x1895xf32>
    %194 = vector.broadcast %158 : vector<8x1xf32> to vector<8x1895xf32>
    %195 = arith.addf %193, %194 : vector<8x1895xf32>
    %cst_49 = arith.constant 0.000000e+00 : f32
    %196 = vector.broadcast %cst_49 : f32 to vector<8x1895xf32>
    %197 = arith.cmpf ogt, %195, %196 : vector<8x1895xf32>
    %cst_50 = arith.constant 0.00999999977 : f32
    %198 = vector.broadcast %cst_50 : f32 to vector<8x1895xf32>
    %199 = arith.mulf %198, %195 : vector<8x1895xf32>
    %200 = arith.select %197, %195, %199 : vector<8x1895xi1>, vector<8x1895xf32>
    %c0_51 = arith.constant 0 : index
    %c0_52 = arith.constant 0 : index
    %201 = vector.load %arg9[%c0_51, %c0_52] : memref<8x72xf32, #tpu.memory_space<vmem>>, vector<8x72xf32>
    %c0_53 = arith.constant 0 : index
    %c0_54 = arith.constant 0 : index
    %202 = vector.load %arg10[%c0_53, %c0_54] : memref<8x1xf32, #tpu.memory_space<vmem>>, vector<8x1xf32>
    %203 = vector.extract_strided_slice %201 {offsets = [0, 0], sizes = [8, 8], strides = [1, 1]} : vector<8x72xf32> to vector<8x8xf32>
    %204 = vector.extract_strided_slice %200 {offsets = [0, 0], sizes = [8, 1861], strides = [1, 1]} : vector<8x1895xf32> to vector<8x1861xf32>
    %cst_55 = arith.constant dense<0.000000e+00> : vector<8x1861xf32>
    %205 = tpu.matmul %203, %204, %cst_55 {dimension_numbers = #tpu.dot_dimension_numbers<[1], [0], [0], [1], [0, 0, 1, 1], [], []>} : vector<8x8xf32>, vector<8x1861xf32>, vector<8x1861xf32> -> vector<8x1861xf32>
    %206 = vector.extract_strided_slice %201 {offsets = [0, 8], sizes = [8, 8], strides = [1, 1]} : vector<8x72xf32> to vector<8x8xf32>
    %207 = vector.extract_strided_slice %200 {offsets = [0, 1], sizes = [8, 1861], strides = [1, 1]} : vector<8x1895xf32> to vector<8x1861xf32>
    %cst_56 = arith.constant dense<0.000000e+00> : vector<8x1861xf32>
    %208 = tpu.matmul %206, %207, %cst_56 {dimension_numbers = #tpu.dot_dimension_numbers<[1], [0], [0], [1], [0, 0, 1, 1], [], []>} : vector<8x8xf32>, vector<8x1861xf32>, vector<8x1861xf32> -> vector<8x1861xf32>
    %209 = arith.addf %205, %208 : vector<8x1861xf32>
    %210 = vector.extract_strided_slice %201 {offsets = [0, 16], sizes = [8, 8], strides = [1, 1]} : vector<8x72xf32> to vector<8x8xf32>
    %211 = vector.extract_strided_slice %200 {offsets = [0, 2], sizes = [8, 1861], strides = [1, 1]} : vector<8x1895xf32> to vector<8x1861xf32>
    %cst_57 = arith.constant dense<0.000000e+00> : vector<8x1861xf32>
    %212 = tpu.matmul %210, %211, %cst_57 {dimension_numbers = #tpu.dot_dimension_numbers<[1], [0], [0], [1], [0, 0, 1, 1], [], []>} : vector<8x8xf32>, vector<8x1861xf32>, vector<8x1861xf32> -> vector<8x1861xf32>
    %213 = arith.addf %209, %212 : vector<8x1861xf32>
    %214 = vector.extract_strided_slice %201 {offsets = [0, 24], sizes = [8, 8], strides = [1, 1]} : vector<8x72xf32> to vector<8x8xf32>
    %215 = vector.extract_strided_slice %200 {offsets = [0, 16], sizes = [8, 1861], strides = [1, 1]} : vector<8x1895xf32> to vector<8x1861xf32>
    %cst_58 = arith.constant dense<0.000000e+00> : vector<8x1861xf32>
    %216 = tpu.matmul %214, %215, %cst_58 {dimension_numbers = #tpu.dot_dimension_numbers<[1], [0], [0], [1], [0, 0, 1, 1], [], []>} : vector<8x8xf32>, vector<8x1861xf32>, vector<8x1861xf32> -> vector<8x1861xf32>
    %217 = arith.addf %213, %216 : vector<8x1861xf32>
    %218 = vector.extract_strided_slice %201 {offsets = [0, 32], sizes = [8, 8], strides = [1, 1]} : vector<8x72xf32> to vector<8x8xf32>
    %219 = vector.extract_strided_slice %200 {offsets = [0, 17], sizes = [8, 1861], strides = [1, 1]} : vector<8x1895xf32> to vector<8x1861xf32>
    %cst_59 = arith.constant dense<0.000000e+00> : vector<8x1861xf32>
    %220 = tpu.matmul %218, %219, %cst_59 {dimension_numbers = #tpu.dot_dimension_numbers<[1], [0], [0], [1], [0, 0, 1, 1], [], []>} : vector<8x8xf32>, vector<8x1861xf32>, vector<8x1861xf32> -> vector<8x1861xf32>
    %221 = arith.addf %217, %220 : vector<8x1861xf32>
    %222 = vector.extract_strided_slice %201 {offsets = [0, 40], sizes = [8, 8], strides = [1, 1]} : vector<8x72xf32> to vector<8x8xf32>
    %223 = vector.extract_strided_slice %200 {offsets = [0, 18], sizes = [8, 1861], strides = [1, 1]} : vector<8x1895xf32> to vector<8x1861xf32>
    %cst_60 = arith.constant dense<0.000000e+00> : vector<8x1861xf32>
    %224 = tpu.matmul %222, %223, %cst_60 {dimension_numbers = #tpu.dot_dimension_numbers<[1], [0], [0], [1], [0, 0, 1, 1], [], []>} : vector<8x8xf32>, vector<8x1861xf32>, vector<8x1861xf32> -> vector<8x1861xf32>
    %225 = arith.addf %221, %224 : vector<8x1861xf32>
    %226 = vector.extract_strided_slice %201 {offsets = [0, 48], sizes = [8, 8], strides = [1, 1]} : vector<8x72xf32> to vector<8x8xf32>
    %227 = vector.extract_strided_slice %200 {offsets = [0, 32], sizes = [8, 1861], strides = [1, 1]} : vector<8x1895xf32> to vector<8x1861xf32>
    %cst_61 = arith.constant dense<0.000000e+00> : vector<8x1861xf32>
    %228 = tpu.matmul %226, %227, %cst_61 {dimension_numbers = #tpu.dot_dimension_numbers<[1], [0], [0], [1], [0, 0, 1, 1], [], []>} : vector<8x8xf32>, vector<8x1861xf32>, vector<8x1861xf32> -> vector<8x1861xf32>
    %229 = arith.addf %225, %228 : vector<8x1861xf32>
    %230 = vector.extract_strided_slice %201 {offsets = [0, 56], sizes = [8, 8], strides = [1, 1]} : vector<8x72xf32> to vector<8x8xf32>
    %231 = vector.extract_strided_slice %200 {offsets = [0, 33], sizes = [8, 1861], strides = [1, 1]} : vector<8x1895xf32> to vector<8x1861xf32>
    %cst_62 = arith.constant dense<0.000000e+00> : vector<8x1861xf32>
    %232 = tpu.matmul %230, %231, %cst_62 {dimension_numbers = #tpu.dot_dimension_numbers<[1], [0], [0], [1], [0, 0, 1, 1], [], []>} : vector<8x8xf32>, vector<8x1861xf32>, vector<8x1861xf32> -> vector<8x1861xf32>
    %233 = arith.addf %229, %232 : vector<8x1861xf32>
    %234 = vector.extract_strided_slice %201 {offsets = [0, 64], sizes = [8, 8], strides = [1, 1]} : vector<8x72xf32> to vector<8x8xf32>
    %235 = vector.extract_strided_slice %200 {offsets = [0, 34], sizes = [8, 1861], strides = [1, 1]} : vector<8x1895xf32> to vector<8x1861xf32>
    %cst_63 = arith.constant dense<0.000000e+00> : vector<8x1861xf32>
    %236 = tpu.matmul %234, %235, %cst_63 {dimension_numbers = #tpu.dot_dimension_numbers<[1], [0], [0], [1], [0, 0, 1, 1], [], []>} : vector<8x8xf32>, vector<8x1861xf32>, vector<8x1861xf32> -> vector<8x1861xf32>
    %237 = arith.addf %233, %236 : vector<8x1861xf32>
    %238 = vector.broadcast %202 : vector<8x1xf32> to vector<8x1861xf32>
    %239 = arith.addf %237, %238 : vector<8x1861xf32>
    %cst_64 = arith.constant 0.000000e+00 : f32
    %240 = vector.broadcast %cst_64 : f32 to vector<8x1861xf32>
    %241 = arith.cmpf ogt, %239, %240 : vector<8x1861xf32>
    %cst_65 = arith.constant 0.00999999977 : f32
    %242 = vector.broadcast %cst_65 : f32 to vector<8x1861xf32>
    %243 = arith.mulf %242, %239 : vector<8x1861xf32>
    %244 = arith.select %241, %239, %243 : vector<8x1861xi1>, vector<8x1861xf32>
    %c0_66 = arith.constant 0 : index
    %c0_67 = arith.constant 0 : index
    %245 = vector.load %arg11[%c0_66, %c0_67] : memref<8x1861xf32, #tpu.memory_space<vmem>>, vector<8x1861xf32>
    %cst_68 = arith.constant dense<0.000000e+00> : vector<8x8xf32>
    %246 = tpu.matmul %245, %244, %cst_68 {dimension_numbers = #tpu.dot_dimension_numbers<[1], [1], [0], [0], [0, 0, 1, 0], [], []>} : vector<8x1861xf32>, vector<8x1861xf32>, vector<8x8xf32> -> vector<8x8xf32>
    %c0_69 = arith.constant 0 : index
    %c0_70 = arith.constant 0 : index
    %247 = vector.load %arg12[%c0_69, %c0_70] : memref<8x128xf32, #tpu.memory_space<vmem>>, vector<8x128xf32>
    %cst_71 = arith.constant dense<0.000000e+00> : vector<8x128xf32>
    %248 = tpu.matmul %246, %247, %cst_71 {dimension_numbers = #tpu.dot_dimension_numbers<[1], [0], [0], [1], [0, 0, 1, 1], [], []>} : vector<8x8xf32>, vector<8x128xf32>, vector<8x128xf32> -> vector<8x128xf32>
    %c0_72 = arith.constant 0 : index
    %c0_73 = arith.constant 0 : index
    %249 = vector.load %arg14[%c0_72, %c0_73] : memref<1x128xf32, #tpu.memory_space<vmem>>, vector<1x128xf32>
    %250 = vector.broadcast %249 : vector<1x128xf32> to vector<8x128xf32>
    %251 = arith.addf %248, %250 : vector<8x128xf32>
    %cst_74 = arith.constant 0.000000e+00 : f32
    %252 = vector.broadcast %cst_74 : f32 to vector<2x32xf32>
    %253 = vector.extract_strided_slice %251 {offsets = [0, 0], sizes = [2, 128], strides = [1, 1]} : vector<8x128xf32> to vector<2x128xf32>
    %c0_75 = arith.constant 0 : index
    %c0_76 = arith.constant 0 : index
    %254 = vector.load %arg13[%c0_75, %c0_76] : memref<32x128xf32, #tpu.memory_space<vmem>>, vector<32x128xf32>
    %cst_77 = arith.constant dense<0.000000e+00> : vector<2x128xf32>
    %255 = tpu.matmul %252, %254, %cst_77 {dimension_numbers = #tpu.dot_dimension_numbers<[1], [0], [0], [1], [0, 0, 1, 1], [], []>} : vector<2x32xf32>, vector<32x128xf32>, vector<2x128xf32> -> vector<2x128xf32>
    %256 = arith.addf %253, %255 : vector<2x128xf32>
    %257 = vector.extract_strided_slice %256 {offsets = [0, 0], sizes = [2, 32], strides = [1, 1]} : vector<2x128xf32> to vector<2x32xf32>
    %cst_78 = arith.constant 0.000000e+00 : f32
    %258 = vector.broadcast %cst_78 : f32 to vector<2x32xf32>
    %259 = arith.subf %258, %257 : vector<2x32xf32>
    %260 = math.exp %259 : vector<2x32xf32>
    %cst_79 = arith.constant 1.000000e+00 : f32
    %261 = vector.broadcast %cst_79 : f32 to vector<2x32xf32>
    %262 = arith.addf %261, %260 : vector<2x32xf32>
    %263 = tpu.reciprocal %262 {approx = true} : vector<2x32xf32> -> vector<2x32xf32>
    %264 = vector.extract_strided_slice %256 {offsets = [0, 32], sizes = [2, 32], strides = [1, 1]} : vector<2x128xf32> to vector<2x32xf32>
    %cst_80 = arith.constant 0.000000e+00 : f32
    %265 = vector.broadcast %cst_80 : f32 to vector<2x32xf32>
    %266 = arith.subf %265, %264 : vector<2x32xf32>
    %267 = math.exp %266 : vector<2x32xf32>
    %cst_81 = arith.constant 1.000000e+00 : f32
    %268 = vector.broadcast %cst_81 : f32 to vector<2x32xf32>
    %269 = arith.addf %268, %267 : vector<2x32xf32>
    %270 = tpu.reciprocal %269 {approx = true} : vector<2x32xf32> -> vector<2x32xf32>
    %271 = vector.extract_strided_slice %256 {offsets = [0, 64], sizes = [2, 32], strides = [1, 1]} : vector<2x128xf32> to vector<2x32xf32>
    %272 = math.tanh %271 : vector<2x32xf32>
    %273 = vector.extract_strided_slice %256 {offsets = [0, 96], sizes = [2, 32], strides = [1, 1]} : vector<2x128xf32> to vector<2x32xf32>
    %cst_82 = arith.constant 0.000000e+00 : f32
    %274 = vector.broadcast %cst_82 : f32 to vector<2x32xf32>
    %275 = arith.subf %274, %273 : vector<2x32xf32>
    %276 = math.exp %275 : vector<2x32xf32>
    %cst_83 = arith.constant 1.000000e+00 : f32
    %277 = vector.broadcast %cst_83 : f32 to vector<2x32xf32>
    %278 = arith.addf %277, %276 : vector<2x32xf32>
    %279 = tpu.reciprocal %278 {approx = true} : vector<2x32xf32> -> vector<2x32xf32>
    %280 = arith.mulf %270, %252 : vector<2x32xf32>
    %281 = arith.mulf %263, %272 : vector<2x32xf32>
    %282 = arith.addf %280, %281 : vector<2x32xf32>
    %283 = math.tanh %282 : vector<2x32xf32>
    %284 = arith.mulf %279, %283 : vector<2x32xf32>
    %285 = tpu.concatenate %284, %252 in 1 : vector<2x32xf32>, vector<2x32xf32> -> vector<2x64xf32>
    %c0_84 = arith.constant 0 : index
    %c0_85 = arith.constant 0 : index
    %286 = vector.load %arg15[%c0_84, %c0_85] : memref<64x128xf32, #tpu.memory_space<vmem>>, vector<64x128xf32>
    %cst_86 = arith.constant dense<0.000000e+00> : vector<2x128xf32>
    %287 = tpu.matmul %285, %286, %cst_86 {dimension_numbers = #tpu.dot_dimension_numbers<[1], [0], [0], [1], [0, 0, 1, 1], [], []>} : vector<2x64xf32>, vector<64x128xf32>, vector<2x128xf32> -> vector<2x128xf32>
    %c0_87 = arith.constant 0 : index
    %c0_88 = arith.constant 0 : index
    %288 = vector.load %arg16[%c0_87, %c0_88] : memref<1x128xf32, #tpu.memory_space<vmem>>, vector<1x128xf32>
    %289 = vector.broadcast %288 : vector<1x128xf32> to vector<2x128xf32>
    %290 = arith.addf %287, %289 : vector<2x128xf32>
    %291 = vector.extract_strided_slice %290 {offsets = [0, 0], sizes = [2, 32], strides = [1, 1]} : vector<2x128xf32> to vector<2x32xf32>
    %cst_89 = arith.constant 0.000000e+00 : f32
    %292 = vector.broadcast %cst_89 : f32 to vector<2x32xf32>
    %293 = arith.subf %292, %291 : vector<2x32xf32>
    %294 = math.exp %293 : vector<2x32xf32>
    %cst_90 = arith.constant 1.000000e+00 : f32
    %295 = vector.broadcast %cst_90 : f32 to vector<2x32xf32>
    %296 = arith.addf %295, %294 : vector<2x32xf32>
    %297 = tpu.reciprocal %296 {approx = true} : vector<2x32xf32> -> vector<2x32xf32>
    %298 = vector.extract_strided_slice %290 {offsets = [0, 32], sizes = [2, 32], strides = [1, 1]} : vector<2x128xf32> to vector<2x32xf32>
    %cst_91 = arith.constant 0.000000e+00 : f32
    %299 = vector.broadcast %cst_91 : f32 to vector<2x32xf32>
    %300 = arith.subf %299, %298 : vector<2x32xf32>
    %301 = math.exp %300 : vector<2x32xf32>
    %cst_92 = arith.constant 1.000000e+00 : f32
    %302 = vector.broadcast %cst_92 : f32 to vector<2x32xf32>
    %303 = arith.addf %302, %301 : vector<2x32xf32>
    %304 = tpu.reciprocal %303 {approx = true} : vector<2x32xf32> -> vector<2x32xf32>
    %305 = vector.extract_strided_slice %290 {offsets = [0, 64], sizes = [2, 32], strides = [1, 1]} : vector<2x128xf32> to vector<2x32xf32>
    %306 = math.tanh %305 : vector<2x32xf32>
    %307 = vector.extract_strided_slice %290 {offsets = [0, 96], sizes = [2, 32], strides = [1, 1]} : vector<2x128xf32> to vector<2x32xf32>
    %cst_93 = arith.constant 0.000000e+00 : f32
    %308 = vector.broadcast %cst_93 : f32 to vector<2x32xf32>
    %309 = arith.subf %308, %307 : vector<2x32xf32>
    %310 = math.exp %309 : vector<2x32xf32>
    %cst_94 = arith.constant 1.000000e+00 : f32
    %311 = vector.broadcast %cst_94 : f32 to vector<2x32xf32>
    %312 = arith.addf %311, %310 : vector<2x32xf32>
    %313 = tpu.reciprocal %312 {approx = true} : vector<2x32xf32> -> vector<2x32xf32>
    %314 = arith.mulf %304, %252 : vector<2x32xf32>
    %315 = arith.mulf %297, %306 : vector<2x32xf32>
    %316 = arith.addf %314, %315 : vector<2x32xf32>
    %317 = math.tanh %316 : vector<2x32xf32>
    %318 = arith.mulf %313, %317 : vector<2x32xf32>
    %319 = vector.extract_strided_slice %251 {offsets = [2, 0], sizes = [2, 128], strides = [1, 1]} : vector<8x128xf32> to vector<2x128xf32>
    %c0_95 = arith.constant 0 : index
    %c0_96 = arith.constant 0 : index
    %320 = vector.load %arg13[%c0_95, %c0_96] : memref<32x128xf32, #tpu.memory_space<vmem>>, vector<32x128xf32>
    %cst_97 = arith.constant dense<0.000000e+00> : vector<2x128xf32>
    %321 = tpu.matmul %284, %320, %cst_97 {dimension_numbers = #tpu.dot_dimension_numbers<[1], [0], [0], [1], [0, 0, 1, 1], [], []>} : vector<2x32xf32>, vector<32x128xf32>, vector<2x128xf32> -> vector<2x128xf32>
    %322 = arith.addf %319, %321 : vector<2x128xf32>
    %323 = vector.extract_strided_slice %322 {offsets = [0, 0], sizes = [2, 32], strides = [1, 1]} : vector<2x128xf32> to vector<2x32xf32>
    %cst_98 = arith.constant 0.000000e+00 : f32
    %324 = vector.broadcast %cst_98 : f32 to vector<2x32xf32>
    %325 = arith.subf %324, %323 : vector<2x32xf32>
    %326 = math.exp %325 : vector<2x32xf32>
    %cst_99 = arith.constant 1.000000e+00 : f32
    %327 = vector.broadcast %cst_99 : f32 to vector<2x32xf32>
    %328 = arith.addf %327, %326 : vector<2x32xf32>
    %329 = tpu.reciprocal %328 {approx = true} : vector<2x32xf32> -> vector<2x32xf32>
    %330 = vector.extract_strided_slice %322 {offsets = [0, 32], sizes = [2, 32], strides = [1, 1]} : vector<2x128xf32> to vector<2x32xf32>
    %cst_100 = arith.constant 0.000000e+00 : f32
    %331 = vector.broadcast %cst_100 : f32 to vector<2x32xf32>
    %332 = arith.subf %331, %330 : vector<2x32xf32>
    %333 = math.exp %332 : vector<2x32xf32>
    %cst_101 = arith.constant 1.000000e+00 : f32
    %334 = vector.broadcast %cst_101 : f32 to vector<2x32xf32>
    %335 = arith.addf %334, %333 : vector<2x32xf32>
    %336 = tpu.reciprocal %335 {approx = true} : vector<2x32xf32> -> vector<2x32xf32>
    %337 = vector.extract_strided_slice %322 {offsets = [0, 64], sizes = [2, 32], strides = [1, 1]} : vector<2x128xf32> to vector<2x32xf32>
    %338 = math.tanh %337 : vector<2x32xf32>
    %339 = vector.extract_strided_slice %322 {offsets = [0, 96], sizes = [2, 32], strides = [1, 1]} : vector<2x128xf32> to vector<2x32xf32>
    %cst_102 = arith.constant 0.000000e+00 : f32
    %340 = vector.broadcast %cst_102 : f32 to vector<2x32xf32>
    %341 = arith.subf %340, %339 : vector<2x32xf32>
    %342 = math.exp %341 : vector<2x32xf32>
    %cst_103 = arith.constant 1.000000e+00 : f32
    %343 = vector.broadcast %cst_103 : f32 to vector<2x32xf32>
    %344 = arith.addf %343, %342 : vector<2x32xf32>
    %345 = tpu.reciprocal %344 {approx = true} : vector<2x32xf32> -> vector<2x32xf32>
    %346 = arith.mulf %336, %282 : vector<2x32xf32>
    %347 = arith.mulf %329, %338 : vector<2x32xf32>
    %348 = arith.addf %346, %347 : vector<2x32xf32>
    %349 = math.tanh %348 : vector<2x32xf32>
    %350 = arith.mulf %345, %349 : vector<2x32xf32>
    %351 = tpu.concatenate %350, %318 in 1 : vector<2x32xf32>, vector<2x32xf32> -> vector<2x64xf32>
    %c0_104 = arith.constant 0 : index
    %c0_105 = arith.constant 0 : index
    %352 = vector.load %arg15[%c0_104, %c0_105] : memref<64x128xf32, #tpu.memory_space<vmem>>, vector<64x128xf32>
    %cst_106 = arith.constant dense<0.000000e+00> : vector<2x128xf32>
    %353 = tpu.matmul %351, %352, %cst_106 {dimension_numbers = #tpu.dot_dimension_numbers<[1], [0], [0], [1], [0, 0, 1, 1], [], []>} : vector<2x64xf32>, vector<64x128xf32>, vector<2x128xf32> -> vector<2x128xf32>
    %c0_107 = arith.constant 0 : index
    %c0_108 = arith.constant 0 : index
    %354 = vector.load %arg16[%c0_107, %c0_108] : memref<1x128xf32, #tpu.memory_space<vmem>>, vector<1x128xf32>
    %355 = vector.broadcast %354 : vector<1x128xf32> to vector<2x128xf32>
    %356 = arith.addf %353, %355 : vector<2x128xf32>
    %357 = vector.extract_strided_slice %356 {offsets = [0, 0], sizes = [2, 32], strides = [1, 1]} : vector<2x128xf32> to vector<2x32xf32>
    %cst_109 = arith.constant 0.000000e+00 : f32
    %358 = vector.broadcast %cst_109 : f32 to vector<2x32xf32>
    %359 = arith.subf %358, %357 : vector<2x32xf32>
    %360 = math.exp %359 : vector<2x32xf32>
    %cst_110 = arith.constant 1.000000e+00 : f32
    %361 = vector.broadcast %cst_110 : f32 to vector<2x32xf32>
    %362 = arith.addf %361, %360 : vector<2x32xf32>
    %363 = tpu.reciprocal %362 {approx = true} : vector<2x32xf32> -> vector<2x32xf32>
    %364 = vector.extract_strided_slice %356 {offsets = [0, 32], sizes = [2, 32], strides = [1, 1]} : vector<2x128xf32> to vector<2x32xf32>
    %cst_111 = arith.constant 0.000000e+00 : f32
    %365 = vector.broadcast %cst_111 : f32 to vector<2x32xf32>
    %366 = arith.subf %365, %364 : vector<2x32xf32>
    %367 = math.exp %366 : vector<2x32xf32>
    %cst_112 = arith.constant 1.000000e+00 : f32
    %368 = vector.broadcast %cst_112 : f32 to vector<2x32xf32>
    %369 = arith.addf %368, %367 : vector<2x32xf32>
    %370 = tpu.reciprocal %369 {approx = true} : vector<2x32xf32> -> vector<2x32xf32>
    %371 = vector.extract_strided_slice %356 {offsets = [0, 64], sizes = [2, 32], strides = [1, 1]} : vector<2x128xf32> to vector<2x32xf32>
    %372 = math.tanh %371 : vector<2x32xf32>
    %373 = vector.extract_strided_slice %356 {offsets = [0, 96], sizes = [2, 32], strides = [1, 1]} : vector<2x128xf32> to vector<2x32xf32>
    %cst_113 = arith.constant 0.000000e+00 : f32
    %374 = vector.broadcast %cst_113 : f32 to vector<2x32xf32>
    %375 = arith.subf %374, %373 : vector<2x32xf32>
    %376 = math.exp %375 : vector<2x32xf32>
    %cst_114 = arith.constant 1.000000e+00 : f32
    %377 = vector.broadcast %cst_114 : f32 to vector<2x32xf32>
    %378 = arith.addf %377, %376 : vector<2x32xf32>
    %379 = tpu.reciprocal %378 {approx = true} : vector<2x32xf32> -> vector<2x32xf32>
    %380 = arith.mulf %370, %316 : vector<2x32xf32>
    %381 = arith.mulf %363, %372 : vector<2x32xf32>
    %382 = arith.addf %380, %381 : vector<2x32xf32>
    %383 = math.tanh %382 : vector<2x32xf32>
    %384 = arith.mulf %379, %383 : vector<2x32xf32>
    %385 = vector.extract_strided_slice %251 {offsets = [4, 0], sizes = [2, 128], strides = [1, 1]} : vector<8x128xf32> to vector<2x128xf32>
    %c0_115 = arith.constant 0 : index
    %c0_116 = arith.constant 0 : index
    %386 = vector.load %arg13[%c0_115, %c0_116] : memref<32x128xf32, #tpu.memory_space<vmem>>, vector<32x128xf32>
    %cst_117 = arith.constant dense<0.000000e+00> : vector<2x128xf32>
    %387 = tpu.matmul %350, %386, %cst_117 {dimension_numbers = #tpu.dot_dimension_numbers<[1], [0], [0], [1], [0, 0, 1, 1], [], []>} : vector<2x32xf32>, vector<32x128xf32>, vector<2x128xf32> -> vector<2x128xf32>
    %388 = arith.addf %385, %387 : vector<2x128xf32>
    %389 = vector.extract_strided_slice %388 {offsets = [0, 0], sizes = [2, 32], strides = [1, 1]} : vector<2x128xf32> to vector<2x32xf32>
    %cst_118 = arith.constant 0.000000e+00 : f32
    %390 = vector.broadcast %cst_118 : f32 to vector<2x32xf32>
    %391 = arith.subf %390, %389 : vector<2x32xf32>
    %392 = math.exp %391 : vector<2x32xf32>
    %cst_119 = arith.constant 1.000000e+00 : f32
    %393 = vector.broadcast %cst_119 : f32 to vector<2x32xf32>
    %394 = arith.addf %393, %392 : vector<2x32xf32>
    %395 = tpu.reciprocal %394 {approx = true} : vector<2x32xf32> -> vector<2x32xf32>
    %396 = vector.extract_strided_slice %388 {offsets = [0, 32], sizes = [2, 32], strides = [1, 1]} : vector<2x128xf32> to vector<2x32xf32>
    %cst_120 = arith.constant 0.000000e+00 : f32
    %397 = vector.broadcast %cst_120 : f32 to vector<2x32xf32>
    %398 = arith.subf %397, %396 : vector<2x32xf32>
    %399 = math.exp %398 : vector<2x32xf32>
    %cst_121 = arith.constant 1.000000e+00 : f32
    %400 = vector.broadcast %cst_121 : f32 to vector<2x32xf32>
    %401 = arith.addf %400, %399 : vector<2x32xf32>
    %402 = tpu.reciprocal %401 {approx = true} : vector<2x32xf32> -> vector<2x32xf32>
    %403 = vector.extract_strided_slice %388 {offsets = [0, 64], sizes = [2, 32], strides = [1, 1]} : vector<2x128xf32> to vector<2x32xf32>
    %404 = math.tanh %403 : vector<2x32xf32>
    %405 = vector.extract_strided_slice %388 {offsets = [0, 96], sizes = [2, 32], strides = [1, 1]} : vector<2x128xf32> to vector<2x32xf32>
    %cst_122 = arith.constant 0.000000e+00 : f32
    %406 = vector.broadcast %cst_122 : f32 to vector<2x32xf32>
    %407 = arith.subf %406, %405 : vector<2x32xf32>
    %408 = math.exp %407 : vector<2x32xf32>
    %cst_123 = arith.constant 1.000000e+00 : f32
    %409 = vector.broadcast %cst_123 : f32 to vector<2x32xf32>
    %410 = arith.addf %409, %408 : vector<2x32xf32>
    %411 = tpu.reciprocal %410 {approx = true} : vector<2x32xf32> -> vector<2x32xf32>
    %412 = arith.mulf %402, %348 : vector<2x32xf32>
    %413 = arith.mulf %395, %404 : vector<2x32xf32>
    %414 = arith.addf %412, %413 : vector<2x32xf32>
    %415 = math.tanh %414 : vector<2x32xf32>
    %416 = arith.mulf %411, %415 : vector<2x32xf32>
    %417 = tpu.concatenate %416, %384 in 1 : vector<2x32xf32>, vector<2x32xf32> -> vector<2x64xf32>
    %c0_124 = arith.constant 0 : index
    %c0_125 = arith.constant 0 : index
    %418 = vector.load %arg15[%c0_124, %c0_125] : memref<64x128xf32, #tpu.memory_space<vmem>>, vector<64x128xf32>
    %cst_126 = arith.constant dense<0.000000e+00> : vector<2x128xf32>
    %419 = tpu.matmul %417, %418, %cst_126 {dimension_numbers = #tpu.dot_dimension_numbers<[1], [0], [0], [1], [0, 0, 1, 1], [], []>} : vector<2x64xf32>, vector<64x128xf32>, vector<2x128xf32> -> vector<2x128xf32>
    %c0_127 = arith.constant 0 : index
    %c0_128 = arith.constant 0 : index
    %420 = vector.load %arg16[%c0_127, %c0_128] : memref<1x128xf32, #tpu.memory_space<vmem>>, vector<1x128xf32>
    %421 = vector.broadcast %420 : vector<1x128xf32> to vector<2x128xf32>
    %422 = arith.addf %419, %421 : vector<2x128xf32>
    %423 = vector.extract_strided_slice %422 {offsets = [0, 0], sizes = [2, 32], strides = [1, 1]} : vector<2x128xf32> to vector<2x32xf32>
    %cst_129 = arith.constant 0.000000e+00 : f32
    %424 = vector.broadcast %cst_129 : f32 to vector<2x32xf32>
    %425 = arith.subf %424, %423 : vector<2x32xf32>
    %426 = math.exp %425 : vector<2x32xf32>
    %cst_130 = arith.constant 1.000000e+00 : f32
    %427 = vector.broadcast %cst_130 : f32 to vector<2x32xf32>
    %428 = arith.addf %427, %426 : vector<2x32xf32>
    %429 = tpu.reciprocal %428 {approx = true} : vector<2x32xf32> -> vector<2x32xf32>
    %430 = vector.extract_strided_slice %422 {offsets = [0, 32], sizes = [2, 32], strides = [1, 1]} : vector<2x128xf32> to vector<2x32xf32>
    %cst_131 = arith.constant 0.000000e+00 : f32
    %431 = vector.broadcast %cst_131 : f32 to vector<2x32xf32>
    %432 = arith.subf %431, %430 : vector<2x32xf32>
    %433 = math.exp %432 : vector<2x32xf32>
    %cst_132 = arith.constant 1.000000e+00 : f32
    %434 = vector.broadcast %cst_132 : f32 to vector<2x32xf32>
    %435 = arith.addf %434, %433 : vector<2x32xf32>
    %436 = tpu.reciprocal %435 {approx = true} : vector<2x32xf32> -> vector<2x32xf32>
    %437 = vector.extract_strided_slice %422 {offsets = [0, 64], sizes = [2, 32], strides = [1, 1]} : vector<2x128xf32> to vector<2x32xf32>
    %438 = math.tanh %437 : vector<2x32xf32>
    %439 = vector.extract_strided_slice %422 {offsets = [0, 96], sizes = [2, 32], strides = [1, 1]} : vector<2x128xf32> to vector<2x32xf32>
    %cst_133 = arith.constant 0.000000e+00 : f32
    %440 = vector.broadcast %cst_133 : f32 to vector<2x32xf32>
    %441 = arith.subf %440, %439 : vector<2x32xf32>
    %442 = math.exp %441 : vector<2x32xf32>
    %cst_134 = arith.constant 1.000000e+00 : f32
    %443 = vector.broadcast %cst_134 : f32 to vector<2x32xf32>
    %444 = arith.addf %443, %442 : vector<2x32xf32>
    %445 = tpu.reciprocal %444 {approx = true} : vector<2x32xf32> -> vector<2x32xf32>
    %446 = arith.mulf %436, %382 : vector<2x32xf32>
    %447 = arith.mulf %429, %438 : vector<2x32xf32>
    %448 = arith.addf %446, %447 : vector<2x32xf32>
    %449 = math.tanh %448 : vector<2x32xf32>
    %450 = arith.mulf %445, %449 : vector<2x32xf32>
    %451 = vector.extract_strided_slice %251 {offsets = [6, 0], sizes = [2, 128], strides = [1, 1]} : vector<8x128xf32> to vector<2x128xf32>
    %c0_135 = arith.constant 0 : index
    %c0_136 = arith.constant 0 : index
    %452 = vector.load %arg13[%c0_135, %c0_136] : memref<32x128xf32, #tpu.memory_space<vmem>>, vector<32x128xf32>
    %cst_137 = arith.constant dense<0.000000e+00> : vector<2x128xf32>
    %453 = tpu.matmul %416, %452, %cst_137 {dimension_numbers = #tpu.dot_dimension_numbers<[1], [0], [0], [1], [0, 0, 1, 1], [], []>} : vector<2x32xf32>, vector<32x128xf32>, vector<2x128xf32> -> vector<2x128xf32>
    %454 = arith.addf %451, %453 : vector<2x128xf32>
    %455 = vector.extract_strided_slice %454 {offsets = [0, 0], sizes = [2, 32], strides = [1, 1]} : vector<2x128xf32> to vector<2x32xf32>
    %cst_138 = arith.constant 0.000000e+00 : f32
    %456 = vector.broadcast %cst_138 : f32 to vector<2x32xf32>
    %457 = arith.subf %456, %455 : vector<2x32xf32>
    %458 = math.exp %457 : vector<2x32xf32>
    %cst_139 = arith.constant 1.000000e+00 : f32
    %459 = vector.broadcast %cst_139 : f32 to vector<2x32xf32>
    %460 = arith.addf %459, %458 : vector<2x32xf32>
    %461 = tpu.reciprocal %460 {approx = true} : vector<2x32xf32> -> vector<2x32xf32>
    %462 = vector.extract_strided_slice %454 {offsets = [0, 32], sizes = [2, 32], strides = [1, 1]} : vector<2x128xf32> to vector<2x32xf32>
    %cst_140 = arith.constant 0.000000e+00 : f32
    %463 = vector.broadcast %cst_140 : f32 to vector<2x32xf32>
    %464 = arith.subf %463, %462 : vector<2x32xf32>
    %465 = math.exp %464 : vector<2x32xf32>
    %cst_141 = arith.constant 1.000000e+00 : f32
    %466 = vector.broadcast %cst_141 : f32 to vector<2x32xf32>
    %467 = arith.addf %466, %465 : vector<2x32xf32>
    %468 = tpu.reciprocal %467 {approx = true} : vector<2x32xf32> -> vector<2x32xf32>
    %469 = vector.extract_strided_slice %454 {offsets = [0, 64], sizes = [2, 32], strides = [1, 1]} : vector<2x128xf32> to vector<2x32xf32>
    %470 = math.tanh %469 : vector<2x32xf32>
    %471 = vector.extract_strided_slice %454 {offsets = [0, 96], sizes = [2, 32], strides = [1, 1]} : vector<2x128xf32> to vector<2x32xf32>
    %cst_142 = arith.constant 0.000000e+00 : f32
    %472 = vector.broadcast %cst_142 : f32 to vector<2x32xf32>
    %473 = arith.subf %472, %471 : vector<2x32xf32>
    %474 = math.exp %473 : vector<2x32xf32>
    %cst_143 = arith.constant 1.000000e+00 : f32
    %475 = vector.broadcast %cst_143 : f32 to vector<2x32xf32>
    %476 = arith.addf %475, %474 : vector<2x32xf32>
    %477 = tpu.reciprocal %476 {approx = true} : vector<2x32xf32> -> vector<2x32xf32>
    %478 = arith.mulf %468, %414 : vector<2x32xf32>
    %479 = arith.mulf %461, %470 : vector<2x32xf32>
    %480 = arith.addf %478, %479 : vector<2x32xf32>
    %481 = math.tanh %480 : vector<2x32xf32>
    %482 = arith.mulf %477, %481 : vector<2x32xf32>
    %483 = tpu.concatenate %482, %450 in 1 : vector<2x32xf32>, vector<2x32xf32> -> vector<2x64xf32>
    %c0_144 = arith.constant 0 : index
    %c0_145 = arith.constant 0 : index
    %484 = vector.load %arg15[%c0_144, %c0_145] : memref<64x128xf32, #tpu.memory_space<vmem>>, vector<64x128xf32>
    %cst_146 = arith.constant dense<0.000000e+00> : vector<2x128xf32>
    %485 = tpu.matmul %483, %484, %cst_146 {dimension_numbers = #tpu.dot_dimension_numbers<[1], [0], [0], [1], [0, 0, 1, 1], [], []>} : vector<2x64xf32>, vector<64x128xf32>, vector<2x128xf32> -> vector<2x128xf32>
    %c0_147 = arith.constant 0 : index
    %c0_148 = arith.constant 0 : index
    %486 = vector.load %arg16[%c0_147, %c0_148] : memref<1x128xf32, #tpu.memory_space<vmem>>, vector<1x128xf32>
    %487 = vector.broadcast %486 : vector<1x128xf32> to vector<2x128xf32>
    %488 = arith.addf %485, %487 : vector<2x128xf32>
    %489 = vector.extract_strided_slice %488 {offsets = [0, 0], sizes = [2, 32], strides = [1, 1]} : vector<2x128xf32> to vector<2x32xf32>
    %cst_149 = arith.constant 0.000000e+00 : f32
    %490 = vector.broadcast %cst_149 : f32 to vector<2x32xf32>
    %491 = arith.subf %490, %489 : vector<2x32xf32>
    %492 = math.exp %491 : vector<2x32xf32>
    %cst_150 = arith.constant 1.000000e+00 : f32
    %493 = vector.broadcast %cst_150 : f32 to vector<2x32xf32>
    %494 = arith.addf %493, %492 : vector<2x32xf32>
    %495 = tpu.reciprocal %494 {approx = true} : vector<2x32xf32> -> vector<2x32xf32>
    %496 = vector.extract_strided_slice %488 {offsets = [0, 32], sizes = [2, 32], strides = [1, 1]} : vector<2x128xf32> to vector<2x32xf32>
    %cst_151 = arith.constant 0.000000e+00 : f32
    %497 = vector.broadcast %cst_151 : f32 to vector<2x32xf32>
    %498 = arith.subf %497, %496 : vector<2x32xf32>
    %499 = math.exp %498 : vector<2x32xf32>
    %cst_152 = arith.constant 1.000000e+00 : f32
    %500 = vector.broadcast %cst_152 : f32 to vector<2x32xf32>
    %501 = arith.addf %500, %499 : vector<2x32xf32>
    %502 = tpu.reciprocal %501 {approx = true} : vector<2x32xf32> -> vector<2x32xf32>
    %503 = vector.extract_strided_slice %488 {offsets = [0, 64], sizes = [2, 32], strides = [1, 1]} : vector<2x128xf32> to vector<2x32xf32>
    %504 = math.tanh %503 : vector<2x32xf32>
    %505 = vector.extract_strided_slice %488 {offsets = [0, 96], sizes = [2, 32], strides = [1, 1]} : vector<2x128xf32> to vector<2x32xf32>
    %cst_153 = arith.constant 0.000000e+00 : f32
    %506 = vector.broadcast %cst_153 : f32 to vector<2x32xf32>
    %507 = arith.subf %506, %505 : vector<2x32xf32>
    %508 = math.exp %507 : vector<2x32xf32>
    %cst_154 = arith.constant 1.000000e+00 : f32
    %509 = vector.broadcast %cst_154 : f32 to vector<2x32xf32>
    %510 = arith.addf %509, %508 : vector<2x32xf32>
    %511 = tpu.reciprocal %510 {approx = true} : vector<2x32xf32> -> vector<2x32xf32>
    %512 = arith.mulf %502, %448 : vector<2x32xf32>
    %513 = arith.mulf %495, %504 : vector<2x32xf32>
    %514 = arith.addf %512, %513 : vector<2x32xf32>
    %515 = math.tanh %514 : vector<2x32xf32>
    %516 = arith.mulf %511, %515 : vector<2x32xf32>
    %c0_155 = arith.constant 0 : index
    %c0_156 = arith.constant 0 : index
    %517 = vector.load %arg17[%c0_155, %c0_156] : memref<32x5xf32, #tpu.memory_space<vmem>>, vector<32x5xf32>
    %cst_157 = arith.constant dense<0.000000e+00> : vector<2x5xf32>
    %518 = tpu.matmul %516, %517, %cst_157 {dimension_numbers = #tpu.dot_dimension_numbers<[1], [0], [0], [1], [0, 0, 1, 1], [], []>} : vector<2x32xf32>, vector<32x5xf32>, vector<2x5xf32> -> vector<2x5xf32>
    %c0_158 = arith.constant 0 : index
    %c0_159 = arith.constant 0 : index
    %519 = vector.load %arg18[%c0_158, %c0_159] : memref<1x5xf32, #tpu.memory_space<vmem>>, vector<1x5xf32>
    %520 = vector.broadcast %519 : vector<1x5xf32> to vector<2x5xf32>
    %521 = arith.addf %518, %520 : vector<2x5xf32>
    %c0_160 = arith.constant 0 : index
    %c0_161 = arith.constant 0 : index
    %522 = vector.load %arg19[%c0_160, %c0_161] : memref<2x5xf32, #tpu.memory_space<vmem>>, vector<2x5xf32>
    tpu.vector_store %arg19[%c0_160, %c0_161], %521 {strides = array<i32>} : memref<2x5xf32, #tpu.memory_space<vmem>>, vector<2x5xf32>,
    return
  }
}

</mosaic_0001>

<bundles_post_ra>
// kernel: _lambda_.1
= control target key start
LH: loop header
LB: loop body
LE: loop exit
PB: predicated region body
PF: predicated region fallthrough
CT: control target
= control target key end

     0   :  { %s34872_s0 = inlined_call_operand.vmem [shape: f32[1,2048], index: 0, kind: input, shape index: {}]   ;;  %s34873_s1 = inlined_call_operand.vmem [shape: f32[4,9], index: 1, kind: input, shape index: {}]   ;;  %s34874_s2 = inlined_call_operand.vmem [shape: f32[4,1], index: 2, kind: input, shape index: {}]   ;;  %s34875_s3 = inlined_call_operand.vmem [shape: f32[4,36], index: 3, kind: input, shape index: {}]   ;;  %s34876_s4 = inlined_call_operand.vmem [shape: f32[4,1], index: 4, kind: input, shape index: {}]   ;;  %s34877_s5 = inlined_call_operand.vmem [shape: f32[4,36], index: 5, kind: input, shape index: {}]   ;;  %s34878_s6 = inlined_call_operand.vmem [shape: f32[4,1], index: 6, kind: input, shape index: {}]   ;;  %s34879_s7 = inlined_call_operand.vmem [shape: f32[8,36], index: 7, kind: input, shape index: {}]   ;;  %s34880_s8 = inlined_call_operand.vmem [shape: f32[8,1], index: 8, kind: input, shape index: {}]   ;;  %s34881_s9 = inlined_call_operand.vmem [shape: f32[8,72], index: 9, kind: input, shape index: {}]   ;;  %s34882_s10 = inlined_call_operand.vmem [shape: f32[8,1], index: 10, kind: input, shape index: {}]   ;;  %s34883_s11 = inlined_call_operand.vmem [shape: f32[8,1861], index: 11, kind: input, shape index: {}]   ;;  %s34884_s12 = inlined_call_operand.vmem [shape: f32[8,128], index: 12, kind: input, shape index: {}]   ;;  %s34885_s13 = inlined_call_operand.vmem [shape: f32[32,128], index: 13, kind: input, shape index: {}]   ;;  %s34886_s14 = inlined_call_operand.vmem [shape: f32[1,128], index: 14, kind: input, shape index: {}]   ;;  %s34887_s15 = inlined_call_operand.vmem [shape: f32[64,128], index: 15, kind: input, shape index: {}]   ;;  %s34888_s16 = inlined_call_operand.vmem [shape: f32[1,128], index: 16, kind: input, shape index: {}]   ;;  %s34889_s17 = inlined_call_operand.vmem [shape: f32[32,5], index: 17, kind: input, shape index: {}]   ;;  %s34890_s18 = inlined_call_operand.vmem [shape: f32[1,5], index: 18, kind: input, shape index: {}]   ;;  %s34891_s19 = inlined_call_operand.hbm [shape: f32[2,5], index: 19, kind: output, shape index: {}]  }
   0x1   :  { %34999 = sst [smem:[#allocation49_spill]] %s34872_s0 }
   0x2   :  { %35000 = sst [smem:[#allocation50_spill]] %s34873_s1 }
   0x3   :  { %35001 = sst [smem:[#allocation51_spill]] %s34874_s2 }
   0x4   :  { %35002 = sst [smem:[#allocation52_spill]] %s34875_s3 }
   0x5   :  { %s35003_s20 = sld [smem:[#allocation50_spill]]  ;;  %v27939_v1 = vmov 1   ;;  %v27940_v2 = vmov 3   ;;  %v73_v3 = vlaneseq }
   0x6   :  { %27839 = vset.pattern.permute.xlu0 %v27939_v1  ;;  %27841 = vset.pattern.permute.xlu1 %v27940_v2 }
   0xb   :  { %v65_v0 = vld [vmem:[%s35003_s20] sm:$0xf] }
   0xc   :  { %170 = vperm.xlu0 %27839, %v65_v0   ;;  %402 = vperm.xlu1 %27841, %v65_v0  }
   0xd   :  { %24 = vsyncpa [#allocation3], 0  ;;  %v28073_v4 = vshrl.u32 %v73_v3, 7  ;;  %v27941_v5 = vmov 2   ;;  %v27942_v6 = vmov 4   ;;  %s35004_s22 = sld [smem:[#allocation49_spill]] }
   0xe   :  { %v27943_v10 = vmov 5   ;;  %v27944_v11 = vmov 6   ;;  %v27945_v14 = vmov 7   ;;  %v27946_v15 = vmov 0   ;;  %s27948_s24 = smov 127   ;;  %s27949_s25 = smov 126  }
   0xf   :  { %v99_v7 = vsub.s32 6, %v28073_v4  ;;  %v103_v8 = vsub.s32 7, %v28073_v4  ;;  %v27947_v16 = vmov 8   ;;  %v87_v17 = vsub.s32 3, %v28073_v4  ;;  %s27950_s3 = smov 112   ;;  %s27951_s26 = smov 111  }
  0x10   :  { %27840 = vset.pattern.permute.xlu0 %v27941_v5  ;;  %27842 = vset.pattern.permute.xlu1 %v27942_v6  ;;  %v79_v18 = vsub.s32 1, %v28073_v4  ;;  %v91_v22 = vsub.s32 4, %v28073_v4  ;;  %v83_v23 = vsub.s32 2, %v28073_v4  ;;  %v75_v25 = vsub.s32 0, %v28073_v4  ;;  %s34950_s27 = smov 110   ;;  %s27953_s28 = smov 96  }
  0x11   :  { %286 = vperm.xlu0 %27840, %v65_v0   ;;  %518 = vperm.xlu1 %27842, %v65_v0   ;;  %v95_v34 = vsub.s32 5, %v28073_v4  ;;  %s27954_s29 = smov 95   ;;  %s35014_s20 = sld [smem:[#allocation51_spill]]  ;;  %vm237_vm0 = vcmask 1039360   ;;  %vm353_vm1 = vcmask 1031168   ;;  %vm469_vm2 = vcmask 916480  }
  0x12   :  { %s27955_s21 = smov 94   ;;  %vm585_vm3 = vcmask 908288   ;;  %vm701_vm4 = vcmask 900096   ;;  %vm817_vm5 = vcmask 785408   ;;  %vm933_vm6 = vcmask 777216   ;;  %s35054_s2 = sld [smem:[#allocation52_spill]] }
  0x13   :  { %v28080_v9 = vld [vmem:[%s35004_s22 + $0x8] sm:$0xff]  ;;  %v63_v19 = vld [vmem:[%s35004_s22] sm:$0xff]  ;;  %vm1049_vm7 = vcmask 769024   ;;  %s27956_s23 = smov 124   ;;  %s27958_s0 = smov 120  }
  0x14   :  { %v28083_v12 = vrot.slane %v28080_v9, %v99_v7  ;;  %v28086_v13 = vrot.slane %v28080_v9, %v103_v8  ;;  %v28095_v20 = vrot.slane %v63_v19, %v87_v17  ;;  %v28097_v21 = vrot.slane %v63_v19, %v79_v18  ;;  %s27959_s30 = smov 116   ;;  %s34948_s1 = smov 104  }
  0x15   :  { %27843 = vset.pattern.permute.xlu1 %v27943_v10  ;;  %27844 = vset.pattern.permute.xlu0 %v27944_v11  ;;  %v28110_v28 = vrot.slane %v63_v19, %v91_v22  ;;  %v28114_v29 = vrot.slane %v63_v19, %v83_v23  ;;  %v28124_v33 = vrot.slane %v63_v19, %v75_v25 }
  0x16   :  { %35005 = vst [vmem:[#allocation5_spill] sm:$0xff] %v28083_v12  ;;  %634 = vperm.xlu1 %27843, %v65_v0   ;;  %750 = vperm.xlu0 %27844, %v65_v0   ;;  %35006 = vst [vmem:[#allocation6_spill] sm:$0xff] %v28086_v13  ;;  %v28135_v37 = vrot.slane %v63_v19, %v95_v34  ;;  %v28143_v40 = vrot.slane %v63_v19, %v99_v7 }
  0x17   :  { %v28159_v46 = vrot.slane %v63_v19, %v103_v8  ;;  %v28174_v51 = vrot.slane %v28080_v9, %v75_v25  ;;  %v28189_v56 = vrot.slane %v28080_v9, %v79_v18  ;;  %v28231_v6 = vrot.slane %v28080_v9, %v87_v17 }
  0x18   :  { %v28262_v19 = vrot.slane %v28080_v9, %v91_v22 }
  0x19   :  { %35007 = vst [vmem:[#allocation7_spill] sm:$0xff] %v28159_v46  ;;  %35008 = vst [vmem:[#allocation8_spill] sm:$0xff] %v28174_v51 }
  0x1a   :  { %27845 = vset.pattern.permute.xlu1 %v27945_v14  ;;  %27847 = vset.pattern.permute.xlu0 %v27946_v15  ;;  %35009 = vst [vmem:[#allocation9_spill] sm:$0xff] %v28189_v56  ;;  %35011 = vst [vmem:[#allocation11_spill] sm:$0xff] %v28231_v6 }
  0x1b   :  { %866 = vperm.xlu1 %27845, %v65_v0   ;;  %68 = vperm.xlu0 %27847, %v65_v0   ;;  %35012 = vst [vmem:[#allocation12_spill] sm:$0xff] %v28262_v19 }
  0x1f   :  { %27846 = vset.pattern.permute.xlu1 %v27947_v16 }
  0x20   :  { %982 = vperm.xlu1 %27846, %v65_v0   ;;  %v28214_v0 = vrot.slane %v28080_v9, %v83_v23 }
  0x22   :  { %35010 = vst [vmem:[#allocation10_spill] sm:$0xff] %v28214_v0 }
  0x24   :  { %27848 = vset.pattern.permute.xlu1 %v27946_v15 }
  0x87   :  { %v28101_v24 = vpop.permute.xlu0 %170  ;;  %v28153_v43 = vpop.permute.xlu1 %402 }
  0x88   :  { %v176_v26 = vmul.f32 %v28101_v24, %v28095_v20  ;;  %v174_v27 = vmul.f32 %v28101_v24, %v28097_v21  ;;  %v177_v30 = vmul.f32 %v28101_v24, %v28110_v28  ;;  %v175_v31 = vmul.f32 %v28101_v24, %v28114_v29 }
  0x89   :  { %v173_v36 = vmul.f32 %v28101_v24, %v28124_v33  ;;  %v178_v39 = vmul.f32 %v28101_v24, %v28135_v37  ;;  %v179_v42 = vmul.f32 %v28101_v24, %v28143_v40  ;;  %v406_v47 = vmul.f32 %v28153_v43, %v28097_v21 }
  0x8a   :  { %211 = vrot.lane.b32.xlu0 %v176_v26, %s27948_s24  ;;  %207 = vrot.lane.b32.xlu1 %v174_v27, %s27948_s24  ;;  %v180_v48 = vmul.f32 %v28101_v24, %v28159_v46  ;;  %v408_v49 = vmul.f32 %v28153_v43, %v28095_v20  ;;  %v407_v52 = vmul.f32 %v28153_v43, %v28114_v29 }
  0x8b   :  { %v181_v53 = vmul.f32 %v28101_v24, %v28174_v51  ;;  %v405_v55 = vmul.f32 %v28153_v43, %v28124_v33  ;;  %v409_v58 = vmul.f32 %v28153_v43, %v28110_v28  ;;  %v182_v59 = vmul.f32 %v28101_v24, %v28189_v56 }
  0x8c   :  { %v28122_v32 = vpop.permute.xlu0 %286  ;;  %v28193_v57 = vpop.permute.xlu1 %518  ;;  %v410_v63 = vmul.f32 %v28153_v43, %v28135_v37  ;;  %v183_v2 = vmul.f32 %v28101_v24, %v28214_v0  ;;  %v411_v7 = vmul.f32 %v28153_v43, %v28143_v40  ;;  %v184_v8 = vmul.f32 %v28101_v24, %v28231_v6 }
  0x8d   :  { %v290_v35 = vmul.f32 %v28122_v32, %v28097_v21  ;;  %v292_v38 = vmul.f32 %v28122_v32, %v28095_v20  ;;  %v291_v41 = vmul.f32 %v28122_v32, %v28114_v29  ;;  %v293_v44 = vmul.f32 %v28122_v32, %v28110_v28 }
  0x8e   :  { %213 = vrot.lane.b32.xlu0 %v177_v30, %s27948_s24  ;;  %209 = vrot.lane.b32.xlu1 %v175_v31, %s27948_s24  ;;  %v289_v45 = vmul.f32 %v28122_v32, %v28124_v33  ;;  %v294_v50 = vmul.f32 %v28122_v32, %v28135_v37  ;;  %v295_v54 = vmul.f32 %v28122_v32, %v28143_v40 }
  0x8f   :  { %v522_v60 = vmul.f32 %v28193_v57, %v28097_v21  ;;  %v296_v61 = vmul.f32 %v28122_v32, %v28159_v46  ;;  %v524_v62 = vmul.f32 %v28193_v57, %v28095_v20  ;;  %v523_v1 = vmul.f32 %v28193_v57, %v28114_v29 }
  0x90   :  { %v297_v3 = vmul.f32 %v28122_v32, %v28174_v51  ;;  %v521_v5 = vmul.f32 %v28193_v57, %v28124_v33  ;;  %v525_v11 = vmul.f32 %v28193_v57, %v28110_v28  ;;  %v298_v14 = vmul.f32 %v28122_v32, %v28189_v56 }
  0x91   :  { %v28241_v10 = vpop.permute.xlu1 %634  ;;  %v412_v16 = vmul.f32 %v28153_v43, %v28159_v46  ;;  %v526_v18 = vmul.f32 %v28193_v57, %v28135_v37  ;;  %v185_v25 = vmul.f32 %v28101_v24, %v28262_v19  ;;  %v299_v26 = vmul.f32 %v28122_v32, %v28214_v0 }
  0x92   :  { %323 = vrot.lane.b32.xlu0 %v290_v35, %s27949_s25  ;;  %205 = vrot.lane.b32.xlu1 %v173_v36, %s27948_s24  ;;  %v638_v15 = vmul.f32 %v28241_v10, %v28097_v21  ;;  %v640_v17 = vmul.f32 %v28241_v10, %v28095_v20  ;;  %v639_v23 = vmul.f32 %v28241_v10, %v28114_v29 }
  0x93   :  { %v637_v22 = vmul.f32 %v28241_v10, %v28124_v33  ;;  %v28279_v27 = vrot.slane %v28080_v9, %v95_v34  ;;  %v413_v30 = vmul.f32 %v28153_v43, %v28174_v51  ;;  %v527_v4 = vmul.f32 %v28193_v57, %v28143_v40  ;;  %v28295_v34 = vpop.permute.xlu0 %750 }
  0x94   :  { %v300_v9 = vmul.f32 %v28122_v32, %v28231_v6  ;;  %v641_v35 = vmul.f32 %v28241_v10, %v28110_v28  ;;  %v414_v36 = vmul.f32 %v28153_v43, %v28189_v56 }
  0x95   :  { %35013 = vst [vmem:[#allocation13_spill] sm:$0xff] %v28279_v27  ;;  %v186_v31 = vmul.f32 %v28101_v24, %v28279_v27 }
  0x96   :  { %327 = vrot.lane.b32.xlu0 %v292_v38, %s27949_s25  ;;  %215 = vrot.lane.b32.xlu1 %v178_v39, %s27948_s24  ;;  %v754_v38 = vmul.f32 %v28295_v34, %v28097_v21  ;;  %v528_v39 = vmul.f32 %v28193_v57, %v28159_v46 }
  0x9a   :  { %217 = vrot.lane.b32.xlu0 %v179_v42, %s27948_s24  ;;  %325 = vrot.lane.b32.xlu1 %v291_v41, %s27949_s25  ;;  %v756_v41 = vmul.f32 %v28295_v34, %v28095_v20  ;;  %v642_v42 = vmul.f32 %v28241_v10, %v28135_v37 }
  0x9e   :  { %329 = vrot.lane.b32.xlu0 %v293_v44, %s27949_s25  ;;  %321 = vrot.lane.b32.xlu1 %v289_v45, %s27949_s25  ;;  %v755_v44 = vmul.f32 %v28295_v34, %v28114_v29  ;;  %v187_v45 = vmul.f32 %v28101_v24, %v28083_v12 }
  0xa2   :  { %439 = vrot.lane.b32.xlu0 %v406_v47, %s27950_s3  ;;  %219 = vrot.lane.b32.xlu1 %v180_v48, %s27948_s24  ;;  %v28319_v47 = vpop.permute.xlu1 %866  ;;  %v301_v48 = vmul.f32 %v28122_v32, %v28262_v19 }
  0xa6   :  { %443 = vrot.lane.b32.xlu0 %v408_v49, %s27950_s3  ;;  %331 = vrot.lane.b32.xlu1 %v294_v50, %s27949_s25  ;;  %v753_v49 = vmul.f32 %v28295_v34, %v28124_v33  ;;  %v28329_v50 = vpop.permute.xlu1 %982 }
  0xaa   :  { %221 = vrot.lane.b32.xlu0 %v181_v53, %s27948_s24  ;;  %441 = vrot.lane.b32.xlu1 %v407_v52, %s27950_s3  ;;  %v28331_v52 = vpop.permute.xlu0 %68  ;;  %v415_v53 = vmul.f32 %v28153_v43, %v28214_v0 }
  0xae   :  { %333 = vrot.lane.b32.xlu0 %v295_v54, %s27949_s25  ;;  %437 = vrot.lane.b32.xlu1 %v405_v55, %s27950_s3  ;;  %v188_v54 = vmul.f32 %v28101_v24, %v28086_v13 }
  0xb2   :  { %445 = vrot.lane.b32.xlu0 %v409_v58, %s27950_s3  ;;  %223 = vrot.lane.b32.xlu1 %v182_v59, %s27948_s24  ;;  %v529_v59 = vmul.f32 %v28193_v57, %v28174_v51 }
  0xb6   :  { %555 = vrot.lane.b32.xlu0 %v522_v60, %s27951_s26  ;;  %335 = vrot.lane.b32.xlu1 %v296_v61, %s27949_s25  ;;  %v302_v60 = vmul.f32 %v28122_v32, %v28279_v27 }
  0xba   :  { %559 = vrot.lane.b32.xlu0 %v524_v62, %s27951_s26  ;;  %447 = vrot.lane.b32.xlu1 %v410_v63, %s27950_s3  ;;  %v643_v62 = vmul.f32 %v28241_v10, %v28143_v40  ;;  %v416_v63 = vmul.f32 %v28153_v43, %v28231_v6 }
  0xbe   :  { %225 = vrot.lane.b32.xlu0 %v183_v2, %s27948_s24  ;;  %557 = vrot.lane.b32.xlu1 %v523_v1, %s27951_s26 }
  0xc2   :  { %337 = vrot.lane.b32.xlu0 %v297_v3, %s27949_s25  ;;  %553 = vrot.lane.b32.xlu1 %v521_v5, %s27951_s26  ;;  %v757_v3 = vmul.f32 %v28295_v34, %v28110_v28  ;;  %v530_v5 = vmul.f32 %v28193_v57, %v28189_v56 }
  0xc6   :  { %449 = vrot.lane.b32.xlu0 %v411_v7, %s27950_s3  ;;  %227 = vrot.lane.b32.xlu1 %v184_v8, %s27948_s24 }
  0xca   :  { %561 = vrot.lane.b32.xlu0 %v525_v11, %s27951_s26  ;;  %339 = vrot.lane.b32.xlu1 %v298_v14, %s27949_s25  ;;  %v870_v11 = vmul.f32 %v28319_v47, %v28097_v21  ;;  %v644_v14 = vmul.f32 %v28241_v10, %v28159_v46 }
  0xce   :  { %671 = vrot.lane.b32.xlu0 %v638_v15, %s34950_s27  ;;  %451 = vrot.lane.b32.xlu1 %v412_v16, %s27950_s3 }
  0xd2   :  { %675 = vrot.lane.b32.xlu0 %v640_v17, %s34950_s27  ;;  %563 = vrot.lane.b32.xlu1 %v526_v18, %s27951_s26  ;;  %v872_v17 = vmul.f32 %v28319_v47, %v28095_v20  ;;  %v758_v18 = vmul.f32 %v28295_v34, %v28135_v37 }
  0xd6   :  { %229 = vrot.lane.b32.xlu0 %v185_v25, %s27948_s24  ;;  %673 = vrot.lane.b32.xlu1 %v639_v23, %s34950_s27 }
  0xda   :  { %341 = vrot.lane.b32.xlu0 %v299_v26, %s27949_s25  ;;  %669 = vrot.lane.b32.xlu1 %v637_v22, %s34950_s27  ;;  %v869_v26 = vmul.f32 %v28319_v47, %v28124_v33  ;;  %v871_v22 = vmul.f32 %v28319_v47, %v28114_v29 }
  0xde   :  { %453 = vrot.lane.b32.xlu0 %v413_v30, %s27950_s3  ;;  %231 = vrot.lane.b32.xlu1 %v186_v31, %s27948_s24  ;;  %v1097_v30 = vld [vmem:[%s35014_s20] sm:$0xf]  ;;  %s27960_s20 = smov 108  }
  0xe2   :  { %565 = vrot.lane.b32.xlu0 %v527_v4, %s27951_s26  ;;  %343 = vrot.lane.b32.xlu1 %v300_v9, %s27949_s25  ;;  %v304_v9 = vmul.f32 %v28122_v32, %v28086_v13 }
  0xe6   :  { %677 = vrot.lane.b32.xlu0 %v641_v35, %s34950_s27  ;;  %455 = vrot.lane.b32.xlu1 %v414_v36, %s27950_s3 }
  0xea   :  { %787 = vrot.lane.b32.xlu0 %v754_v38, %s27953_s28  ;;  %567 = vrot.lane.b32.xlu1 %v528_v39, %s27951_s26  ;;  %v418_v38 = vmul.f32 %v28153_v43, %v28279_v27  ;;  %v303_v39 = vmul.f32 %v28122_v32, %v28083_v12 }
  0xee   :  { %791 = vrot.lane.b32.xlu0 %v756_v41, %s27953_s28  ;;  %679 = vrot.lane.b32.xlu1 %v642_v42, %s34950_s27 }
  0xf2   :  { %233 = vrot.lane.b32.xlu0 %v187_v45, %s27948_s24  ;;  %789 = vrot.lane.b32.xlu1 %v755_v44, %s27953_s28  ;;  %v532_v44 = vmul.f32 %v28193_v57, %v28231_v6  ;;  %v417_v45 = vmul.f32 %v28153_v43, %v28262_v19 }
  0xf6   :  { %345 = vrot.lane.b32.xlu0 %v301_v48, %s27949_s25  ;;  %785 = vrot.lane.b32.xlu1 %v753_v49, %s27953_s28  ;;  %v646_v49 = vmul.f32 %v28241_v10, %v28189_v56 }
  0xfa   :  { %457 = vrot.lane.b32.xlu0 %v415_v53, %s27950_s3  ;;  %235 = vrot.lane.b32.xlu1 %v188_v54, %s27948_s24  ;;  %v531_v53 = vmul.f32 %v28193_v57, %v28214_v0 }
  0xfc   :  { %v28339_v55 = vpop.permute.xlu0 %211  ;;  %v28341_v58 = vpop.permute.xlu1 %207 }
  0xfe   :  { %569 = vrot.lane.b32.xlu0 %v529_v59, %s27951_s26  ;;  %347 = vrot.lane.b32.xlu1 %v302_v60, %s27949_s25  ;;  %v760_v60 = vmul.f32 %v28295_v34, %v28159_v46 }
 0x100   :  { %v28349_v61 = vpop.permute.xlu0 %213  ;;  %v28351_v24 = vpop.permute.xlu1 %209 }
 0x102   :  { %681 = vrot.lane.b32.xlu0 %v643_v62, %s34950_s27  ;;  %459 = vrot.lane.b32.xlu1 %v416_v63, %s27950_s3  ;;  %v645_v62 = vmul.f32 %v28241_v10, %v28174_v51 }
 0x104   :  { %v28359_v1 = vpop.permute.xlu0 %323  ;;  %v28361_v2 = vpop.permute.xlu1 %205 }
 0x106   :  { %793 = vrot.lane.b32.xlu0 %v757_v3, %s27953_s28  ;;  %571 = vrot.lane.b32.xlu1 %v530_v5, %s27951_s26  ;;  %v874_v5 = vmul.f32 %v28319_v47, %v28135_v37 }
 0x108   :  { %v28369_v7 = vpop.permute.xlu0 %327  ;;  %v28371_v8 = vpop.permute.xlu1 %215 }
 0x10a   :  { %903 = vrot.lane.b32.xlu0 %v870_v11, %s27954_s29  ;;  %683 = vrot.lane.b32.xlu1 %v644_v14, %s34950_s27  ;;  %v759_v11 = vmul.f32 %v28295_v34, %v28143_v40 }
 0x10c   :  { %v28379_v15 = vpop.permute.xlu0 %217  ;;  %v28381_v16 = vpop.permute.xlu1 %325 }
 0x10e   :  { %907 = vrot.lane.b32.xlu0 %v872_v17, %s27954_s29  ;;  %795 = vrot.lane.b32.xlu1 %v758_v18, %s27953_s28  ;;  %v987_v18 = vmul.f32 %v28329_v50, %v28114_v29 }
 0x110   :  { %v28389_v23 = vpop.permute.xlu0 %329  ;;  %v28391_v25 = vpop.permute.xlu1 %321 }
 0x112   :  { %901 = vrot.lane.b32.xlu0 %v869_v26, %s27954_s29  ;;  %905 = vrot.lane.b32.xlu1 %v871_v22, %s27954_s29  ;;  %v873_v26 = vmul.f32 %v28319_v47, %v28110_v28 }
 0x114   :  { %v28402_v31 = vpop.permute.xlu0 %439  ;;  %v28404_v4 = vpop.permute.xlu1 %219 }
 0x116   :  { %351 = vrot.lane.b32.xlu0 %v304_v9, %s27949_s25  ;;  %1100 = vperm.xlu1 %27848, %v1097_v30   ;;  %v985_v9 = vmul.f32 %v28329_v50, %v28124_v33 }
 0x118   :  { %v28409_v35 = vpop.permute.xlu0 %443  ;;  %v28411_v36 = vpop.permute.xlu1 %331 }
 0x11a   :  { %463 = vrot.lane.b32.xlu0 %v418_v38, %s27950_s3  ;;  %349 = vrot.lane.b32.xlu1 %v303_v39, %s27949_s25  ;;  %v986_v38 = vmul.f32 %v28329_v50, %v28097_v21 }
 0x11c   :  { %v28419_v41 = vpop.permute.xlu0 %221  ;;  %v28421_v42 = vpop.permute.xlu1 %441 }
 0x11d   :  { %35015 = vst [vmem:[#allocation14_spill] sm:$0xff] %v28419_v41 }
 0x11e   :  { %575 = vrot.lane.b32.xlu0 %v532_v44, %s27951_s26  ;;  %461 = vrot.lane.b32.xlu1 %v417_v45, %s27950_s3  ;;  %v420_v45 = vmul.f32 %v28153_v43, %v28086_v13 }
 0x120   :  { %v28429_v48 = vpop.permute.xlu0 %333  ;;  %v28431_v32 = vpop.permute.xlu1 %437 }
 0x122   :  { %687 = vrot.lane.b32.xlu0 %v646_v49, %s34950_s27  ;;  %573 = vrot.lane.b32.xlu1 %v531_v53, %s27951_s26  ;;  %v988_v49 = vmul.f32 %v28329_v50, %v28095_v20 }
 0x124   :  { %v28439_v54 = vpop.permute.xlu0 %445  ;;  %v28441_v59 = vpop.permute.xlu1 %223 }
 0x125   :  { %35016 = vst [vmem:[#allocation15_spill] sm:$0xff] %v28441_v59 }
 0x126   :  { %799 = vrot.lane.b32.xlu0 %v760_v60, %s27953_s28  ;;  %685 = vrot.lane.b32.xlu1 %v645_v62, %s34950_s27  ;;  %v534_v62 = vmul.f32 %v28193_v57, %v28279_v27 }
 0x128   :  { %v28449_v63 = vpop.permute.xlu0 %555  ;;  %v28451_v3 = vpop.permute.xlu1 %335 }
 0x129   :  { %35017 = vst [vmem:[#allocation16_spill] sm:$0xff] %v28451_v3 }
 0x12a   :  { %911 = vrot.lane.b32.xlu0 %v874_v5, %s27954_s29  ;;  %797 = vrot.lane.b32.xlu1 %v759_v11, %s27953_s28  ;;  %v419_v5 = vmul.f32 %v28153_v43, %v28083_v12 }
 0x12c   :  { %v28459_v14 = vpop.permute.xlu0 %559  ;;  %v28461_v17 = vpop.permute.xlu1 %447 }
 0x12e   :  { %1021 = vrot.lane.b32.xlu0 %v987_v18, %s27955_s21  ;;  %909 = vrot.lane.b32.xlu1 %v873_v26, %s27954_s29  ;;  %v648_v26 = vmul.f32 %v28241_v10, %v28231_v6 }
 0x130   :  { %v28469_v22 = vpop.permute.xlu0 %225  ;;  %v28471_v30 = vpop.permute.xlu1 %557 }
 0x131   :  { %35018 = vst [vmem:[#allocation17_spill] sm:$0xff] %v28469_v22 }
 0x132   :  { %1017 = vrot.lane.b32.xlu0 %v985_v9, %s27955_s21  ;;  %1019 = vrot.lane.b32.xlu1 %v986_v38, %s27955_s21  ;;  %v533_v9 = vmul.f32 %v28193_v57, %v28262_v19 }
 0x134   :  { %v28479_v39 = vpop.permute.xlu0 %337  ;;  %v28481_v44 = vpop.permute.xlu1 %553 }
 0x135   :  { %35019 = vst [vmem:[#allocation18_spill] sm:$0xff] %v28479_v39 }
 0x136   :  { %467 = vrot.lane.b32.xlu0 %v420_v45, %s27950_s3  ;;  %1023 = vrot.lane.b32.xlu1 %v988_v49, %s27955_s21  ;;  %v762_v45 = vmul.f32 %v28295_v34, %v28189_v56  ;;  %v647_v49 = vmul.f32 %v28241_v10, %v28214_v0 }
 0x138   :  { %v28489_v53 = vpop.permute.xlu0 %449  ;;  %v28491_v60 = vpop.permute.xlu1 %227 }
 0x139   :  { %35020 = vst [vmem:[#allocation19_spill] sm:$0xff] %v28489_v53  ;;  %35021 = vst [vmem:[#allocation20_spill] sm:$0xff] %v28491_v60 }
 0x13a   :  { %579 = vrot.lane.b32.xlu0 %v534_v62, %s27951_s26  ;;  %465 = vrot.lane.b32.xlu1 %v419_v5, %s27950_s3 }
 0x13c   :  { %v28499_v11 = vpop.permute.xlu0 %561  ;;  %v28501_v18 = vpop.permute.xlu1 %339 }
 0x13d   :  { %35022 = vst [vmem:[#allocation21_spill] sm:$0xff] %v28501_v18 }
 0x13e   :  { %691 = vrot.lane.b32.xlu0 %v648_v26, %s34950_s27  ;;  %577 = vrot.lane.b32.xlu1 %v533_v9, %s27951_s26  ;;  %v876_v26 = vmul.f32 %v28319_v47, %v28159_v46  ;;  %v761_v9 = vmul.f32 %v28295_v34, %v28174_v51 }
 0x140   :  { %v28509_v38 = vpop.permute.xlu0 %671  ;;  %v28511_v43 = vpop.permute.xlu1 %451 }
 0x141   :  { %35023 = vst [vmem:[#allocation22_spill] sm:$0xff] %v28511_v43 }
 0x142   :  { %803 = vrot.lane.b32.xlu0 %v762_v45, %s27953_s28  ;;  %689 = vrot.lane.b32.xlu1 %v647_v49, %s34950_s27  ;;  %v990_v45 = vmul.f32 %v28329_v50, %v28135_v37  ;;  %v875_v49 = vmul.f32 %v28319_v47, %v28143_v40 }
 0x144   :  { %v28519_v62 = vpop.permute.xlu0 %675  ;;  %v28521_v5 = vpop.permute.xlu1 %563 }
 0x146   :  { %915 = vrot.lane.b32.xlu0 %v876_v26, %s27954_s29  ;;  %801 = vrot.lane.b32.xlu1 %v761_v9, %s27953_s28  ;;  %v536_v26 = vmul.f32 %v28193_v57, %v28086_v13  ;;  %v989_v9 = vmul.f32 %v28329_v50, %v28110_v28 }
 0x148   :  { %v28529_v18 = vpop.permute.xlu0 %229  ;;  %v28531_v60 = vpop.permute.xlu1 %673 }
 0x149   :  { %35024 = vst [vmem:[#allocation23_spill] sm:$0xff] %v28529_v18 }
 0x14a   :  { %1027 = vrot.lane.b32.xlu0 %v990_v45, %s27955_s21  ;;  %913 = vrot.lane.b32.xlu1 %v875_v49, %s27954_s29  ;;  %v650_v45 = vmul.f32 %v28241_v10, %v28279_v27  ;;  %v535_v49 = vmul.f32 %v28193_v57, %v28083_v12 }
 0x14c   :  { %v28539_v39 = vpop.permute.xlu0 %341  ;;  %v28541_v22 = vpop.permute.xlu1 %669 }
 0x14d   :  { %35025 = vst [vmem:[#allocation24_spill] sm:$0xff] %v28539_v39 }
 0x14e   :  { %583 = vrot.lane.b32.xlu0 %v536_v26, %s27951_s26  ;;  %1025 = vrot.lane.b32.xlu1 %v989_v9, %s27955_s21  ;;  %v764_v26 = vmul.f32 %v28295_v34, %v28231_v6  ;;  %v649_v9 = vmul.f32 %v28241_v10, %v28262_v19 }
 0x150   :  { %v28549_v18 = vpop.permute.xlu0 %453  ;;  %v28551_v59 = vpop.permute.xlu1 %231 }
 0x151   :  { %35026 = vst [vmem:[#allocation25_spill] sm:$0xff] %v28549_v18  ;;  %35027 = vst [vmem:[#allocation26_spill] sm:$0xff] %v28551_v59 }
 0x152   :  { %695 = vrot.lane.b32.xlu0 %v650_v45, %s34950_s27  ;;  %581 = vrot.lane.b32.xlu1 %v535_v49, %s27951_s26  ;;  %v878_v45 = vmul.f32 %v28319_v47, %v28189_v56  ;;  %v763_v49 = vmul.f32 %v28295_v34, %v28214_v0 }
 0x154   :  { %v28559_v39 = vpop.permute.xlu0 %565  ;;  %v28561_v41 = vpop.permute.xlu1 %343 }
 0x155   :  { %35028 = vst [vmem:[#allocation27_spill] sm:$0xff] %v28559_v39  ;;  %35029 = vst [vmem:[#allocation28_spill] sm:$0xff] %v28561_v41 }
 0x156   :  { %807 = vrot.lane.b32.xlu0 %v764_v26, %s27953_s28  ;;  %693 = vrot.lane.b32.xlu1 %v649_v9, %s34950_s27  ;;  %v992_v26 = vmul.f32 %v28329_v50, %v28159_v46  ;;  %v877_v9 = vmul.f32 %v28319_v47, %v28174_v51 }
 0x158   :  { %v28569_v59 = vpop.permute.xlu0 %677  ;;  %v28571_v57 = vpop.permute.xlu1 %455 }
 0x159   :  { %35030 = vst [vmem:[#allocation29_spill] sm:$0xff] %v28571_v57 }
 0x15a   :  { %919 = vrot.lane.b32.xlu0 %v878_v45, %s27954_s29  ;;  %805 = vrot.lane.b32.xlu1 %v763_v49, %s27953_s28  ;;  %v652_v45 = vmul.f32 %v28241_v10, %v28086_v13  ;;  %v991_v49 = vmul.f32 %v28329_v50, %v28143_v40 }
 0x15c   :  { %v28579_v41 = vpop.permute.xlu0 %787  ;;  %v28581_v18 = vpop.permute.xlu1 %567 }
 0x15d   :  { %35031 = vst [vmem:[#allocation30_spill] sm:$0xff] %v28581_v18 }
 0x15e   :  { %1031 = vrot.lane.b32.xlu0 %v992_v26, %s27955_s21  ;;  %917 = vrot.lane.b32.xlu1 %v877_v9, %s27954_s29  ;;  %v766_v26 = vmul.f32 %v28295_v34, %v28279_v27  ;;  %v651_v9 = vmul.f32 %v28241_v10, %v28083_v12 }
 0x160   :  { %v28589_v57 = vpop.permute.xlu0 %791  ;;  %v28591_v39 = vpop.permute.xlu1 %679 }
 0x162   :  { %699 = vrot.lane.b32.xlu0 %v652_v45, %s34950_s27  ;;  %1029 = vrot.lane.b32.xlu1 %v991_v49, %s27955_s21  ;;  %v880_v45 = vmul.f32 %v28319_v47, %v28231_v6  ;;  %v765_v49 = vmul.f32 %v28295_v34, %v28262_v19 }
 0x164   :  { %v28599_v46 = vpop.permute.xlu0 %233  ;;  %v28601_v18 = vpop.permute.xlu1 %789 }
 0x165   :  { %35032 = vst [vmem:[#allocation31_spill] sm:$0xff] %v28599_v46 }
 0x166   :  { %811 = vrot.lane.b32.xlu0 %v766_v26, %s27953_s28  ;;  %697 = vrot.lane.b32.xlu1 %v651_v9, %s34950_s27  ;;  %v994_v26 = vmul.f32 %v28329_v50, %v28189_v56  ;;  %v879_v9 = vmul.f32 %v28319_v47, %v28214_v0 }
 0x168   :  { %v28609_v43 = vpop.permute.xlu0 %345  ;;  %v28611_v53 = vpop.permute.xlu1 %785 }
 0x169   :  { %35033 = vst [vmem:[#allocation32_spill] sm:$0xff] %v28609_v43 }
 0x16a   :  { %923 = vrot.lane.b32.xlu0 %v880_v45, %s27954_s29  ;;  %809 = vrot.lane.b32.xlu1 %v765_v49, %s27953_s28  ;;  %v768_v45 = vmul.f32 %v28295_v34, %v28086_v13  ;;  %v993_v49 = vmul.f32 %v28329_v50, %v28174_v51  ;;  %v155_v51 = vmul.f32 %v28114_v29, %v28331_v52 }
 0x16b   :  { %v586_v29 = vsel %vm585_vm3, %v28481_v44, %v28449_v63 }
 0x16c   :  { %v28619_v46 = vpop.permute.xlu0 %457  ;;  %v28621_v10 = vpop.permute.xlu1 %235 }
 0x16d   :  { %35034 = vst [vmem:[#allocation33_spill] sm:$0xff] %v28619_v46  ;;  %35035 = vst [vmem:[#allocation34_spill] sm:$0xff] %v28621_v10 }
 0x16e   :  { %1035 = vrot.lane.b32.xlu0 %v994_v26, %s27955_s21  ;;  %921 = vrot.lane.b32.xlu1 %v879_v9, %s27954_s29  ;;  %v882_v26 = vmul.f32 %v28319_v47, %v28279_v27  ;;  %v767_v9 = vmul.f32 %v28295_v34, %v28083_v12 }
 0x170   :  { %v28629_v43 = vpop.permute.xlu0 %569  ;;  %v28631_v3 = vpop.permute.xlu1 %347 }
 0x171   :  { %35036 = vst [vmem:[#allocation35_spill] sm:$0xff] %v28629_v43  ;;  %35037 = vst [vmem:[#allocation36_spill] sm:$0xff] %v28631_v3 }
 0x172   :  { %815 = vrot.lane.b32.xlu0 %v768_v45, %s27953_s28  ;;  %1033 = vrot.lane.b32.xlu1 %v993_v49, %s27955_s21  ;;  %v996_v45 = vmul.f32 %v28329_v50, %v28231_v6  ;;  %v881_v49 = vmul.f32 %v28319_v47, %v28262_v19 }
 0x174   :  { %v28639_v10 = vpop.permute.xlu0 %681  ;;  %v28645_v46 = vpop.permute.xlu1 %459 }
 0x175   :  { %35038 = vst [vmem:[#allocation37_spill] sm:$0xff] %v28645_v46 }
 0x176   :  { %927 = vrot.lane.b32.xlu0 %v882_v26, %s27954_s29  ;;  %813 = vrot.lane.b32.xlu1 %v767_v9, %s27953_s28  ;;  %v884_v26 = vmul.f32 %v28319_v47, %v28086_v13  ;;  %v995_v9 = vmul.f32 %v28329_v50, %v28214_v0 }
 0x178   :  { %v28649_v3 = vpop.permute.xlu0 %793  ;;  %v28657_v43 = vpop.permute.xlu1 %571 }
 0x179   :  { %35039 = vst [vmem:[#allocation38_spill] sm:$0xff] %v28657_v43 }
 0x17a   :  { %1039 = vrot.lane.b32.xlu0 %v996_v45, %s27955_s21  ;;  %925 = vrot.lane.b32.xlu1 %v881_v49, %s27954_s29  ;;  %v998_v45 = vmul.f32 %v28329_v50, %v28279_v27  ;;  %v883_v49 = vmul.f32 %v28319_v47, %v28083_v12 }
 0x17c   :  { %v28659_v34 = vpop.permute.xlu0 %903  ;;  %v28673_v43 = vpop.permute.xlu1 %683 }
 0x17e   :  { %931 = vrot.lane.b32.xlu0 %v884_v26, %s27954_s29  ;;  %1037 = vrot.lane.b32.xlu1 %v995_v9, %s27955_s21  ;;  %v1000_v26 = vmul.f32 %v28329_v50, %v28086_v13  ;;  %v997_v9 = vmul.f32 %v28329_v50, %v28262_v19 }
 0x180   :  { %v28667_v46 = vpop.permute.xlu0 %907  ;;  %v28685_v27 = vpop.permute.xlu1 %795 }
 0x182   :  { %1043 = vrot.lane.b32.xlu0 %v998_v45, %s27955_s21  ;;  %929 = vrot.lane.b32.xlu1 %v883_v49, %s27954_s29  ;;  %v999_v45 = vmul.f32 %v28329_v50, %v28083_v12 }
 0x184   :  { %v28677_v6 = vpop.permute.xlu0 %901  ;;  %v28694_v0 = vpop.permute.xlu1 %905 }
 0x186   :  { %1047 = vrot.lane.b32.xlu0 %v1000_v26, %s27955_s21  ;;  %1041 = vrot.lane.b32.xlu1 %v997_v9, %s27955_s21 }
 0x188   :  { %v28687_v47 = vpop.permute.xlu0 %351 }
 0x189   :  { %35040 = vst [vmem:[#allocation39_spill] sm:$0xff] %v28687_v47 }
 0x18a   :  { %1045 = vrot.lane.b32.xlu1 %v999_v45, %s27955_s21  ;;  %v154_v45 = vmul.f32 %v28097_v21, %v28331_v52  ;;  %v354_v21 = vsel %vm353_vm1, %v28391_v25, %v28359_v1 }
 0x18c   :  { %v28692_v49 = vpop.permute.xlu0 %463 }
 0x18d   :  { %35041 = vst [vmem:[#allocation40_spill] sm:$0xff] %v28692_v49  ;;  %v153_v49 = vmul.f32 %v28124_v33, %v28331_v52 }
 0x190   :  { %v28696_v13 = vpop.permute.xlu0 %575 }
 0x191   :  { %35042 = vst [vmem:[#allocation41_spill] sm:$0xff] %v28696_v13  ;;  %v28698_v19 = vpop.permute.xlu1 %1100 }
 0x194   :  { %v28700_v26 = vpop.permute.xlu0 %687 }
 0x195   :  { %35043 = vst [vmem:[#allocation42_spill] sm:$0xff] %v28700_v26  ;;  %v28702_v9 = vpop.permute.xlu1 %349  ;;  %v355_v26 = vsel %vm353_vm1, %v28359_v1, %v28381_v16  ;;  %v240_v1 = vsel %vm237_vm0, %v28351_v24, %v28339_v55 }
 0x196   :  { %35044 = vst [vmem:[#allocation43_spill] sm:$0xff] %v28702_v9  ;;  %v239_v9 = vsel %vm237_vm0, %v28341_v58, %v28351_v24 }
 0x197   :  { %v270_v12 = vadd.f32 %v239_v9, %v154_v45 }
 0x198   :  { %v28704_v56 = vpop.permute.xlu0 %799 }
 0x199   :  { %35045 = vst [vmem:[#allocation44_spill] sm:$0xff] %v28704_v56  ;;  %v28706_v47 = vpop.permute.xlu1 %461  ;;  %v386_v25 = vadd.f32 %v355_v26, %v270_v12  ;;  %v271_v12 = vadd.f32 %v240_v1, %v155_v51  ;;  %v702_v26 = vsel %vm701_vm4, %v28541_v22, %v28509_v38  ;;  %v819_v51 = vsel %vm817_vm5, %v28579_v41, %v28601_v18 }
 0x19a   :  { %35046 = vst [vmem:[#allocation45_spill] sm:$0xff] %v28706_v47  ;;  %v238_v47 = vsel %vm237_vm0, %v28361_v2, %v28341_v58  ;;  %v471_v58 = vsel %vm469_vm2, %v28402_v31, %v28421_v42  ;;  %v470_v2 = vsel %vm469_vm2, %v28431_v32, %v28402_v31  ;;  %v356_v31 = vsel %vm353_vm1, %v28381_v16, %v28369_v7 }
 0x19b   :  { %v502_v32 = vadd.f32 %v471_v58, %v386_v25  ;;  %v818_v58 = vsel %vm817_vm5, %v28611_v53, %v28579_v41  ;;  %v588_v22 = vsel %vm585_vm3, %v28471_v30, %v28459_v14  ;;  %v704_v41 = vsel %vm701_vm4, %v28531_v60, %v28519_v62 }
 0x19c   :  { %v28708_v50 = vpop.permute.xlu0 %911 }
 0x19d   :  { %v28714_v13 = vpop.permute.xlu1 %573 }
 0x19e   :  { %35047 = vst [vmem:[#allocation46_spill] sm:$0xff] %v28714_v13  ;;  %v269_v13 = vadd.f32 %v238_v47, %v153_v49  ;;  %v587_v49 = vsel %vm585_vm3, %v28449_v63, %v28471_v30  ;;  %v472_v63 = vsel %vm469_vm2, %v28421_v42, %v28409_v35 }
 0x19f   :  { %v618_v44 = vadd.f32 %v587_v49, %v502_v32  ;;  %v935_v49 = vsel %vm933_vm6, %v28659_v34, %v28694_v0  ;;  %v820_v32 = vsel %vm817_vm5, %v28601_v18, %v28589_v57 }
 0x1a0   :  { %v1022_v33 = vpop.permute.xlu0 %1021  ;;  %v385_v47 = vadd.f32 %v354_v21, %v269_v13  ;;  %v703_v13 = vsel %vm701_vm4, %v28509_v38, %v28531_v60  ;;  %v387_v21 = vadd.f32 %v356_v31, %v271_v12  ;;  %v936_v60 = vsel %vm933_vm6, %v28694_v0, %v28667_v46 }
 0x1a1   :  { %v28728_v56 = vpop.permute.xlu1 %685  ;;  %v734_v38 = vadd.f32 %v703_v13, %v618_v44 }
 0x1a2   :  { %v501_v45 = vadd.f32 %v470_v2, %v385_v47  ;;  %v503_v25 = vadd.f32 %v472_v63, %v387_v21  ;;  %v934_v47 = vsel %vm933_vm6, %v28677_v6, %v28659_v34 }
 0x1a3   :  { %v850_v53 = vadd.f32 %v819_v51, %v734_v38 }
 0x1a4   :  { %v1018_v9 = vpop.permute.xlu0 %1017  ;;  %v617_v16 = vadd.f32 %v586_v29, %v501_v45  ;;  %v619_v30 = vadd.f32 %v588_v22, %v503_v25 }
 0x1a5   :  { %v28750_v24 = vpop.permute.xlu1 %797  ;;  %v966_v6 = vadd.f32 %v935_v49, %v850_v53 }
 0x1a6   :  { %v733_v42 = vadd.f32 %v702_v26, %v617_v16  ;;  %v735_v13 = vadd.f32 %v704_v41, %v619_v30  ;;  %v157_v30 = vmul.f32 %v28110_v28, %v28331_v52  ;;  %v358_v28 = vsel %vm353_vm1, %v28389_v23, %v28411_v36 }
 0x1a8   :  { %v28767_v2 = vpop.permute.xlu0 %467  ;;  %v849_v29 = vadd.f32 %v818_v58, %v733_v42  ;;  %v851_v16 = vadd.f32 %v820_v32, %v735_v13 }
 0x1a9   :  { %v28772_v1 = vpop.permute.xlu1 %909 }
 0x1aa   :  { %v965_v45 = vadd.f32 %v934_v47, %v849_v29  ;;  %v967_v22 = vadd.f32 %v936_v60, %v851_v16  ;;  %v473_v60 = vsel %vm469_vm2, %v28409_v35, %v28439_v54  ;;  %v590_v16 = vsel %vm585_vm3, %v28499_v11, %v28521_v5 }
 0x1ab   :  { %v705_v35 = vsel %vm701_vm4, %v28519_v62, %v28569_v59  ;;  %v938_v62 = vsel %vm933_vm6, %v28772_v1, %v28708_v50 }
 0x1ac   :  { %v28783_v31 = vpop.permute.xlu0 %579 }
 0x1ad   :  { %v1020_v12 = vpop.permute.xlu1 %1019 }
 0x1ae   :  { %v1050_v34 = vsel %vm1049_vm7, %v1018_v9, %v1020_v12  ;;  %v1051_v26 = vsel %vm1049_vm7, %v1020_v12, %v1022_v33  ;;  %v242_v12 = vsel %vm237_vm0, %v28349_v61, %v28371_v8 }
 0x1af   :  { %v1081_v63 = vadd.f32 %v1050_v34, %v965_v45  ;;  %v1082_v44 = vadd.f32 %v1051_v26, %v966_v6  ;;  %v241_v6 = vsel %vm237_vm0, %v28339_v55, %v28349_v61  ;;  %v273_v61 = vadd.f32 %v242_v12, %v157_v30 }
 0x1b0   :  { %v28793_v21 = vpop.permute.xlu0 %691 }
 0x1b1   :  { %v1103_v51 = vadd.f32 %v28698_v19, %v1081_v63  ;;  %v1104_v18 = vadd.f32 %v28698_v19, %v1082_v44  ;;  %v1024_v58 = vpop.permute.xlu1 %1023  ;;  %v474_v63 = vsel %vm469_vm2, %v28439_v54, %v28461_v17  ;;  %v706_v54 = vsel %vm701_vm4, %v28569_v59, %v28591_v39 }
 0x1b2   :  { %v1052_v38 = vsel %vm1049_vm7, %v1022_v33, %v1024_v58  ;;  %v156_v33 = vmul.f32 %v28095_v20, %v28331_v52  ;;  %v357_v20 = vsel %vm353_vm1, %v28369_v7, %v28389_v23  ;;  %v389_v7 = vadd.f32 %v358_v28, %v273_v61 }
 0x1b3   :  { %vm1120_vm8 = vcmp.gt.f32.partialorder %v1104_v18, 0.0  ;;  %v1136_v9 = vmul.f32 0.01, %v1104_v18  ;;  %v1083_v42 = vadd.f32 %v1052_v38, %v967_v22  ;;  %v1135_v47 = vmul.f32 0.01, %v1103_v51 }
 0x1b4   :  { %v28798_v25 = vpop.permute.xlu0 %803  ;;  %vm1119_vm9 = vcmp.gt.f32.partialorder %v1103_v51, 0.0  ;;  %v272_v34 = vadd.f32 %v241_v6, %v156_v33  ;;  %v589_v23 = vsel %vm585_vm3, %v28459_v14, %v28499_v11  ;;  %v505_v22 = vadd.f32 %v474_v63, %v389_v7 }
 0x1b5   :  { %v28800_v0 = vsel %vm1120_vm8, %v1104_v18, %v1136_v9  ;;  %v28802_v49 = vpop.permute.xlu1 %465  ;;  %v1105_v41 = vadd.f32 %v28698_v19, %v1083_v42  ;;  %v28813_v32 = vsel %vm1119_vm9, %v1103_v51, %v1135_v47  ;;  %v821_v11 = vsel %vm817_vm5, %v28589_v57, %v28649_v3 }
 0x1b6   :  { %1190 = vrot.lane.b32.xlu1 %v28800_v0, %s27948_s24  ;;  %v388_v44 = vadd.f32 %v357_v20, %v272_v34  ;;  %v621_v14 = vadd.f32 %v590_v16, %v505_v22  ;;  %v822_v42 = vsel %vm817_vm5, %v28649_v3, %v28685_v27  ;;  %v937_v59 = vsel %vm933_vm6, %v28667_v46, %v28772_v1 }
 0x1b7   :  { %vm1121_vm10 = vcmp.gt.f32.partialorder %v1105_v41, 0.0  ;;  %v1137_v53 = vmul.f32 0.01, %v1105_v41  ;;  %v158_v7 = vmul.f32 %v28135_v37, %v28331_v52  ;;  %v244_v16 = vsel %vm237_vm0, %v28379_v15, %v28404_v4  ;;  %v35049_v37 = vld [vmem:[#allocation16_spill] sm:$0xff] }
 0x1b8   :  { %v28807_v29 = vpop.permute.xlu0 %915  ;;  %v504_v18 = vadd.f32 %v473_v60, %v388_v44 }
 0x1b9   :  { %v28815_v45 = vpop.permute.xlu1 %577  ;;  %v28823_v13 = vsel %vm1121_vm10, %v1105_v41, %v1137_v53  ;;  %v737_v53 = vadd.f32 %v706_v54, %v621_v14  ;;  %v360_v54 = vsel %vm353_vm1, %v28429_v48, %v35049_v37 }
 0x1ba   :  { %35048 = vst [vmem:[#allocation47_spill] sm:$0xff] %v28823_v13  ;;  %1188 = vrot.lane.b32.xlu1 %v28813_v32, %s27948_s24  ;;  %1192 = vrot.lane.b32.xlu0 %v28823_v13, %s27948_s24  ;;  %v620_v9 = vadd.f32 %v589_v23, %v504_v18  ;;  %v159_v23 = vmul.f32 %v28143_v40, %v28331_v52 }
 0x1bb   :  { %v853_v57 = vadd.f32 %v822_v42, %v737_v53  ;;  %v35052_v42 = vld [vmem:[#allocation19_spill] sm:$0xff]  ;;  %v35053_v53 = vld [vmem:[#allocation22_spill] sm:$0xff] }
 0x1bc   :  { %v28835_v55 = vpop.permute.xlu0 %1027  ;;  %v736_v41 = vadd.f32 %v705_v35, %v620_v9  ;;  %v359_v35 = vsel %vm353_vm1, %v28411_v36, %v28429_v48  ;;  %v275_v40 = vadd.f32 %v244_v16, %v159_v23  ;;  %v476_v36 = vsel %vm469_vm2, %v35052_v42, %v35053_v53  ;;  %v35060_v16 = vld [vmem:[#allocation9_spill] sm:$0xff] }
 0x1bd   :  { %v28837_v26 = vpop.permute.xlu1 %689  ;;  %v969_v3 = vadd.f32 %v938_v62, %v853_v57  ;;  %v28925_v62 = vld [vmem:[%s35054_s2] sm:$0xf]  ;;  %v35057_v57 = vld [vmem:[#allocation30_spill] sm:$0xff] }
 0x1be   :  { %v852_v30 = vadd.f32 %v821_v11, %v736_v41  ;;  %v475_v41 = vsel %vm469_vm2, %v28461_v17, %v35052_v42  ;;  %35055 = vst [vmem:[#allocation19_spill] sm:$0xff] %v28925_v62 }
 0x1c0   :  { %v28851_v51 = vpop.permute.xlu0 %583  ;;  %v968_v12 = vadd.f32 %v937_v59, %v852_v30  ;;  %v391_v59 = vadd.f32 %v360_v54, %v275_v40  ;;  %v35056_v30 = vld [vmem:[#allocation27_spill] sm:$0xff]  ;;  %v35063_v40 = vld [vmem:[#allocation14_spill] sm:$0xff] }
 0x1c1   :  { %v28853_v38 = vpop.permute.xlu1 %801  ;;  %v591_v17 = vsel %vm585_vm3, %v28521_v5, %v35056_v30  ;;  %v35058_v5 = vld [vmem:[#allocation7_spill] sm:$0xff]  ;;  %v245_v42 = vsel %vm237_vm0, %v28404_v4, %v35063_v40 }
 0x1c2   :  { %v35065_v4 = vld [vmem:[#allocation15_spill] sm:$0xff] }
 0x1c4   :  { %v28867_v47 = vpop.permute.xlu0 %695 }
 0x1c5   :  { %v28869_v33 = vpop.permute.xlu1 %913 }
 0x1c8   :  { %v28877_v6 = vpop.permute.xlu0 %807 }
 0x1c9   :  { %v1026_v20 = vpop.permute.xlu1 %1025 }
 0x1ca   :  { %v1053_v28 = vsel %vm1049_vm7, %v1024_v58, %v1026_v20  ;;  %v1054_v34 = vsel %vm1049_vm7, %v1026_v20, %v28835_v55  ;;  %v243_v58 = vsel %vm237_vm0, %v28371_v8, %v28379_v15 }
 0x1cb   :  { %v1084_v61 = vadd.f32 %v1053_v28, %v968_v12  ;;  %v1085_v60 = vadd.f32 %v1054_v34, %v969_v3  ;;  %v274_v9 = vadd.f32 %v243_v58, %v158_v7  ;;  %v592_v12 = vsel %vm585_vm3, %v35056_v30, %v35057_v57 }
 0x1cc   :  { %v28882_v63 = vpop.permute.xlu0 %919  ;;  %v507_v28 = vadd.f32 %v476_v36, %v391_v59  ;;  %v35064_v59 = vld [vmem:[#allocation11_spill] sm:$0xff] }
 0x1cd   :  { %v1106_v46 = vadd.f32 %v28698_v19, %v1084_v61  ;;  %v1107_v1 = vadd.f32 %v28698_v19, %v1085_v60  ;;  %v28886_v44 = vpop.permute.xlu1 %581  ;;  %v390_v48 = vadd.f32 %v359_v35, %v274_v9  ;;  %v707_v61 = vsel %vm701_vm4, %v28591_v39, %v28639_v10  ;;  %v35061_v39 = vld [vmem:[#allocation10_spill] sm:$0xff]  ;;  %v35062_v35 = vld [vmem:[#allocation44_spill] sm:$0xff] }
 0x1ce   :  { %v708_v60 = vsel %vm701_vm4, %v28639_v10, %v28673_v43  ;;  %v623_v23 = vadd.f32 %v592_v12, %v507_v28  ;;  %v823_v10 = vsel %vm817_vm5, %v28685_v27, %v28750_v24  ;;  %v824_v54 = vsel %vm817_vm5, %v28750_v24, %v35062_v35 }
 0x1cf   :  { %vm1122_vm11 = vcmp.gt.f32.partialorder %v1106_v46, 0.0  ;;  %vm1123_vm12 = vcmp.gt.f32.partialorder %v1107_v1, 0.0  ;;  %v1138_v18 = vmul.f32 0.01, %v1106_v46  ;;  %v1139_v22 = vmul.f32 0.01, %v1107_v1 }
 0x1d0   :  { %v28904_v8 = vpop.permute.xlu0 %1031  ;;  %v506_v20 = vadd.f32 %v475_v41, %v390_v48  ;;  %v739_v36 = vadd.f32 %v708_v60, %v623_v23  ;;  %v164_v30 = vmul.f32 %v35064_v59, %v28331_v52  ;;  %v939_v27 = vsel %vm933_vm6, %v28708_v50, %v28869_v33  ;;  %v35067_v50 = vld [vmem:[#allocation17_spill] sm:$0xff] }
 0x1d1   :  { %v28906_v14 = vsel %vm1122_vm11, %v1106_v46, %v1138_v18  ;;  %v28908_v11 = vsel %vm1123_vm12, %v1107_v1, %v1139_v22  ;;  %v28910_v15 = vpop.permute.xlu1 %693  ;;  %v160_v46 = vmul.f32 %v35058_v5, %v28331_v52  ;;  %v35059_v1 = vld [vmem:[#allocation8_spill] sm:$0xff]  ;;  %v162_v18 = vmul.f32 %v35060_v16, %v28331_v52  ;;  %v35069_v23 = vld [vmem:[#allocation5_spill] sm:$0xff] }
 0x1d2   :  { %35050 = vst [vmem:[#allocation16_spill] sm:$0xff] %v28906_v14  ;;  %35051 = vst [vmem:[#allocation48_spill] sm:$0xff] %v28908_v11  ;;  %1194 = vrot.lane.b32.xlu0 %v28906_v14, %s27948_s24  ;;  %1196 = vrot.lane.b32.xlu1 %v28908_v11, %s27948_s24  ;;  %v161_v7 = vmul.f32 %v35059_v1, %v28331_v52  ;;  %v622_v58 = vadd.f32 %v591_v17, %v506_v20  ;;  %v34936_v17 = vmov 0.0   ;;  %v35066_v20 = vld [vmem:[#allocation12_spill] sm:$0xff] }
 0x1d3   :  { %v163_v22 = vmul.f32 %v35061_v39, %v28331_v52  ;;  %v940_v24 = vsel %vm933_vm6, %v28869_v33, %v28807_v29  ;;  %1335 = vmatprep.mubr.f32.mxu0 %v34936_v17  ;;  %1406 = vmatprep.mubr.f32.mxu1 %v34936_v17  ;;  %v246_v12 = vsel %vm237_vm0, %v35063_v40, %v35065_v4  ;;  %v35068_v33 = vld [vmem:[#allocation13_spill] sm:$0xff]  ;;  %v35070_v40 = vld [vmem:[#allocation18_spill] sm:$0xff]  ;;  %v35073_v17 = vld [vmem:[#allocation23_spill] sm:$0xff] }
 0x1d4   :  { %v28933_v3 = vpop.permute.xlu0 %699  ;;  %v738_v41 = vadd.f32 %v707_v61, %v622_v58  ;;  %v165_v28 = vmul.f32 %v35066_v20, %v28331_v52  ;;  %v855_v60 = vadd.f32 %v824_v54, %v739_v36  ;;  %v276_v5 = vadd.f32 %v245_v42, %v160_v46 }
 0x1d5   :  { %v28935_v34 = vpop.permute.xlu1 %805  ;;  %v247_v1 = vsel %vm237_vm0, %v35065_v4, %v35067_v50  ;;  %v166_v58 = vmul.f32 %v35068_v33, %v28331_v52  ;;  %v28988_v16 = vmul.f32 %v35069_v23, %v28331_v52  ;;  %v361_v59 = vsel %vm353_vm1, %v35049_v37, %v35070_v40  ;;  %v35072_v4 = vld [vmem:[#allocation21_spill] sm:$0xff] }
 0x1d6   :  { %1170 = vrot.lane.b32.xlu0 %v28925_v62, %s27956_s23  ;;  %v854_v61 = vadd.f32 %v823_v10, %v738_v41  ;;  %v35071_v10 = vld [vmem:[#allocation20_spill] sm:$0xff]  ;;  %v971_v42 = vadd.f32 %v940_v24, %v855_v60  ;;  %v277_v36 = vadd.f32 %v246_v12, %v161_v7  ;;  %v362_v20 = vsel %vm353_vm1, %v35070_v40, %v35072_v4 }
 0x1d7   :  { %v248_v46 = vsel %vm237_vm0, %v35067_v50, %v35071_v10  ;;  %v249_v37 = vsel %vm237_vm0, %v35071_v10, %v35073_v17  ;;  %v35074_v62 = vld [vmem:[#allocation24_spill] sm:$0xff]  ;;  %v278_v12 = vadd.f32 %v247_v1, %v162_v18  ;;  %v35075_v50 = vld [vmem:[#allocation6_spill] sm:$0xff] }
 0x1d8   :  { %v28959_v9 = vpop.permute.xlu0 %811  ;;  %v970_v54 = vadd.f32 %v939_v27, %v854_v61  ;;  %v363_v27 = vsel %vm353_vm1, %v35072_v4, %v35074_v62  ;;  %v392_v61 = vadd.f32 %v361_v59, %v276_v5  ;;  %v279_v60 = vadd.f32 %v248_v46, %v163_v22  ;;  %v35077_v5 = vld [vmem:[#allocation26_spill] sm:$0xff] }
 0x1d9   :  { %v28964_v48 = vpop.permute.xlu1 %917  ;;  %v168_v40 = vmul.f32 %v35075_v50, %v28331_v52  ;;  %v393_v14 = vadd.f32 %v362_v20, %v277_v36  ;;  %v394_v18 = vadd.f32 %v363_v27, %v278_v12  ;;  %v250_v22 = vsel %vm237_vm0, %v35073_v17, %v35077_v5  ;;  %v35078_v52 = vld [vmem:[#allocation29_spill] sm:$0xff]  ;;  %v35080_v20 = vld [vmem:[#allocation35_spill] sm:$0xff] }
 0x1da   :  { %v35083_v12 = vld [vmem:[#allocation31_spill] sm:$0xff] }
 0x1dc   :  { %v28990_v39 = vpop.permute.xlu0 %923 }
 0x1dd   :  { %v1030_v41 = vpop.permute.xlu1 %1029 }
 0x1de   :  { %v1055_v33 = vsel %vm1049_vm7, %v28835_v55, %v1030_v41  ;;  %v1056_v23 = vsel %vm1049_vm7, %v1030_v41, %v28904_v8  ;;  %v35076_v41 = vld [vmem:[#allocation25_spill] sm:$0xff] }
 0x1df   :  { %v1086_v24 = vadd.f32 %v1055_v33, %v970_v54  ;;  %v1087_v7 = vadd.f32 %v1056_v23, %v971_v42  ;;  %v477_v11 = vsel %vm469_vm2, %v35053_v53, %v35076_v41  ;;  %v280_v54 = vadd.f32 %v249_v37, %v164_v30  ;;  %v35079_v42 = vld [vmem:[#allocation28_spill] sm:$0xff]  ;;  %v35081_v33 = vld [vmem:[#allocation38_spill] sm:$0xff] }
 0x1e0   :  { %v29013_v55 = vpop.permute.xlu0 %1035  ;;  %v478_v1 = vsel %vm469_vm2, %v35076_v41, %v35078_v52  ;;  %v508_v46 = vadd.f32 %v477_v11, %v392_v61  ;;  %v364_v36 = vsel %vm353_vm1, %v35074_v62, %v35079_v42  ;;  %v593_v30 = vsel %vm585_vm3, %v35057_v57, %v35080_v20  ;;  %v35084_v61 = vld [vmem:[#allocation42_spill] sm:$0xff] }
 0x1e1   :  { %v1108_v10 = vadd.f32 %v28698_v19, %v1086_v24  ;;  %v1109_v13 = vadd.f32 %v28698_v19, %v1087_v7  ;;  %v29020_v4 = vpop.permute.xlu1 %697  ;;  %v594_v17 = vsel %vm585_vm3, %v35080_v20, %v35081_v33  ;;  %v281_v37 = vadd.f32 %v250_v22, %v165_v28  ;;  %v35087_v22 = vld [vmem:[#allocation34_spill] sm:$0xff] }
 0x1e2   :  { %v509_v27 = vadd.f32 %v478_v1, %v393_v14  ;;  %v251_v62 = vsel %vm237_vm0, %v35077_v5, %v35083_v12  ;;  %v709_v57 = vsel %vm701_vm4, %v28673_v43, %v28728_v56  ;;  %v710_v50 = vsel %vm701_vm4, %v28728_v56, %v35084_v61  ;;  %v35085_v14 = vld [vmem:[#allocation32_spill] sm:$0xff]  ;;  %v35086_v5 = vld [vmem:[#allocation33_spill] sm:$0xff] }
 0x1e3   :  { %vm1124_vm13 = vcmp.gt.f32.partialorder %v1108_v10, 0.0  ;;  %vm1125_vm14 = vcmp.gt.f32.partialorder %v1109_v13, 0.0  ;;  %v1140_v59 = vmul.f32 0.01, %v1108_v10  ;;  %v1141_v53 = vmul.f32 0.01, %v1109_v13 }
 0x1e4   :  { %v29037_v23 = vpop.permute.xlu0 %815  ;;  %v365_v28 = vsel %vm353_vm1, %v35079_v42, %v35085_v14  ;;  %v624_v41 = vadd.f32 %v593_v30, %v508_v46  ;;  %v479_v43 = vsel %vm469_vm2, %v35078_v52, %v35086_v5  ;;  %v252_v56 = vsel %vm237_vm0, %v35083_v12, %v35087_v22 }
 0x1e5   :  { %v29039_v24 = vsel %vm1124_vm13, %v1108_v10, %v1140_v59  ;;  %v29041_v7 = vsel %vm1125_vm14, %v1109_v13, %v1141_v53  ;;  %v29043_v11 = vpop.permute.xlu1 %809  ;;  %v395_v13 = vadd.f32 %v364_v36, %v279_v60  ;;  %v625_v10 = vadd.f32 %v594_v17, %v509_v27  ;;  %v35088_v53 = vld [vmem:[#allocation36_spill] sm:$0xff] }
 0x1e6   :  { %35082 = vst [vmem:[#allocation22_spill] sm:$0xff] %v29041_v7  ;;  %1200 = vrot.lane.b32.xlu0 %v29041_v7, %s27948_s24  ;;  %1198 = vrot.lane.b32.xlu1 %v29039_v24, %s27948_s24  ;;  %v825_v1 = vsel %vm817_vm5, %v35062_v35, %v28853_v38  ;;  %v826_v60 = vsel %vm817_vm5, %v28853_v38, %v28798_v25 }
 0x1e7   :  { %v282_v59 = vadd.f32 %v251_v62, %v166_v58  ;;  %v366_v46 = vsel %vm353_vm1, %v35085_v14, %v35088_v53  ;;  %v740_v42 = vadd.f32 %v709_v57, %v624_v41  ;;  %v741_v36 = vadd.f32 %v710_v50, %v625_v10  ;;  %v35089_v50 = vld [vmem:[#allocation37_spill] sm:$0xff]  ;;  %v35091_v14 = vld [vmem:[#allocation39_spill] sm:$0xff] }
 0x1e8   :  { %v396_v20 = vadd.f32 %v365_v28, %v280_v54  ;;  %v284_v30 = vadd.f32 %v35087_v22, %v168_v40  ;;  %v941_v17 = vsel %vm933_vm6, %v28807_v29, %v28964_v48  ;;  %v942_v35 = vsel %vm933_vm6, %v28964_v48, %v28882_v63  ;;  %v29083_v38 = vpop.permute.xlu0 %927  ;;  %v35090_v54 = vld [vmem:[#allocation43_spill] sm:$0xff]  ;;  %v35092_v28 = vld [vmem:[#allocation45_spill] sm:$0xff] }
 0x1e9   :  { %v922_v52 = vpop.permute.xlu1 %921  ;;  %v510_v58 = vadd.f32 %v479_v43, %v394_v18  ;;  %v283_v27 = vadd.f32 %v252_v56, %v28988_v16  ;;  %v856_v12 = vadd.f32 %v825_v1, %v740_v42  ;;  %v857_v62 = vadd.f32 %v826_v60, %v741_v36  ;;  %v35093_v16 = vld [vmem:[#allocation40_spill] sm:$0xff]  ;;  %v35095_v56 = vld [vmem:[#allocation41_spill] sm:$0xff] }
 0x1ea   :  { %v397_v57 = vadd.f32 %v366_v46, %v281_v37  ;;  %v480_v40 = vsel %vm469_vm2, %v35086_v5, %v35089_v50  ;;  %v367_v29 = vsel %vm353_vm1, %v35088_v53, %v35090_v54  ;;  %v368_v48 = vsel %vm353_vm1, %v35090_v54, %v35091_v14  ;;  %v35094_v5 = vld [vmem:[#allocation46_spill] sm:$0xff] }
 0x1eb   :  { %v481_v18 = vsel %vm469_vm2, %v35089_v50, %v35092_v28  ;;  %v482_v37 = vsel %vm469_vm2, %v35092_v28, %v35093_v16  ;;  %v972_v41 = vadd.f32 %v941_v17, %v856_v12  ;;  %v973_v10 = vadd.f32 %v942_v35, %v857_v62 }
 0x1ec   :  { %v595_v22 = vsel %vm585_vm3, %v35081_v33, %v35094_v5  ;;  %v596_v1 = vsel %vm585_vm3, %v35094_v5, %v35095_v56  ;;  %v511_v46 = vadd.f32 %v480_v40, %v395_v13  ;;  %v400_v42 = vadd.f32 %v35091_v14, %v284_v30  ;;  %v29112_v33 = vpop.permute.xlu0 %1039 }
 0x1ed   :  { %v1034_v43 = vpop.permute.xlu1 %1033  ;;  %v398_v35 = vadd.f32 %v367_v29, %v282_v59  ;;  %v399_v12 = vadd.f32 %v368_v48, %v283_v27  ;;  %v512_v62 = vadd.f32 %v481_v18, %v396_v20  ;;  %v513_v50 = vadd.f32 %v482_v37, %v397_v57 }
 0x1ee   :  { %v1057_v60 = vsel %vm1049_vm7, %v28904_v8, %v1034_v43  ;;  %v1058_v53 = vsel %vm1049_vm7, %v1034_v43, %v29013_v55  ;;  %v626_v54 = vadd.f32 %v595_v22, %v510_v58  ;;  %v627_v28 = vadd.f32 %v596_v1, %v511_v46 }
 0x1ef   :  { %v1088_v36 = vadd.f32 %v1057_v60, %v972_v41  ;;  %v1089_v17 = vadd.f32 %v1058_v53, %v973_v10  ;;  %v483_v13 = vsel %vm469_vm2, %v35093_v16, %v28802_v49  ;;  %v484_v59 = vsel %vm469_vm2, %v28802_v49, %v28767_v2 }
 0x1f0   :  { %v711_v20 = vsel %vm701_vm4, %v35084_v61, %v28837_v26  ;;  %v712_v30 = vsel %vm701_vm4, %v28837_v26, %v28793_v21  ;;  %v597_v57 = vsel %vm585_vm3, %v35095_v56, %v28815_v45  ;;  %v598_v49 = vsel %vm585_vm3, %v28815_v45, %v28783_v31 }
 0x1f1   :  { %v1110_v5 = vadd.f32 %v28698_v19, %v1088_v36  ;;  %v1111_v8 = vadd.f32 %v28698_v19, %v1089_v17  ;;  %v29116_v7 = vpop.permute.xlu1 %813  ;;  %v827_v61 = vsel %vm817_vm5, %v28798_v25, %v28935_v34  ;;  %v828_v26 = vsel %vm817_vm5, %v28935_v34, %v28877_v6  ;;  %v932_v25 = vpop.permute.xlu0 %931 }
 0x1f2   :  { %v742_v40 = vadd.f32 %v711_v20, %v626_v54  ;;  %v743_v29 = vadd.f32 %v712_v30, %v627_v28  ;;  %v516_v16 = vadd.f32 %v28767_v2, %v400_v42  ;;  %v943_v45 = vsel %vm933_vm6, %v28882_v63, %v922_v52 }
 0x1f3   :  { %vm1126_vm15 = vcmp.gt.f32.partialorder %v1110_v5, 0.0  ;;  %vm1127_vm8 = vcmp.gt.f32.partialorder %v1111_v8, 0.0  ;;  %v1142_v58 = vmul.f32 0.01, %v1110_v5  ;;  %v1143_v27 = vmul.f32 0.01, %v1111_v8 }
 0x1f4   :  { %v944_v37 = vsel %vm933_vm6, %v922_v52, %v28990_v39  ;;  %v514_v34 = vadd.f32 %v483_v13, %v398_v35  ;;  %v599_v41 = vsel %vm585_vm3, %v28783_v31, %v28886_v44  ;;  %v858_v10 = vadd.f32 %v827_v61, %v742_v40 }
 0x1f5   :  { %v29142_v14 = vsel %vm1126_vm15, %v1110_v5, %v1142_v58  ;;  %v29144_v48 = vsel %vm1127_vm8, %v1111_v8, %v1143_v27  ;;  %v926_v18 = vpop.permute.xlu1 %925  ;;  %v859_v2 = vadd.f32 %v828_v26, %v743_v29  ;;  %v515_v43 = vadd.f32 %v484_v59, %v399_v12 }
 0x1f6   :  { %1204 = vrot.lane.b32.xlu0 %v29144_v48, %s27948_s24  ;;  %1202 = vrot.lane.b32.xlu1 %v29142_v14, %s27948_s24  ;;  %v628_v22 = vadd.f32 %v597_v57, %v512_v62  ;;  %v629_v63 = vadd.f32 %v598_v49, %v513_v50  ;;  %v600_v52 = vsel %vm585_vm3, %v28886_v44, %v28851_v51  ;;  %v1044_v50 = vpop.permute.xlu0 %1043  ;;  %vm1238_vm8 = vcmask 1043456  }
 0x1f7   :  { %v713_v56 = vsel %vm701_vm4, %v28793_v21, %v28910_v15  ;;  %v714_v1 = vsel %vm701_vm4, %v28910_v15, %v28867_v47  ;;  %v974_v60 = vadd.f32 %v943_v45, %v858_v10  ;;  %v975_v53 = vadd.f32 %v944_v37, %v859_v2 }
 0x1f8   :  { %v632_v46 = vadd.f32 %v28851_v51, %v516_v16  ;;  %v630_v42 = vadd.f32 %v599_v41, %v514_v34  ;;  %v715_v21 = vsel %vm701_vm4, %v28867_v47, %v29020_v4  ;;  %v829_v15 = vsel %vm817_vm5, %v28877_v6, %v29043_v11 }
 0x1f9   :  { %v1038_v31 = vpop.permute.xlu1 %1037  ;;  %v631_v12 = vadd.f32 %v600_v52, %v515_v43  ;;  %v744_v62 = vadd.f32 %v713_v56, %v628_v22  ;;  %v745_v51 = vadd.f32 %v714_v1, %v629_v63  ;;  %v716_v47 = vsel %vm701_vm4, %v29020_v4, %v28933_v3 }
 0x1fa   :  { %v1059_v36 = vsel %vm1049_vm7, %v29013_v55, %v1038_v31  ;;  %v1060_v44 = vsel %vm1049_vm7, %v1038_v31, %v29112_v33  ;;  %v830_v55 = vsel %vm817_vm5, %v29043_v11, %v28959_v9  ;;  %v748_v54 = vadd.f32 %v28933_v3, %v632_v46  ;;  %v1048_v29 = vpop.permute.xlu0 %1047 }
 0x1fb   :  { %v1090_v17 = vadd.f32 %v1059_v36, %v974_v60  ;;  %v1091_v35 = vadd.f32 %v1060_v44, %v975_v53  ;;  %v746_v8 = vadd.f32 %v715_v21, %v630_v42  ;;  %v860_v13 = vadd.f32 %v829_v15, %v744_v62  ;;  %v35097_v62 = vld [vmem:[#allocation48_spill] sm:$0xff] }
 0x1fc   :  { %v945_v59 = vsel %vm933_vm6, %v28990_v39, %v926_v18  ;;  %v946_v11 = vsel %vm933_vm6, %v926_v18, %v29083_v38  ;;  %v861_v20 = vadd.f32 %v830_v55, %v745_v51  ;;  %v747_v58 = vadd.f32 %v716_v47, %v631_v12  ;;  %v35096_v12 = vld [vmem:[#allocation47_spill] sm:$0xff]  ;;  %v35098_v51 = vld [vmem:[#allocation16_spill] sm:$0xff] }
 0x1fd   :  { %v1112_v28 = vadd.f32 %v28698_v19, %v1090_v17  ;;  %v1113_v6 = vadd.f32 %v28698_v19, %v1091_v35  ;;  %v930_v5 = vpop.permute.xlu1 %929  ;;  %v864_v3 = vadd.f32 %v29037_v23, %v748_v54  ;;  %v831_v4 = vsel %vm817_vm5, %v28959_v9, %v29116_v7  ;;  %v35099_v55 = vld [vmem:[#allocation19_spill] sm:$0xff] }
 0x1fe   :  { %v832_v57 = vsel %vm817_vm5, %v29116_v7, %v29037_v23  ;;  %v976_v39 = vadd.f32 %v945_v59, %v860_v13  ;;  %v977_v49 = vadd.f32 %v946_v11, %v861_v20  ;;  %v947_v9 = vsel %vm933_vm6, %v29083_v38, %v930_v5 }
 0x1ff   :  { %vm1128_vm9 = vcmp.gt.f32.partialorder %v1112_v28, 0.0  ;;  %vm1129_vm10 = vcmp.gt.f32.partialorder %v1113_v6, 0.0  ;;  %v1144_v30 = vmul.f32 0.01, %v1112_v28  ;;  %v1145_v27 = vmul.f32 0.01, %v1113_v6 }
 0x200   :  { %v980_v40 = vadd.f32 %v932_v25, %v864_v3  ;;  %v948_v23 = vsel %vm933_vm6, %v930_v5, %v932_v25  ;;  %v862_v34 = vadd.f32 %v831_v4, %v746_v8  ;;  %v863_v41 = vadd.f32 %v832_v57, %v747_v58 }
 0x201   :  { %v29198_v61 = vsel %vm1128_vm9, %v1112_v28, %v1144_v30  ;;  %v1042_v26 = vpop.permute.xlu1 %1041  ;;  %v29200_v18 = vsel %vm1129_vm10, %v1113_v6, %v1145_v27  ;;  %vm1235_vm9 = vcmask 31744   ;;  %v35101_v30 = vmov 0.0  }
 0x202   :  { %v1061_v16 = vsel %vm1049_vm7, %v29112_v33, %v1042_v26  ;;  %v1062_v45 = vsel %vm1049_vm7, %v1042_v26, %v1044_v50  ;;  %1206 = vrot.lane.b32.xlu1 %v29198_v61, %s27948_s24  ;;  %1208 = vrot.lane.b32.xlu0 %v29200_v18, %s27948_s24  ;;  %v1096_v10 = vadd.f32 %v1048_v29, %v980_v40 }
 0x203   :  { %v1092_v7 = vadd.f32 %v1061_v16, %v976_v39  ;;  %v1093_v37 = vadd.f32 %v1062_v45, %v977_v49  ;;  %v978_v22 = vadd.f32 %v947_v9, %v862_v34  ;;  %v979_v63 = vadd.f32 %v948_v23, %v863_v41 }
 0x204   :  { %v1118_v46 = vadd.f32 %v28698_v19, %v1096_v10 }
 0x205   :  { %v1114_v33 = vadd.f32 %v28698_v19, %v1092_v7  ;;  %v1115_v2 = vadd.f32 %v28698_v19, %v1093_v37  ;;  %v1046_v43 = vpop.permute.xlu1 %1045 }
 0x206   :  { %v1063_v52 = vsel %vm1049_vm7, %v1044_v50, %v1046_v43  ;;  %v1064_v38 = vsel %vm1049_vm7, %v1046_v43, %v1048_v29  ;;  %v1150_v15 = vmul.f32 0.01, %v1118_v46  ;;  %vm1134_vm15 = vcmp.gt.f32.partialorder %v1118_v46, 0.0  ;;  %v35100_v50 = vld [vmem:[#allocation22_spill] sm:$0xff] }
 0x207   :  { %vm1130_vm11 = vcmp.gt.f32.partialorder %v1114_v33, 0.0  ;;  %vm1131_vm12 = vcmp.gt.f32.partialorder %v1115_v2, 0.0  ;;  %v1146_v25 = vmul.f32 0.01, %v1114_v33  ;;  %v1147_v56 = vmul.f32 0.01, %v1115_v2 }
 0x208   :  { %v1094_v1 = vadd.f32 %v1063_v52, %v978_v22  ;;  %v1095_v60 = vadd.f32 %v1064_v38, %v979_v63 }
 0x209   :  { %v29216_v53 = vsel %vm1130_vm11, %v1114_v33, %v1146_v25  ;;  %v29218_v31 = vsel %vm1131_vm12, %v1115_v2, %v1147_v56 }
 0x20a   :  { %v1116_v42 = vadd.f32 %v28698_v19, %v1094_v1  ;;  %v1117_v36 = vadd.f32 %v28698_v19, %v1095_v60  ;;  %1212 = vrot.lane.b32.xlu0 %v29218_v31, %s27948_s24  ;;  %1210 = vrot.lane.b32.xlu1 %v29216_v53, %s27948_s24  ;;  %v29235_v19 = vsel %vm1134_vm15, %v1118_v46, %v1150_v15 }
 0x20c   :  { %vm1132_vm13 = vcmp.gt.f32.partialorder %v1116_v42, 0.0  ;;  %vm1133_vm14 = vcmp.gt.f32.partialorder %v1117_v36, 0.0  ;;  %v1148_v44 = vmul.f32 0.01, %v1116_v42  ;;  %v1149_v21 = vmul.f32 0.01, %v1117_v36 }
 0x20e   :  { %v29227_v17 = vsel %vm1132_vm13, %v1116_v42, %v1148_v44  ;;  %v29229_v35 = vsel %vm1133_vm14, %v1117_v36, %v1149_v21 }
 0x20f   :  { %1216 = vrot.lane.b32.xlu0 %v29229_v35, %s27948_s24  ;;  %1214 = vrot.lane.b32.xlu1 %v29227_v17, %s27948_s24 }
 0x213   :  { %2445 = vrot.lane.b32.xlu0 %v28800_v0, %s27949_s25  ;;  %1218 = vrot.lane.b32.xlu1 %v29235_v19, %s27948_s24 }
 0x217   :  { %2443 = vrot.lane.b32.xlu0 %v28813_v32, %s27949_s25  ;;  %2447 = vrot.lane.b32.xlu1 %v35096_v12, %s27949_s25 }
 0x21b   :  { %2451 = vrot.lane.b32.xlu0 %v35097_v62, %s27949_s25  ;;  %2449 = vrot.lane.b32.xlu1 %v35098_v51, %s27949_s25 }
 0x21f   :  { %2453 = vrot.lane.b32.xlu0 %v29039_v24, %s27949_s25  ;;  %2441 = vrot.lane.b32.xlu1 %v35099_v55, %s27958_s0 }
 0x223   :  { %2457 = vrot.lane.b32.xlu0 %v29142_v14, %s27949_s25  ;;  %2455 = vrot.lane.b32.xlu1 %v35100_v50, %s27949_s25 }
 0x227   :  { %2461 = vrot.lane.b32.xlu0 %v29198_v61, %s27949_s25  ;;  %2459 = vrot.lane.b32.xlu1 %v29144_v48, %s27949_s25 }
 0x228   :  { %v1191_v54 = vpop.permute.xlu1 %1190 }
 0x22b   :  { %2465 = vrot.lane.b32.xlu0 %v29216_v53, %s27949_s25  ;;  %2463 = vrot.lane.b32.xlu1 %v29200_v18, %s27949_s25 }
 0x22c   :  { %v1189_v47 = vpop.permute.xlu1 %1188  ;;  %v1193_v28 = vpop.permute.xlu0 %1192 }
 0x22d   :  { %v1220_v6 = vsel %vm237_vm0, %v1189_v47, %v1191_v54  ;;  %v1221_v5 = vsel %vm237_vm0, %v1191_v54, %v1193_v28 }
 0x22e   :  { %26751 = vmatprep.subr.msk.mxu0 %vm1238_vm8, %v1221_v5 }
 0x22f   :  { %2469 = vrot.lane.b32.xlu0 %v29227_v17, %s27949_s25  ;;  %2467 = vrot.lane.b32.xlu1 %v29218_v31, %s27949_s25 }
 0x230   :  { %26752 = vmatpush1.msk.msra.mxu0 %vm1238_vm8, %v1220_v6 }
 0x233   :  { %2473 = vrot.lane.b32.xlu0 %v29235_v19, %s27949_s25  ;;  %2471 = vrot.lane.b32.xlu1 %v29229_v35, %s27949_s25 }
 0x237   :  { %3114 = vrot.lane.b32.xlu0 %v35096_v12, %s27950_s3  ;;  %3112 = vrot.lane.b32.xlu1 %v28800_v0, %s27950_s3 }
 0x23b   :  { %3116 = vrot.lane.b32.xlu0 %v35098_v51, %s27950_s3  ;;  %3110 = vrot.lane.b32.xlu1 %v28813_v32, %s27950_s3 }
 0x23f   :  { %3108 = vrot.lane.b32.xlu0 %v35099_v55, %s27959_s30  ;;  %3118 = vrot.lane.b32.xlu1 %v35097_v62, %s27950_s3 }
 0x243   :  { %3122 = vrot.lane.b32.xlu0 %v35100_v50, %s27950_s3  ;;  %3120 = vrot.lane.b32.xlu1 %v29039_v24, %s27950_s3 }
 0x244   :  { %v1195_v8 = vpop.permute.xlu0 %1194  ;;  %v1197_v13 = vpop.permute.xlu1 %1196 }
 0x245   :  { %v1223_v59 = vsel %vm237_vm0, %v1195_v8, %v1197_v13  ;;  %v1222_v11 = vsel %vm237_vm0, %v1193_v28, %v1195_v8 }
 0x246   :  { %26754 = vmatprep.subr.msk.mxu1 %vm1238_vm8, %v1223_v59 }
 0x247   :  { %3126 = vrot.lane.b32.xlu0 %v29144_v48, %s27950_s3  ;;  %26755 = vmatpush1.msk.msra.mxu1 %vm1238_vm8, %v1222_v11 }
 0x248   :  { %3124 = vrot.lane.b32.xlu1 %v29142_v14, %s27950_s3  ;;  %v29301_v20 = vpop.permute.xlu0 %1170 }
 0x249   :  { %26753 = vmatmul.mubr.msk.f32.vlgmr.msra.gmra.mxu0 %vm1235_vm9, %v29301_v20  ;;  %26756 = vmatmul.mubr.msk.f32.vlgmr.msra.gmra.mxu1 %vm1235_vm9, %v29301_v20 }
 0x24a   :  { %1477 = vmatprep.mubr.f32.mxu0 %v35101_v30  ;;  %1548 = vmatprep.mubr.f32.mxu1 %v35101_v30 }
 0x24b   :  { %3130 = vrot.lane.b32.xlu0 %v29200_v18, %s27950_s3 }
 0x24c   :  { %3128 = vrot.lane.b32.xlu1 %v29198_v61, %s27950_s3 }
 0x24f   :  { %3134 = vrot.lane.b32.xlu0 %v29218_v31, %s27950_s3 }
 0x250   :  { %3132 = vrot.lane.b32.xlu1 %v29216_v53, %s27950_s3 }
 0x253   :  { %3138 = vrot.lane.b32.xlu0 %v29229_v35, %s27950_s3 }
 0x254   :  { %3136 = vrot.lane.b32.xlu1 %v29227_v17, %s27950_s3 }
 0x257   :  { %3779 = vrot.lane.b32.xlu0 %v28800_v0, %s27951_s26 }
 0x258   :  { %3140 = vrot.lane.b32.xlu1 %v29235_v19, %s27950_s3  ;;  %v1201_v58 = vpop.permute.xlu0 %1200  ;;  %v1199_v3 = vpop.permute.xlu1 %1198 }
 0x259   :  { %v1224_v4 = vsel %vm237_vm0, %v1197_v13, %v1199_v3  ;;  %v1225_v27 = vsel %vm237_vm0, %v1199_v3, %v1201_v58 }
 0x25a   :  { %26757 = vmatprep.subr.msk.mxu0 %vm1238_vm8, %v1225_v27 }
 0x25b   :  { %3777 = vrot.lane.b32.xlu0 %v28813_v32, %s27951_s26  ;;  %26758 = vmatpush1.msk.msra.mxu0 %vm1238_vm8, %v1224_v4 }
 0x25c   :  { %3781 = vrot.lane.b32.xlu1 %v35096_v12, %s27951_s26  ;;  %26759 = vmatmul.mubr.msk.f32.vlgmr.msra.gmra.mxu0 %vm1235_vm9, %v29301_v20 }
 0x25d   :  { %1619 = vmatprep.mubr.f32.mxu0 %v35101_v30 }
 0x25f   :  { %3785 = vrot.lane.b32.xlu0 %v35097_v62, %s27951_s26 }
 0x260   :  { %3783 = vrot.lane.b32.xlu1 %v35098_v51, %s27951_s26 }
 0x263   :  { %3787 = vrot.lane.b32.xlu0 %v29039_v24, %s27951_s26 }
 0x264   :  { %3775 = vrot.lane.b32.xlu1 %v35099_v55, %s27950_s3 }
 0x267   :  { %3791 = vrot.lane.b32.xlu0 %v29142_v14, %s27951_s26 }
 0x268   :  { %3789 = vrot.lane.b32.xlu1 %v35100_v50, %s27951_s26  ;;  %v1205_v57 = vpop.permute.xlu0 %1204  ;;  %v1203_v39 = vpop.permute.xlu1 %1202 }
 0x269   :  { %v1226_v49 = vsel %vm237_vm0, %v1201_v58, %v1203_v39  ;;  %v1227_v26 = vsel %vm237_vm0, %v1203_v39, %v1205_v57 }
 0x26a   :  { %26760 = vmatprep.subr.msk.mxu1 %vm1238_vm8, %v1227_v26 }
 0x26b   :  { %3795 = vrot.lane.b32.xlu0 %v29198_v61, %s27951_s26  ;;  %26761 = vmatpush1.msk.msra.mxu1 %vm1238_vm8, %v1226_v49 }
 0x26c   :  { %3793 = vrot.lane.b32.xlu1 %v29144_v48, %s27951_s26  ;;  %26762 = vmatmul.mubr.msk.f32.vlgmr.msra.gmra.mxu1 %vm1235_vm9, %v29301_v20 }
 0x26d   :  { %1690 = vmatprep.mubr.f32.mxu1 %v35101_v30 }
 0x26f   :  { %3799 = vrot.lane.b32.xlu0 %v29216_v53, %s27951_s26 }
 0x270   :  { %3797 = vrot.lane.b32.xlu1 %v29200_v18, %s27951_s26 }
 0x273   :  { %3803 = vrot.lane.b32.xlu0 %v29227_v17, %s27951_s26 }
 0x274   :  { %3801 = vrot.lane.b32.xlu1 %v29218_v31, %s27951_s26  ;;  %v1207_v40 = vpop.permute.xlu1 %1206  ;;  %v1209_v29 = vpop.permute.xlu0 %1208 }
 0x275   :  { %v1228_v16 = vsel %vm237_vm0, %v1205_v57, %v1207_v40  ;;  %v1229_v45 = vsel %vm237_vm0, %v1207_v40, %v1209_v29 }
 0x276   :  { %26763 = vmatprep.subr.msk.mxu0 %vm1238_vm8, %v1229_v45 }
 0x277   :  { %3807 = vrot.lane.b32.xlu0 %v29235_v19, %s27951_s26  ;;  %26764 = vmatpush1.msk.msra.mxu0 %vm1238_vm8, %v1228_v16 }
 0x278   :  { %3805 = vrot.lane.b32.xlu1 %v29229_v35, %s27951_s26  ;;  %26765 = vmatmul.mubr.msk.f32.vlgmr.msra.gmra.mxu0 %vm1235_vm9, %v29301_v20 }
 0x279   :  { %1761 = vmatprep.mubr.f32.mxu0 %v35101_v30 }
 0x27b   :  { %4448 = vrot.lane.b32.xlu0 %v35096_v12, %s34950_s27 }
 0x27c   :  { %4446 = vrot.lane.b32.xlu1 %v28800_v0, %s34950_s27  ;;  %v1213_v9 = vpop.permute.xlu0 %1212  ;;  %v1211_v23 = vpop.permute.xlu1 %1210 }
 0x27d   :  { %v1230_v7 = vsel %vm237_vm0, %v1209_v29, %v1211_v23  ;;  %v1231_v37 = vsel %vm237_vm0, %v1211_v23, %v1213_v9 }
 0x27e   :  { %26766 = vmatprep.subr.msk.mxu1 %vm1238_vm8, %v1231_v37 }
 0x27f   :  { %4450 = vrot.lane.b32.xlu0 %v35098_v51, %s34950_s27  ;;  %26767 = vmatpush1.msk.msra.mxu1 %vm1238_vm8, %v1230_v7 }
 0x280   :  { %4444 = vrot.lane.b32.xlu1 %v28813_v32, %s34950_s27  ;;  %26768 = vmatmul.mubr.msk.f32.vlgmr.msra.gmra.mxu1 %vm1235_vm9, %v29301_v20 }
 0x281   :  { %v1217_v34 = vpop.permute.xlu0 %1216  ;;  %v1215_v41 = vpop.permute.xlu1 %1214  ;;  %1832 = vmatprep.mubr.f32.mxu1 %v35101_v30 }
 0x282   :  { %v1232_v10 = vsel %vm237_vm0, %v1213_v9, %v1215_v41  ;;  %v1233_v33 = vsel %vm237_vm0, %v1215_v41, %v1217_v34 }
 0x283   :  { %4442 = vrot.lane.b32.xlu0 %v35099_v55, %s27960_s20  ;;  %26769 = vmatprep.subr.msk.mxu0 %vm1238_vm8, %v1233_v33 }
 0x284   :  { %4452 = vrot.lane.b32.xlu1 %v35097_v62, %s34950_s27  ;;  %26770 = vmatpush1.msk.msra.mxu0 %vm1238_vm8, %v1232_v10 }
 0x285   :  { %v2446_v2 = vpop.permute.xlu0 %2445  ;;  %26771 = vmatmul.mubr.msk.f32.vlgmr.msra.gmra.mxu0 %vm1235_vm9, %v29301_v20  ;;  %26775 = vmatprep.subr.msk.mxu0 %vm1238_vm8, %v28800_v0  ;;  %v1219_v43 = vpop.permute.xlu1 %1218 }
 0x286   :  { %v1234_v22 = vsel %vm237_vm0, %v1217_v34, %v1219_v43  ;;  %26772 = vmatprep.subr.msk.mxu1 %vm1238_vm8, %v1219_v43  ;;  %26776 = vmatpush1.msk.msra.mxu0 %vm1238_vm8, %v28813_v32 }
 0x287   :  { %4456 = vrot.lane.b32.xlu0 %v35100_v50, %s34950_s27  ;;  %26773 = vmatpush1.msk.msra.mxu1 %vm1238_vm8, %v1234_v22 }
 0x288   :  { %4454 = vrot.lane.b32.xlu1 %v29039_v24, %s34950_s27  ;;  %26781 = vmatprep.subr.msk.mxu0 %vm1238_vm8, %v29039_v24 }
 0x289   :  { %26774 = vmatmul.mubr.msk.f32.vlgmr.msra.gmra.mxu1 %vm1235_vm9, %v29301_v20  ;;  %1937 = vmatprep.mubr.f32.mxu0 %v35101_v30  ;;  %v2444_v63 = vpop.permute.xlu0 %2443  ;;  %v2448_v52 = vpop.permute.xlu1 %2447 }
 0x28a   :  { %26778 = vmatprep.subr.msk.mxu1 %vm1238_vm8, %v35098_v51  ;;  %26777 = vmatmul.mubr.msk.f32.vlgmr.msra.gmra.mxu0 %vm1235_vm9, %v35099_v55  ;;  %v2476_v60 = vsel %vm353_vm1, %v2446_v2, %v2448_v52  ;;  %v2475_v36 = vsel %vm353_vm1, %v2444_v63, %v2446_v2 }
 0x28b   :  { %26779 = vmatpush1.msk.msra.mxu1 %vm1238_vm8, %v35096_v12  ;;  %26782 = vmatpush1.msk.msra.mxu0 %vm1238_vm8, %v35097_v62 }
 0x28c   :  { %26784 = vmatprep.subr.msk.mxu1 %vm1238_vm8, %v29142_v14  ;;  %26787 = vmatprep.subr.msk.mxu0 %vm1238_vm8, %v29198_v61 }
 0x28d   :  { %4460 = vrot.lane.b32.xlu0 %v29144_v48, %s34950_s27  ;;  %4458 = vrot.lane.b32.xlu1 %v29142_v14, %s34950_s27  ;;  %v2452_v38 = vpop.permute.xlu0 %2451  ;;  %v2450_v25 = vpop.permute.xlu1 %2449 }
 0x28e   :  { %2008 = vmatprep.mubr.f32.mxu1 %v35101_v30  ;;  %2079 = vmatprep.mubr.f32.mxu0 %v35101_v30  ;;  %v2478_v15 = vsel %vm353_vm1, %v2450_v25, %v2452_v38  ;;  %v2477_v47 = vsel %vm353_vm1, %v2448_v52, %v2450_v25 }
 0x28f   :  { %26780 = vmatmul.mubr.msk.f32.vlgmr.msra.gmra.mxu1 %vm1235_vm9, %v35099_v55  ;;  %26783 = vmatmul.mubr.msk.f32.vlgmr.msra.gmra.mxu0 %vm1235_vm9, %v35099_v55 }
 0x290   :  { %26785 = vmatpush1.msk.msra.mxu1 %vm1238_vm8, %v35100_v50  ;;  %26788 = vmatpush1.msk.msra.mxu0 %vm1238_vm8, %v29144_v48 }
 0x291   :  { %26790 = vmatprep.subr.msk.mxu1 %vm1238_vm8, %v29216_v53  ;;  %26793 = vmatprep.subr.msk.mxu0 %vm1238_vm8, %v29227_v17  ;;  %v2454_v56 = vpop.permute.xlu0 %2453  ;;  %v29449_v1 = vpop.permute.xlu1 %2441 }
 0x292   :  { %4464 = vrot.lane.b32.xlu0 %v29200_v18, %s34950_s27  ;;  %4462 = vrot.lane.b32.xlu1 %v29198_v61, %s34950_s27  ;;  %v2479_v8 = vsel %vm353_vm1, %v2452_v38, %v2454_v56 }
 0x293   :  { %2150 = vmatprep.mubr.f32.mxu1 %v35101_v30  ;;  %2221 = vmatprep.mubr.f32.mxu0 %v35101_v30 }
 0x294   :  { %26786 = vmatmul.mubr.msk.f32.vlgmr.msra.gmra.mxu1 %vm1235_vm9, %v35099_v55  ;;  %26789 = vmatmul.mubr.msk.f32.vlgmr.msra.gmra.mxu0 %vm1235_vm9, %v35099_v55 }
 0x295   :  { %26791 = vmatpush1.msk.msra.mxu1 %vm1238_vm8, %v29200_v18  ;;  %26794 = vmatpush1.msk.msra.mxu0 %vm1238_vm8, %v29218_v31  ;;  %v2458_v46 = vpop.permute.xlu0 %2457  ;;  %v2456_v42 = vpop.permute.xlu1 %2455 }
 0x296   :  { %26796 = vmatprep.subr.msk.mxu1 %vm1238_vm8, %v29235_v19  ;;  %26799 = vmatprep.subr.msk.mxu0 %vm1238_vm8, %v2476_v60  ;;  %v2480_v54 = vsel %vm353_vm1, %v2454_v56, %v2456_v42  ;;  %v2481_v59 = vsel %vm353_vm1, %v2456_v42, %v2458_v46 }
 0x297   :  { %4468 = vrot.lane.b32.xlu0 %v29218_v31, %s34950_s27  ;;  %4466 = vrot.lane.b32.xlu1 %v29216_v53, %s34950_s27 }
 0x298   :  { %2292 = vmatprep.mubr.f32.mxu1 %v35101_v30  ;;  %2363 = vmatprep.mubr.f32.mxu0 %v35101_v30 }
 0x299   :  { %26792 = vmatmul.mubr.msk.f32.vlgmr.msra.gmra.mxu1 %vm1235_vm9, %v35099_v55  ;;  %26795 = vmatmul.mubr.msk.f32.vlgmr.msra.gmra.mxu0 %vm1235_vm9, %v35099_v55  ;;  %v2462_v44 = vpop.permute.xlu0 %2461  ;;  %v2460_v21 = vpop.permute.xlu1 %2459 }
 0x29a   :  { %26797 = vmatpush1.msk.msra.mxu1 %vm1238_vm8, %v29229_v35  ;;  %26800 = vmatpush1.msk.msra.mxu0 %vm1238_vm8, %v2475_v36  ;;  %v2482_v5 = vsel %vm353_vm1, %v2458_v46, %v2460_v21  ;;  %v2483_v3 = vsel %vm353_vm1, %v2460_v21, %v2462_v44 }
 0x29b   :  { %26802 = vmatprep.subr.msk.mxu1 %vm1238_vm8, %v2478_v15  ;;  %4472 = vrot.lane.b32.xlu0 %v29229_v35, %s34950_s27 }
 0x29c   :  { %4470 = vrot.lane.b32.xlu1 %v29227_v17, %s34950_s27  ;;  %2434 = vmatprep.mubr.f32.mxu1 %v35101_v30 }
 0x29d   :  { %26805 = vmatprep.subr.msk.mxu0 %vm1238_vm8, %v2480_v54  ;;  %26798 = vmatmul.mubr.msk.f32.vlgmr.msra.gmra.mxu1 %vm1235_vm9, %v35099_v55  ;;  %v2466_v28 = vpop.permute.xlu0 %2465  ;;  %v2464_v6 = vpop.permute.xlu1 %2463 }
 0x29e   :  { %2588 = vmatprep.mubr.f32.mxu0 %v35101_v30  ;;  %26803 = vmatpush1.msk.msra.mxu1 %vm1238_vm8, %v2477_v47  ;;  %v2484_v11 = vsel %vm353_vm1, %v2462_v44, %v2464_v6  ;;  %v2485_v57 = vsel %vm353_vm1, %v2464_v6, %v2466_v28 }
 0x29f   :  { %26801 = vmatmul.mubr.msk.f32.vlgmr.msra.gmra.mxu0 %vm1235_vm9, %v29449_v1  ;;  %5113 = vrot.lane.b32.xlu0 %v28800_v0, %s27953_s28 }
 0x2a0   :  { %26806 = vmatpush1.msk.msra.mxu0 %vm1238_vm8, %v2479_v8  ;;  %4474 = vrot.lane.b32.xlu1 %v29235_v19, %s34950_s27  ;;  %s27962_s27 = smov 100  }
 0x2a1   :  { %2659 = vmatprep.mubr.f32.mxu1 %v35101_v30  ;;  %26808 = vmatprep.subr.msk.mxu1 %vm1238_vm8, %v2482_v5  ;;  %v2470_v13 = vpop.permute.xlu0 %2469  ;;  %v2468_v20 = vpop.permute.xlu1 %2467  ;;  %v29643_v5 = vld [vmem:[%s35054_s2] sm:$0xf]  ;;  %s35131_s2 = smov 110  }
 0x2a2   :  { %26804 = vmatmul.mubr.msk.f32.vlgmr.msra.gmra.mxu1 %vm1235_vm9, %v29449_v1  ;;  %2730 = vmatprep.mubr.f32.mxu0 %v35101_v30  ;;  %v2486_v58 = vsel %vm353_vm1, %v2466_v28, %v2468_v20  ;;  %v2487_v29 = vsel %vm353_vm1, %v2468_v20, %v2470_v13 }
 0x2a3   :  { %26809 = vmatpush1.msk.msra.mxu1 %vm1238_vm8, %v2481_v59  ;;  %26807 = vmatmul.mubr.msk.f32.vlgmr.msra.gmra.mxu0 %vm1235_vm9, %v29449_v1 }
 0x2a4   :  { %5111 = vrot.lane.b32.xlu0 %v28813_v32, %s27953_s28  ;;  %5115 = vrot.lane.b32.xlu1 %v35096_v12, %s27953_s28 }
 0x2a5   :  { %2801 = vmatprep.mubr.f32.mxu1 %v35101_v30  ;;  %26811 = vmatprep.subr.msk.mxu0 %vm1238_vm8, %v2484_v11  ;;  %v2474_v4 = vpop.permute.xlu0 %2473  ;;  %v2472_v27 = vpop.permute.xlu1 %2471 }
 0x2a6   :  { %26810 = vmatmul.mubr.msk.f32.vlgmr.msra.gmra.mxu1 %vm1235_vm9, %v29449_v1  ;;  %26812 = vmatpush1.msk.msra.mxu0 %vm1238_vm8, %v2483_v3  ;;  %v2488_v39 = vsel %vm353_vm1, %v2470_v13, %v2472_v27  ;;  %v2489_v49 = vsel %vm353_vm1, %v2472_v27, %v2474_v4 }
 0x2a7   :  { %2872 = vmatprep.mubr.f32.mxu0 %v35101_v30  ;;  %26814 = vmatprep.subr.msk.mxu1 %vm1238_vm8, %v2486_v58 }
 0x2a8   :  { %26813 = vmatmul.mubr.msk.f32.vlgmr.msra.gmra.mxu0 %vm1235_vm9, %v29449_v1  ;;  %5119 = vrot.lane.b32.xlu0 %v35097_v62, %s27953_s28 }
 0x2a9   :  { %5117 = vrot.lane.b32.xlu1 %v35098_v51, %s27953_s28  ;;  %26815 = vmatpush1.msk.msra.mxu1 %vm1238_vm8, %v2485_v57  ;;  %v3115_v26 = vpop.permute.xlu0 %3114  ;;  %v3113_v40 = vpop.permute.xlu1 %3112 }
 0x2aa   :  { %2943 = vmatprep.mubr.f32.mxu1 %v35101_v30  ;;  %26820 = vmatprep.subr.msk.mxu1 %vm1238_vm8, %v2474_v4  ;;  %v3143_v16 = vsel %vm469_vm2, %v3113_v40, %v3115_v26 }
 0x2ab   :  { %26816 = vmatmul.mubr.msk.f32.vlgmr.msra.gmra.mxu1 %vm1235_vm9, %v29449_v1  ;;  %26817 = vmatprep.subr.msk.mxu0 %vm1238_vm8, %v2488_v39 }
 0x2ac   :  { %5121 = vrot.lane.b32.xlu0 %v29039_v24, %s27953_s28  ;;  %26821 = vmatpush1.msk.msra.mxu1 %vm1238_vm8, %v2489_v49 }
 0x2ad   :  { %5109 = vrot.lane.b32.xlu1 %v35099_v55, %s34948_s1  ;;  %26818 = vmatpush1.msk.msra.mxu0 %vm1238_vm8, %v2487_v29  ;;  %v3117_v45 = vpop.permute.xlu0 %3116  ;;  %v3111_v9 = vpop.permute.xlu1 %3110  ;;  %s35169_s1 = smov 104  }
 0x2ae   :  { %3014 = vmatprep.mubr.f32.mxu0 %v35101_v30  ;;  %3085 = vmatprep.mubr.f32.mxu1 %v35101_v30  ;;  %v3142_v23 = vsel %vm469_vm2, %v3111_v9, %v3113_v40  ;;  %v3144_v34 = vsel %vm469_vm2, %v3115_v26, %v3117_v45 }
 0x2af   :  { %26819 = vmatmul.mubr.msk.f32.vlgmr.msra.gmra.mxu0 %vm1235_vm9, %v29449_v1  ;;  %26822 = vmatmul.mubr.msk.f32.vlgmr.msra.gmra.mxu1 %vm1235_vm9, %v29449_v1 }
 0x2b0   :  { %5125 = vrot.lane.b32.xlu0 %v29142_v14, %s27953_s28  ;;  %26823 = vmatprep.subr.msk.mxu0 %vm1238_vm8, %v3143_v16 }
 0x2b1   :  { %5123 = vrot.lane.b32.xlu1 %v35100_v50, %s27953_s28  ;;  %26824 = vmatpush1.msk.msra.mxu0 %vm1238_vm8, %v3142_v23  ;;  %v29565_v55 = vpop.permute.xlu0 %3108  ;;  %v3119_v7 = vpop.permute.xlu1 %3118 }
 0x2b2   :  { %3255 = vmatprep.mubr.f32.mxu0 %v35101_v30  ;;  %3326 = vmatprep.mubr.f32.mxu1 %v35101_v30  ;;  %v3145_v37 = vsel %vm469_vm2, %v3117_v45, %v3119_v7 }
 0x2b3   :  { %26825 = vmatmul.mubr.msk.f32.vlgmr.msra.gmra.mxu0 %vm1235_vm9, %v29565_v55  ;;  %26826 = vmatprep.subr.msk.mxu1 %vm1238_vm8, %v3145_v37 }
 0x2b4   :  { %5129 = vrot.lane.b32.xlu0 %v29198_v61, %s27953_s28  ;;  %26827 = vmatpush1.msk.msra.mxu1 %vm1238_vm8, %v3144_v34 }
 0x2b5   :  { %5127 = vrot.lane.b32.xlu1 %v29144_v48, %s27953_s28  ;;  %v3123_v41 = vpop.permute.xlu0 %3122  ;;  %26828 = vmatmul.mubr.msk.f32.vlgmr.msra.gmra.mxu1 %vm1235_vm9, %v29565_v55  ;;  %v3121_v10 = vpop.permute.xlu1 %3120 }
 0x2b6   :  { %3397 = vmatprep.mubr.f32.mxu0 %v35101_v30  ;;  %v3146_v33 = vsel %vm469_vm2, %v3119_v7, %v3121_v10  ;;  %v3147_v2 = vsel %vm469_vm2, %v3121_v10, %v3123_v41  ;;  %3468 = vmatprep.mubr.f32.mxu1 %v35101_v30 }
 0x2b7   :  { %26829 = vmatprep.subr.msk.mxu0 %vm1238_vm8, %v3147_v2 }
 0x2b8   :  { %5133 = vrot.lane.b32.xlu0 %v29216_v53, %s27953_s28  ;;  %26830 = vmatpush1.msk.msra.mxu0 %vm1238_vm8, %v3146_v33 }
 0x2b9   :  { %5131 = vrot.lane.b32.xlu1 %v29200_v18, %s27953_s28  ;;  %v3127_v43 = vpop.permute.xlu0 %3126  ;;  %26831 = vmatmul.mubr.msk.f32.vlgmr.msra.gmra.mxu0 %vm1235_vm9, %v29565_v55 }
 0x2ba   :  { %v3125_v22 = vpop.permute.xlu1 %3124  ;;  %3539 = vmatprep.mubr.f32.mxu0 %v35101_v30 }
 0x2bb   :  { %v3148_v63 = vsel %vm469_vm2, %v3123_v41, %v3125_v22  ;;  %v3149_v52 = vsel %vm469_vm2, %v3125_v22, %v3127_v43 }
 0x2bc   :  { %5137 = vrot.lane.b32.xlu0 %v29227_v17, %s27953_s28  ;;  %26832 = vmatprep.subr.msk.mxu1 %vm1238_vm8, %v3149_v52 }
 0x2bd   :  { %5135 = vrot.lane.b32.xlu1 %v29218_v31, %s27953_s28  ;;  %26833 = vmatpush1.msk.msra.mxu1 %vm1238_vm8, %v3148_v63  ;;  %v3131_v38 = vpop.permute.xlu0 %3130 }
 0x2be   :  { %26834 = vmatmul.mubr.msk.f32.vlgmr.msra.gmra.mxu1 %vm1235_vm9, %v29565_v55  ;;  %v3129_v25 = vpop.permute.xlu1 %3128 }
 0x2bf   :  { %v3150_v56 = vsel %vm469_vm2, %v3127_v43, %v3129_v25  ;;  %v3151_v1 = vsel %vm469_vm2, %v3129_v25, %v3131_v38  ;;  %3610 = vmatprep.mubr.f32.mxu1 %v35101_v30 }
 0x2c0   :  { %5141 = vrot.lane.b32.xlu0 %v29235_v19, %s27953_s28  ;;  %26835 = vmatprep.subr.msk.mxu0 %vm1238_vm8, %v3151_v1 }
 0x2c1   :  { %5139 = vrot.lane.b32.xlu1 %v29229_v35, %s27953_s28  ;;  %26836 = vmatpush1.msk.msra.mxu0 %vm1238_vm8, %v3150_v56  ;;  %v3135_v60 = vpop.permute.xlu0 %3134 }
 0x2c2   :  { %26837 = vmatmul.mubr.msk.f32.vlgmr.msra.gmra.mxu0 %vm1235_vm9, %v29565_v55  ;;  %v3133_v46 = vpop.permute.xlu1 %3132 }
 0x2c3   :  { %v3152_v42 = vsel %vm469_vm2, %v3131_v38, %v3133_v46  ;;  %v3153_v36 = vsel %vm469_vm2, %v3133_v46, %v3135_v60  ;;  %3681 = vmatprep.mubr.f32.mxu0 %v35101_v30 }
 0x2c4   :  { %5782 = vrot.lane.b32.xlu0 %v35096_v12, %s27954_s29  ;;  %26838 = vmatprep.subr.msk.mxu1 %vm1238_vm8, %v3153_v36 }
 0x2c5   :  { %5780 = vrot.lane.b32.xlu1 %v28800_v0, %s27954_s29  ;;  %26839 = vmatpush1.msk.msra.mxu1 %vm1238_vm8, %v3152_v42  ;;  %v3139_v44 = vpop.permute.xlu0 %3138 }
 0x2c6   :  { %26840 = vmatmul.mubr.msk.f32.vlgmr.msra.gmra.mxu1 %vm1235_vm9, %v29565_v55  ;;  %v3137_v21 = vpop.permute.xlu1 %3136 }
 0x2c7   :  { %v3154_v15 = vsel %vm469_vm2, %v3135_v60, %v3137_v21  ;;  %v3155_v54 = vsel %vm469_vm2, %v3137_v21, %v3139_v44  ;;  %3752 = vmatprep.mubr.f32.mxu1 %v35101_v30 }
 0x2c8   :  { %5784 = vrot.lane.b32.xlu0 %v35098_v51, %s27954_s29  ;;  %26841 = vmatprep.subr.msk.mxu0 %vm1238_vm8, %v3155_v54 }
 0x2c9   :  { %5778 = vrot.lane.b32.xlu1 %v28813_v32, %s27954_s29  ;;  %26842 = vmatpush1.msk.msra.mxu0 %vm1238_vm8, %v3154_v15  ;;  %v3780_v47 = vpop.permute.xlu0 %3779 }
 0x2ca   :  { %26843 = vmatmul.mubr.msk.f32.vlgmr.msra.gmra.mxu0 %vm1235_vm9, %v29565_v55  ;;  %v3141_v28 = vpop.permute.xlu1 %3140 }
 0x2cb   :  { %v3156_v6 = vsel %vm469_vm2, %v3139_v44, %v3141_v28  ;;  %26844 = vmatprep.subr.msk.mxu1 %vm1238_vm8, %v3141_v28  ;;  %3922 = vmatprep.mubr.f32.mxu0 %v35101_v30  ;;  %v1168_v44 = vld [vmem:[%s34876_s4] sm:$0xf] }
 0x2cc   :  { %5776 = vrot.lane.b32.xlu0 %v29643_v5, %s27962_s27  ;;  %26845 = vmatpush1.msk.msra.mxu1 %vm1238_vm8, %v3156_v6 }
 0x2cd   :  { %5786 = vrot.lane.b32.xlu1 %v35097_v62, %s27954_s29  ;;  %26846 = vmatmul.mubr.msk.f32.vlgmr.msra.gmra.mxu1 %vm1235_vm9, %v29565_v55  ;;  %v3778_v8 = vpop.permute.xlu0 %3777 }
 0x2ce   :  { %v3809_v13 = vsel %vm585_vm3, %v3778_v8, %v3780_v47  ;;  %v3782_v59 = vpop.permute.xlu1 %3781  ;;  %3993 = vmatprep.mubr.f32.mxu1 %v35101_v30 }
 0x2cf   :  { %v3810_v11 = vsel %vm585_vm3, %v3780_v47, %v3782_v59 }
 0x2d0   :  { %5790 = vrot.lane.b32.xlu0 %v35100_v50, %s27954_s29  ;;  %26847 = vmatprep.subr.msk.mxu0 %vm1238_vm8, %v3810_v11 }
 0x2d1   :  { %5788 = vrot.lane.b32.xlu1 %v29039_v24, %s27954_s29  ;;  %26848 = vmatpush1.msk.msra.mxu0 %vm1238_vm8, %v3809_v13  ;;  %v3786_v20 = vpop.permute.xlu0 %3785 }
 0x2d2   :  { %v3784_v58 = vpop.permute.xlu1 %3783 }
 0x2d3   :  { %v3811_v3 = vsel %vm585_vm3, %v3782_v59, %v3784_v58  ;;  %v3812_v4 = vsel %vm585_vm3, %v3784_v58, %v3786_v20 }
 0x2d4   :  { %5794 = vrot.lane.b32.xlu0 %v29144_v48, %s27954_s29  ;;  %26850 = vmatprep.subr.msk.mxu1 %vm1238_vm8, %v3812_v4 }
 0x2d5   :  { %5792 = vrot.lane.b32.xlu1 %v29142_v14, %s27954_s29  ;;  %26851 = vmatpush1.msk.msra.mxu1 %vm1238_vm8, %v3811_v3  ;;  %v3788_v27 = vpop.permute.xlu0 %3787 }
 0x2d6   :  { %v3776_v57 = vpop.permute.xlu1 %3775  ;;  %v3813_v40 = vsel %vm585_vm3, %v3786_v20, %v3788_v27 }
 0x2d7   :  { %26849 = vmatmul.mubr.msk.f32.vlgmr.msra.gmra.mxu0 %vm1235_vm9, %v3776_v57  ;;  %26852 = vmatmul.mubr.msk.f32.vlgmr.msra.gmra.mxu1 %vm1235_vm9, %v3776_v57 }
 0x2d8   :  { %5798 = vrot.lane.b32.xlu0 %v29200_v18, %s27954_s29  ;;  %4064 = vmatprep.mubr.f32.mxu0 %v35101_v30 }
 0x2d9   :  { %5796 = vrot.lane.b32.xlu1 %v29198_v61, %s27954_s29  ;;  %v3792_v39 = vpop.permute.xlu0 %3791  ;;  %4135 = vmatprep.mubr.f32.mxu1 %v35101_v30 }
 0x2da   :  { %v3790_v49 = vpop.permute.xlu1 %3789 }
 0x2db   :  { %v3814_v26 = vsel %vm585_vm3, %v3788_v27, %v3790_v49  ;;  %v3815_v9 = vsel %vm585_vm3, %v3790_v49, %v3792_v39 }
 0x2dc   :  { %5802 = vrot.lane.b32.xlu0 %v29218_v31, %s27954_s29  ;;  %26853 = vmatprep.subr.msk.mxu0 %vm1238_vm8, %v3814_v26 }
 0x2dd   :  { %5800 = vrot.lane.b32.xlu1 %v29216_v53, %s27954_s29  ;;  %26854 = vmatpush1.msk.msra.mxu0 %vm1238_vm8, %v3813_v40  ;;  %v3796_v29 = vpop.permute.xlu0 %3795 }
 0x2de   :  { %26855 = vmatmul.mubr.msk.f32.vlgmr.msra.gmra.mxu0 %vm1235_vm9, %v3776_v57  ;;  %v3794_v16 = vpop.permute.xlu1 %3793 }
 0x2df   :  { %v3816_v45 = vsel %vm585_vm3, %v3792_v39, %v3794_v16  ;;  %4206 = vmatprep.mubr.f32.mxu0 %v35101_v30  ;;  %v3817_v37 = vsel %vm585_vm3, %v3794_v16, %v3796_v29 }
 0x2e0   :  { %5806 = vrot.lane.b32.xlu0 %v29229_v35, %s27954_s29  ;;  %26856 = vmatprep.subr.msk.mxu1 %vm1238_vm8, %v3816_v45 }
 0x2e1   :  { %5804 = vrot.lane.b32.xlu1 %v29227_v17, %s27954_s29  ;;  %26857 = vmatpush1.msk.msra.mxu1 %vm1238_vm8, %v3815_v9  ;;  %v3800_v23 = vpop.permute.xlu0 %3799 }
 0x2e2   :  { %26858 = vmatmul.mubr.msk.f32.vlgmr.msra.gmra.mxu1 %vm1235_vm9, %v3776_v57  ;;  %v3798_v55 = vpop.permute.xlu1 %3797 }
 0x2e3   :  { %v3818_v7 = vsel %vm585_vm3, %v3796_v29, %v3798_v55  ;;  %4277 = vmatprep.mubr.f32.mxu1 %v35101_v30  ;;  %v3819_v33 = vsel %vm585_vm3, %v3798_v55, %v3800_v23 }
 0x2e4   :  { %6447 = vrot.lane.b32.xlu0 %v28800_v0, %s27955_s21  ;;  %26859 = vmatprep.subr.msk.mxu0 %vm1238_vm8, %v3818_v7 }
 0x2e5   :  { %5808 = vrot.lane.b32.xlu1 %v29235_v19, %s27954_s29  ;;  %26860 = vmatpush1.msk.msra.mxu0 %vm1238_vm8, %v3817_v37  ;;  %v3804_v34 = vpop.permute.xlu0 %3803 }
 0x2e6   :  { %26861 = vmatmul.mubr.msk.f32.vlgmr.msra.gmra.mxu0 %vm1235_vm9, %v3776_v57  ;;  %v3802_v41 = vpop.permute.xlu1 %3801 }
 0x2e7   :  { %v3820_v10 = vsel %vm585_vm3, %v3800_v23, %v3802_v41  ;;  %4348 = vmatprep.mubr.f32.mxu0 %v35101_v30 }
 0x2e8   :  { %6445 = vrot.lane.b32.xlu0 %v28813_v32, %s27955_s21  ;;  %26862 = vmatprep.subr.msk.mxu1 %vm1238_vm8, %v3820_v10  ;;  %v3821_v32 = vsel %vm585_vm3, %v3802_v41, %v3804_v34 }
 0x2e9   :  { %6449 = vrot.lane.b32.xlu1 %v35096_v12, %s27955_s21  ;;  %26863 = vmatpush1.msk.msra.mxu1 %vm1238_vm8, %v3819_v33  ;;  %v3808_v0 = vpop.permute.xlu0 %3807 }
 0x2ea   :  { %26864 = vmatmul.mubr.msk.f32.vlgmr.msra.gmra.mxu1 %vm1235_vm9, %v3776_v57  ;;  %v3806_v2 = vpop.permute.xlu1 %3805  ;;  %26868 = vmatprep.subr.msk.mxu1 %vm1238_vm8, %v3808_v0 }
 0x2eb   :  { %v3823_v43 = vsel %vm585_vm3, %v3806_v2, %v3808_v0  ;;  %v3822_v22 = vsel %vm585_vm3, %v3804_v34, %v3806_v2  ;;  %4419 = vmatprep.mubr.f32.mxu1 %v35101_v30 }
 0x2ec   :  { %6453 = vrot.lane.b32.xlu0 %v35097_v62, %s27955_s21  ;;  %26865 = vmatprep.subr.msk.mxu0 %vm1238_vm8, %v3822_v22 }
 0x2ed   :  { %6451 = vrot.lane.b32.xlu1 %v35098_v51, %s27955_s21  ;;  %26869 = vmatpush1.msk.msra.mxu1 %vm1238_vm8, %v3823_v43  ;;  %v4449_v12 = vpop.permute.xlu0 %4448 }
 0x2ee   :  { %26866 = vmatpush1.msk.msra.mxu0 %vm1238_vm8, %v3821_v32  ;;  %26870 = vmatmul.mubr.msk.f32.vlgmr.msra.gmra.mxu1 %vm1235_vm9, %v3776_v57  ;;  %v4447_v63 = vpop.permute.xlu1 %4446 }
 0x2ef   :  { %26867 = vmatmul.mubr.msk.f32.vlgmr.msra.gmra.mxu0 %vm1235_vm9, %v3776_v57  ;;  %v4477_v52 = vsel %vm701_vm4, %v4447_v63, %v4449_v12  ;;  %4660 = vmatprep.mubr.f32.mxu1 %v35101_v30 }
 0x2f0   :  { %6455 = vrot.lane.b32.xlu0 %v29039_v24, %s27955_s21  ;;  %26871 = vmatprep.subr.msk.mxu0 %vm1238_vm8, %v4477_v52 }
 0x2f1   :  { %6443 = vrot.lane.b32.xlu1 %v29643_v5, %s27953_s28  ;;  %v4451_v62 = vpop.permute.xlu0 %4450  ;;  %4589 = vmatprep.mubr.f32.mxu0 %v35101_v30 }
 0x2f2   :  { %v4445_v51 = vpop.permute.xlu1 %4444  ;;  %v4478_v1 = vsel %vm701_vm4, %v4449_v12, %v4451_v62 }
 0x2f3   :  { %v4476_v38 = vsel %vm701_vm4, %v4445_v51, %v4447_v63 }
 0x2f4   :  { %6459 = vrot.lane.b32.xlu0 %v29142_v14, %s27955_s21  ;;  %26872 = vmatpush1.msk.msra.mxu0 %vm1238_vm8, %v4476_v38 }
 0x2f5   :  { %6457 = vrot.lane.b32.xlu1 %v35100_v50, %s27955_s21  ;;  %v29744_v24 = vpop.permute.xlu0 %4442 }
 0x2f6   :  { %v4453_v25 = vpop.permute.xlu1 %4452  ;;  %26873 = vmatmul.mubr.msk.f32.vlgmr.msra.gmra.mxu0 %vm1235_vm9, %v29744_v24 }
 0x2f7   :  { %v4479_v56 = vsel %vm701_vm4, %v4451_v62, %v4453_v25  ;;  %4731 = vmatprep.mubr.f32.mxu0 %v35101_v30 }
 0x2f8   :  { %6463 = vrot.lane.b32.xlu0 %v29198_v61, %s27955_s21  ;;  %26874 = vmatprep.subr.msk.mxu1 %vm1238_vm8, %v4479_v56 }
 0x2f9   :  { %6461 = vrot.lane.b32.xlu1 %v29144_v48, %s27955_s21  ;;  %26875 = vmatpush1.msk.msra.mxu1 %vm1238_vm8, %v4478_v1  ;;  %v4457_v14 = vpop.permute.xlu0 %4456 }
 0x2fa   :  { %26876 = vmatmul.mubr.msk.f32.vlgmr.msra.gmra.mxu1 %vm1235_vm9, %v29744_v24  ;;  %v4455_v50 = vpop.permute.xlu1 %4454 }
 0x2fb   :  { %v4480_v60 = vsel %vm701_vm4, %v4453_v25, %v4455_v50  ;;  %v4481_v46 = vsel %vm701_vm4, %v4455_v50, %v4457_v14  ;;  %4802 = vmatprep.mubr.f32.mxu1 %v35101_v30 }
 0x2fc   :  { %6467 = vrot.lane.b32.xlu0 %v29216_v53, %s27955_s21  ;;  %26877 = vmatprep.subr.msk.mxu0 %vm1238_vm8, %v4481_v46 }
 0x2fd   :  { %6465 = vrot.lane.b32.xlu1 %v29200_v18, %s27955_s21  ;;  %26878 = vmatpush1.msk.msra.mxu0 %vm1238_vm8, %v4480_v60 }
 0x2fe   :  { %26879 = vmatmul.mubr.msk.f32.vlgmr.msra.gmra.mxu0 %vm1235_vm9, %v29744_v24 }
 0x2ff   :  { %v4461_v48 = vpop.permute.xlu0 %4460  ;;  %v4459_v61 = vpop.permute.xlu1 %4458  ;;  %4873 = vmatprep.mubr.f32.mxu0 %v35101_v30 }
 0x300   :  { %6471 = vrot.lane.b32.xlu0 %v29227_v17, %s27955_s21  ;;  %v4482_v42 = vsel %vm701_vm4, %v4457_v14, %v4459_v61  ;;  %v4483_v53 = vsel %vm701_vm4, %v4459_v61, %v4461_v48 }
 0x301   :  { %6469 = vrot.lane.b32.xlu1 %v29218_v31, %s27955_s21  ;;  %26880 = vmatprep.subr.msk.mxu1 %vm1238_vm8, %v4483_v53 }
 0x302   :  { %26881 = vmatpush1.msk.msra.mxu1 %vm1238_vm8, %v4482_v42 }
 0x303   :  { %26882 = vmatmul.mubr.msk.f32.vlgmr.msra.gmra.mxu1 %vm1235_vm9, %v29744_v24 }
 0x304   :  { %6475 = vrot.lane.b32.xlu0 %v29235_v19, %s27955_s21  ;;  %v4465_v18 = vpop.permute.xlu0 %4464  ;;  %v4463_v36 = vpop.permute.xlu1 %4462  ;;  %4944 = vmatprep.mubr.f32.mxu1 %v35101_v30 }
 0x305   :  { %6473 = vrot.lane.b32.xlu1 %v29229_v35, %s27955_s21  ;;  %v4484_v17 = vsel %vm701_vm4, %v4461_v48, %v4463_v36  ;;  %v4485_v31 = vsel %vm701_vm4, %v4463_v36, %v4465_v18 }
 0x306   :  { %26883 = vmatprep.subr.msk.mxu0 %vm1238_vm8, %v4485_v31 }
 0x307   :  { %26884 = vmatpush1.msk.msra.mxu0 %vm1238_vm8, %v4484_v17 }
 0x308   :  { %26885 = vmatmul.mubr.msk.f32.vlgmr.msra.gmra.mxu0 %vm1235_vm9, %v29744_v24 }
 0x309   :  { %7112 = vperm.xlu1 %27848, %v1168_v44   ;;  %v4469_v19 = vpop.permute.xlu0 %4468  ;;  %v4467_v21 = vpop.permute.xlu1 %4466  ;;  %5015 = vmatprep.mubr.f32.mxu0 %v35101_v30 }
 0x30a   :  { %v4486_v35 = vsel %vm701_vm4, %v4465_v18, %v4467_v21  ;;  %v4487_v15 = vsel %vm701_vm4, %v4467_v21, %v4469_v19  ;;  %v29849_v43 = vpop.f32.mrf.mxu0  ;;  %v29854_v12 = vpop.f32.mrf.mxu1 }
 0x30b   :  { %26886 = vmatprep.subr.msk.mxu1 %vm1238_vm8, %v4487_v15 }
 0x30c   :  { %26887 = vmatpush1.msk.msra.mxu1 %vm1238_vm8, %v4486_v35  ;;  %v29860_v51 = vpop.f32.mrf.mxu0  ;;  %v29867_v25 = vpop.f32.mrf.mxu1 }
 0x30d   :  { %v4473_v54 = vpop.permute.xlu0 %4472  ;;  %26888 = vmatmul.mubr.msk.f32.vlgmr.msra.gmra.mxu1 %vm1235_vm9, %v29744_v24 }
 0x30e   :  { %v4471_v47 = vpop.permute.xlu1 %4470  ;;  %5086 = vmatprep.mubr.f32.mxu1 %v35101_v30 }
 0x30f   :  { %v4488_v28 = vsel %vm701_vm4, %v4469_v19, %v4471_v47  ;;  %v4489_v6 = vsel %vm701_vm4, %v4471_v47, %v4473_v54 }
 0x310   :  { %26889 = vmatprep.subr.msk.mxu0 %vm1238_vm8, %v4489_v6 }
 0x311   :  { %26890 = vmatpush1.msk.msra.mxu0 %vm1238_vm8, %v4488_v28  ;;  %v5114_v5 = vpop.permute.xlu0 %5113 }
 0x312   :  { %26891 = vmatmul.mubr.msk.f32.vlgmr.msra.gmra.mxu0 %vm1235_vm9, %v29744_v24  ;;  %v4475_v8 = vpop.permute.xlu1 %4474 }
 0x313   :  { %v4490_v13 = vsel %vm701_vm4, %v4473_v54, %v4475_v8  ;;  %26892 = vmatprep.subr.msk.mxu1 %vm1238_vm8, %v4475_v8  ;;  %5256 = vmatprep.mubr.f32.mxu0 %v35101_v30 }
 0x314   :  { %26893 = vmatpush1.msk.msra.mxu1 %vm1238_vm8, %v4490_v13 }
 0x315   :  { %26894 = vmatmul.mubr.msk.f32.vlgmr.msra.gmra.mxu1 %vm1235_vm9, %v29744_v24 }
 0x316   :  { %v5112_v59 = vpop.permute.xlu0 %5111  ;;  %v5116_v11 = vpop.permute.xlu1 %5115  ;;  %5327 = vmatprep.mubr.f32.mxu1 %v35101_v30 }
 0x317   :  { %v5143_v20 = vsel %vm817_vm5, %v5112_v59, %v5114_v5  ;;  %v5144_v58 = vsel %vm817_vm5, %v5114_v5, %v5116_v11 }
 0x318   :  { %26895 = vmatprep.subr.msk.mxu0 %vm1238_vm8, %v5144_v58 }
 0x319   :  { %26896 = vmatpush1.msk.msra.mxu0 %vm1238_vm8, %v5143_v20 }
 0x31a   :  { %v5120_v3 = vpop.permute.xlu0 %5119 }
 0x31b   :  { %v5118_v4 = vpop.permute.xlu1 %5117 }
 0x31c   :  { %v5145_v27 = vsel %vm817_vm5, %v5116_v11, %v5118_v4  ;;  %v5146_v57 = vsel %vm817_vm5, %v5118_v4, %v5120_v3  ;;  %v1479_v1 = vpop.f32.mrf.mxu0 }
 0x31d   :  { %26898 = vmatprep.subr.msk.mxu1 %vm1238_vm8, %v5146_v57 }
 0x31e   :  { %26899 = vmatpush1.msk.msra.mxu1 %vm1238_vm8, %v5145_v27  ;;  %v5122_v39 = vpop.permute.xlu0 %5121  ;;  %v29876_v48 = vpop.f32.mrf.mxu0 }
 0x31f   :  { %v5110_v49 = vpop.permute.xlu1 %5109  ;;  %v5147_v16 = vsel %vm817_vm5, %v5120_v3, %v5122_v39 }
 0x320   :  { %26897 = vmatmul.mubr.msk.f32.vlgmr.msra.gmra.mxu0 %vm1235_vm9, %v5110_v49  ;;  %26900 = vmatmul.mubr.msk.f32.vlgmr.msra.gmra.mxu1 %vm1235_vm9, %v5110_v49 }
 0x321   :  { %5398 = vmatprep.mubr.f32.mxu0 %v35101_v30  ;;  %5469 = vmatprep.mubr.f32.mxu1 %v35101_v30 }
 0x322   :  { %v5126_v26 = vpop.permute.xlu0 %5125 }
 0x323   :  { %v5124_v40 = vpop.permute.xlu1 %5123 }
 0x324   :  { %v5148_v29 = vsel %vm817_vm5, %v5122_v39, %v5124_v40  ;;  %v5149_v55 = vsel %vm817_vm5, %v5124_v40, %v5126_v26 }
 0x325   :  { %26901 = vmatprep.subr.msk.mxu0 %vm1238_vm8, %v5148_v29 }
 0x326   :  { %26902 = vmatpush1.msk.msra.mxu0 %vm1238_vm8, %v5147_v16  ;;  %v5130_v45 = vpop.permute.xlu0 %5129 }
 0x327   :  { %26903 = vmatmul.mubr.msk.f32.vlgmr.msra.gmra.mxu0 %vm1235_vm9, %v5110_v49  ;;  %v5128_v9 = vpop.permute.xlu1 %5127 }
 0x328   :  { %v5150_v23 = vsel %vm817_vm5, %v5126_v26, %v5128_v9  ;;  %5540 = vmatprep.mubr.f32.mxu0 %v35101_v30  ;;  %v5151_v41 = vsel %vm817_vm5, %v5128_v9, %v5130_v45 }
 0x329   :  { %26904 = vmatprep.subr.msk.mxu1 %vm1238_vm8, %v5150_v23 }
 0x32a   :  { %26905 = vmatpush1.msk.msra.mxu1 %vm1238_vm8, %v5149_v55  ;;  %v5134_v7 = vpop.permute.xlu0 %5133 }
 0x32b   :  { %26906 = vmatmul.mubr.msk.f32.vlgmr.msra.gmra.mxu1 %vm1235_vm9, %v5110_v49  ;;  %v5132_v37 = vpop.permute.xlu1 %5131 }
 0x32c   :  { %v5152_v34 = vsel %vm817_vm5, %v5130_v45, %v5132_v37  ;;  %5611 = vmatprep.mubr.f32.mxu1 %v35101_v30  ;;  %v5153_v2 = vsel %vm817_vm5, %v5132_v37, %v5134_v7  ;;  %v29873_v60 = vpop.f32.mrf.mxu1 }
 0x32d   :  { %26907 = vmatprep.subr.msk.mxu0 %vm1238_vm8, %v5152_v34 }
 0x32e   :  { %26908 = vmatpush1.msk.msra.mxu0 %vm1238_vm8, %v5151_v41  ;;  %v5138_v10 = vpop.permute.xlu0 %5137  ;;  %v29885_v18 = vpop.f32.mrf.mxu1 }
 0x32f   :  { %26909 = vmatmul.mubr.msk.f32.vlgmr.msra.gmra.mxu0 %vm1235_vm9, %v5110_v49  ;;  %v5136_v33 = vpop.permute.xlu1 %5135 }
 0x330   :  { %v5154_v0 = vsel %vm817_vm5, %v5134_v7, %v5136_v33  ;;  %5682 = vmatprep.mubr.f32.mxu0 %v35101_v30  ;;  %v5155_v62 = vsel %vm817_vm5, %v5136_v33, %v5138_v10 }
 0x331   :  { %26910 = vmatprep.subr.msk.mxu1 %vm1238_vm8, %v5154_v0 }
 0x332   :  { %26911 = vmatpush1.msk.msra.mxu1 %vm1238_vm8, %v5153_v2  ;;  %v5142_v22 = vpop.permute.xlu0 %5141 }
 0x333   :  { %26912 = vmatmul.mubr.msk.f32.vlgmr.msra.gmra.mxu1 %vm1235_vm9, %v5110_v49  ;;  %v5140_v32 = vpop.permute.xlu1 %5139  ;;  %26916 = vmatprep.subr.msk.mxu1 %vm1238_vm8, %v5142_v22 }
 0x334   :  { %v5157_v63 = vsel %vm817_vm5, %v5140_v32, %v5142_v22  ;;  %v5156_v52 = vsel %vm817_vm5, %v5138_v10, %v5140_v32  ;;  %5753 = vmatprep.mubr.f32.mxu1 %v35101_v30 }
 0x335   :  { %26913 = vmatprep.subr.msk.mxu0 %vm1238_vm8, %v5156_v52  ;;  %26917 = vmatpush1.msk.msra.mxu1 %vm1238_vm8, %v5157_v63 }
 0x336   :  { %26914 = vmatpush1.msk.msra.mxu0 %vm1238_vm8, %v5155_v62  ;;  %v5783_v38 = vpop.permute.xlu0 %5782 }
 0x337   :  { %26915 = vmatmul.mubr.msk.f32.vlgmr.msra.gmra.mxu0 %vm1235_vm9, %v5110_v49  ;;  %26918 = vmatmul.mubr.msk.f32.vlgmr.msra.gmra.mxu1 %vm1235_vm9, %v5110_v49  ;;  %v5781_v24 = vpop.permute.xlu1 %5780 }
 0x338   :  { %v5811_v56 = vsel %vm933_vm6, %v5781_v24, %v5783_v38  ;;  %5923 = vmatprep.mubr.f32.mxu0 %v35101_v30  ;;  %5994 = vmatprep.mubr.f32.mxu1 %v35101_v30  ;;  %v29881_v42 = vpop.f32.mrf.mxu0 }
 0x339   :  { %26919 = vmatprep.subr.msk.mxu0 %vm1238_vm8, %v5811_v56 }
 0x33a   :  { %v5785_v14 = vpop.permute.xlu0 %5784  ;;  %v29894_v19 = vpop.f32.mrf.mxu0 }
 0x33b   :  { %v5779_v50 = vpop.permute.xlu1 %5778  ;;  %v5812_v17 = vsel %vm933_vm6, %v5783_v38, %v5785_v14 }
 0x33c   :  { %v5810_v46 = vsel %vm933_vm6, %v5779_v50, %v5781_v24 }
 0x33d   :  { %26920 = vmatpush1.msk.msra.mxu0 %vm1238_vm8, %v5810_v46 }
 0x33e   :  { %v29879_v61 = vpop.permute.xlu0 %5776 }
 0x33f   :  { %v5787_v53 = vpop.permute.xlu1 %5786  ;;  %26921 = vmatmul.mubr.msk.f32.vlgmr.msra.gmra.mxu0 %vm1235_vm9, %v29879_v61 }
 0x340   :  { %v5813_v36 = vsel %vm933_vm6, %v5785_v14, %v5787_v53  ;;  %6065 = vmatprep.mubr.f32.mxu0 %v35101_v30  ;;  %v29892_v44 = vpop.f32.mrf.mxu1 }
 0x341   :  { %26922 = vmatprep.subr.msk.mxu1 %vm1238_vm8, %v5813_v36 }
 0x342   :  { %26923 = vmatpush1.msk.msra.mxu1 %vm1238_vm8, %v5812_v17  ;;  %v5791_v31 = vpop.permute.xlu0 %5790  ;;  %v29905_v28 = vpop.f32.mrf.mxu1 }
 0x343   :  { %26924 = vmatmul.mubr.msk.f32.vlgmr.msra.gmra.mxu1 %vm1235_vm9, %v29879_v61  ;;  %v5789_v21 = vpop.permute.xlu1 %5788  ;;  %35102 = vst [vmem:[#allocation27_spill] sm:$0xff] %v29905_v28 }
 0x344   :  { %v5814_v35 = vsel %vm933_vm6, %v5787_v53, %v5789_v21  ;;  %v5815_v15 = vsel %vm933_vm6, %v5789_v21, %v5791_v31  ;;  %6136 = vmatprep.mubr.f32.mxu1 %v35101_v30 }
 0x345   :  { %26925 = vmatprep.subr.msk.mxu0 %vm1238_vm8, %v5815_v15  ;;  %v29902_v54 = vpop.f32.mrf.mxu0 }
 0x346   :  { %26926 = vmatpush1.msk.msra.mxu0 %vm1238_vm8, %v5814_v35  ;;  %v5795_v47 = vpop.permute.xlu0 %5794 }
 0x347   :  { %26927 = vmatmul.mubr.msk.f32.vlgmr.msra.gmra.mxu0 %vm1235_vm9, %v29879_v61  ;;  %v5793_v6 = vpop.permute.xlu1 %5792  ;;  %v29909_v5 = vpop.f32.mrf.mxu0 }
 0x348   :  { %35103 = vst [vmem:[#allocation30_spill] sm:$0xff] %v29909_v5  ;;  %v5816_v8 = vsel %vm933_vm6, %v5791_v31, %v5793_v6  ;;  %v5817_v13 = vsel %vm933_vm6, %v5793_v6, %v5795_v47  ;;  %6207 = vmatprep.mubr.f32.mxu0 %v35101_v30 }
 0x349   :  { %26928 = vmatprep.subr.msk.mxu1 %vm1238_vm8, %v5817_v13  ;;  %v1834_v59 = vpop.f32.mrf.mxu1 }
 0x34a   :  { %26929 = vmatpush1.msk.msra.mxu1 %vm1238_vm8, %v5816_v8  ;;  %v5799_v11 = vpop.permute.xlu0 %5798  ;;  %v1939_v20 = vpop.f32.mrf.mxu0 }
 0x34b   :  { %26930 = vmatmul.mubr.msk.f32.vlgmr.msra.gmra.mxu1 %vm1235_vm9, %v29879_v61  ;;  %v5797_v58 = vpop.permute.xlu1 %5796  ;;  %v1940_v3 = vadd.f32 %v1939_v20, %v29849_v43  ;;  %v29919_v4 = vpop.f32.mrf.mxu1 }
 0x34c   :  { %35104 = vst [vmem:[#allocation7_spill] sm:$0xff] %v29919_v4  ;;  %v5818_v27 = vsel %vm933_vm6, %v5795_v47, %v5797_v58  ;;  %v5819_v57 = vsel %vm933_vm6, %v5797_v58, %v5799_v11  ;;  %v29923_v39 = vpop.f32.mrf.mxu0  ;;  %6278 = vmatprep.mubr.f32.mxu1 %v35101_v30 }
 0x34d   :  { %26931 = vmatprep.subr.msk.mxu0 %vm1238_vm8, %v5819_v57 }
 0x34e   :  { %26932 = vmatpush1.msk.msra.mxu0 %vm1238_vm8, %v5818_v27  ;;  %v5803_v49 = vpop.permute.xlu0 %5802 }
 0x34f   :  { %26933 = vmatmul.mubr.msk.f32.vlgmr.msra.gmra.mxu0 %vm1235_vm9, %v29879_v61  ;;  %v5801_v26 = vpop.permute.xlu1 %5800  ;;  %v2010_v40 = vpop.f32.mrf.mxu1 }
 0x350   :  { %v5820_v29 = vsel %vm933_vm6, %v5799_v11, %v5801_v26  ;;  %v5821_v16 = vsel %vm933_vm6, %v5801_v26, %v5803_v49  ;;  %v2081_v45 = vpop.f32.mrf.mxu0  ;;  %6349 = vmatprep.mubr.f32.mxu0 %v35101_v30 }
 0x351   :  { %26934 = vmatprep.subr.msk.mxu1 %vm1238_vm8, %v5821_v16  ;;  %v2082_v9 = vadd.f32 %v2081_v45, %v1479_v1  ;;  %v29934_v23 = vpop.f32.mrf.mxu1 }
 0x352   :  { %26935 = vmatpush1.msk.msra.mxu1 %vm1238_vm8, %v5820_v29  ;;  %v5807_v55 = vpop.permute.xlu0 %5806  ;;  %v29937_v7 = vpop.f32.mrf.mxu0 }
 0x353   :  { %26936 = vmatmul.mubr.msk.f32.vlgmr.msra.gmra.mxu1 %vm1235_vm9, %v29879_v61  ;;  %v5805_v37 = vpop.permute.xlu1 %5804 }
 0x354   :  { %v5822_v34 = vsel %vm933_vm6, %v5803_v49, %v5805_v37  ;;  %v5823_v41 = vsel %vm933_vm6, %v5805_v37, %v5807_v55  ;;  %v2152_v10 = vpop.f32.mrf.mxu1  ;;  %v2223_v33 = vpop.f32.mrf.mxu0  ;;  %6420 = vmatprep.mubr.f32.mxu1 %v35101_v30 }
 0x355   :  { %26937 = vmatprep.subr.msk.mxu0 %vm1238_vm8, %v5823_v41  ;;  %v2153_v0 = vadd.f32 %v2152_v10, %v29873_v60  ;;  %v2224_v2 = vadd.f32 %v2223_v33, %v29881_v42 }
 0x356   :  { %26938 = vmatpush1.msk.msra.mxu0 %vm1238_vm8, %v5822_v34  ;;  %v6448_v43 = vpop.permute.xlu0 %6447  ;;  %v29948_v22 = vpop.f32.mrf.mxu1 }
 0x357   :  { %26939 = vmatmul.mubr.msk.f32.vlgmr.msra.gmra.mxu0 %vm1235_vm9, %v29879_v61  ;;  %v5809_v32 = vpop.permute.xlu1 %5808  ;;  %v29952_v63 = vpop.f32.mrf.mxu0 }
 0x358   :  { %v5824_v52 = vsel %vm933_vm6, %v5807_v55, %v5809_v32  ;;  %26940 = vmatprep.subr.msk.mxu1 %vm1238_vm8, %v5809_v32  ;;  %6590 = vmatprep.mubr.f32.mxu0 %v35101_v30 }
 0x359   :  { %26941 = vmatpush1.msk.msra.mxu1 %vm1238_vm8, %v5824_v52  ;;  %v2294_v62 = vpop.f32.mrf.mxu1  ;;  %v2365_v38 = vpop.f32.mrf.mxu0 }
 0x35a   :  { %v2295_v24 = vadd.f32 %v2294_v62, %v29892_v44  ;;  %26942 = vmatmul.mubr.msk.f32.vlgmr.msra.gmra.mxu1 %vm1235_vm9, %v29879_v61  ;;  %v6446_v56 = vpop.permute.xlu0 %6445  ;;  %v2366_v1 = vadd.f32 %v2365_v38, %v29902_v54  ;;  %v2011_v54 = vadd.f32 %v2010_v40, %v29854_v12 }
 0x35b   :  { %v6477_v14 = vsel %vm1049_vm7, %v6446_v56, %v6448_v43  ;;  %v6450_v50 = vpop.permute.xlu1 %6449  ;;  %v29963_v60 = vpop.f32.mrf.mxu1  ;;  %6661 = vmatprep.mubr.f32.mxu1 %v35101_v30 }
 0x35c   :  { %35105 = vst [vmem:[#allocation8_spill] sm:$0xff] %v29963_v60  ;;  %v29966_v46 = vpop.f32.mrf.mxu0  ;;  %v6478_v42 = vsel %vm1049_vm7, %v6448_v43, %v6450_v50 }
 0x35d   :  { %35106 = vst [vmem:[#allocation9_spill] sm:$0xff] %v29966_v46  ;;  %26943 = vmatprep.subr.msk.mxu0 %vm1238_vm8, %v6478_v42  ;;  %v2436_v53 = vpop.f32.mrf.mxu1 }
 0x35e   :  { %v2437_v36 = vadd.f32 %v2436_v53, %v1834_v59  ;;  %26944 = vmatpush1.msk.msra.mxu0 %vm1238_vm8, %v6477_v14  ;;  %v6454_v61 = vpop.permute.xlu0 %6453 }
 0x35f   :  { %v2590_v17 = vpop.f32.mrf.mxu0  ;;  %v6452_v31 = vpop.permute.xlu1 %6451 }
 0x360   :  { %v3092_v44 = vadd.f32 %v2590_v17, %v1940_v3  ;;  %v6479_v21 = vsel %vm1049_vm7, %v6450_v50, %v6452_v31  ;;  %v29972_v35 = vpop.f32.mrf.mxu1  ;;  %v6480_v15 = vsel %vm1049_vm7, %v6452_v31, %v6454_v61 }
 0x361   :  { %35107 = vst [vmem:[#allocation10_spill] sm:$0xff] %v29972_v35  ;;  %v29976_v47 = vpop.f32.mrf.mxu0  ;;  %26946 = vmatprep.subr.msk.mxu1 %vm1238_vm8, %v6480_v15 }
 0x362   :  { %v2661_v6 = vpop.f32.mrf.mxu1  ;;  %26947 = vmatpush1.msk.msra.mxu1 %vm1238_vm8, %v6479_v21  ;;  %v6456_v8 = vpop.permute.xlu0 %6455 }
 0x363   :  { %v3094_v13 = vadd.f32 %v2661_v6, %v2011_v54  ;;  %v2732_v59 = vpop.f32.mrf.mxu0  ;;  %v29980_v11 = vpop.permute.xlu1 %6443  ;;  %v6481_v16 = vsel %vm1049_vm7, %v6454_v61, %v6456_v8 }
 0x364   :  { %v29982_v20 = vadd.f32 %v2732_v59, %v2082_v9  ;;  %v29984_v58 = vpop.f32.mrf.mxu1  ;;  %26945 = vmatmul.mubr.msk.f32.vlgmr.msra.gmra.mxu0 %vm1235_vm9, %v29980_v11  ;;  %26948 = vmatmul.mubr.msk.f32.vlgmr.msra.gmra.mxu1 %vm1235_vm9, %v29980_v11 }
 0x365   :  { %v29990_v12 = vpop.f32.mrf.mxu0  ;;  %6732 = vmatprep.mubr.f32.mxu0 %v35101_v30  ;;  %6803 = vmatprep.mubr.f32.mxu1 %v35101_v30 }
 0x366   :  { %v2803_v3 = vpop.f32.mrf.mxu1  ;;  %v6460_v27 = vpop.permute.xlu0 %6459 }
 0x367   :  { %v29994_v57 = vadd.f32 %v2803_v3, %v2153_v0  ;;  %v6458_v49 = vpop.permute.xlu1 %6457 }
 0x368   :  { %v2874_v26 = vpop.f32.mrf.mxu0  ;;  %v29996_v40 = vpop.f32.mrf.mxu1  ;;  %v6482_v29 = vsel %vm1049_vm7, %v6456_v8, %v6458_v49  ;;  %v6483_v10 = vsel %vm1049_vm7, %v6458_v49, %v6460_v27 }
 0x369   :  { %v30000_v45 = vadd.f32 %v2874_v26, %v2224_v2  ;;  %26949 = vmatprep.subr.msk.mxu0 %vm1238_vm8, %v6482_v29 }
 0x36a   :  { %26950 = vmatpush1.msk.msra.mxu0 %vm1238_vm8, %v6481_v16  ;;  %v6464_v9 = vpop.permute.xlu0 %6463  ;;  %v30009_v33 = vpop.f32.mrf.mxu0 }
 0x36b   :  { %v2945_v55 = vpop.f32.mrf.mxu1  ;;  %26951 = vmatmul.mubr.msk.f32.vlgmr.msra.gmra.mxu0 %vm1235_vm9, %v29980_v11  ;;  %v6462_v37 = vpop.permute.xlu1 %6461 }
 0x36c   :  { %v3102_v34 = vadd.f32 %v2945_v55, %v2295_v24  ;;  %v6484_v41 = vsel %vm1049_vm7, %v6460_v27, %v6462_v37  ;;  %6874 = vmatprep.mubr.f32.mxu0 %v35101_v30  ;;  %v6485_v14 = vsel %vm1049_vm7, %v6462_v37, %v6464_v9 }
 0x36d   :  { %v30011_v0 = vpop.f32.mrf.mxu1  ;;  %26952 = vmatprep.subr.msk.mxu1 %vm1238_vm8, %v6484_v41 }
 0x36e   :  { %35108 = vst [vmem:[#allocation44_spill] sm:$0xff] %v30011_v0  ;;  %26953 = vmatpush1.msk.msra.mxu1 %vm1238_vm8, %v6483_v10  ;;  %v6468_v2 = vpop.permute.xlu0 %6467 }
 0x36f   :  { %v3016_v43 = vpop.f32.mrf.mxu0  ;;  %v3087_v32 = vpop.f32.mrf.mxu1  ;;  %26954 = vmatmul.mubr.msk.f32.vlgmr.msra.gmra.mxu1 %vm1235_vm9, %v29980_v11 }
 0x370   :  { %v3104_v52 = vadd.f32 %v3016_v43, %v2366_v1  ;;  %v3106_v62 = vadd.f32 %v3087_v32, %v2437_v36  ;;  %v6466_v38 = vpop.permute.xlu1 %6465  ;;  %6945 = vmatprep.mubr.f32.mxu1 %v35101_v30 }
 0x371   :  { %v30018_v24 = vpop.f32.mrf.mxu0  ;;  %v6486_v56 = vsel %vm1049_vm7, %v6464_v9, %v6466_v38  ;;  %v30024_v53 = vpop.f32.mrf.mxu1  ;;  %v6487_v17 = vsel %vm1049_vm7, %v6466_v38, %v6468_v2 }
 0x372   :  { %35109 = vst [vmem:[#allocation14_spill] sm:$0xff] %v30018_v24  ;;  %26955 = vmatprep.subr.msk.mxu0 %vm1238_vm8, %v6486_v56  ;;  %v6472_v50 = vpop.permute.xlu0 %6471  ;;  %35110 = vst [vmem:[#allocation11_spill] sm:$0xff] %v30024_v53 }
 0x373   :  { %26956 = vmatpush1.msk.msra.mxu0 %vm1238_vm8, %v6485_v14  ;;  %v3257_v42 = vpop.f32.mrf.mxu0 }
 0x374   :  { %26957 = vmatmul.mubr.msk.f32.vlgmr.msra.gmra.mxu0 %vm1235_vm9, %v29980_v11  ;;  %v6470_v1 = vpop.permute.xlu1 %6469  ;;  %v30028_v36 = vadd.f32 %v3257_v42, %v3092_v44 }
 0x375   :  { %v6488_v61 = vsel %vm1049_vm7, %v6468_v2, %v6470_v1  ;;  %7016 = vmatprep.mubr.f32.mxu0 %v35101_v30  ;;  %v3328_v21 = vpop.f32.mrf.mxu1  ;;  %v30040_v44 = vpop.f32.mrf.mxu0  ;;  %v6489_v59 = vsel %vm1049_vm7, %v6470_v1, %v6472_v50 }
 0x376   :  { %26958 = vmatprep.subr.msk.mxu1 %vm1238_vm8, %v6488_v61  ;;  %v6476_v31 = vpop.permute.xlu0 %6475  ;;  %v30035_v15 = vadd.f32 %v3328_v21, %v3094_v13 }
 0x377   :  { %26959 = vmatpush1.msk.msra.mxu1 %vm1238_vm8, %v6487_v17  ;;  %v30054_v27 = vpop.f32.mrf.mxu1 }
 0x378   :  { %26960 = vmatmul.mubr.msk.f32.vlgmr.msra.gmra.mxu1 %vm1235_vm9, %v29980_v11  ;;  %v6474_v54 = vpop.permute.xlu1 %6473  ;;  %26964 = vmatprep.subr.msk.mxu1 %vm1238_vm8, %v6476_v31 }
 0x379   :  { %v6491_v6 = vsel %vm1049_vm7, %v6474_v54, %v6476_v31  ;;  %v6490_v8 = vsel %vm1049_vm7, %v6472_v50, %v6474_v54  ;;  %7087 = vmatprep.mubr.f32.mxu1 %v35101_v30  ;;  %v3399_v13 = vpop.f32.mrf.mxu0 }
 0x37a   :  { %26961 = vmatprep.subr.msk.mxu0 %vm1238_vm8, %v6490_v8  ;;  %26965 = vmatpush1.msk.msra.mxu1 %vm1238_vm8, %v6491_v6  ;;  %v3763_v3 = vadd.f32 %v3399_v13, %v29982_v20 }
 0x37b   :  { %26962 = vmatpush1.msk.msra.mxu0 %vm1238_vm8, %v6489_v59  ;;  %v30059_v29 = vpop.f32.mrf.mxu0 }
 0x37c   :  { %26963 = vmatmul.mubr.msk.f32.vlgmr.msra.gmra.mxu0 %vm1235_vm9, %v29980_v11  ;;  %26966 = vmatmul.mubr.msk.f32.vlgmr.msra.gmra.mxu1 %vm1235_vm9, %v29980_v11 }
 0x37d   :  { %7345 = vmatprep.mubr.f32.mxu0 %v35101_v30  ;;  %7416 = vmatprep.mubr.f32.mxu1 %v35101_v30 }
 0x37e   :  { %v3470_v49 = vpop.f32.mrf.mxu1 }
 0x37f   :  { %v3765_v26 = vadd.f32 %v3470_v49, %v29994_v57 }
 0x380   :  { %v30062_v9 = vpop.f32.mrf.mxu1 }
 0x382   :  { %v3541_v16 = vpop.f32.mrf.mxu0 }
 0x383   :  { %v3767_v20 = vadd.f32 %v3541_v16, %v30000_v45 }
 0x384   :  { %v30064_v41 = vpop.f32.mrf.mxu0 }
 0x385   :  { %35111 = vst [vmem:[#allocation15_spill] sm:$0xff] %v30064_v41 }
 0x386   :  { %v3612_v55 = vpop.f32.mrf.mxu1 }
 0x387   :  { %v3769_v37 = vadd.f32 %v3612_v55, %v3102_v34  ;;  %v30081_v34 = vld [vmem:[%s34877_s5] sm:$0xf] }
 0x388   :  { %v30066_v10 = vpop.f32.mrf.mxu1  ;;  %35115 = vst [vmem:[#allocation5_spill] sm:$0xff] %v30081_v34  ;;  %7182 = vrot.lane.b32.xlu1 %v30081_v34, %s27956_s23  ;;  %8451 = vrot.lane.b32.xlu0 %v30081_v34, %s27958_s0 }
 0x389   :  { %35112 = vst [vmem:[#allocation12_spill] sm:$0xff] %v30066_v10 }
 0x38a   :  { %v3683_v11 = vpop.f32.mrf.mxu0 }
 0x38b   :  { %v3771_v2 = vadd.f32 %v3683_v11, %v3104_v52 }
 0x38c   :  { %v30068_v38 = vpop.f32.mrf.mxu0  ;;  %9118 = vrot.lane.b32.xlu1 %v30081_v34, %s27959_s30  ;;  %9785 = vrot.lane.b32.xlu0 %v30081_v34, %s27950_s3 }
 0x38d   :  { %v3754_v43 = vpop.f32.mrf.mxu1  ;;  %35113 = vst [vmem:[#allocation17_spill] sm:$0xff] %v30068_v38 }
 0x38e   :  { %v3773_v32 = vadd.f32 %v3754_v43, %v3106_v62 }
 0x38f   :  { %v30072_v56 = vpop.f32.mrf.mxu1 }
 0x390   :  { %35114 = vst [vmem:[#allocation13_spill] sm:$0xff] %v30072_v56  ;;  %10452 = vrot.lane.b32.xlu1 %v30081_v34, %s27960_s20 }
 0x397   :  { %v30070_v57 = vpop.f32.mrf.mxu0  ;;  %v30074_v14 = vpop.f32.mrf.mxu1 }
 0x398   :  { %v4426_v28 = vadd.f32 %v30070_v57, %v30028_v36  ;;  %v2013_v36 = vadd.f32 %v29934_v23, %v29867_v25 }
 0x399   :  { %v30076_v45 = vpop.f32.mrf.mxu0  ;;  %v30087_v62 = vpop.f32.mrf.mxu1 }
 0x39e   :  { %v4066_v50 = vpop.f32.mrf.mxu0 }
 0x39f   :  { %v4430_v52 = vadd.f32 %v4066_v50, %v3763_v3 }
 0x3a0   :  { %v30093_v61 = vpop.f32.mrf.mxu0 }
 0x3a2   :  { %v4137_v42 = vpop.f32.mrf.mxu1 }
 0x3a3   :  { %v4432_v1 = vadd.f32 %v4137_v42, %v3765_v26 }
 0x3a4   :  { %v30097_v21 = vpop.f32.mrf.mxu1 }
 0x3a6   :  { %v4208_v17 = vpop.f32.mrf.mxu0 }
 0x3a7   :  { %v4434_v31 = vadd.f32 %v4208_v17, %v3767_v20 }
 0x3a8   :  { %v30101_v59 = vpop.f32.mrf.mxu0 }
 0x3a9   :  { %35117 = vst [vmem:[#allocation20_spill] sm:$0xff] %v30101_v59 }
 0x3aa   :  { %v4279_v54 = vpop.f32.mrf.mxu1 }
 0x3ab   :  { %v4436_v6 = vadd.f32 %v4279_v54, %v3769_v37 }
 0x3ac   :  { %v30099_v8 = vpop.f32.mrf.mxu1 }
 0x3ad   :  { %35116 = vst [vmem:[#allocation18_spill] sm:$0xff] %v30099_v8 }
 0x3ae   :  { %v4421_v13 = vpop.f32.mrf.mxu1 }
 0x3af   :  { %v4350_v3 = vpop.f32.mrf.mxu0  ;;  %v4440_v49 = vadd.f32 %v4421_v13, %v3773_v32 }
 0x3b0   :  { %v4438_v16 = vadd.f32 %v4350_v3, %v3771_v2  ;;  %v30107_v11 = vpop.f32.mrf.mxu1 }
 0x3b1   :  { %v30103_v26 = vpop.f32.mrf.mxu0  ;;  %35119 = vst [vmem:[#allocation23_spill] sm:$0xff] %v30107_v11 }
 0x3b2   :  { %35118 = vst [vmem:[#allocation21_spill] sm:$0xff] %v30103_v26 }
 0x3b6   :  { %v30105_v55 = vpop.f32.mrf.mxu0 }
 0x3b8   :  { %v30109_v43 = vpop.f32.mrf.mxu0 }
 0x3ba   :  { %v30111_v20 = vpop.f32.mrf.mxu1 }
 0x3bc   :  { %v30113_v42 = vpop.f32.mrf.mxu1 }
 0x3be   :  { %v4733_v50 = vpop.f32.mrf.mxu0 }
 0x3bf   :  { %v5097_v37 = vadd.f32 %v4733_v50, %v4430_v52 }
 0x3c0   :  { %v30115_v34 = vpop.f32.mrf.mxu0 }
 0x3c3   :  { %v4804_v17 = vpop.f32.mrf.mxu1 }
 0x3c4   :  { %v5099_v54 = vadd.f32 %v4804_v17, %v4432_v1 }
 0x3c5   :  { %v30117_v13 = vpop.f32.mrf.mxu1 }
 0x3c8   :  { %v4875_v32 = vpop.f32.mrf.mxu0 }
 0x3c9   :  { %v5101_v2 = vadd.f32 %v4875_v32, %v4434_v31 }
 0x3ca   :  { %v30119_v56 = vpop.f32.mrf.mxu0 }
 0x3cb   :  { %35120 = vst [vmem:[#allocation24_spill] sm:$0xff] %v30119_v56 }
 0x3cd   :  { %v4946_v3 = vpop.f32.mrf.mxu1 }
 0x3ce   :  { %v5103_v30 = vadd.f32 %v4946_v3, %v4436_v6 }
 0x3cf   :  { %v30121_v26 = vpop.f32.mrf.mxu1 }
 0x3d0   :  { %35121 = vst [vmem:[#allocation6_spill] sm:$0xff] %v30121_v26 }
 0x3d2   :  { %v5017_v11 = vpop.f32.mrf.mxu0 }
 0x3d3   :  { %v5105_v53 = vadd.f32 %v5017_v11, %v4438_v16 }
 0x3d4   :  { %v30123_v50 = vpop.f32.mrf.mxu0 }
 0x3d5   :  { %v5088_v38 = vpop.f32.mrf.mxu1  ;;  %35122 = vst [vmem:[#allocation25_spill] sm:$0xff] %v30123_v50 }
 0x3d6   :  { %v5107_v52 = vadd.f32 %v5088_v38, %v4440_v49 }
 0x3d7   :  { %v30125_v1 = vpop.f32.mrf.mxu1 }
 0x3d8   :  { %35123 = vst [vmem:[#allocation26_spill] sm:$0xff] %v30125_v1 }
 0x3e0   :  { %v5258_v35 = vpop.f32.mrf.mxu0  ;;  %v5329_v17 = vpop.f32.mrf.mxu1 }
 0x3e2   :  { %v30127_v4 = vpop.f32.mrf.mxu0  ;;  %v30131_v6 = vpop.f32.mrf.mxu1 }
 0x3e7   :  { %v5400_v31 = vpop.f32.mrf.mxu0 }
 0x3e8   :  { %v30129_v32 = vadd.f32 %v5400_v31, %v5097_v37 }
 0x3e9   :  { %v30135_v46 = vpop.f32.mrf.mxu0 }
 0x3eb   :  { %v5471_v3 = vpop.f32.mrf.mxu1 }
 0x3ec   :  { %v30133_v24 = vadd.f32 %v5471_v3, %v5099_v54 }
 0x3ed   :  { %v30137_v49 = vpop.f32.mrf.mxu1 }
 0x3ef   :  { %v5542_v16 = vpop.f32.mrf.mxu0 }
 0x3f0   :  { %v5768_v38 = vadd.f32 %v5542_v16, %v5101_v2 }
 0x3f1   :  { %v30139_v1 = vpop.f32.mrf.mxu0 }
 0x3f2   :  { %35124 = vst [vmem:[#allocation29_spill] sm:$0xff] %v30139_v1 }
 0x3f3   :  { %v5613_v11 = vpop.f32.mrf.mxu1 }
 0x3f4   :  { %v5770_v50 = vadd.f32 %v5613_v11, %v5103_v30 }
 0x3f5   :  { %v30141_v5 = vpop.f32.mrf.mxu1 }
 0x3f6   :  { %35125 = vst [vmem:[#allocation28_spill] sm:$0xff] %v30141_v5 }
 0x3f7   :  { %v5684_v26 = vpop.f32.mrf.mxu0  ;;  %v5755_v37 = vpop.f32.mrf.mxu1 }
 0x3f8   :  { %v5772_v31 = vadd.f32 %v5684_v26, %v5105_v53  ;;  %v5774_v8 = vadd.f32 %v5755_v37, %v5107_v52 }
 0x3f9   :  { %v30143_v56 = vpop.f32.mrf.mxu0  ;;  %v30145_v3 = vpop.f32.mrf.mxu1 }
 0x3fa   :  { %35126 = vst [vmem:[#allocation35_spill] sm:$0xff] %v30143_v56  ;;  %35127 = vst [vmem:[#allocation38_spill] sm:$0xff] %v30145_v3 }
 0x3ff   :  { %v5925_v54 = vpop.f32.mrf.mxu0 }
 0x401   :  { %v5927_v10 = vpop.f32.mrf.mxu0 }
 0x403   :  { %v5996_v59 = vpop.f32.mrf.mxu1 }
 0x405   :  { %v5998_v16 = vpop.f32.mrf.mxu1 }
 0x407   :  { %v30147_v2 = vpop.f32.mrf.mxu0 }
 0x409   :  { %v30149_v0 = vpop.f32.mrf.mxu0 }
 0x40b   :  { %v30151_v30 = vpop.f32.mrf.mxu1 }
 0x40d   :  { %v30155_v1 = vpop.f32.mrf.mxu1 }
 0x40f   :  { %v6209_v11 = vpop.f32.mrf.mxu0 }
 0x410   :  { %v30153_v5 = vadd.f32 %v6209_v11, %v5768_v38  ;;  %v4428_v38 = vadd.f32 %v30074_v14, %v30035_v15  ;;  %v5093_v11 = vadd.f32 %v30105_v55, %v4426_v28  ;;  %v30183_v55 = vpop.permute.xlu1 %7112 }
 0x411   :  { %v30159_v52 = vpop.f32.mrf.mxu0 }
 0x412   :  { %35129 = vst [vmem:[#allocation42_spill] sm:$0xff] %v30159_v52 }
 0x413   :  { %v6280_v53 = vpop.f32.mrf.mxu1 }
 0x414   :  { %v30157_v26 = vadd.f32 %v6280_v53, %v5770_v50  ;;  %v5095_v50 = vadd.f32 %v30111_v20, %v4428_v38  ;;  %v5760_v53 = vadd.f32 %v5258_v35, %v5093_v11  ;;  %v3095_v35 = vadd.f32 %v29984_v58, %v2013_v36 }
 0x415   :  { %v30161_v3 = vpop.f32.mrf.mxu1  ;;  %v6431_v36 = vadd.f32 %v30147_v2, %v30129_v32 }
 0x416   :  { %35128 = vst [vmem:[#allocation31_spill] sm:$0xff] %v30157_v26  ;;  %35130 = vst [vmem:[#allocation32_spill] sm:$0xff] %v30161_v3  ;;  %v5762_v52 = vadd.f32 %v5329_v17, %v5095_v50 }
 0x417   :  { %v6351_v37 = vpop.f32.mrf.mxu0 }
 0x418   :  { %v30163_v56 = vadd.f32 %v6351_v37, %v5772_v31  ;;  %v6427_v31 = vadd.f32 %v5925_v54, %v5760_v53  ;;  %v6429_v37 = vadd.f32 %v5996_v59, %v5762_v52 }
 0x419   :  { %v30173_v26 = vpop.f32.mrf.mxu0 }
 0x41a   :  { %v6422_v41 = vpop.f32.mrf.mxu1 }
 0x41b   :  { %v30165_v60 = vadd.f32 %v6422_v41, %v5774_v8  ;;  %v1942_v41 = vadd.f32 %v29923_v39, %v29860_v51  ;;  %v3762_v51 = vadd.f32 %v30054_v27, %v3095_v35  ;;  %v2155_v35 = vadd.f32 %v29948_v22, %v29885_v18 }
 0x41c   :  { %v30175_v3 = vpop.f32.mrf.mxu1 }
 0x41d   :  { %v3093_v8 = vadd.f32 %v29976_v47, %v1942_v41  ;;  %v4429_v47 = vadd.f32 %v30087_v62, %v3762_v51 }
 0x41f   :  { %v3760_v17 = vadd.f32 %v30040_v44, %v3093_v8  ;;  %v5096_v27 = vadd.f32 %v30113_v42, %v4429_v47 }
 0x421   :  { %v4427_v23 = vadd.f32 %v30076_v45, %v3760_v17  ;;  %v5763_v45 = vadd.f32 %v30131_v6, %v5096_v27 }
 0x423   :  { %v5094_v44 = vadd.f32 %v30109_v43, %v4427_v23  ;;  %v6430_v50 = vadd.f32 %v5998_v16, %v5763_v45 }
 0x424   :  { %v6592_v57 = vpop.f32.mrf.mxu0  ;;  %v6663_v15 = vpop.f32.mrf.mxu1 }
 0x425   :  { %v7094_v14 = vadd.f32 %v6592_v57, %v6427_v31  ;;  %v7096_v28 = vadd.f32 %v6663_v15, %v6429_v37  ;;  %v5761_v52 = vadd.f32 %v30127_v4, %v5094_v44  ;;  %v6433_v57 = vadd.f32 %v30151_v30, %v30133_v24 }
 0x426   :  { %v6594_v38 = vpop.f32.mrf.mxu0  ;;  %v6665_v62 = vpop.f32.mrf.mxu1  ;;  %v2084_v24 = vadd.f32 %v29937_v7, %v29876_v48 }
 0x427   :  { %v7115_v20 = vadd.f32 %v30183_v55, %v7094_v14  ;;  %v7117_v59 = vadd.f32 %v30183_v55, %v7096_v28  ;;  %v6428_v11 = vadd.f32 %v5927_v10, %v5761_v52  ;;  %v7097_v31 = vadd.f32 %v6665_v62, %v6430_v50  ;;  %v35132_v62 = vld [vmem:[#allocation31_spill] sm:$0xff]  ;;  %v35134_v50 = vld [vmem:[#allocation8_spill] sm:$0xff] }
 0x428   :  { %v3097_v32 = vadd.f32 %v29990_v12, %v2084_v24  ;;  %v2226_v52 = vadd.f32 %v29952_v63, %v29894_v19  ;;  %v35137_v19 = vld [vmem:[#allocation20_spill] sm:$0xff] }
 0x429   :  { %vm7131_vm10 = vcmp.gt.f32.partialorder %v7115_v20, 0.0  ;;  %v7147_v25 = vmul.f32 0.01, %v7115_v20  ;;  %vm7133_vm11 = vcmp.gt.f32.partialorder %v7117_v59, 0.0  ;;  %v7149_v39 = vmul.f32 0.01, %v7117_v59 }
 0x42a   :  { %v7095_v53 = vadd.f32 %v6594_v38, %v6428_v11  ;;  %v7118_v43 = vadd.f32 %v30183_v55, %v7097_v31  ;;  %v3101_v45 = vadd.f32 %v30009_v33, %v2226_v52  ;;  %v35135_v31 = vld [vmem:[#allocation15_spill] sm:$0xff]  ;;  %v35147_v52 = vld [vmem:[#allocation9_spill] sm:$0xff] }
 0x42b   :  { %v30191_v54 = vsel %vm7131_vm10, %v7115_v20, %v7147_v25  ;;  %v30193_v58 = vsel %vm7133_vm11, %v7117_v59, %v7149_v39  ;;  %v6734_v37 = vpop.f32.mrf.mxu0  ;;  %v3764_v20 = vadd.f32 %v30059_v29, %v3097_v32  ;;  %v3099_v59 = vadd.f32 %v29996_v40, %v2155_v35 }
 0x42c   :  { %7204 = vrot.lane.b32.xlu1 %v30193_v58, %s27948_s24  ;;  %7200 = vrot.lane.b32.xlu0 %v30191_v54, %s27948_s24  ;;  %v7116_v4 = vadd.f32 %v30183_v55, %v7095_v53  ;;  %v7150_v42 = vmul.f32 0.01, %v7118_v43  ;;  %vm7134_vm13 = vcmp.gt.f32.partialorder %v7118_v43, 0.0  ;;  %v7098_v15 = vadd.f32 %v6734_v37, %v6431_v36  ;;  %v35138_v37 = vld [vmem:[#allocation12_spill] sm:$0xff] }
 0x42d   :  { %v4431_v48 = vadd.f32 %v30093_v61, %v3764_v20  ;;  %v3766_v17 = vadd.f32 %v30062_v9, %v3099_v59  ;;  %v6736_v29 = vpop.f32.mrf.mxu0  ;;  %v35139_v36 = vld [vmem:[#allocation24_spill] sm:$0xff]  ;;  %v35143_v20 = vld [vmem:[#allocation42_spill] sm:$0xff] }
 0x42e   :  { %v7148_v10 = vmul.f32 0.01, %v7116_v4  ;;  %vm7132_vm12 = vcmp.gt.f32.partialorder %v7116_v4, 0.0  ;;  %v30223_v16 = vsel %vm7134_vm13, %v7118_v43, %v7150_v42  ;;  %v7119_v28 = vadd.f32 %v30183_v55, %v7098_v15  ;;  %v35136_v43 = vld [vmem:[#allocation44_spill] sm:$0xff]  ;;  %v35140_v15 = vld [vmem:[#allocation18_spill] sm:$0xff] }
 0x42f   :  { %v6805_v41 = vpop.f32.mrf.mxu1  ;;  %v5098_v18 = vadd.f32 %v30115_v34, %v4431_v48  ;;  %v4433_v22 = vadd.f32 %v30097_v21, %v3766_v17  ;;  %v35144_v48 = vld [vmem:[#allocation28_spill] sm:$0xff] }
 0x430   :  { %8453 = vrot.lane.b32.xlu1 %v30191_v54, %s27949_s25  ;;  %8457 = vrot.lane.b32.xlu0 %v30193_v58, %s27949_s25  ;;  %v30221_v6 = vsel %vm7132_vm12, %v7116_v4, %v7148_v10  ;;  %v7100_v14 = vadd.f32 %v6805_v41, %v6433_v57  ;;  %v7151_v2 = vmul.f32 0.01, %v7119_v28  ;;  %vm7135_vm14 = vcmp.gt.f32.partialorder %v7119_v28, 0.0 }
 0x431   :  { %v5765_v40 = vadd.f32 %v30135_v46, %v5098_v18  ;;  %v5100_v61 = vadd.f32 %v30117_v13, %v4433_v22  ;;  %v6807_v39 = vpop.f32.mrf.mxu1  ;;  %v3768_v4 = vadd.f32 %v35135_v31, %v3101_v45  ;;  %v35150_v31 = vld [vmem:[#allocation10_spill] sm:$0xff] }
 0x432   :  { %v7121_v8 = vadd.f32 %v30183_v55, %v7100_v14  ;;  %v30259_v7 = vsel %vm7135_vm14, %v7119_v28, %v7151_v2  ;;  %v35141_v28 = vld [vmem:[#allocation29_spill] sm:$0xff] }
 0x433   :  { %v6432_v51 = vadd.f32 %v30149_v0, %v5765_v40  ;;  %v5767_v25 = vadd.f32 %v30137_v49, %v5100_v61  ;;  %v4435_v63 = vadd.f32 %v35137_v19, %v3768_v4  ;;  %v35152_v19 = vld [vmem:[#allocation11_spill] sm:$0xff] }
 0x434   :  { %9124 = vrot.lane.b32.xlu1 %v30193_v58, %s27950_s3  ;;  %9120 = vrot.lane.b32.xlu0 %v30191_v54, %s27950_s3  ;;  %v7153_v30 = vmul.f32 0.01, %v7121_v8  ;;  %vm7137_vm15 = vcmp.gt.f32.partialorder %v7121_v8, 0.0  ;;  %v6876_v23 = vpop.f32.mrf.mxu0 }
 0x435   :  { %v7099_v9 = vadd.f32 %v6736_v29, %v6432_v51  ;;  %v6434_v46 = vadd.f32 %v30155_v1, %v5767_v25  ;;  %v7102_v44 = vadd.f32 %v6876_v23, %v30153_v5  ;;  %v35133_v5 = vld [vmem:[#allocation27_spill] sm:$0xff]  ;;  %v5102_v57 = vadd.f32 %v35139_v36, %v4435_v63  ;;  %v35145_v29 = vld [vmem:[#allocation32_spill] sm:$0xff]  ;;  %v30368_v23 = vpop.permute.xlu1 %7182 }
 0x436   :  { %v30261_v12 = vsel %vm7137_vm15, %v7121_v8, %v7153_v30  ;;  %v2297_v53 = vadd.f32 %v35134_v50, %v35133_v5  ;;  %v6878_v2 = vpop.f32.mrf.mxu0  ;;  %v35142_v30 = vld [vmem:[#allocation6_spill] sm:$0xff] }
 0x437   :  { %v7120_v34 = vadd.f32 %v30183_v55, %v7099_v9  ;;  %v7101_v21 = vadd.f32 %v6807_v39, %v6434_v46  ;;  %v7123_v38 = vadd.f32 %v30183_v55, %v7102_v44  ;;  %v5769_v8 = vadd.f32 %v35141_v28, %v5102_v57  ;;  %v35157_v28 = vld [vmem:[#allocation25_spill] sm:$0xff] }
 0x438   :  { %9787 = vrot.lane.b32.xlu1 %v30191_v54, %s27951_s26  ;;  %9791 = vrot.lane.b32.xlu0 %v30193_v58, %s27951_s26  ;;  %v6947_v27 = vpop.f32.mrf.mxu1  ;;  %v3103_v10 = vadd.f32 %v35136_v43, %v2297_v53  ;;  %v35151_v43 = vld [vmem:[#allocation17_spill] sm:$0xff] }
 0x439   :  { %v7152_v0 = vmul.f32 0.01, %v7120_v34  ;;  %v7122_v13 = vadd.f32 %v30183_v55, %v7101_v21  ;;  %vm7136_vm10 = vcmp.gt.f32.partialorder %v7120_v34, 0.0  ;;  %v7104_v11 = vadd.f32 %v6947_v27, %v35132_v62  ;;  %v30380_v62 = vpop.permute.xlu1 %9118 }
 0x43a   :  { %v7155_v33 = vmul.f32 0.01, %v7123_v38  ;;  %vm7139_vm12 = vcmp.gt.f32.partialorder %v7123_v38, 0.0  ;;  %v3770_v41 = vadd.f32 %v35138_v37, %v3103_v10  ;;  %v6436_v59 = vadd.f32 %v35143_v20, %v5769_v8  ;;  %v6949_v40 = vpop.f32.mrf.mxu1 }
 0x43b   :  { %v30293_v1 = vsel %vm7136_vm10, %v7120_v34, %v7152_v0  ;;  %v7154_v49 = vmul.f32 0.01, %v7122_v13  ;;  %vm7138_vm11 = vcmp.gt.f32.partialorder %v7122_v13, 0.0  ;;  %v7125_v42 = vadd.f32 %v30183_v55, %v7104_v11  ;;  %v35148_v11 = vld [vmem:[#allocation14_spill] sm:$0xff] }
 0x43c   :  { %10458 = vrot.lane.b32.xlu1 %v30193_v58, %s35131_s2  ;;  %10454 = vrot.lane.b32.xlu0 %v30191_v54, %s35131_s2  ;;  %v4437_v14 = vadd.f32 %v35140_v15, %v3770_v41  ;;  %v30329_v24 = vsel %vm7139_vm12, %v7123_v38, %v7155_v33  ;;  %v7103_v18 = vadd.f32 %v6878_v2, %v6436_v59  ;;  %v7018_v21 = vpop.f32.mrf.mxu0  ;;  %v30378_v38 = vpop.permute.xlu0 %8451  ;;  %v35153_v33 = vld [vmem:[#allocation21_spill] sm:$0xff] }
 0x43d   :  { %v30299_v47 = vsel %vm7138_vm11, %v7122_v13, %v7154_v49  ;;  %v7157_v32 = vmul.f32 0.01, %v7125_v42  ;;  %vm7141_vm13 = vcmp.gt.f32.partialorder %v7125_v42, 0.0  ;;  %v7106_v13 = vadd.f32 %v7018_v21, %v30163_v56  ;;  %v7089_v49 = vpop.f32.mrf.mxu1  ;;  %v35146_v56 = vld [vmem:[#allocation30_spill] sm:$0xff]  ;;  %v30401_v57 = vpop.permute.xlu1 %10452  ;;  %v35156_v15 = vld [vmem:[#allocation13_spill] sm:$0xff] }
 0x43e   :  { %v5104_v35 = vadd.f32 %v35142_v30, %v4437_v14  ;;  %v7124_v51 = vadd.f32 %v30183_v55, %v7103_v18  ;;  %v7108_v27 = vadd.f32 %v7089_v49, %v30165_v60  ;;  %v2368_v45 = vadd.f32 %v35147_v52, %v35146_v56  ;;  %v35149_v60 = vld [vmem:[#allocation7_spill] sm:$0xff]  ;;  %35155 = vst [vmem:[#allocation34_spill] sm:$0xff] %v30401_v57  ;;  %v7020_v59 = vpop.f32.mrf.mxu0 }
 0x43f   :  { %v30338_v22 = vsel %vm7141_vm13, %v7125_v42, %v7157_v32  ;;  %v7127_v44 = vadd.f32 %v30183_v55, %v7106_v13  ;;  %v2439_v4 = vadd.f32 %v35150_v31, %v35149_v60  ;;  %v35158_v32 = vld [vmem:[#allocation23_spill] sm:$0xff] }
 0x440   :  { %7206 = vrot.lane.b32.xlu1 %v30223_v16, %s27948_s24  ;;  %7202 = vrot.lane.b32.xlu0 %v30221_v6, %s27948_s24  ;;  %v5771_v17 = vadd.f32 %v35144_v48, %v5104_v35  ;;  %v7156_v9 = vmul.f32 0.01, %v7124_v51  ;;  %vm7140_vm14 = vcmp.gt.f32.partialorder %v7124_v51, 0.0  ;;  %v3105_v5 = vadd.f32 %v35148_v11, %v2368_v45  ;;  %v30399_v36 = vpop.permute.xlu0 %9785  ;;  %v35159_v30 = vld [vmem:[#allocation35_spill] sm:$0xff]  ;;  %v35160_v48 = vld [vmem:[#allocation26_spill] sm:$0xff] }
 0x441   :  { %v7159_v50 = vmul.f32 0.01, %v7127_v44  ;;  %v7129_v53 = vadd.f32 %v30183_v55, %v7108_v27  ;;  %vm7143_vm10 = vcmp.gt.f32.partialorder %v7127_v44, 0.0  ;;  %v3107_v63 = vadd.f32 %v35152_v19, %v2439_v4  ;;  %35154 = vst [vmem:[#allocation33_spill] sm:$0xff] %v30399_v36 }
 0x442   :  { %v6438_v61 = vadd.f32 %v35145_v29, %v5771_v17  ;;  %v30355_v46 = vsel %vm7140_vm14, %v7124_v51, %v7156_v9  ;;  %v3772_v10 = vadd.f32 %v35151_v43, %v3105_v5  ;;  %v7091_v9 = vpop.f32.mrf.mxu1  ;;  %v35164_v19 = vmov 0.0  }
 0x443   :  { %v30393_v37 = vsel %vm7143_vm10, %v7127_v44, %v7159_v50  ;;  %v7161_v41 = vmul.f32 0.01, %v7129_v53  ;;  %vm7145_vm11 = vcmp.gt.f32.partialorder %v7129_v53, 0.0  ;;  %v3774_v14 = vadd.f32 %v35156_v15, %v3107_v63 }
 0x444   :  { %8455 = vrot.lane.b32.xlu1 %v30221_v6, %s27949_s25  ;;  %8459 = vrot.lane.b32.xlu0 %v30223_v16, %s27949_s25  ;;  %v7105_v25 = vadd.f32 %v6949_v40, %v6438_v61  ;;  %v4439_v42 = vadd.f32 %v35153_v33, %v3772_v10  ;;  %v35161_v61 = vld [vmem:[#allocation38_spill] sm:$0xff] }
 0x445   :  { %v4441_v2 = vadd.f32 %v35158_v32, %v3774_v14  ;;  %v30407_v20 = vsel %vm7145_vm11, %v7129_v53, %v7161_v41 }
 0x446   :  { %v7126_v39 = vadd.f32 %v30183_v55, %v7105_v25  ;;  %v5106_v8 = vadd.f32 %v35157_v28, %v4439_v42 }
 0x447   :  { %v5108_v17 = vadd.f32 %v35160_v48, %v4441_v2 }
 0x448   :  { %9126 = vrot.lane.b32.xlu1 %v30223_v16, %s27950_s3  ;;  %9122 = vrot.lane.b32.xlu0 %v30221_v6, %s27950_s3  ;;  %v7158_v34 = vmul.f32 0.01, %v7126_v39  ;;  %vm7142_vm15 = vcmp.gt.f32.partialorder %v7126_v39, 0.0  ;;  %v5773_v35 = vadd.f32 %v35159_v30, %v5106_v8 }
 0x449   :  { %v5775_v51 = vadd.f32 %v35161_v61, %v5108_v17  ;;  %v35170_v61 = vld [vmem:[#allocation5_spill] sm:$0xff] }
 0x44a   :  { %v30361_v0 = vsel %vm7142_vm15, %v7126_v39, %v7158_v34  ;;  %v6440_v18 = vadd.f32 %v30173_v26, %v5773_v35 }
 0x44b   :  { %v6442_v39 = vadd.f32 %v30175_v3, %v5775_v51 }
 0x44c   :  { %9789 = vrot.lane.b32.xlu1 %v30221_v6, %s27951_s26  ;;  %9793 = vrot.lane.b32.xlu0 %v30223_v16, %s27951_s26  ;;  %v7107_v25 = vadd.f32 %v7020_v59, %v6440_v18 }
 0x44d   :  { %v7109_v13 = vadd.f32 %v7091_v9, %v6442_v39 }
 0x44e   :  { %v7128_v26 = vadd.f32 %v30183_v55, %v7107_v25 }
 0x44f   :  { %v7130_v3 = vadd.f32 %v30183_v55, %v7109_v13 }
 0x450   :  { %10460 = vrot.lane.b32.xlu1 %v30223_v16, %s35131_s2  ;;  %10456 = vrot.lane.b32.xlu0 %v30221_v6, %s35131_s2  ;;  %v7160_v27 = vmul.f32 0.01, %v7128_v26  ;;  %vm7144_vm12 = vcmp.gt.f32.partialorder %v7128_v26, 0.0 }
 0x451   :  { %v7162_v11 = vmul.f32 0.01, %v7130_v3  ;;  %vm7146_vm13 = vcmp.gt.f32.partialorder %v7130_v3, 0.0 }
 0x452   :  { %v30445_v45 = vsel %vm7144_vm12, %v7128_v26, %v7160_v27 }
 0x453   :  { %v30455_v50 = vsel %vm7146_vm13, %v7130_v3, %v7162_v11 }
 0x454   :  { %7212 = vrot.lane.b32.xlu1 %v30261_v12, %s27948_s24  ;;  %7208 = vrot.lane.b32.xlu0 %v30259_v7, %s27948_s24 }
 0x458   :  { %8461 = vrot.lane.b32.xlu1 %v30259_v7, %s27949_s25  ;;  %8465 = vrot.lane.b32.xlu0 %v30261_v12, %s27949_s25 }
 0x45c   :  { %9132 = vrot.lane.b32.xlu1 %v30261_v12, %s27950_s3  ;;  %9128 = vrot.lane.b32.xlu0 %v30259_v7, %s27950_s3 }
 0x460   :  { %9795 = vrot.lane.b32.xlu1 %v30259_v7, %s27951_s26  ;;  %9799 = vrot.lane.b32.xlu0 %v30261_v12, %s27951_s26 }
 0x464   :  { %10466 = vrot.lane.b32.xlu1 %v30261_v12, %s35131_s2  ;;  %10462 = vrot.lane.b32.xlu0 %v30259_v7, %s35131_s2 }
 0x468   :  { %8463 = vrot.lane.b32.xlu1 %v30293_v1, %s27949_s25  ;;  %7210 = vrot.lane.b32.xlu0 %v30293_v1, %s27948_s24 }
 0x46c   :  { %8467 = vrot.lane.b32.xlu1 %v30299_v47, %s27949_s25  ;;  %7214 = vrot.lane.b32.xlu0 %v30299_v47, %s27948_s24 }
 0x470   :  { %9797 = vrot.lane.b32.xlu1 %v30293_v1, %s27951_s26  ;;  %9130 = vrot.lane.b32.xlu0 %v30293_v1, %s27950_s3 }
 0x474   :  { %9801 = vrot.lane.b32.xlu1 %v30299_v47, %s27951_s26  ;;  %9134 = vrot.lane.b32.xlu0 %v30299_v47, %s27950_s3 }
 0x478   :  { %7216 = vrot.lane.b32.xlu1 %v30329_v24, %s27948_s24  ;;  %10464 = vrot.lane.b32.xlu0 %v30293_v1, %s35131_s2 }
 0x47c   :  { %7220 = vrot.lane.b32.xlu1 %v30338_v22, %s27948_s24  ;;  %8469 = vrot.lane.b32.xlu0 %v30329_v24, %s27949_s25 }
 0x480   :  { %9136 = vrot.lane.b32.xlu1 %v30329_v24, %s27950_s3  ;;  %8473 = vrot.lane.b32.xlu0 %v30338_v22, %s27949_s25 }
 0x484   :  { %9140 = vrot.lane.b32.xlu1 %v30338_v22, %s27950_s3  ;;  %9803 = vrot.lane.b32.xlu0 %v30329_v24, %s27951_s26 }
 0x488   :  { %8471 = vrot.lane.b32.xlu1 %v30355_v46, %s27949_s25  ;;  %9807 = vrot.lane.b32.xlu0 %v30338_v22, %s27951_s26 }
 0x48c   :  { %8475 = vrot.lane.b32.xlu1 %v30361_v0, %s27949_s25  ;;  %7218 = vrot.lane.b32.xlu0 %v30355_v46, %s27948_s24 }
 0x490   :  { %9805 = vrot.lane.b32.xlu1 %v30355_v46, %s27951_s26  ;;  %7222 = vrot.lane.b32.xlu0 %v30361_v0, %s27948_s24 }
 0x494   :  { %9809 = vrot.lane.b32.xlu1 %v30361_v0, %s27951_s26  ;;  %9138 = vrot.lane.b32.xlu0 %v30355_v46, %s27950_s3 }
 0x498   :  { %7224 = vrot.lane.b32.xlu1 %v30393_v37, %s27948_s24  ;;  %9142 = vrot.lane.b32.xlu0 %v30361_v0, %s27950_s3 }
 0x49c   :  { %7228 = vrot.lane.b32.xlu1 %v30407_v20, %s27948_s24  ;;  %8477 = vrot.lane.b32.xlu0 %v30393_v37, %s27949_s25 }
 0x49e   :  { %v7201_v40 = vpop.permute.xlu0 %7200  ;;  %v30415_v29 = vpop.permute.xlu1 %7204 }
 0x4a0   :  { %9144 = vrot.lane.b32.xlu1 %v30393_v37, %s27950_s3  ;;  %8481 = vrot.lane.b32.xlu0 %v30407_v20, %s27949_s25 }
 0x4a2   :  { %v30423_v34 = vpop.permute.xlu0 %8457  ;;  %v30425_v21 = vpop.permute.xlu1 %8453 }
 0x4a4   :  { %9148 = vrot.lane.b32.xlu1 %v30407_v20, %s27950_s3  ;;  %9811 = vrot.lane.b32.xlu0 %v30393_v37, %s27951_s26 }
 0x4a6   :  { %v30432_v49 = vpop.permute.xlu0 %9120  ;;  %v30434_v44 = vpop.permute.xlu1 %9124 }
 0x4a8   :  { %10470 = vrot.lane.b32.xlu1 %v30329_v24, %s35131_s2  ;;  %9815 = vrot.lane.b32.xlu0 %v30407_v20, %s27951_s26 }
 0x4aa   :  { %v30441_v56 = vpop.permute.xlu0 %9791  ;;  %v30443_v52 = vpop.permute.xlu1 %9787 }
 0x4ac   :  { %10474 = vrot.lane.b32.xlu1 %v30338_v22, %s35131_s2  ;;  %7226 = vrot.lane.b32.xlu0 %v30445_v45, %s27948_s24 }
 0x4ae   :  { %v30451_v55 = vpop.permute.xlu0 %10454  ;;  %v30453_v5 = vpop.permute.xlu1 %10458 }
 0x4af   :  { %35162 = vst [vmem:[#allocation36_spill] sm:$0xff] %v30451_v55  ;;  %35163 = vst [vmem:[#allocation37_spill] sm:$0xff] %v30453_v5 }
 0x4b0   :  { %10478 = vrot.lane.b32.xlu1 %v30393_v37, %s35131_s2  ;;  %7230 = vrot.lane.b32.xlu0 %v30455_v50, %s27948_s24 }
 0x4b2   :  { %v7203_v53 = vpop.permute.xlu0 %7202  ;;  %v7207_v60 = vpop.permute.xlu1 %7206 }
 0x4b3   :  { %v7232_v31 = vsel %vm237_vm0, %v7201_v40, %v7203_v53  ;;  %v7233_v4 = vsel %vm237_vm0, %v7203_v53, %v30415_v29  ;;  %v7234_v2 = vsel %vm237_vm0, %v30415_v29, %v7207_v60 }
 0x4b4   :  { %10482 = vrot.lane.b32.xlu1 %v30407_v20, %s35131_s2  ;;  %10468 = vrot.lane.b32.xlu0 %v30299_v47, %s35131_s2 }
 0x4b5   :  { %26967 = vmatprep.subr.msk.mxu0 %vm1238_vm8, %v7233_v4 }
 0x4b6   :  { %26968 = vmatpush1.msk.msra.mxu0 %vm1238_vm8, %v7232_v31  ;;  %v30470_v43 = vpop.permute.xlu0 %8459  ;;  %v30472_v10 = vpop.permute.xlu1 %8455 }
 0x4b7   :  { %26969 = vmatmul.mubr.msk.f32.vlgmr.msra.gmra.mxu0 %vm1235_vm9, %v30368_v23 }
 0x4b8   :  { %11123 = vrot.lane.b32.xlu1 %v30221_v6, %s27953_s28  ;;  %10472 = vrot.lane.b32.xlu0 %v30355_v46, %s35131_s2 }
 0x4b9   :  { %7487 = vmatprep.mubr.f32.mxu0 %v35164_v19 }
 0x4ba   :  { %v30481_v63 = vpop.permute.xlu0 %9122  ;;  %v30483_v33 = vpop.permute.xlu1 %9126 }
 0x4bc   :  { %8479 = vrot.lane.b32.xlu1 %v30445_v45, %s27949_s25  ;;  %10476 = vrot.lane.b32.xlu0 %v30361_v0, %s35131_s2 }
 0x4be   :  { %v30489_v42 = vpop.permute.xlu0 %9793  ;;  %v30491_v41 = vpop.permute.xlu1 %9789 }
 0x4c0   :  { %8483 = vrot.lane.b32.xlu1 %v30455_v50, %s27949_s25  ;;  %9146 = vrot.lane.b32.xlu0 %v30445_v45, %s27950_s3 }
 0x4c2   :  { %v30497_v15 = vpop.permute.xlu0 %10456  ;;  %v30499_v14 = vpop.permute.xlu1 %10460 }
 0x4c3   :  { %35165 = vst [vmem:[#allocation43_spill] sm:$0xff] %v30497_v15  ;;  %35166 = vst [vmem:[#allocation39_spill] sm:$0xff] %v30499_v14 }
 0x4c4   :  { %9813 = vrot.lane.b32.xlu1 %v30445_v45, %s27951_s26  ;;  %9150 = vrot.lane.b32.xlu0 %v30455_v50, %s27950_s3 }
 0x4c6   :  { %v7209_v28 = vpop.permute.xlu0 %7208  ;;  %v7213_v8 = vpop.permute.xlu1 %7212 }
 0x4c7   :  { %v7235_v32 = vsel %vm237_vm0, %v7207_v60, %v7209_v28 }
 0x4c8   :  { %9817 = vrot.lane.b32.xlu1 %v30455_v50, %s27951_s26  ;;  %10480 = vrot.lane.b32.xlu0 %v30445_v45, %s35131_s2 }
 0x4c9   :  { %26970 = vmatprep.subr.msk.mxu1 %vm1238_vm8, %v7235_v32 }
 0x4ca   :  { %26971 = vmatpush1.msk.msra.mxu1 %vm1238_vm8, %v7234_v2  ;;  %v30514_v30 = vpop.permute.xlu0 %8465  ;;  %v30516_v35 = vpop.permute.xlu1 %8461 }
 0x4cb   :  { %26972 = vmatmul.mubr.msk.f32.vlgmr.msra.gmra.mxu1 %vm1235_vm9, %v30368_v23 }
 0x4cc   :  { %11121 = vrot.lane.b32.xlu1 %v30191_v54, %s27953_s28  ;;  %10484 = vrot.lane.b32.xlu0 %v30455_v50, %s35131_s2 }
 0x4cd   :  { %7558 = vmatprep.mubr.f32.mxu1 %v35164_v19 }
 0x4ce   :  { %v30525_v59 = vpop.permute.xlu0 %9128  ;;  %v30527_v48 = vpop.permute.xlu1 %9132 }
 0x4d0   :  { %11129 = vrot.lane.b32.xlu1 %v30259_v7, %s27953_s28  ;;  %11125 = vrot.lane.b32.xlu0 %v30193_v58, %s27953_s28 }
 0x4d2   :  { %v30533_v17 = vpop.permute.xlu0 %9799  ;;  %v30535_v18 = vpop.permute.xlu1 %9795 }
 0x4d4   :  { %11131 = vrot.lane.b32.xlu1 %v30293_v1, %s27953_s28  ;;  %11127 = vrot.lane.b32.xlu0 %v30223_v16, %s27953_s28 }
 0x4d6   :  { %v30541_v40 = vpop.permute.xlu0 %10462  ;;  %v30543_v29 = vpop.permute.xlu1 %10466 }
 0x4d7   :  { %35167 = vst [vmem:[#allocation45_spill] sm:$0xff] %v30541_v40  ;;  %35168 = vst [vmem:[#allocation40_spill] sm:$0xff] %v30543_v29 }
 0x4d8   :  { %11135 = vrot.lane.b32.xlu1 %v30299_v47, %s27953_s28  ;;  %11119 = vrot.lane.b32.xlu0 %v35170_v61, %s35169_s1 }
 0x4da   :  { %v7211_v51 = vpop.permute.xlu0 %7210  ;;  %v30549_v25 = vpop.permute.xlu1 %8463 }
 0x4db   :  { %v7236_v9 = vsel %vm237_vm0, %v7209_v28, %v7211_v51  ;;  %v7237_v39 = vsel %vm237_vm0, %v7211_v51, %v7213_v8 }
 0x4dc   :  { %11139 = vrot.lane.b32.xlu1 %v30355_v46, %s27953_s28  ;;  %11133 = vrot.lane.b32.xlu0 %v30261_v12, %s27953_s28 }
 0x4dd   :  { %26973 = vmatprep.subr.msk.mxu0 %vm1238_vm8, %v7237_v39 }
 0x4de   :  { %26974 = vmatpush1.msk.msra.mxu0 %vm1238_vm8, %v7236_v9  ;;  %v7215_v26 = vpop.permute.xlu0 %7214  ;;  %v30559_v13 = vpop.permute.xlu1 %8467 }
 0x4df   :  { %26975 = vmatmul.mubr.msk.f32.vlgmr.msra.gmra.mxu0 %vm1235_vm9, %v30368_v23  ;;  %v7238_v28 = vsel %vm237_vm0, %v7213_v8, %v7215_v26 }
 0x4e0   :  { %11143 = vrot.lane.b32.xlu1 %v30361_v0, %s27953_s28  ;;  %11137 = vrot.lane.b32.xlu0 %v30329_v24, %s27953_s28 }
 0x4e1   :  { %7629 = vmatprep.mubr.f32.mxu0 %v35164_v19 }
 0x4e2   :  { %v30568_v27 = vpop.permute.xlu0 %9130  ;;  %v30570_v3 = vpop.permute.xlu1 %9797 }
 0x4e3   :  { %35171 = vst [vmem:[#allocation46_spill] sm:$0xff] %v30570_v3 }
 0x4e4   :  { %11141 = vrot.lane.b32.xlu0 %v30338_v22, %s27953_s28  ;;  %11147 = vrot.lane.b32.xlu1 %v30445_v45, %s27953_s28 }
 0x4e6   :  { %v30576_v11 = vpop.permute.xlu0 %9134  ;;  %v30578_v53 = vpop.permute.xlu1 %9801 }
 0x4e7   :  { %35172 = vst [vmem:[#allocation41_spill] sm:$0xff] %v30578_v53 }
 0x4e8   :  { %11145 = vrot.lane.b32.xlu0 %v30393_v37, %s27953_s28  ;;  %11151 = vrot.lane.b32.xlu1 %v30455_v50, %s27953_s28 }
 0x4ea   :  { %v30584_v60 = vpop.permute.xlu0 %10464  ;;  %v7217_v31 = vpop.permute.xlu1 %7216 }
 0x4eb   :  { %35173 = vst [vmem:[#allocation47_spill] sm:$0xff] %v30584_v60  ;;  %v7239_v4 = vsel %vm237_vm0, %v7215_v26, %v7217_v31 }
 0x4ec   :  { %11149 = vrot.lane.b32.xlu0 %v30407_v20, %s27953_s28  ;;  %11792 = vrot.lane.b32.xlu1 %v30193_v58, %s27954_s29 }
 0x4ed   :  { %26976 = vmatprep.subr.msk.mxu1 %vm1238_vm8, %v7239_v4 }
 0x4ee   :  { %26977 = vmatpush1.msk.msra.mxu1 %vm1238_vm8, %v7238_v28  ;;  %v30594_v32 = vpop.permute.xlu0 %8469  ;;  %v7221_v2 = vpop.permute.xlu1 %7220 }
 0x4ef   :  { %26978 = vmatmul.mubr.msk.f32.vlgmr.msra.gmra.mxu1 %vm1235_vm9, %v30368_v23 }
 0x4f0   :  { %11790 = vrot.lane.b32.xlu0 %v30221_v6, %s27954_s29  ;;  %11794 = vrot.lane.b32.xlu1 %v30223_v16, %s27954_s29 }
 0x4f1   :  { %7700 = vmatprep.mubr.f32.mxu1 %v35164_v19 }
 0x4f2   :  { %v30603_v51 = vpop.permute.xlu0 %8473  ;;  %v30605_v8 = vpop.permute.xlu1 %9136 }
 0x4f4   :  { %11788 = vrot.lane.b32.xlu0 %v30191_v54, %s27954_s29  ;;  %11786 = vrot.lane.b32.xlu1 %v35170_v61, %s27962_s27 }
 0x4f6   :  { %v30611_v9 = vpop.permute.xlu0 %9803  ;;  %v30613_v39 = vpop.permute.xlu1 %9140 }
 0x4f7   :  { %35174 = vst [vmem:[#allocation48_spill] sm:$0xff] %v30611_v9 }
 0x4f8   :  { %11796 = vrot.lane.b32.xlu0 %v30259_v7, %s27954_s29  ;;  %11800 = vrot.lane.b32.xlu1 %v30261_v12, %s27954_s29 }
 0x4fa   :  { %v30619_v26 = vpop.permute.xlu0 %9807  ;;  %v30621_v4 = vpop.permute.xlu1 %8471 }
 0x4fb   :  { %35175 = vst [vmem:[#allocation16_spill] sm:$0xff] %v30619_v26 }
 0x4fc   :  { %11798 = vrot.lane.b32.xlu0 %v30293_v1, %s27954_s29  ;;  %11804 = vrot.lane.b32.xlu1 %v30329_v24, %s27954_s29 }
 0x4fe   :  { %v7219_v28 = vpop.permute.xlu0 %7218  ;;  %v30627_v57 = vpop.permute.xlu1 %8475 }
 0x4ff   :  { %v7240_v60 = vsel %vm237_vm0, %v7217_v31, %v7219_v28  ;;  %v7241_v29 = vsel %vm237_vm0, %v7219_v28, %v7221_v2 }
 0x500   :  { %11802 = vrot.lane.b32.xlu0 %v30299_v47, %s27954_s29  ;;  %11808 = vrot.lane.b32.xlu1 %v30338_v22, %s27954_s29 }
 0x501   :  { %26979 = vmatprep.subr.msk.mxu0 %vm1238_vm8, %v7241_v29 }
 0x502   :  { %26980 = vmatpush1.msk.msra.mxu0 %vm1238_vm8, %v7240_v60  ;;  %v7223_v14 = vpop.permute.xlu0 %7222  ;;  %v30637_v40 = vpop.permute.xlu1 %9805 }
 0x503   :  { %35176 = vst [vmem:[#allocation19_spill] sm:$0xff] %v30637_v40  ;;  %26981 = vmatmul.mubr.msk.f32.vlgmr.msra.gmra.mxu0 %vm1235_vm9, %v30368_v23  ;;  %v7242_v15 = vsel %vm237_vm0, %v7221_v2, %v7223_v14 }
 0x504   :  { %11806 = vrot.lane.b32.xlu0 %v30355_v46, %s27954_s29  ;;  %11812 = vrot.lane.b32.xlu1 %v30393_v37, %s27954_s29 }
 0x505   :  { %7771 = vmatprep.mubr.f32.mxu0 %v35164_v19 }
 0x506   :  { %v30646_v31 = vpop.permute.xlu0 %9138  ;;  %v30648_v28 = vpop.permute.xlu1 %9809 }
 0x507   :  { %35177 = vst [vmem:[#allocation22_spill] sm:$0xff] %v30648_v28 }
 0x508   :  { %11810 = vrot.lane.b32.xlu0 %v30361_v0, %s27954_s29  ;;  %11816 = vrot.lane.b32.xlu1 %v30407_v20, %s27954_s29 }
 0x50a   :  { %v30654_v29 = vpop.permute.xlu0 %9142  ;;  %v7225_v60 = vpop.permute.xlu1 %7224 }
 0x50b   :  { %v7243_v55 = vsel %vm237_vm0, %v7223_v14, %v7225_v60 }
 0x50c   :  { %11814 = vrot.lane.b32.xlu0 %v30445_v45, %s27954_s29  ;;  %12457 = vrot.lane.b32.xlu1 %v30221_v6, %s27955_s21 }
 0x50d   :  { %26982 = vmatprep.subr.msk.mxu1 %vm1238_vm8, %v7243_v55 }
 0x50e   :  { %26983 = vmatpush1.msk.msra.mxu1 %vm1238_vm8, %v7242_v15  ;;  %v30664_v5 = vpop.permute.xlu0 %8477  ;;  %v7229_v28 = vpop.permute.xlu1 %7228 }
 0x50f   :  { %26984 = vmatmul.mubr.msk.f32.vlgmr.msra.gmra.mxu1 %vm1235_vm9, %v30368_v23 }
 0x510   :  { %11818 = vrot.lane.b32.xlu0 %v30455_v50, %s27954_s29  ;;  %12455 = vrot.lane.b32.xlu1 %v30191_v54, %s27955_s21 }
 0x511   :  { %7842 = vmatprep.mubr.f32.mxu1 %v35164_v19 }
 0x512   :  { %v30673_v40 = vpop.permute.xlu0 %8481  ;;  %v30675_v14 = vpop.permute.xlu1 %9144 }
 0x514   :  { %12459 = vrot.lane.b32.xlu0 %v30193_v58, %s27955_s21  ;;  %12463 = vrot.lane.b32.xlu1 %v30259_v7, %s27955_s21 }
 0x516   :  { %v30681_v55 = vpop.permute.xlu0 %9811  ;;  %v30683_v15 = vpop.permute.xlu1 %9148 }
 0x517   :  { %35178 = vst [vmem:[#allocation31_spill] sm:$0xff] %v30681_v55 }
 0x518   :  { %12461 = vrot.lane.b32.xlu0 %v30223_v16, %s27955_s21  ;;  %12465 = vrot.lane.b32.xlu1 %v30293_v1, %s27955_s21 }
 0x51a   :  { %v30689_v2 = vpop.permute.xlu0 %9815  ;;  %v30691_v26 = vpop.permute.xlu1 %10470 }
 0x51b   :  { %35179 = vst [vmem:[#allocation27_spill] sm:$0xff] %v30689_v2  ;;  %35180 = vst [vmem:[#allocation8_spill] sm:$0xff] %v30691_v26 }
 0x51c   :  { %12453 = vrot.lane.b32.xlu0 %v35170_v61, %s27953_s28  ;;  %12469 = vrot.lane.b32.xlu1 %v30299_v47, %s27955_s21 }
 0x51e   :  { %v7227_v53 = vpop.permute.xlu0 %7226  ;;  %v30697_v55 = vpop.permute.xlu1 %10474 }
 0x51f   :  { %v7244_v9 = vsel %vm237_vm0, %v7225_v60, %v7227_v53  ;;  %v7245_v36 = vsel %vm237_vm0, %v7227_v53, %v7229_v28  ;;  %v9155_v60 = vsel %vm469_vm2, %v30483_v33, %v30525_v59 }
 0x520   :  { %12467 = vrot.lane.b32.xlu0 %v30261_v12, %s27955_s21  ;;  %12473 = vrot.lane.b32.xlu1 %v30355_v46, %s27955_s21 }
 0x521   :  { %26985 = vmatprep.subr.msk.mxu0 %vm1238_vm8, %v7245_v36 }
 0x522   :  { %26986 = vmatpush1.msk.msra.mxu0 %vm1238_vm8, %v7244_v9  ;;  %v7231_v26 = vpop.permute.xlu0 %7230  ;;  %v30707_v2 = vpop.permute.xlu1 %10478  ;;  %v8495_v9 = vsel %vm353_vm1, %v30603_v51, %v30627_v57 }
 0x523   :  { %v7246_v3 = vsel %vm237_vm0, %v7229_v28, %v7231_v26  ;;  %26987 = vmatmul.mubr.msk.f32.vlgmr.msra.gmra.mxu0 %vm1235_vm9, %v30368_v23  ;;  %26991 = vmatprep.subr.msk.mxu0 %vm1238_vm8, %v30221_v6 }
 0x524   :  { %26988 = vmatprep.subr.msk.mxu1 %vm1238_vm8, %v7231_v26  ;;  %26992 = vmatpush1.msk.msra.mxu0 %vm1238_vm8, %v30191_v54 }
 0x525   :  { %12471 = vrot.lane.b32.xlu0 %v30329_v24, %s27955_s21  ;;  %12477 = vrot.lane.b32.xlu1 %v30361_v0, %s27955_s21 }
 0x526   :  { %26989 = vmatpush1.msk.msra.mxu1 %vm1238_vm8, %v7246_v3  ;;  %26997 = vmatprep.subr.msk.mxu0 %vm1238_vm8, %v30293_v1  ;;  %v30724_v36 = vpop.permute.xlu0 %10468  ;;  %v30726_v53 = vpop.permute.xlu1 %10482  ;;  %v8496_v3 = vsel %vm353_vm1, %v30627_v57, %v30664_v5 }
 0x527   :  { %26990 = vmatmul.mubr.msk.f32.vlgmr.msra.gmra.mxu1 %vm1235_vm9, %v30368_v23  ;;  %7947 = vmatprep.mubr.f32.mxu0 %v35164_v19  ;;  %v8488_v23 = vsel %vm353_vm1, %v30470_v43, %v30516_v35 }
 0x528   :  { %26994 = vmatprep.subr.msk.mxu1 %vm1238_vm8, %v30223_v16  ;;  %26993 = vmatmul.mubr.msk.f32.vlgmr.msra.gmra.mxu0 %vm1235_vm9, %v35170_v61  ;;  %v8491_v61 = vsel %vm353_vm1, %v30514_v30, %v30559_v13 }
 0x529   :  { %26995 = vmatpush1.msk.msra.mxu1 %vm1238_vm8, %v30193_v58  ;;  %26998 = vmatpush1.msk.msra.mxu0 %vm1238_vm8, %v30259_v7  ;;  %v27914_v58 = vld [vmem:[%s34877_s5] sm:$0xf] }
 0x52a   :  { %27000 = vmatprep.subr.msk.mxu1 %vm1238_vm8, %v30299_v47  ;;  %27003 = vmatprep.subr.msk.mxu0 %vm1238_vm8, %v30355_v46  ;;  %v30743_v54 = vpop.permute.xlu0 %10472  ;;  %v30745_v6 = vpop.permute.xlu1 %11123  ;;  %v8486_v47 = vsel %vm353_vm1, %v30472_v10, %v30423_v34 }
 0x52b   :  { %12475 = vrot.lane.b32.xlu0 %v30338_v22, %s27955_s21  ;;  %12481 = vrot.lane.b32.xlu1 %v30445_v45, %s27955_s21 }
 0x52c   :  { %8018 = vmatprep.mubr.f32.mxu1 %v35164_v19  ;;  %8089 = vmatprep.mubr.f32.mxu0 %v35164_v19 }
 0x52d   :  { %26996 = vmatmul.mubr.msk.f32.vlgmr.msra.gmra.mxu1 %vm1235_vm9, %v27914_v58  ;;  %26999 = vmatmul.mubr.msk.f32.vlgmr.msra.gmra.mxu0 %vm1235_vm9, %v27914_v58 }
 0x52e   :  { %27001 = vmatpush1.msk.msra.mxu1 %vm1238_vm8, %v30261_v12  ;;  %27004 = vmatpush1.msk.msra.mxu0 %vm1238_vm8, %v30329_v24  ;;  %v30762_v16 = vpop.permute.xlu0 %10476  ;;  %v30764_v7 = vpop.permute.xlu1 %8479  ;;  %v7180_v24 = vld [vmem:[%s34878_s6] sm:$0xf] }
 0x52f   :  { %27006 = vmatprep.subr.msk.mxu1 %vm1238_vm8, %v30361_v0  ;;  %27009 = vmatprep.subr.msk.mxu0 %vm1238_vm8, %v30445_v45  ;;  %v8485_v0 = vsel %vm353_vm1, %v30425_v21, %v30472_v10  ;;  %v8487_v45 = vsel %vm353_vm1, %v30423_v34, %v30470_v43  ;;  %v8492_v10 = vsel %vm353_vm1, %v30559_v13, %v30594_v32 }
 0x530   :  { %12479 = vrot.lane.b32.xlu0 %v30393_v37, %s27955_s21  ;;  %12485 = vrot.lane.b32.xlu1 %v30455_v50, %s27955_s21  ;;  %v8494_v34 = vsel %vm353_vm1, %v30621_v4, %v30603_v51  ;;  %v8497_v26 = vsel %vm353_vm1, %v30664_v5, %v30764_v7  ;;  %v9152_v51 = vsel %vm469_vm2, %v30432_v49, %v30481_v63 }
 0x531   :  { %8160 = vmatprep.mubr.f32.mxu1 %v35164_v19  ;;  %8231 = vmatprep.mubr.f32.mxu0 %v35164_v19  ;;  %v9157_v49 = vsel %vm469_vm2, %v30568_v27, %v30527_v48 }
 0x532   :  { %27002 = vmatmul.mubr.msk.f32.vlgmr.msra.gmra.mxu1 %vm1235_vm9, %v27914_v58  ;;  %27005 = vmatmul.mubr.msk.f32.vlgmr.msra.gmra.mxu0 %vm1235_vm9, %v27914_v58  ;;  %v30778_v12 = vpop.permute.xlu0 %9146  ;;  %v30780_v1 = vpop.permute.xlu1 %8483 }
 0x533   :  { %27007 = vmatpush1.msk.msra.mxu1 %vm1238_vm8, %v30338_v22  ;;  %27010 = vmatpush1.msk.msra.mxu0 %vm1238_vm8, %v30393_v37  ;;  %v8490_v37 = vsel %vm353_vm1, %v30549_v25, %v30514_v30  ;;  %v8498_v30 = vsel %vm353_vm1, %v30764_v7, %v30673_v40  ;;  %v8499_v28 = vsel %vm353_vm1, %v30673_v40, %v30780_v1 }
 0x534   :  { %27012 = vmatprep.subr.msk.mxu1 %vm1238_vm8, %v30455_v50  ;;  %27015 = vmatprep.subr.msk.mxu0 %vm1238_vm8, %v8486_v47  ;;  %v8489_v50 = vsel %vm353_vm1, %v30516_v35, %v30549_v25  ;;  %v8493_v25 = vsel %vm353_vm1, %v30594_v32, %v30621_v4  ;;  %v9153_v4 = vsel %vm469_vm2, %v30481_v63, %v30434_v44 }
 0x535   :  { %12483 = vrot.lane.b32.xlu0 %v30407_v20, %s27955_s21  ;;  %8302 = vmatprep.mubr.f32.mxu1 %v35164_v19  ;;  %v9156_v7 = vsel %vm469_vm2, %v30525_v59, %v30568_v27  ;;  %v9158_v59 = vsel %vm469_vm2, %v30527_v48, %v30576_v11  ;;  %v9160_v27 = vsel %vm469_vm2, %v30605_v8, %v30646_v31 }
 0x536   :  { %27008 = vmatmul.mubr.msk.f32.vlgmr.msra.gmra.mxu1 %vm1235_vm9, %v27914_v58  ;;  %8373 = vmatprep.mubr.f32.mxu0 %v35164_v19  ;;  %v30800_v22 = vpop.permute.xlu0 %9150  ;;  %v30802_v46 = vpop.permute.xlu1 %9813  ;;  %v9163_v47 = vsel %vm469_vm2, %v30654_v29, %v30675_v14  ;;  %v9165_v48 = vsel %vm469_vm2, %v30778_v12, %v30683_v15 }
 0x537   :  { %27013 = vmatpush1.msk.msra.mxu1 %vm1238_vm8, %v30407_v20  ;;  %27011 = vmatmul.mubr.msk.f32.vlgmr.msra.gmra.mxu0 %vm1235_vm9, %v27914_v58 }
 0x538   :  { %27016 = vmatpush1.msk.msra.mxu0 %vm1238_vm8, %v8485_v0  ;;  %27018 = vmatprep.subr.msk.mxu1 %vm1238_vm8, %v8488_v23  ;;  %v9820_v0 = vsel %vm585_vm3, %v30491_v41, %v30441_v56  ;;  %v9822_v23 = vsel %vm585_vm3, %v30489_v42, %v30535_v18 }
 0x539   :  { %27021 = vmatprep.subr.msk.mxu0 %vm1238_vm8, %v8490_v37  ;;  %13122 = vperm.xlu0 %27847, %v7180_v24   ;;  %v9164_v24 = vsel %vm469_vm2, %v30675_v14, %v30778_v12  ;;  %v9819_v14 = vsel %vm585_vm3, %v30443_v52, %v30491_v41  ;;  %v9166_v12 = vsel %vm469_vm2, %v30683_v15, %v30800_v22  ;;  %v35181_v52 = vld [vmem:[#allocation46_spill] sm:$0xff] }
 0x53a   :  { %8444 = vmatprep.mubr.f32.mxu1 %v35164_v19  ;;  %8598 = vmatprep.mubr.f32.mxu0 %v35164_v19  ;;  %v30821_v20 = vpop.permute.xlu0 %10480  ;;  %v30823_v21 = vpop.permute.xlu1 %9817  ;;  %v9824_v41 = vsel %vm585_vm3, %v35181_v52, %v30533_v17  ;;  %v9821_v37 = vsel %vm585_vm3, %v30441_v56, %v30489_v42  ;;  %v35186_v56 = vld [vmem:[#allocation19_spill] sm:$0xff] }
 0x53b   :  { %27014 = vmatmul.mubr.msk.f32.vlgmr.msra.gmra.mxu1 %vm1235_vm9, %v27914_v58  ;;  %27017 = vmatmul.mubr.msk.f32.vlgmr.msra.gmra.mxu0 %vm1235_vm9, %v30378_v38  ;;  %v9154_v58 = vsel %vm469_vm2, %v30434_v44, %v30483_v33  ;;  %v9161_v44 = vsel %vm469_vm2, %v30646_v31, %v30613_v39  ;;  %v9162_v31 = vsel %vm469_vm2, %v30613_v39, %v30654_v29 }
 0x53c   :  { %27019 = vmatpush1.msk.msra.mxu1 %vm1238_vm8, %v8487_v45  ;;  %27022 = vmatpush1.msk.msra.mxu0 %vm1238_vm8, %v8489_v50  ;;  %v9823_v45 = vsel %vm585_vm3, %v30535_v18, %v35181_v52  ;;  %v35182_v50 = vld [vmem:[#allocation33_spill] sm:$0xff] }
 0x53d   :  { %27024 = vmatprep.subr.msk.mxu1 %vm1238_vm8, %v8492_v10  ;;  %27027 = vmatprep.subr.msk.mxu0 %vm1238_vm8, %v8494_v34  ;;  %v35183_v10 = vld [vmem:[#allocation48_spill] sm:$0xff]  ;;  %v35184_v34 = vld [vmem:[#allocation41_spill] sm:$0xff] }
 0x53e   :  { %8669 = vmatprep.mubr.f32.mxu1 %v35164_v19  ;;  %8740 = vmatprep.mubr.f32.mxu0 %v35164_v19  ;;  %v30846_v43 = vpop.permute.xlu0 %10484  ;;  %v30848_v35 = vpop.permute.xlu1 %11121 }
 0x53f   :  { %27020 = vmatmul.mubr.msk.f32.vlgmr.msra.gmra.mxu1 %vm1235_vm9, %v30378_v38  ;;  %27023 = vmatmul.mubr.msk.f32.vlgmr.msra.gmra.mxu0 %vm1235_vm9, %v30378_v38 }
 0x540   :  { %27025 = vmatpush1.msk.msra.mxu1 %vm1238_vm8, %v8491_v61  ;;  %27028 = vmatpush1.msk.msra.mxu0 %vm1238_vm8, %v8493_v25  ;;  %v9826_v61 = vsel %vm585_vm3, %v35184_v34, %v35183_v10  ;;  %v35185_v25 = vld [vmem:[#allocation16_spill] sm:$0xff] }
 0x541   :  { %27030 = vmatprep.subr.msk.mxu1 %vm1238_vm8, %v8496_v3  ;;  %27033 = vmatprep.subr.msk.mxu0 %vm1238_vm8, %v8498_v30  ;;  %v9828_v42 = vsel %vm585_vm3, %v35186_v56, %v35185_v25  ;;  %v9825_v3 = vsel %vm585_vm3, %v30533_v17, %v35184_v34  ;;  %v9827_v30 = vsel %vm585_vm3, %v35183_v10, %v35186_v56  ;;  %v35198_v10 = vld [vmem:[#allocation8_spill] sm:$0xff] }
 0x542   :  { %8811 = vmatprep.mubr.f32.mxu1 %v35164_v19  ;;  %8882 = vmatprep.mubr.f32.mxu0 %v35164_v19  ;;  %v30872_v13 = vpop.permute.xlu0 %11125  ;;  %v30874_v32 = vpop.permute.xlu1 %11129  ;;  %v10493_v34 = vsel %vm701_vm4, %v30724_v36, %v35198_v10 }
 0x543   :  { %27026 = vmatmul.mubr.msk.f32.vlgmr.msra.gmra.mxu1 %vm1235_vm9, %v30378_v38  ;;  %27029 = vmatmul.mubr.msk.f32.vlgmr.msra.gmra.mxu0 %vm1235_vm9, %v30378_v38 }
 0x544   :  { %27031 = vmatpush1.msk.msra.mxu1 %vm1238_vm8, %v8495_v9  ;;  %27034 = vmatpush1.msk.msra.mxu0 %vm1238_vm8, %v8497_v26  ;;  %v35187_v9 = vld [vmem:[#allocation31_spill] sm:$0xff]  ;;  %v35188_v26 = vld [vmem:[#allocation22_spill] sm:$0xff] }
 0x545   :  { %27036 = vmatprep.subr.msk.mxu1 %vm1238_vm8, %v30780_v1  ;;  %27039 = vmatprep.subr.msk.mxu0 %vm1238_vm8, %v9153_v4  ;;  %v9159_v1 = vsel %vm469_vm2, %v30576_v11, %v30605_v8  ;;  %v9830_v4 = vsel %vm585_vm3, %v35188_v26, %v35187_v9 }
 0x546   :  { %8953 = vmatprep.mubr.f32.mxu1 %v35164_v19  ;;  %9024 = vmatprep.mubr.f32.mxu0 %v35164_v19  ;;  %v30896_v57 = vpop.permute.xlu0 %11127  ;;  %v30898_v5 = vpop.permute.xlu1 %11131 }
 0x547   :  { %27032 = vmatmul.mubr.msk.f32.vlgmr.msra.gmra.mxu1 %vm1235_vm9, %v30378_v38  ;;  %27035 = vmatmul.mubr.msk.f32.vlgmr.msra.gmra.mxu0 %vm1235_vm9, %v30378_v38 }
 0x548   :  { %27037 = vmatpush1.msk.msra.mxu1 %vm1238_vm8, %v8499_v28  ;;  %27040 = vmatpush1.msk.msra.mxu0 %vm1238_vm8, %v9152_v51  ;;  %v35189_v51 = vld [vmem:[#allocation27_spill] sm:$0xff] }
 0x549   :  { %27042 = vmatprep.subr.msk.mxu1 %vm1238_vm8, %v9155_v60  ;;  %27045 = vmatprep.subr.msk.mxu0 %vm1238_vm8, %v9157_v49  ;;  %v9832_v17 = vsel %vm585_vm3, %v30802_v46, %v35189_v51  ;;  %v9829_v49 = vsel %vm585_vm3, %v35185_v25, %v35188_v26  ;;  %v10498_v26 = vsel %vm701_vm4, %v30707_v2, %v30821_v20 }
 0x54a   :  { %9095 = vmatprep.mubr.f32.mxu1 %v35164_v19  ;;  %9265 = vmatprep.mubr.f32.mxu0 %v35164_v19  ;;  %v30922_v63 = vpop.permute.xlu0 %11119  ;;  %v30924_v40 = vpop.permute.xlu1 %11135 }
 0x54b   :  { %27038 = vmatmul.mubr.msk.f32.vlgmr.msra.gmra.mxu1 %vm1235_vm9, %v30378_v38  ;;  %27041 = vmatmul.mubr.msk.f32.vlgmr.msra.gmra.mxu0 %vm1235_vm9, %v30380_v62 }
 0x54c   :  { %27043 = vmatpush1.msk.msra.mxu1 %vm1238_vm8, %v9154_v58  ;;  %27046 = vmatpush1.msk.msra.mxu0 %vm1238_vm8, %v9156_v7  ;;  %v9831_v58 = vsel %vm585_vm3, %v35187_v9, %v30802_v46  ;;  %v35190_v7 = vld [vmem:[#allocation37_spill] sm:$0xff]  ;;  %v10496_v9 = vsel %vm701_vm4, %v30697_v55, %v30762_v16 }
 0x54d   :  { %27048 = vmatprep.subr.msk.mxu1 %vm1238_vm8, %v9159_v1  ;;  %27051 = vmatprep.subr.msk.mxu0 %vm1238_vm8, %v9161_v44  ;;  %v35191_v1 = vld [vmem:[#allocation43_spill] sm:$0xff] }
 0x54e   :  { %9336 = vmatprep.mubr.f32.mxu1 %v35164_v19  ;;  %9407 = vmatprep.mubr.f32.mxu0 %v35164_v19  ;;  %v30948_v38 = vpop.permute.xlu0 %11133  ;;  %v30950_v33 = vpop.permute.xlu1 %11139  ;;  %v10487_v44 = vsel %vm701_vm4, %v35191_v1, %v35190_v7 }
 0x54f   :  { %27044 = vmatmul.mubr.msk.f32.vlgmr.msra.gmra.mxu1 %vm1235_vm9, %v30380_v62  ;;  %27047 = vmatmul.mubr.msk.f32.vlgmr.msra.gmra.mxu0 %vm1235_vm9, %v30380_v62 }
 0x550   :  { %27049 = vmatpush1.msk.msra.mxu1 %vm1238_vm8, %v9158_v59  ;;  %27052 = vmatpush1.msk.msra.mxu0 %vm1238_vm8, %v9160_v27  ;;  %v35192_v27 = vld [vmem:[#allocation36_spill] sm:$0xff] }
 0x551   :  { %27054 = vmatprep.subr.msk.mxu1 %vm1238_vm8, %v9163_v47  ;;  %27057 = vmatprep.subr.msk.mxu0 %vm1238_vm8, %v9165_v48  ;;  %v10486_v47 = vsel %vm701_vm4, %v35192_v27, %v35191_v1  ;;  %v9833_v48 = vsel %vm585_vm3, %v35189_v51, %v30823_v21  ;;  %v11156_v51 = vsel %vm817_vm5, %v30896_v57, %v30874_v32 }
 0x552   :  { %9478 = vmatprep.mubr.f32.mxu1 %v35164_v19  ;;  %9549 = vmatprep.mubr.f32.mxu0 %v35164_v19  ;;  %v30974_v11 = vpop.permute.xlu0 %11137  ;;  %v30976_v8 = vpop.permute.xlu1 %11143 }
 0x553   :  { %27050 = vmatmul.mubr.msk.f32.vlgmr.msra.gmra.mxu1 %vm1235_vm9, %v30380_v62  ;;  %27053 = vmatmul.mubr.msk.f32.vlgmr.msra.gmra.mxu0 %vm1235_vm9, %v30380_v62 }
 0x554   :  { %27055 = vmatpush1.msk.msra.mxu1 %vm1238_vm8, %v9162_v31  ;;  %27058 = vmatpush1.msk.msra.mxu0 %vm1238_vm8, %v9164_v24  ;;  %v35193_v31 = vld [vmem:[#allocation45_spill] sm:$0xff]  ;;  %v35194_v24 = vld [vmem:[#allocation39_spill] sm:$0xff] }
 0x555   :  { %27060 = vmatprep.subr.msk.mxu1 %vm1238_vm8, %v30800_v22  ;;  %27063 = vmatprep.subr.msk.mxu0 %vm1238_vm8, %v9820_v0  ;;  %v10489_v0 = vsel %vm701_vm4, %v35194_v24, %v35193_v31 }
 0x556   :  { %9620 = vmatprep.mubr.f32.mxu1 %v35164_v19  ;;  %9691 = vmatprep.mubr.f32.mxu0 %v35164_v19  ;;  %v30998_v39 = vpop.permute.xlu0 %11141  ;;  %v31000_v29 = vpop.permute.xlu1 %11147 }
 0x557   :  { %27056 = vmatmul.mubr.msk.f32.vlgmr.msra.gmra.mxu1 %vm1235_vm9, %v30380_v62  ;;  %27059 = vmatmul.mubr.msk.f32.vlgmr.msra.gmra.mxu0 %vm1235_vm9, %v30380_v62 }
 0x558   :  { %27061 = vmatpush1.msk.msra.mxu1 %vm1238_vm8, %v9166_v12  ;;  %27064 = vmatpush1.msk.msra.mxu0 %vm1238_vm8, %v9819_v14  ;;  %v35195_v14 = vld [vmem:[#allocation40_spill] sm:$0xff]  ;;  %v35196_v12 = vld [vmem:[#allocation47_spill] sm:$0xff] }
 0x559   :  { %27066 = vmatprep.subr.msk.mxu1 %vm1238_vm8, %v9822_v23  ;;  %27069 = vmatprep.subr.msk.mxu0 %vm1238_vm8, %v9824_v41  ;;  %v10491_v23 = vsel %vm701_vm4, %v35196_v12, %v35195_v14  ;;  %v10488_v41 = vsel %vm701_vm4, %v35190_v7, %v35194_v24  ;;  %v10492_v56 = vsel %vm701_vm4, %v35195_v14, %v30724_v36 }
 0x55a   :  { %9762 = vmatprep.mubr.f32.mxu1 %v35164_v19  ;;  %9932 = vmatprep.mubr.f32.mxu0 %v35164_v19  ;;  %v31024_v15 = vpop.permute.xlu0 %11145  ;;  %v31026_v22 = vpop.permute.xlu1 %11151  ;;  %v10499_v36 = vsel %vm701_vm4, %v30821_v20, %v30726_v53  ;;  %v11153_v20 = vsel %vm817_vm5, %v30848_v35, %v30745_v6  ;;  %v11155_v35 = vsel %vm817_vm5, %v30872_v13, %v30896_v57 }
 0x55b   :  { %27062 = vmatmul.mubr.msk.f32.vlgmr.msra.gmra.mxu1 %vm1235_vm9, %v30380_v62  ;;  %27065 = vmatmul.mubr.msk.f32.vlgmr.msra.gmra.mxu0 %vm1235_vm9, %v35182_v50  ;;  %v11164_v7 = vsel %vm817_vm5, %v30976_v8, %v31024_v15  ;;  %v11165_v1 = vsel %vm817_vm5, %v31024_v15, %v31000_v29 }
 0x55c   :  { %27067 = vmatpush1.msk.msra.mxu1 %vm1238_vm8, %v9821_v37  ;;  %27070 = vmatpush1.msk.msra.mxu0 %vm1238_vm8, %v9823_v45  ;;  %v10490_v37 = vsel %vm701_vm4, %v35193_v31, %v35196_v12  ;;  %v35197_v45 = vld [vmem:[#allocation34_spill] sm:$0xff] }
 0x55d   :  { %27072 = vmatprep.subr.msk.mxu1 %vm1238_vm8, %v9826_v61  ;;  %27075 = vmatprep.subr.msk.mxu0 %vm1238_vm8, %v9828_v42  ;;  %v10495_v61 = vsel %vm701_vm4, %v30743_v54, %v30697_v55  ;;  %v10494_v42 = vsel %vm701_vm4, %v35198_v10, %v30743_v54 }
 0x55e   :  { %10003 = vmatprep.mubr.f32.mxu1 %v35164_v19  ;;  %10074 = vmatprep.mubr.f32.mxu0 %v35164_v19  ;;  %v31050_v62 = vpop.permute.xlu0 %11149  ;;  %v31052_v18 = vpop.permute.xlu1 %11792 }
 0x55f   :  { %27068 = vmatmul.mubr.msk.f32.vlgmr.msra.gmra.mxu1 %vm1235_vm9, %v35182_v50  ;;  %27071 = vmatmul.mubr.msk.f32.vlgmr.msra.gmra.mxu0 %vm1235_vm9, %v35182_v50 }
 0x560   :  { %27073 = vmatpush1.msk.msra.mxu1 %vm1238_vm8, %v9825_v3  ;;  %27076 = vmatpush1.msk.msra.mxu0 %vm1238_vm8, %v9827_v30  ;;  %v10497_v3 = vsel %vm701_vm4, %v30762_v16, %v30707_v2  ;;  %v10500_v16 = vsel %vm701_vm4, %v30726_v53, %v30846_v43  ;;  %v11158_v53 = vsel %vm817_vm5, %v30898_v5, %v30948_v38 }
 0x561   :  { %27078 = vmatprep.subr.msk.mxu1 %vm1238_vm8, %v9830_v4  ;;  %27081 = vmatprep.subr.msk.mxu0 %vm1238_vm8, %v9832_v17  ;;  %v11154_v4 = vsel %vm817_vm5, %v30745_v6, %v30872_v13  ;;  %v11157_v17 = vsel %vm817_vm5, %v30874_v32, %v30898_v5  ;;  %v11162_v13 = vsel %vm817_vm5, %v30950_v33, %v30998_v39 }
 0x562   :  { %10145 = vmatprep.mubr.f32.mxu1 %v35164_v19  ;;  %10216 = vmatprep.mubr.f32.mxu0 %v35164_v19  ;;  %v31076_v28 = vpop.permute.xlu0 %11790  ;;  %v31078_v60 = vpop.permute.xlu1 %11794  ;;  %v11159_v5 = vsel %vm817_vm5, %v30948_v38, %v30924_v40 }
 0x563   :  { %27074 = vmatmul.mubr.msk.f32.vlgmr.msra.gmra.mxu1 %vm1235_vm9, %v35182_v50  ;;  %27077 = vmatmul.mubr.msk.f32.vlgmr.msra.gmra.mxu0 %vm1235_vm9, %v35182_v50 }
 0x564   :  { %27079 = vmatpush1.msk.msra.mxu1 %vm1238_vm8, %v9829_v49  ;;  %27082 = vmatpush1.msk.msra.mxu0 %vm1238_vm8, %v9831_v58  ;;  %v11160_v49 = vsel %vm817_vm5, %v30924_v40, %v30974_v11  ;;  %v11161_v58 = vsel %vm817_vm5, %v30974_v11, %v30950_v33  ;;  %v11166_v40 = vsel %vm817_vm5, %v31000_v29, %v31050_v62 }
 0x565   :  { %27084 = vmatprep.subr.msk.mxu1 %vm1238_vm8, %v30823_v21  ;;  %27087 = vmatprep.subr.msk.mxu0 %vm1238_vm8, %v10487_v44  ;;  %v11163_v11 = vsel %vm817_vm5, %v30998_v39, %v30976_v8  ;;  %v11821_v44 = vsel %vm933_vm6, %v31076_v28, %v31052_v18  ;;  %v11167_v29 = vsel %vm817_vm5, %v31050_v62, %v31026_v22 }
 0x566   :  { %10287 = vmatprep.mubr.f32.mxu1 %v35164_v19  ;;  %10358 = vmatprep.mubr.f32.mxu0 %v35164_v19  ;;  %v31100_v46 = vpop.permute.xlu0 %11788  ;;  %v31102_v59 = vpop.permute.xlu1 %11786 }
 0x567   :  { %27080 = vmatmul.mubr.msk.f32.vlgmr.msra.gmra.mxu1 %vm1235_vm9, %v35182_v50  ;;  %27083 = vmatmul.mubr.msk.f32.vlgmr.msra.gmra.mxu0 %vm1235_vm9, %v35182_v50  ;;  %v11820_v15 = vsel %vm933_vm6, %v31100_v46, %v31076_v28  ;;  %v11822_v46 = vsel %vm933_vm6, %v31052_v18, %v31078_v60 }
 0x568   :  { %27085 = vmatpush1.msk.msra.mxu1 %vm1238_vm8, %v9833_v48  ;;  %27088 = vmatpush1.msk.msra.mxu0 %vm1238_vm8, %v10486_v47 }
 0x569   :  { %27090 = vmatprep.subr.msk.mxu1 %vm1238_vm8, %v10489_v0  ;;  %27093 = vmatprep.subr.msk.mxu0 %vm1238_vm8, %v10491_v23 }
 0x56a   :  { %10429 = vmatprep.mubr.f32.mxu1 %v35164_v19  ;;  %10599 = vmatprep.mubr.f32.mxu0 %v35164_v19  ;;  %v31126_v21 = vpop.permute.xlu0 %11796  ;;  %v31128_v52 = vpop.permute.xlu1 %11800 }
 0x56b   :  { %27086 = vmatmul.mubr.msk.f32.vlgmr.msra.gmra.mxu1 %vm1235_vm9, %v35182_v50  ;;  %27089 = vmatmul.mubr.msk.f32.vlgmr.msra.gmra.mxu0 %vm1235_vm9, %v35197_v45  ;;  %v11823_v27 = vsel %vm933_vm6, %v31078_v60, %v31126_v21 }
 0x56c   :  { %27091 = vmatpush1.msk.msra.mxu1 %vm1238_vm8, %v10488_v41  ;;  %27094 = vmatpush1.msk.msra.mxu0 %vm1238_vm8, %v10490_v37 }
 0x56d   :  { %27096 = vmatprep.subr.msk.mxu1 %vm1238_vm8, %v10493_v34  ;;  %27099 = vmatprep.subr.msk.mxu0 %vm1238_vm8, %v10495_v61 }
 0x56e   :  { %10670 = vmatprep.mubr.f32.mxu1 %v35164_v19  ;;  %10741 = vmatprep.mubr.f32.mxu0 %v35164_v19  ;;  %v31152_v50 = vpop.permute.xlu0 %11798  ;;  %v31154_v25 = vpop.permute.xlu1 %11804 }
 0x56f   :  { %27092 = vmatmul.mubr.msk.f32.vlgmr.msra.gmra.mxu1 %vm1235_vm9, %v35197_v45  ;;  %27095 = vmatmul.mubr.msk.f32.vlgmr.msra.gmra.mxu0 %vm1235_vm9, %v35197_v45  ;;  %v11824_v47 = vsel %vm933_vm6, %v31126_v21, %v31152_v50 }
 0x570   :  { %27097 = vmatpush1.msk.msra.mxu1 %vm1238_vm8, %v10492_v56  ;;  %27100 = vmatpush1.msk.msra.mxu0 %vm1238_vm8, %v10494_v42 }
 0x571   :  { %27102 = vmatprep.subr.msk.mxu1 %vm1238_vm8, %v10497_v3  ;;  %27105 = vmatprep.subr.msk.mxu0 %vm1238_vm8, %v10499_v36 }
 0x572   :  { %10812 = vmatprep.mubr.f32.mxu1 %v35164_v19  ;;  %10883 = vmatprep.mubr.f32.mxu0 %v35164_v19  ;;  %v31178_v54 = vpop.permute.xlu0 %11802  ;;  %v31180_v30 = vpop.permute.xlu1 %11808 }
 0x573   :  { %27098 = vmatmul.mubr.msk.f32.vlgmr.msra.gmra.mxu1 %vm1235_vm9, %v35197_v45  ;;  %27101 = vmatmul.mubr.msk.f32.vlgmr.msra.gmra.mxu0 %vm1235_vm9, %v35197_v45  ;;  %v11827_v48 = vsel %vm933_vm6, %v31178_v54, %v31154_v25  ;;  %v11826_v31 = vsel %vm933_vm6, %v31128_v52, %v31178_v54 }
 0x574   :  { %27103 = vmatpush1.msk.msra.mxu1 %vm1238_vm8, %v10496_v9  ;;  %27106 = vmatpush1.msk.msra.mxu0 %vm1238_vm8, %v10498_v26 }
 0x575   :  { %27108 = vmatprep.subr.msk.mxu1 %vm1238_vm8, %v30846_v43  ;;  %27111 = vmatprep.subr.msk.mxu0 %vm1238_vm8, %v11154_v4 }
 0x576   :  { %10954 = vmatprep.mubr.f32.mxu1 %v35164_v19  ;;  %11025 = vmatprep.mubr.f32.mxu0 %v35164_v19  ;;  %v31202_v55 = vpop.permute.xlu0 %11806  ;;  %v31204_v2 = vpop.permute.xlu1 %11812 }
 0x577   :  { %27104 = vmatmul.mubr.msk.f32.vlgmr.msra.gmra.mxu1 %vm1235_vm9, %v35197_v45  ;;  %27107 = vmatmul.mubr.msk.f32.vlgmr.msra.gmra.mxu0 %vm1235_vm9, %v35197_v45  ;;  %v11829_v18 = vsel %vm933_vm6, %v31202_v55, %v31180_v30  ;;  %v11828_v24 = vsel %vm933_vm6, %v31154_v25, %v31202_v55 }
 0x578   :  { %27109 = vmatpush1.msk.msra.mxu1 %vm1238_vm8, %v10500_v16  ;;  %27112 = vmatpush1.msk.msra.mxu0 %vm1238_vm8, %v11153_v20 }
 0x579   :  { %27114 = vmatprep.subr.msk.mxu1 %vm1238_vm8, %v11156_v51  ;;  %27117 = vmatprep.subr.msk.mxu0 %vm1238_vm8, %v11158_v53  ;;  %v7347_v53 = vpop.f32.mrf.mxu0 }
 0x57a   :  { %11096 = vmatprep.mubr.f32.mxu1 %v35164_v19  ;;  %11266 = vmatprep.mubr.f32.mxu0 %v35164_v19  ;;  %v31228_v6 = vpop.permute.xlu0 %11810  ;;  %v31230_v43 = vpop.permute.xlu1 %11816 }
 0x57b   :  { %27110 = vmatmul.mubr.msk.f32.vlgmr.msra.gmra.mxu1 %vm1235_vm9, %v35197_v45  ;;  %27113 = vmatmul.mubr.msk.f32.vlgmr.msra.gmra.mxu0 %vm1235_vm9, %v30922_v63  ;;  %v11831_v0 = vsel %vm933_vm6, %v31228_v6, %v31204_v2  ;;  %v11830_v23 = vsel %vm933_vm6, %v31180_v30, %v31228_v6  ;;  %v13379_v6 = vld [vmem:[%s34879_s7] sm:$0xff] }
 0x57c   :  { %27115 = vmatpush1.msk.msra.mxu1 %vm1238_vm8, %v11155_v35  ;;  %27118 = vmatpush1.msk.msra.mxu0 %vm1238_vm8, %v11157_v17 }
 0x57d   :  { %27120 = vmatprep.subr.msk.mxu1 %vm1238_vm8, %v11160_v49  ;;  %27123 = vmatprep.subr.msk.mxu0 %vm1238_vm8, %v11162_v13 }
 0x57e   :  { %11337 = vmatprep.mubr.f32.mxu1 %v35164_v19  ;;  %11408 = vmatprep.mubr.f32.mxu0 %v35164_v19  ;;  %v31254_v32 = vpop.permute.xlu0 %11814  ;;  %v31256_v57 = vpop.permute.xlu1 %12457 }
 0x57f   :  { %27116 = vmatmul.mubr.msk.f32.vlgmr.msra.gmra.mxu1 %vm1235_vm9, %v30922_v63  ;;  %27119 = vmatmul.mubr.msk.f32.vlgmr.msra.gmra.mxu0 %vm1235_vm9, %v30922_v63  ;;  %v11833_v14 = vsel %vm933_vm6, %v31254_v32, %v31230_v43  ;;  %v11832_v21 = vsel %vm933_vm6, %v31204_v2, %v31254_v32 }
 0x580   :  { %27121 = vmatpush1.msk.msra.mxu1 %vm1238_vm8, %v11159_v5  ;;  %27124 = vmatpush1.msk.msra.mxu0 %vm1238_vm8, %v11161_v58 }
 0x581   :  { %27126 = vmatprep.subr.msk.mxu1 %vm1238_vm8, %v11164_v7  ;;  %27129 = vmatprep.subr.msk.mxu0 %vm1238_vm8, %v11166_v40 }
 0x582   :  { %11479 = vmatprep.mubr.f32.mxu1 %v35164_v19  ;;  %11550 = vmatprep.mubr.f32.mxu0 %v35164_v19  ;;  %v31280_v38 = vpop.permute.xlu0 %11818  ;;  %v31282_v33 = vpop.permute.xlu1 %12455 }
 0x583   :  { %27122 = vmatmul.mubr.msk.f32.vlgmr.msra.gmra.mxu1 %vm1235_vm9, %v30922_v63  ;;  %27125 = vmatmul.mubr.msk.f32.vlgmr.msra.gmra.mxu0 %vm1235_vm9, %v30922_v63  ;;  %v11834_v37 = vsel %vm933_vm6, %v31230_v43, %v31280_v38  ;;  %v12487_v45 = vsel %vm1049_vm7, %v31282_v33, %v31256_v57  ;;  %v31471_v43 = vpop.f32.mrf.mxu0 }
 0x584   :  { %27127 = vmatpush1.msk.msra.mxu1 %vm1238_vm8, %v11163_v11  ;;  %27130 = vmatpush1.msk.msra.mxu0 %vm1238_vm8, %v11165_v1 }
 0x585   :  { %27132 = vmatprep.subr.msk.mxu1 %vm1238_vm8, %v31026_v22  ;;  %27135 = vmatprep.subr.msk.mxu0 %vm1238_vm8, %v11821_v44  ;;  %v11825_v22 = vsel %vm933_vm6, %v31152_v50, %v31128_v52 }
 0x586   :  { %11621 = vmatprep.mubr.f32.mxu1 %v35164_v19  ;;  %11692 = vmatprep.mubr.f32.mxu0 %v35164_v19  ;;  %v31304_v8 = vpop.permute.xlu0 %12459  ;;  %v31306_v39 = vpop.permute.xlu1 %12463 }
 0x587   :  { %27128 = vmatmul.mubr.msk.f32.vlgmr.msra.gmra.mxu1 %vm1235_vm9, %v30922_v63  ;;  %27131 = vmatmul.mubr.msk.f32.vlgmr.msra.gmra.mxu0 %vm1235_vm9, %v30922_v63  ;;  %v12488_v41 = vsel %vm1049_vm7, %v31256_v57, %v31304_v8 }
 0x588   :  { %27133 = vmatpush1.msk.msra.mxu1 %vm1238_vm8, %v11167_v29  ;;  %27136 = vmatpush1.msk.msra.mxu0 %vm1238_vm8, %v11820_v15 }
 0x589   :  { %27138 = vmatprep.subr.msk.mxu1 %vm1238_vm8, %v11823_v27  ;;  %27141 = vmatprep.subr.msk.mxu0 %vm1238_vm8, %v11825_v22 }
 0x58a   :  { %11763 = vmatprep.mubr.f32.mxu1 %v35164_v19  ;;  %11933 = vmatprep.mubr.f32.mxu0 %v35164_v19  ;;  %v12462_v62 = vpop.permute.xlu0 %12461  ;;  %v12466_v28 = vpop.permute.xlu1 %12465 }
 0x58b   :  { %27134 = vmatmul.mubr.msk.f32.vlgmr.msra.gmra.mxu1 %vm1235_vm9, %v30922_v63  ;;  %27137 = vmatmul.mubr.msk.f32.vlgmr.msra.gmra.mxu0 %vm1235_vm9, %v31102_v59  ;;  %v12490_v61 = vsel %vm1049_vm7, %v12462_v62, %v31306_v39  ;;  %v12489_v56 = vsel %vm1049_vm7, %v31304_v8, %v12462_v62  ;;  %v12491_v42 = vsel %vm1049_vm7, %v31306_v39, %v12466_v28  ;;  %v7418_v35 = vpop.f32.mrf.mxu1 }
 0x58c   :  { %27139 = vmatpush1.msk.msra.mxu1 %vm1238_vm8, %v11822_v46  ;;  %27142 = vmatpush1.msk.msra.mxu0 %vm1238_vm8, %v11824_v47 }
 0x58d   :  { %27144 = vmatprep.subr.msk.mxu1 %vm1238_vm8, %v11827_v48  ;;  %27147 = vmatprep.subr.msk.mxu0 %vm1238_vm8, %v11829_v18  ;;  %v31474_v49 = vpop.f32.mrf.mxu1 }
 0x58e   :  { %12004 = vmatprep.mubr.f32.mxu1 %v35164_v19  ;;  %12075 = vmatprep.mubr.f32.mxu0 %v35164_v19  ;;  %v31352_v63 = vpop.permute.xlu0 %12453  ;;  %v12470_v60 = vpop.permute.xlu1 %12469 }
 0x58f   :  { %27140 = vmatmul.mubr.msk.f32.vlgmr.msra.gmra.mxu1 %vm1235_vm9, %v31102_v59  ;;  %27143 = vmatmul.mubr.msk.f32.vlgmr.msra.gmra.mxu0 %vm1235_vm9, %v31102_v59 }
 0x590   :  { %27145 = vmatpush1.msk.msra.mxu1 %vm1238_vm8, %v11826_v31  ;;  %27148 = vmatpush1.msk.msra.mxu0 %vm1238_vm8, %v11828_v24 }
 0x591   :  { %27150 = vmatprep.subr.msk.mxu1 %vm1238_vm8, %v11831_v0  ;;  %27153 = vmatprep.subr.msk.mxu0 %vm1238_vm8, %v11833_v14 }
 0x592   :  { %12146 = vmatprep.mubr.f32.mxu1 %v35164_v19  ;;  %12217 = vmatprep.mubr.f32.mxu0 %v35164_v19  ;;  %v12468_v12 = vpop.permute.xlu0 %12467  ;;  %v12474_v52 = vpop.permute.xlu1 %12473 }
 0x593   :  { %27146 = vmatmul.mubr.msk.f32.vlgmr.msra.gmra.mxu1 %vm1235_vm9, %v31102_v59  ;;  %27149 = vmatmul.mubr.msk.f32.vlgmr.msra.gmra.mxu0 %vm1235_vm9, %v31102_v59  ;;  %v12492_v10 = vsel %vm1049_vm7, %v12466_v28, %v12468_v12  ;;  %v12493_v54 = vsel %vm1049_vm7, %v12468_v12, %v12470_v60 }
 0x594   :  { %27151 = vmatpush1.msk.msra.mxu1 %vm1238_vm8, %v11830_v23  ;;  %27154 = vmatpush1.msk.msra.mxu0 %vm1238_vm8, %v11832_v21 }
 0x595   :  { %27156 = vmatprep.subr.msk.mxu1 %vm1238_vm8, %v31280_v38  ;;  %27159 = vmatprep.subr.msk.mxu0 %vm1238_vm8, %v12488_v41 }
 0x596   :  { %12288 = vmatprep.mubr.f32.mxu1 %v35164_v19  ;;  %12359 = vmatprep.mubr.f32.mxu0 %v35164_v19 }
 0x597   :  { %27152 = vmatmul.mubr.msk.f32.vlgmr.msra.gmra.mxu1 %vm1235_vm9, %v31102_v59  ;;  %27155 = vmatmul.mubr.msk.f32.vlgmr.msra.gmra.mxu0 %vm1235_vm9, %v31102_v59  ;;  %v12472_v34 = vpop.permute.xlu0 %12471  ;;  %v12478_v50 = vpop.permute.xlu1 %12477 }
 0x598   :  { %27157 = vmatpush1.msk.msra.mxu1 %vm1238_vm8, %v11834_v37  ;;  %27160 = vmatpush1.msk.msra.mxu0 %vm1238_vm8, %v12487_v45  ;;  %v12494_v25 = vsel %vm1049_vm7, %v12470_v60, %v12472_v34  ;;  %v12495_v30 = vsel %vm1049_vm7, %v12472_v34, %v12474_v52 }
 0x599   :  { %27162 = vmatprep.subr.msk.mxu1 %vm1238_vm8, %v12490_v61  ;;  %12430 = vmatprep.mubr.f32.mxu1 %v35164_v19 }
 0x59a   :  { %27165 = vmatprep.subr.msk.mxu0 %vm1238_vm8, %v12492_v10  ;;  %12600 = vmatprep.mubr.f32.mxu0 %v35164_v19 }
 0x59b   :  { %27158 = vmatmul.mubr.msk.f32.vlgmr.msra.gmra.mxu1 %vm1235_vm9, %v31102_v59  ;;  %27161 = vmatmul.mubr.msk.f32.vlgmr.msra.gmra.mxu0 %vm1235_vm9, %v31352_v63 }
 0x59c   :  { %27163 = vmatpush1.msk.msra.mxu1 %vm1238_vm8, %v12489_v56  ;;  %27166 = vmatpush1.msk.msra.mxu0 %vm1238_vm8, %v12491_v42 }
 0x59d   :  { %12671 = vmatprep.mubr.f32.mxu1 %v35164_v19  ;;  %27168 = vmatprep.subr.msk.mxu1 %vm1238_vm8, %v12494_v25  ;;  %v12476_v3 = vpop.permute.xlu0 %12475  ;;  %v12482_v59 = vpop.permute.xlu1 %12481 }
 0x59e   :  { %12742 = vmatprep.mubr.f32.mxu0 %v35164_v19  ;;  %v12496_v36 = vsel %vm1049_vm7, %v12474_v52, %v12476_v3  ;;  %v12497_v4 = vsel %vm1049_vm7, %v12476_v3, %v12478_v50  ;;  %13382 = vrot.lane.b32.xlu0 %v13379_v6, %s27956_s23 }
 0x59f   :  { %27164 = vmatmul.mubr.msk.f32.vlgmr.msra.gmra.mxu1 %vm1235_vm9, %v31352_v63  ;;  %27167 = vmatmul.mubr.msk.f32.vlgmr.msra.gmra.mxu0 %vm1235_vm9, %v31352_v63  ;;  %v7489_v17 = vpop.f32.mrf.mxu0 }
 0x5a0   :  { %27169 = vmatpush1.msk.msra.mxu1 %vm1238_vm8, %v12493_v54  ;;  %12813 = vmatprep.mubr.f32.mxu1 %v35164_v19 }
 0x5a1   :  { %27171 = vmatprep.subr.msk.mxu0 %vm1238_vm8, %v12496_v36  ;;  %12884 = vmatprep.mubr.f32.mxu0 %v35164_v19  ;;  %v31476_v13 = vpop.f32.mrf.mxu0 }
 0x5a2   :  { %27172 = vmatpush1.msk.msra.mxu0 %vm1238_vm8, %v12495_v30  ;;  %v12480_v9 = vpop.permute.xlu0 %12479  ;;  %v12486_v55 = vpop.permute.xlu1 %12485  ;;  %14641 = vrot.lane.b32.xlu0 %v13379_v6, %s27958_s0 }
 0x5a3   :  { %27170 = vmatmul.mubr.msk.f32.vlgmr.msra.gmra.mxu1 %vm1235_vm9, %v31352_v63  ;;  %27173 = vmatmul.mubr.msk.f32.vlgmr.msra.gmra.mxu0 %vm1235_vm9, %v31352_v63  ;;  %v12498_v26 = vsel %vm1049_vm7, %v12478_v50, %v12480_v9  ;;  %v12499_v51 = vsel %vm1049_vm7, %v12480_v9, %v12482_v59 }
 0x5a4   :  { %27174 = vmatprep.subr.msk.mxu1 %vm1238_vm8, %v12498_v26  ;;  %12955 = vmatprep.mubr.f32.mxu1 %v35164_v19 }
 0x5a5   :  { %27175 = vmatpush1.msk.msra.mxu1 %vm1238_vm8, %v12497_v4  ;;  %13026 = vmatprep.mubr.f32.mxu0 %v35164_v19 }
 0x5a6   :  { %27180 = vmatprep.subr.msk.mxu1 %vm1238_vm8, %v12486_v55  ;;  %15301 = vrot.lane.b32.xlu0 %v13379_v6, %s27959_s30 }
 0x5a7   :  { %v12484_v2 = vpop.permute.xlu0 %12483  ;;  %27176 = vmatmul.mubr.msk.f32.vlgmr.msra.gmra.mxu1 %vm1235_vm9, %v31352_v63 }
 0x5a8   :  { %v12501_v16 = vsel %vm1049_vm7, %v12484_v2, %v12486_v55  ;;  %v12500_v20 = vsel %vm1049_vm7, %v12482_v59, %v12484_v2  ;;  %13097 = vmatprep.mubr.f32.mxu1 %v35164_v19 }
 0x5a9   :  { %27177 = vmatprep.subr.msk.mxu0 %vm1238_vm8, %v12500_v20  ;;  %27181 = vmatpush1.msk.msra.mxu1 %vm1238_vm8, %v12501_v16 }
 0x5aa   :  { %27178 = vmatpush1.msk.msra.mxu0 %vm1238_vm8, %v12499_v51  ;;  %15961 = vrot.lane.b32.xlu0 %v13379_v6, %s27950_s3 }
 0x5ab   :  { %27179 = vmatmul.mubr.msk.f32.vlgmr.msra.gmra.mxu0 %vm1235_vm9, %v31352_v63  ;;  %27182 = vmatmul.mubr.msk.f32.vlgmr.msra.gmra.mxu1 %vm1235_vm9, %v31352_v63 }
 0x5ac   :  { %13539 = vmatprep.mubr.f32.mxu0 %v35164_v19  ;;  %13610 = vmatprep.mubr.f32.mxu1 %v35164_v19 }
 0x5ae   :  { %16621 = vrot.lane.b32.xlu0 %v13379_v6, %s27960_s20 }
 0x5af   :  { %v7560_v32 = vpop.f32.mrf.mxu1 }
 0x5b1   :  { %v31479_v5 = vpop.f32.mrf.mxu1 }
 0x5c3   :  { %v7631_v57 = vpop.f32.mrf.mxu0 }
 0x5c5   :  { %v31482_v58 = vpop.f32.mrf.mxu0 }
 0x5cf   :  { %v7702_v7 = vpop.f32.mrf.mxu1 }
 0x5d1   :  { %v31485_v38 = vpop.f32.mrf.mxu1 }
 0x5e3   :  { %v7773_v40 = vpop.f32.mrf.mxu0 }
 0x5e5   :  { %v31487_v33 = vpop.f32.mrf.mxu0 }
 0x5e7   :  { %v7844_v11 = vpop.f32.mrf.mxu1 }
 0x5e8   :  { %v7949_v1 = vpop.f32.mrf.mxu0 }
 0x5e9   :  { %v31489_v44 = vpop.f32.mrf.mxu1  ;;  %v7950_v0 = vadd.f32 %v7949_v1, %v7347_v53 }
 0x5ea   :  { %v31491_v8 = vpop.f32.mrf.mxu0 }
 0x5ed   :  { %v8020_v39 = vpop.f32.mrf.mxu1  ;;  %v8091_v29 = vpop.f32.mrf.mxu0 }
 0x5ee   :  { %v8021_v37 = vadd.f32 %v8020_v39, %v7418_v35  ;;  %v8092_v45 = vadd.f32 %v8091_v29, %v7489_v17 }
 0x5ef   :  { %v31493_v15 = vpop.f32.mrf.mxu1  ;;  %v31495_v27 = vpop.f32.mrf.mxu0 }
 0x5f2   :  { %v8162_v22 = vpop.f32.mrf.mxu1  ;;  %v8233_v62 = vpop.f32.mrf.mxu0 }
 0x5f3   :  { %v8234_v28 = vadd.f32 %v8233_v62, %v7631_v57  ;;  %v8163_v42 = vadd.f32 %v8162_v22, %v7560_v32 }
 0x5f4   :  { %v31497_v46 = vpop.f32.mrf.mxu1  ;;  %v31499_v47 = vpop.f32.mrf.mxu0 }
 0x5f6   :  { %v8304_v48 = vpop.f32.mrf.mxu1 }
 0x5f7   :  { %v8305_v18 = vadd.f32 %v8304_v48, %v7702_v7  ;;  %v8375_v63 = vpop.f32.mrf.mxu0 }
 0x5f8   :  { %v8376_v60 = vadd.f32 %v8375_v63, %v7773_v40  ;;  %v31501_v31 = vpop.f32.mrf.mxu1 }
 0x5f9   :  { %v31503_v24 = vpop.f32.mrf.mxu0 }
 0x5fb   :  { %v8446_v14 = vpop.f32.mrf.mxu1  ;;  %v8600_v12 = vpop.f32.mrf.mxu0 }
 0x5fc   :  { %v8447_v23 = vadd.f32 %v8446_v14, %v7844_v11  ;;  %v9102_v21 = vadd.f32 %v8600_v12, %v7950_v0 }
 0x5fd   :  { %v31505_v52 = vpop.f32.mrf.mxu1  ;;  %v31507_v41 = vpop.f32.mrf.mxu0 }
 0x5ff   :  { %v8671_v10 = vpop.f32.mrf.mxu1  ;;  %v8742_v34 = vpop.f32.mrf.mxu0 }
 0x600   :  { %v9104_v61 = vadd.f32 %v8671_v10, %v8021_v37  ;;  %v9106_v50 = vadd.f32 %v8742_v34, %v8092_v45 }
 0x601   :  { %v31509_v25 = vpop.f32.mrf.mxu1  ;;  %v31511_v56 = vpop.f32.mrf.mxu0 }
 0x603   :  { %v8813_v3 = vpop.f32.mrf.mxu1  ;;  %v8884_v36 = vpop.f32.mrf.mxu0 }
 0x604   :  { %v9108_v54 = vadd.f32 %v8813_v3, %v8163_v42  ;;  %v9110_v59 = vadd.f32 %v8884_v36, %v8234_v28 }
 0x605   :  { %v31513_v30 = vpop.f32.mrf.mxu1  ;;  %v31515_v9 = vpop.f32.mrf.mxu0 }
 0x607   :  { %v8955_v26 = vpop.f32.mrf.mxu1  ;;  %v9026_v4 = vpop.f32.mrf.mxu0 }
 0x608   :  { %v9112_v55 = vadd.f32 %v8955_v26, %v8305_v18  ;;  %v9114_v2 = vadd.f32 %v9026_v4, %v8376_v60 }
 0x609   :  { %v31517_v16 = vpop.f32.mrf.mxu1  ;;  %v31519_v20 = vpop.f32.mrf.mxu0 }
 0x60b   :  { %v9097_v51 = vpop.f32.mrf.mxu1  ;;  %v9267_v53 = vpop.f32.mrf.mxu0 }
 0x60c   :  { %v9116_v6 = vadd.f32 %v9097_v51, %v8447_v23  ;;  %v31521_v35 = vadd.f32 %v9267_v53, %v9102_v21 }
 0x60d   :  { %v31523_v17 = vpop.f32.mrf.mxu1  ;;  %v31525_v32 = vpop.f32.mrf.mxu0 }
 0x60f   :  { %v9338_v57 = vpop.f32.mrf.mxu1  ;;  %v9409_v7 = vpop.f32.mrf.mxu0 }
 0x610   :  { %v31527_v40 = vadd.f32 %v9338_v57, %v9104_v61  ;;  %v31529_v11 = vadd.f32 %v9409_v7, %v9106_v50 }
 0x611   :  { %v31531_v1 = vpop.f32.mrf.mxu1  ;;  %v31533_v39 = vpop.f32.mrf.mxu0 }
 0x613   :  { %v9480_v29 = vpop.f32.mrf.mxu1  ;;  %v9551_v22 = vpop.f32.mrf.mxu0 }
 0x614   :  { %v31535_v62 = vadd.f32 %v9480_v29, %v9108_v54  ;;  %v9777_v28 = vadd.f32 %v9551_v22, %v9110_v59 }
 0x615   :  { %v31537_v48 = vpop.f32.mrf.mxu1  ;;  %v31539_v18 = vpop.f32.mrf.mxu0 }
 0x617   :  { %v9622_v63 = vpop.f32.mrf.mxu1  ;;  %v9693_v60 = vpop.f32.mrf.mxu0 }
 0x618   :  { %v9779_v0 = vadd.f32 %v9622_v63, %v9112_v55  ;;  %v9781_v14 = vadd.f32 %v9693_v60, %v9114_v2 }
 0x619   :  { %v31541_v12 = vpop.f32.mrf.mxu1  ;;  %v31543_v23 = vpop.f32.mrf.mxu0 }
 0x61b   :  { %v9764_v21 = vpop.f32.mrf.mxu1  ;;  %v31545_v37 = vpop.f32.mrf.mxu0 }
 0x61c   :  { %v9783_v45 = vadd.f32 %v9764_v21, %v9116_v6 }
 0x61d   :  { %v31547_v10 = vpop.f32.mrf.mxu1  ;;  %v31549_v34 = vpop.f32.mrf.mxu0 }
 0x61f   :  { %v31551_v61 = vpop.f32.mrf.mxu1  ;;  %v31553_v50 = vpop.f32.mrf.mxu0 }
 0x621   :  { %v31555_v42 = vpop.f32.mrf.mxu1  ;;  %v31557_v3 = vpop.f32.mrf.mxu0 }
 0x623   :  { %v31559_v36 = vpop.f32.mrf.mxu1  ;;  %v10218_v54 = vpop.f32.mrf.mxu0 }
 0x624   :  { %v31561_v59 = vadd.f32 %v10218_v54, %v9777_v28 }
 0x625   :  { %v31563_v26 = vpop.f32.mrf.mxu1  ;;  %v31565_v4 = vpop.f32.mrf.mxu0 }
 0x626   :  { %35199 = vst [vmem:[#allocation15_spill] sm:$0xff] %v31561_v59 }
 0x627   :  { %v10289_v55 = vpop.f32.mrf.mxu1  ;;  %v10360_v2 = vpop.f32.mrf.mxu0 }
 0x628   :  { %v31567_v51 = vadd.f32 %v10289_v55, %v9779_v0  ;;  %v31569_v53 = vadd.f32 %v10360_v2, %v9781_v14 }
 0x629   :  { %v31571_v6 = vpop.f32.mrf.mxu1  ;;  %v31573_v57 = vpop.f32.mrf.mxu0 }
 0x62a   :  { %35200 = vst [vmem:[#allocation44_spill] sm:$0xff] %v31567_v51  ;;  %35201 = vst [vmem:[#allocation20_spill] sm:$0xff] %v31569_v53 }
 0x62b   :  { %v10431_v7 = vpop.f32.mrf.mxu1  ;;  %v31575_v29 = vpop.f32.mrf.mxu0 }
 0x62c   :  { %v31577_v22 = vadd.f32 %v10431_v7, %v9783_v45 }
 0x62d   :  { %v31579_v28 = vpop.f32.mrf.mxu1  ;;  %v31581_v63 = vpop.f32.mrf.mxu0 }
 0x62e   :  { %35202 = vst [vmem:[#allocation12_spill] sm:$0xff] %v31577_v22 }
 0x62f   :  { %v31583_v60 = vpop.f32.mrf.mxu1  ;;  %v31585_v21 = vpop.f32.mrf.mxu0 }
 0x631   :  { %v31587_v0 = vpop.f32.mrf.mxu1  ;;  %v31589_v14 = vpop.f32.mrf.mxu0 }
 0x632   :  { %35203 = vst [vmem:[#allocation24_spill] sm:$0xff] %v31587_v0  ;;  %35204 = vst [vmem:[#allocation18_spill] sm:$0xff] %v31589_v14 }
 0x633   :  { %v31591_v54 = vpop.f32.mrf.mxu1  ;;  %v31593_v55 = vpop.f32.mrf.mxu0 }
 0x634   :  { %35205 = vst [vmem:[#allocation29_spill] sm:$0xff] %v31591_v54  ;;  %35206 = vst [vmem:[#allocation6_spill] sm:$0xff] %v31593_v55 }
 0x635   :  { %v31595_v2 = vpop.f32.mrf.mxu1  ;;  %v31597_v45 = vpop.f32.mrf.mxu0 }
 0x636   :  { %35207 = vst [vmem:[#allocation42_spill] sm:$0xff] %v31595_v2  ;;  %35208 = vst [vmem:[#allocation28_spill] sm:$0xff] %v31597_v45 }
 0x637   :  { %v31599_v7 = vpop.f32.mrf.mxu1  ;;  %v31601_v19 = vpop.f32.mrf.mxu0 }
 0x638   :  { %35209 = vst [vmem:[#allocation32_spill] sm:$0xff] %v31599_v7  ;;  %35210 = vst [vmem:[#allocation30_spill] sm:$0xff] %v31601_v19 }
 0x639   :  { %v31603_v22 = vpop.f32.mrf.mxu1  ;;  %v31605_v53 = vpop.f32.mrf.mxu0 }
 0x63a   :  { %35211 = vst [vmem:[#allocation9_spill] sm:$0xff] %v31603_v22  ;;  %35212 = vst [vmem:[#allocation14_spill] sm:$0xff] %v31605_v53 }
 0x63b   :  { %v31607_v51 = vpop.f32.mrf.mxu1  ;;  %v31609_v59 = vpop.f32.mrf.mxu0 }
 0x63c   :  { %35213 = vst [vmem:[#allocation7_spill] sm:$0xff] %v31607_v51 }
 0x63d   :  { %v31611_v14 = vpop.f32.mrf.mxu1  ;;  %v31613_v54 = vpop.f32.mrf.mxu0 }
 0x63e   :  { %35214 = vst [vmem:[#allocation10_spill] sm:$0xff] %v31611_v14  ;;  %35215 = vst [vmem:[#allocation17_spill] sm:$0xff] %v31613_v54 }
 0x63f   :  { %v31615_v55 = vpop.f32.mrf.mxu1  ;;  %v31617_v2 = vpop.f32.mrf.mxu0 }
 0x640   :  { %35216 = vst [vmem:[#allocation11_spill] sm:$0xff] %v31615_v55  ;;  %35217 = vst [vmem:[#allocation21_spill] sm:$0xff] %v31617_v2 }
 0x641   :  { %v31619_v45 = vpop.f32.mrf.mxu1  ;;  %v31621_v7 = vpop.f32.mrf.mxu0 }
 0x642   :  { %35218 = vst [vmem:[#allocation13_spill] sm:$0xff] %v31619_v45  ;;  %35219 = vst [vmem:[#allocation25_spill] sm:$0xff] %v31621_v7 }
 0x643   :  { %v31623_v19 = vpop.f32.mrf.mxu1  ;;  %v31625_v22 = vpop.f32.mrf.mxu0 }
 0x644   :  { %35220 = vst [vmem:[#allocation23_spill] sm:$0xff] %v31623_v19  ;;  %35221 = vst [vmem:[#allocation35_spill] sm:$0xff] %v31625_v22 }
 0x645   :  { %v31627_v53 = vpop.f32.mrf.mxu1  ;;  %v31629_v51 = vpop.f32.mrf.mxu0 }
 0x646   :  { %35222 = vst [vmem:[#allocation26_spill] sm:$0xff] %v31627_v53  ;;  %35223 = vst [vmem:[#allocation38_spill] sm:$0xff] %v31629_v51  ;;  %v7952_v53 = vadd.f32 %v31491_v8, %v31471_v43  ;;  %v8378_v43 = vadd.f32 %v31503_v24, %v31487_v33  ;;  %v8449_v8 = vadd.f32 %v31505_v52, %v31489_v44 }
 0x647   :  { %v31631_v0 = vpop.f32.mrf.mxu1  ;;  %v31633_v14 = vpop.f32.mrf.mxu0 }
 0x648   :  { %35224 = vst [vmem:[#allocation5_spill] sm:$0xff] %v31633_v14  ;;  %v8023_v14 = vadd.f32 %v31493_v15, %v31474_v49  ;;  %v9103_v49 = vadd.f32 %v31507_v41, %v7952_v53  ;;  %v9115_v33 = vadd.f32 %v31519_v20, %v8378_v43  ;;  %v9117_v44 = vadd.f32 %v31523_v17, %v8449_v8  ;;  %v35235_v43 = vld [vmem:[#allocation42_spill] sm:$0xff]  ;;  %v35236_v8 = vld [vmem:[#allocation28_spill] sm:$0xff] }
 0x649   :  { %v31635_v54 = vpop.f32.mrf.mxu1  ;;  %v31637_v55 = vpop.f32.mrf.mxu0 }
 0x64a   :  { %35225 = vst [vmem:[#allocation46_spill] sm:$0xff] %v31635_v54  ;;  %35226 = vst [vmem:[#allocation33_spill] sm:$0xff] %v31637_v55  ;;  %v8094_v55 = vadd.f32 %v31495_v27, %v31476_v13  ;;  %v8307_v54 = vadd.f32 %v31501_v31, %v31485_v38  ;;  %v9784_v20 = vadd.f32 %v31547_v10, %v9117_v44 }
 0x64b   :  { %v31639_v2 = vpop.f32.mrf.mxu1  ;;  %v11935_v45 = vpop.f32.mrf.mxu0 }
 0x64c   :  { %35227 = vst [vmem:[#allocation48_spill] sm:$0xff] %v31639_v2  ;;  %v8165_v2 = vadd.f32 %v31497_v46, %v31479_v5  ;;  %v9105_v5 = vadd.f32 %v31509_v25, %v8023_v14  ;;  %v9107_v27 = vadd.f32 %v31511_v56, %v8094_v55  ;;  %v9113_v46 = vadd.f32 %v31517_v16, %v8307_v54  ;;  %v35231_v14 = vld [vmem:[#allocation17_spill] sm:$0xff] }
 0x64d   :  { %v31641_v7 = vpop.f32.mrf.mxu1  ;;  %v31643_v19 = vpop.f32.mrf.mxu0  ;;  %v10436_v56 = vadd.f32 %v31545_v37, %v31521_v35  ;;  %v9782_v16 = vadd.f32 %v31543_v23, %v9115_v33  ;;  %v10440_v35 = vadd.f32 %v31553_v50, %v31529_v11  ;;  %v10442_v23 = vadd.f32 %v31559_v36, %v31535_v62 }
 0x64e   :  { %35228 = vst [vmem:[#allocation41_spill] sm:$0xff] %v31641_v7  ;;  %v8236_v7 = vadd.f32 %v31499_v47, %v31482_v58  ;;  %v9109_v58 = vadd.f32 %v31513_v30, %v8165_v2  ;;  %v9770_v47 = vadd.f32 %v31525_v32, %v9103_v49  ;;  %v9772_v52 = vadd.f32 %v31531_v1, %v9105_v5  ;;  %v35233_v2 = vld [vmem:[#allocation15_spill] sm:$0xff] }
 0x64f   :  { %v31647_v22 = vpop.f32.mrf.mxu1  ;;  %v31649_v51 = vpop.f32.mrf.mxu0  ;;  %v9774_v41 = vadd.f32 %v31533_v39, %v9107_v27  ;;  %v10438_v39 = vadd.f32 %v31551_v61, %v31527_v40  ;;  %v11107_v36 = vadd.f32 %v31585_v21, %v10440_v35 }
 0x650   :  { %v9111_v38 = vadd.f32 %v31515_v9, %v8236_v7  ;;  %v9776_v25 = vadd.f32 %v31537_v48, %v9109_v58  ;;  %v9780_v9 = vadd.f32 %v31541_v12, %v9113_v46  ;;  %v10437_v1 = vadd.f32 %v31549_v34, %v9770_v47  ;;  %v31736_v27 = vpop.permute.xlu0 %13122  ;;  %v35237_v58 = vld [vmem:[#allocation11_spill] sm:$0xff]  ;;  %v35238_v46 = vld [vmem:[#allocation21_spill] sm:$0xff]  ;;  %v35239_v47 = vld [vmem:[#allocation44_spill] sm:$0xff] }
 0x651   :  { %v31666_v15 = vpop.f32.mrf.mxu1  ;;  %v31668_v13 = vpop.f32.mrf.mxu0  ;;  %v11103_v48 = vadd.f32 %v31575_v29, %v10436_v56  ;;  %v10441_v12 = vadd.f32 %v31557_v3, %v9774_v41  ;;  %v31718_v3 = vadd.f32 %v31579_v28, %v9784_v20  ;;  %v11105_v62 = vadd.f32 %v31583_v60, %v10438_v39  ;;  %v35230_v29 = vld [vmem:[#allocation18_spill] sm:$0xff]  ;;  %v35244_v20 = vld [vmem:[#allocation25_spill] sm:$0xff] }
 0x652   :  { %v9778_v30 = vadd.f32 %v31539_v18, %v9111_v38  ;;  %v10439_v18 = vadd.f32 %v31555_v42, %v9772_v52  ;;  %v10443_v37 = vadd.f32 %v31563_v26, %v9776_v25  ;;  %v10447_v61 = vadd.f32 %v31571_v6, %v9780_v9  ;;  %v35234_v28 = vld [vmem:[#allocation6_spill] sm:$0xff]  ;;  %v35240_v52 = vld [vmem:[#allocation32_spill] sm:$0xff]  ;;  %v35243_v9 = vld [vmem:[#allocation13_spill] sm:$0xff] }
 0x653   :  { %v31678_v31 = vpop.f32.mrf.mxu1  ;;  %v31680_v24 = vpop.f32.mrf.mxu0  ;;  %v11104_v11 = vadd.f32 %v31581_v63, %v10437_v1  ;;  %v11770_v50 = vadd.f32 %v31609_v59, %v11103_v48  ;;  %v31715_v42 = vadd.f32 %v31573_v57, %v9782_v16  ;;  %v11108_v63 = vadd.f32 %v35230_v29, %v10441_v12  ;;  %v35232_v57 = vld [vmem:[#allocation29_spill] sm:$0xff]  ;;  %v35241_v25 = vld [vmem:[#allocation20_spill] sm:$0xff]  ;;  %v35242_v56 = vld [vmem:[#allocation30_spill] sm:$0xff] }
 0x654   :  { %v10445_v40 = vadd.f32 %v31565_v4, %v9778_v30  ;;  %v35229_v4 = vld [vmem:[#allocation24_spill] sm:$0xff]  ;;  %v11109_v55 = vadd.f32 %v35232_v57, %v10442_v23  ;;  %v11111_v7 = vadd.f32 %v35234_v28, %v35233_v2  ;;  %v11110_v60 = vadd.f32 %v35235_v43, %v10443_v37  ;;  %v35245_v23 = vld [vmem:[#allocation9_spill] sm:$0xff]  ;;  %v35249_v57 = vld [vmem:[#allocation38_spill] sm:$0xff] }
 0x655   :  { %v31691_v17 = vpop.f32.mrf.mxu1  ;;  %v31693_v32 = vpop.f32.mrf.mxu0  ;;  %v11106_v6 = vadd.f32 %v35229_v4, %v10439_v18  ;;  %v11771_v59 = vadd.f32 %v35231_v14, %v11104_v11  ;;  %v12437_v54 = vadd.f32 %v11935_v45, %v11770_v50  ;;  %v11772_v38 = vadd.f32 %v35237_v58, %v11105_v62  ;;  %v35247_v14 = vld [vmem:[#allocation35_spill] sm:$0xff] }
 0x656   :  { %v11112_v21 = vadd.f32 %v35236_v8, %v10445_v40  ;;  %v11774_v33 = vadd.f32 %v35238_v46, %v11107_v36  ;;  %v11113_v41 = vadd.f32 %v35240_v52, %v35239_v47  ;;  %v11115_v30 = vadd.f32 %v35242_v56, %v35241_v25  ;;  %v35246_v40 = vld [vmem:[#allocation23_spill] sm:$0xff] }
 0x657   :  { %v31706_v10 = vpop.f32.mrf.mxu1  ;;  %v31708_v34 = vpop.f32.mrf.mxu0  ;;  %v12438_v45 = vadd.f32 %v31643_v19, %v11771_v59  ;;  %v11773_v16 = vadd.f32 %v35243_v9, %v11106_v6  ;;  %v11775_v1 = vadd.f32 %v35244_v20, %v11108_v63  ;;  %v12439_v48 = vadd.f32 %v31647_v22, %v11772_v38  ;;  %v35248_v59 = vld [vmem:[#allocation26_spill] sm:$0xff] }
 0x658   :  { %v12441_v18 = vadd.f32 %v31649_v51, %v11774_v33  ;;  %v11114_v37 = vadd.f32 %v35245_v23, %v10447_v61  ;;  %v11776_v11 = vadd.f32 %v35246_v40, %v11109_v55  ;;  %v11778_v51 = vadd.f32 %v35247_v14, %v11111_v7  ;;  %v35254_v40 = vld [vmem:[#allocation46_spill] sm:$0xff] }
 0x659   :  { %v31722_v26 = vpop.f32.mrf.mxu1  ;;  %v31724_v53 = vpop.f32.mrf.mxu0  ;;  %v12440_v50 = vadd.f32 %v31666_v15, %v11773_v16  ;;  %v12442_v62 = vadd.f32 %v31668_v13, %v11775_v1  ;;  %v11779_v2 = vadd.f32 %v35249_v57, %v11112_v21  ;;  %v11780_v8 = vadd.f32 %v31631_v0, %v11113_v41 }
 0x65b   :  { %v31734_v49 = vpop.f32.mrf.mxu1  ;;  %v12602_v5 = vpop.f32.mrf.mxu0  ;;  %v12447_v0 = vadd.f32 %v31706_v10, %v11780_v8  ;;  %v35250_v10 = vld [vmem:[#allocation14_spill] sm:$0xff]  ;;  %v12446_v1 = vadd.f32 %v31693_v32, %v11779_v2 }
 0x65c   :  { %v13104_v44 = vadd.f32 %v12602_v5, %v12437_v54  ;;  %v11777_v54 = vadd.f32 %v35248_v59, %v11110_v60  ;;  %v12443_v5 = vadd.f32 %v31678_v31, %v11776_v11  ;;  %v11116_v20 = vadd.f32 %v35250_v10, %v31715_v42 }
 0x65d   :  { %v31747_v39 = vpop.f32.mrf.mxu1  ;;  %v12604_v35 = vpop.f32.mrf.mxu0  ;;  %v11781_v11 = vadd.f32 %v35254_v40, %v11114_v37 }
 0x65e   :  { %v13125_v19 = vadd.f32 %v31736_v27, %v13104_v44  ;;  %v13105_v12 = vadd.f32 %v12604_v35, %v12438_v45  ;;  %v12444_v21 = vadd.f32 %v31691_v17, %v11777_v54  ;;  %v12445_v45 = vadd.f32 %v31680_v24, %v11778_v51  ;;  %v35256_v51 = vld [vmem:[#allocation33_spill] sm:$0xff]  ;;  %v35257_v54 = vld [vmem:[#allocation48_spill] sm:$0xff] }
 0x65f   :  { %v12673_v36 = vpop.f32.mrf.mxu1  ;;  %v12744_v4 = vpop.f32.mrf.mxu0  ;;  %v12448_v14 = vadd.f32 %v31722_v26, %v11781_v11  ;;  %v11783_v59 = vadd.f32 %v35256_v51, %v11116_v20 }
 0x660   :  { %v13157_v6 = vmul.f32 0.01, %v13125_v19  ;;  %v13126_v29 = vadd.f32 %v31736_v27, %v13105_v12  ;;  %v13106_v63 = vadd.f32 %v12673_v36, %v12439_v48  ;;  %v13108_v22 = vadd.f32 %v12744_v4, %v12441_v18  ;;  %v35251_v48 = vld [vmem:[#allocation12_spill] sm:$0xff]  ;;  %v35252_v18 = vld [vmem:[#allocation7_spill] sm:$0xff]  ;;  %v35253_v12 = vld [vmem:[#allocation5_spill] sm:$0xff] }
 0x661   :  { %v12675_v61 = vpop.f32.mrf.mxu1  ;;  %v12746_v28 = vpop.f32.mrf.mxu0  ;;  %vm13141_vm14 = vcmp.gt.f32.partialorder %v13125_v19, 0.0  ;;  %v11782_v23 = vadd.f32 %v35253_v12, %v11115_v30  ;;  %v35255_v30 = vld [vmem:[#allocation10_spill] sm:$0xff] }
 0x662   :  { %v13127_v15 = vadd.f32 %v31736_v27, %v13106_v63  ;;  %v13129_v13 = vadd.f32 %v31736_v27, %v13108_v22  ;;  %v13107_v55 = vadd.f32 %v12675_v61, %v12440_v50  ;;  %v13109_v43 = vadd.f32 %v12746_v28, %v12442_v62 }
 0x663   :  { %v12815_v58 = vpop.f32.mrf.mxu1  ;;  %v31764_v38 = vsel %vm13141_vm14, %v13125_v19, %v13157_v6  ;;  %v12886_v7 = vpop.f32.mrf.mxu0  ;;  %v13158_v60 = vmul.f32 0.01, %v13126_v29  ;;  %vm13142_vm15 = vcmp.gt.f32.partialorder %v13126_v29, 0.0  ;;  %v11117_v19 = vadd.f32 %v35252_v18, %v35251_v48 }
 0x664   :  { %v13159_v46 = vmul.f32 0.01, %v13127_v15  ;;  %v13128_v33 = vadd.f32 %v31736_v27, %v13107_v55  ;;  %13205 = vrot.lane.b32.xlu1 %v31764_v38, %s27948_s24  ;;  %v13110_v44 = vadd.f32 %v12815_v58, %v12443_v5  ;;  %vm13143_vm10 = vcmp.gt.f32.partialorder %v13127_v15, 0.0  ;;  %v35258_v58 = vld [vmem:[#allocation41_spill] sm:$0xff] }
 0x665   :  { %v12817_v31 = vpop.f32.mrf.mxu1  ;;  %v13161_v47 = vmul.f32 0.01, %v13129_v13  ;;  %v13130_v52 = vadd.f32 %v31736_v27, %v13109_v43  ;;  %v13112_v56 = vadd.f32 %v12886_v7, %v12445_v45  ;;  %v12888_v9 = vpop.f32.mrf.mxu0  ;;  %v31778_v16 = vsel %vm13142_vm15, %v13126_v29, %v13158_v60 }
 0x666   :  { %v13111_v41 = vadd.f32 %v12817_v31, %v12444_v21  ;;  %v31773_v25 = vsel %vm13143_vm10, %v13127_v15, %v13159_v46  ;;  %v13131_v17 = vadd.f32 %v31736_v27, %v13110_v44  ;;  %vm13145_vm11 = vcmp.gt.f32.partialorder %v13129_v13, 0.0 }
 0x667   :  { %13209 = vrot.lane.b32.xlu0 %v31773_v25, %s27948_s24  ;;  %v12957_v24 = vpop.f32.mrf.mxu1  ;;  %vm13144_vm12 = vcmp.gt.f32.partialorder %v13128_v33, 0.0  ;;  %v13160_v35 = vmul.f32 0.01, %v13128_v33  ;;  %v13113_v36 = vadd.f32 %v12888_v9, %v12446_v1  ;;  %v31790_v4 = vsel %vm13145_vm11, %v13129_v13, %v13161_v47 }
 0x668   :  { %13207 = vrot.lane.b32.xlu1 %v31778_v16, %s27948_s24  ;;  %v13114_v50 = vadd.f32 %v12957_v24, %v12447_v0  ;;  %v13132_v62 = vadd.f32 %v31736_v27, %v13111_v41  ;;  %v13162_v42 = vmul.f32 0.01, %v13130_v52  ;;  %v13163_v32 = vmul.f32 0.01, %v13131_v17 }
 0x669   :  { %v13133_v6 = vadd.f32 %v31736_v27, %v13112_v56  ;;  %v12959_v29 = vpop.f32.mrf.mxu1  ;;  %v31795_v63 = vsel %vm13144_vm12, %v13128_v33, %v13160_v35  ;;  %vm13146_vm13 = vcmp.gt.f32.partialorder %v13130_v52, 0.0  ;;  %v11118_v37 = vadd.f32 %v35255_v30, %v31718_v3 }
 0x66a   :  { %vm13147_vm14 = vcmp.gt.f32.partialorder %v13131_v17, 0.0  ;;  %v11784_v57 = vadd.f32 %v35257_v54, %v11117_v19  ;;  %v12449_v2 = vadd.f32 %v31708_v34, %v11782_v23  ;;  %v13135_v61 = vadd.f32 %v31736_v27, %v13114_v50  ;;  %v31860_v23 = vpop.permute.xlu0 %13382 }
 0x66b   :  { %13213 = vrot.lane.b32.xlu0 %v31790_v4, %s27948_s24  ;;  %v13028_v22 = vpop.f32.mrf.mxu0  ;;  %v13134_v28 = vadd.f32 %v31736_v27, %v13113_v36  ;;  %v13115_v15 = vadd.f32 %v12959_v29, %v12448_v14  ;;  %v31807_v13 = vsel %vm13146_vm13, %v13130_v52, %v13162_v42  ;;  %v13164_v3 = vmul.f32 0.01, %v13132_v62  ;;  %v13099_v43 = vpop.f32.mrf.mxu1 }
 0x66c   :  { %13211 = vrot.lane.b32.xlu1 %v31795_v63, %s27948_s24  ;;  %v13165_v55 = vmul.f32 0.01, %v13133_v6  ;;  %v13116_v26 = vadd.f32 %v13028_v22, %v12449_v2  ;;  %v31811_v5 = vsel %vm13147_vm14, %v13131_v17, %v13163_v32  ;;  %vm13148_vm15 = vcmp.gt.f32.partialorder %v13132_v62, 0.0 }
 0x66d   :  { %v13030_v8 = vpop.f32.mrf.mxu0  ;;  %v12450_v34 = vadd.f32 %v31724_v53, %v11783_v59  ;;  %vm13149_vm10 = vcmp.gt.f32.partialorder %v13133_v6, 0.0  ;;  %v11785_v7 = vadd.f32 %v35258_v58, %v11118_v37  ;;  %v12451_v60 = vadd.f32 %v31734_v49, %v11784_v57  ;;  %v13101_v47 = vpop.f32.mrf.mxu1 }
 0x66e   :  { %v13167_v21 = vmul.f32 0.01, %v13135_v61  ;;  %v13136_v46 = vadd.f32 %v31736_v27, %v13115_v15  ;;  %v31819_v45 = vsel %vm13148_vm15, %v13132_v62, %v13164_v3  ;;  %v13166_v0 = vmul.f32 0.01, %v13134_v28  ;;  %v31862_v40 = vpop.permute.xlu0 %14641 }
 0x66f   :  { %13215 = vrot.lane.b32.xlu0 %v31807_v13, %s27948_s24  ;;  %v13117_v33 = vadd.f32 %v13030_v8, %v12450_v34  ;;  %v13137_v44 = vadd.f32 %v31736_v27, %v13116_v26  ;;  %v13118_v31 = vadd.f32 %v13099_v43, %v12451_v60  ;;  %v31824_v53 = vsel %vm13149_vm10, %v13133_v6, %v13165_v55 }
 0x670   :  { %13217 = vrot.lane.b32.xlu1 %v31811_v5, %s27948_s24  ;;  %vm13150_vm11 = vcmp.gt.f32.partialorder %v13134_v28, 0.0  ;;  %v12452_v52 = vadd.f32 %v31747_v39, %v11785_v7  ;;  %vm13151_vm12 = vcmp.gt.f32.partialorder %v13135_v61, 0.0  ;;  %v13168_v56 = vmul.f32 0.01, %v13136_v46 }
 0x671   :  { %v13138_v49 = vadd.f32 %v31736_v27, %v13117_v33  ;;  %v31830_v17 = vsel %vm13150_vm11, %v13134_v28, %v13166_v0  ;;  %v13169_v9 = vmul.f32 0.01, %v13137_v44  ;;  %v13139_v24 = vadd.f32 %v31736_v27, %v13118_v31 }
 0x672   :  { %v13119_v41 = vadd.f32 %v13101_v47, %v12452_v52  ;;  %v31835_v10 = vsel %vm13151_vm12, %v13135_v61, %v13167_v21  ;;  %vm13152_vm13 = vcmp.gt.f32.partialorder %v13136_v46, 0.0  ;;  %vm13153_vm14 = vcmp.gt.f32.partialorder %v13137_v44, 0.0  ;;  %v31864_v11 = vpop.permute.xlu0 %15301 }
 0x673   :  { %13219 = vrot.lane.b32.xlu0 %v31819_v45, %s27948_s24  ;;  %v31840_v20 = vsel %vm13152_vm13, %v13136_v46, %v13168_v56  ;;  %v13170_v1 = vmul.f32 0.01, %v13138_v49  ;;  %v13171_v35 = vmul.f32 0.01, %v13139_v24  ;;  %v31844_v48 = vsel %vm13153_vm14, %v13137_v44, %v13169_v9 }
 0x674   :  { %13221 = vrot.lane.b32.xlu1 %v31824_v53, %s27948_s24  ;;  %v13140_v39 = vadd.f32 %v31736_v27, %v13119_v41  ;;  %vm13154_vm15 = vcmp.gt.f32.partialorder %v13138_v49, 0.0  ;;  %vm13155_vm10 = vcmp.gt.f32.partialorder %v13139_v24, 0.0  ;;  %vm27963_vm12 = vmmov 0  }
 0x675   :  { %v31848_v18 = vsel %vm13154_vm15, %v13138_v49, %v13170_v1  ;;  %v31852_v27 = vsel %vm13155_vm10, %v13139_v24, %v13171_v35 }
 0x676   :  { %v13172_v19 = vmul.f32 0.01, %v13140_v39  ;;  %vm13156_vm11 = vcmp.gt.f32.partialorder %v13140_v39, 0.0  ;;  %v31866_v50 = vpop.permute.xlu0 %15961 }
 0x677   :  { %13223 = vrot.lane.b32.xlu0 %v31830_v17, %s27948_s24 }
 0x678   :  { %13225 = vrot.lane.b32.xlu1 %v31835_v10, %s27948_s24  ;;  %v31856_v12 = vsel %vm13156_vm11, %v13140_v39, %v13172_v19 }
 0x67a   :  { %v31868_v62 = vpop.permute.xlu0 %16621 }
 0x67b   :  { %13227 = vrot.lane.b32.xlu0 %v31840_v20, %s27948_s24  ;;  %35259 = vst [vmem:[#allocation16_spill] sm:$0xff] %v31868_v62 }
 0x67c   :  { %13229 = vrot.lane.b32.xlu1 %v31844_v48, %s27948_s24 }
 0x67f   :  { %13231 = vrot.lane.b32.xlu0 %v31848_v18, %s27948_s24 }
 0x680   :  { %13233 = vrot.lane.b32.xlu1 %v31852_v27, %s27948_s24 }
 0x683   :  { %13235 = vrot.lane.b32.xlu0 %v31856_v12, %s27948_s24 }
 0x6d6   :  { %v13206_v36 = vpop.permute.xlu1 %13205 }
 0x6d9   :  { %v13210_v42 = vpop.permute.xlu0 %13209 }
 0x6da   :  { %v13208_v32 = vpop.permute.xlu1 %13207 }
 0x6db   :  { %v13237_v6 = vsel %vm237_vm0, %v13206_v36, %v13208_v32  ;;  %v13238_v29 = vsel %vm237_vm0, %v13208_v32, %v13210_v42 }
 0x6dc   :  { %v13268_v22 = vmax.f32 %v31764_v38, %v13237_v6  ;;  %v31874_v30 = vmax.f32 %v31778_v16, %v13238_v29 }
 0x6dd   :  { %v13214_v37 = vpop.permute.xlu0 %13213 }
 0x6de   :  { %13302 = vrot.lane.b32.xlu1 %v31874_v30, %s27950_s3  ;;  %13300 = vrot.lane.b32.xlu0 %v13268_v22, %s27950_s3  ;;  %v13212_v14 = vpop.permute.xlu1 %13211 }
 0x6df   :  { %v13239_v51 = vsel %vm237_vm0, %v13210_v42, %v13212_v14  ;;  %v13240_v59 = vsel %vm237_vm0, %v13212_v14, %v13214_v37 }
 0x6e0   :  { %v13270_v54 = vmax.f32 %v31773_v25, %v13239_v51  ;;  %v31883_v57 = vmax.f32 %v31795_v63, %v13240_v59 }
 0x6e1   :  { %v13216_v38 = vpop.permute.xlu0 %13215 }
 0x6e2   :  { %v13241_v16 = vsel %vm237_vm0, %v13214_v37, %v13216_v38  ;;  %13306 = vrot.lane.b32.xlu1 %v31883_v57, %s27950_s3  ;;  %13304 = vrot.lane.b32.xlu0 %v13270_v54, %s27950_s3  ;;  %v13218_v2 = vpop.permute.xlu1 %13217 }
 0x6e3   :  { %v31890_v61 = vmax.f32 %v31790_v4, %v13241_v16  ;;  %v13242_v28 = vsel %vm237_vm0, %v13216_v38, %v13218_v2 }
 0x6e4   :  { %v31894_v15 = vmax.f32 %v31807_v13, %v13242_v28 }
 0x6e5   :  { %v13220_v25 = vpop.permute.xlu0 %13219 }
 0x6e6   :  { %v13243_v63 = vsel %vm237_vm0, %v13218_v2, %v13220_v25  ;;  %13308 = vrot.lane.b32.xlu1 %v31890_v61, %s27950_s3  ;;  %13310 = vrot.lane.b32.xlu0 %v31894_v15, %s27950_s3  ;;  %v13222_v3 = vpop.permute.xlu1 %13221 }
 0x6e7   :  { %v31902_v55 = vmax.f32 %v31811_v5, %v13243_v63  ;;  %v13244_v4 = vsel %vm237_vm0, %v13220_v25, %v13222_v3 }
 0x6e8   :  { %v31906_v26 = vmax.f32 %v31819_v45, %v13244_v4 }
 0x6e9   :  { %v13224_v13 = vpop.permute.xlu0 %13223 }
 0x6ea   :  { %v13245_v43 = vsel %vm237_vm0, %v13222_v3, %v13224_v13  ;;  %13312 = vrot.lane.b32.xlu1 %v31902_v55, %s27950_s3  ;;  %13314 = vrot.lane.b32.xlu0 %v31906_v26, %s27950_s3  ;;  %v13226_v8 = vpop.permute.xlu1 %13225 }
 0x6eb   :  { %v31914_v34 = vmax.f32 %v31824_v53, %v13245_v43  ;;  %v13246_v5 = vsel %vm237_vm0, %v13224_v13, %v13226_v8 }
 0x6ec   :  { %v31918_v58 = vmax.f32 %v31830_v17, %v13246_v5 }
 0x6ed   :  { %v13228_v7 = vpop.permute.xlu0 %13227 }
 0x6ee   :  { %v13247_v60 = vsel %vm237_vm0, %v13226_v8, %v13228_v7  ;;  %13316 = vrot.lane.b32.xlu1 %v31914_v34, %s27950_s3  ;;  %13318 = vrot.lane.b32.xlu0 %v31918_v58, %s27950_s3  ;;  %v13230_v21 = vpop.permute.xlu1 %13229 }
 0x6ef   :  { %v31926_v46 = vmax.f32 %v31835_v10, %v13247_v60  ;;  %v13248_v33 = vsel %vm237_vm0, %v13228_v7, %v13230_v21 }
 0x6f0   :  { %v31930_v45 = vmax.f32 %v31840_v20, %v13248_v33 }
 0x6f1   :  { %v13232_v0 = vpop.permute.xlu0 %13231 }
 0x6f2   :  { %v13249_v44 = vsel %vm237_vm0, %v13230_v21, %v13232_v0  ;;  %13320 = vrot.lane.b32.xlu1 %v31926_v46, %s27950_s3  ;;  %13322 = vrot.lane.b32.xlu0 %v31930_v45, %s27950_s3  ;;  %v13234_v31 = vpop.permute.xlu1 %13233 }
 0x6f3   :  { %v31938_v47 = vmax.f32 %v31844_v48, %v13249_v44  ;;  %v13250_v53 = vsel %vm237_vm0, %v13232_v0, %v13234_v31 }
 0x6f4   :  { %v31942_v52 = vmax.f32 %v31848_v18, %v13250_v53 }
 0x6f5   :  { %v13236_v49 = vpop.permute.xlu0 %13235 }
 0x6f6   :  { %v13251_v41 = vsel %vm237_vm0, %v13234_v31, %v13236_v49  ;;  %13324 = vrot.lane.b32.xlu1 %v31938_v47, %s27950_s3  ;;  %13326 = vrot.lane.b32.xlu0 %v31942_v52, %s27950_s3  ;;  %v31953_v56 = vmax.f32 %v31856_v12, %v13236_v49 }
 0x6f7   :  { %v31950_v17 = vmax.f32 %v31852_v27, %v13251_v41 }
 0x6fa   :  { %13328 = vrot.lane.b32.xlu1 %v31950_v17, %s27950_s3  ;;  %13330 = vrot.lane.b32.xlu0 %v31953_v56, %s27950_s3 }
 0x750   :  { %v13301_v9 = vpop.permute.xlu0 %13300  ;;  %v13303_v24 = vpop.permute.xlu1 %13302 }
 0x751   :  { %v13332_v10 = vsel %vm469_vm2, %v13301_v9, %v13303_v24 }
 0x752   :  { %v31960_v39 = vmax.f32 %v13268_v22, %v13332_v10 }
 0x754   :  { %v13305_v20 = vpop.permute.xlu0 %13304  ;;  %13399 = vrot.lane.b32.xlu1 %v31960_v39, %s27948_s24  ;;  %v13307_v1 = vpop.permute.xlu1 %13306 }
 0x755   :  { %v13334_v35 = vsel %vm469_vm2, %v13305_v20, %v13307_v1  ;;  %v13333_v18 = vsel %vm469_vm2, %v13303_v24, %v13305_v20  ;;  %v32175_v24 = vld [vmem:[%s34879_s7] sm:$0xff] }
 0x756   :  { %v31965_v48 = vmax.f32 %v13270_v54, %v13334_v35  ;;  %v31985_v27 = vmax.f32 %v31874_v30, %v13333_v18 }
 0x758   :  { %14643 = vrot.lane.b32.xlu1 %v31960_v39, %s27949_s25  ;;  %13403 = vrot.lane.b32.xlu0 %v31965_v48, %s27948_s24  ;;  %v13309_v19 = vpop.permute.xlu1 %13308  ;;  %v13311_v42 = vpop.permute.xlu0 %13310 }
 0x759   :  { %v13335_v12 = vsel %vm469_vm2, %v13307_v1, %v13309_v19  ;;  %v13336_v32 = vsel %vm469_vm2, %v13309_v19, %v13311_v42  ;;  %v35262_v1 = vmov 0.0  }
 0x75a   :  { %v31993_v36 = vmax.f32 %v31883_v57, %v13335_v12  ;;  %v32013_v22 = vmax.f32 %v31890_v61, %v13336_v32 }
 0x75c   :  { %15303 = vrot.lane.b32.xlu1 %v31960_v39, %s27950_s3  ;;  %14647 = vrot.lane.b32.xlu0 %v31965_v48, %s27949_s25  ;;  %v13315_v6 = vpop.permute.xlu0 %13314  ;;  %v13313_v29 = vpop.permute.xlu1 %13312 }
 0x75d   :  { %v13338_v30 = vsel %vm469_vm2, %v13313_v29, %v13315_v6  ;;  %v13337_v14 = vsel %vm469_vm2, %v13311_v42, %v13313_v29 }
 0x75e   :  { %v32021_v37 = vmax.f32 %v31902_v55, %v13338_v30  ;;  %v32041_v54 = vmax.f32 %v31894_v15, %v13337_v14 }
 0x760   :  { %15963 = vrot.lane.b32.xlu1 %v31960_v39, %s27951_s26  ;;  %15307 = vrot.lane.b32.xlu0 %v31965_v48, %s27950_s3  ;;  %v13319_v51 = vpop.permute.xlu0 %13318  ;;  %v13317_v59 = vpop.permute.xlu1 %13316 }
 0x761   :  { %v13340_v57 = vsel %vm469_vm2, %v13317_v59, %v13319_v51  ;;  %v13339_v61 = vsel %vm469_vm2, %v13315_v6, %v13317_v59 }
 0x762   :  { %v32049_v38 = vmax.f32 %v31914_v34, %v13340_v57  ;;  %v32070_v15 = vmax.f32 %v31906_v26, %v13339_v61 }
 0x764   :  { %16623 = vrot.lane.b32.xlu1 %v31960_v39, %s35131_s2  ;;  %15967 = vrot.lane.b32.xlu0 %v31965_v48, %s27951_s26  ;;  %v13323_v16 = vpop.permute.xlu0 %13322  ;;  %v13321_v2 = vpop.permute.xlu1 %13320 }
 0x765   :  { %v13342_v28 = vsel %vm469_vm2, %v13321_v2, %v13323_v16  ;;  %v13341_v55 = vsel %vm469_vm2, %v13319_v51, %v13321_v2 }
 0x766   :  { %v32073_v25 = vmax.f32 %v31926_v46, %v13342_v28  ;;  %v32094_v26 = vmax.f32 %v31918_v58, %v13341_v55 }
 0x768   :  { %13401 = vrot.lane.b32.xlu1 %v31985_v27, %s27948_s24  ;;  %16627 = vrot.lane.b32.xlu0 %v31965_v48, %s35131_s2  ;;  %v13327_v63 = vpop.permute.xlu0 %13326  ;;  %v13325_v3 = vpop.permute.xlu1 %13324 }
 0x769   :  { %v13344_v4 = vsel %vm469_vm2, %v13325_v3, %v13327_v63  ;;  %v13343_v34 = vsel %vm469_vm2, %v13323_v16, %v13325_v3 }
 0x76a   :  { %v32097_v13 = vmax.f32 %v31938_v47, %v13344_v4  ;;  %v32121_v58 = vmax.f32 %v31930_v45, %v13343_v34 }
 0x76c   :  { %14645 = vrot.lane.b32.xlu1 %v31985_v27, %s27949_s25  ;;  %13405 = vrot.lane.b32.xlu0 %v31993_v36, %s27948_s24  ;;  %v32107_v43 = vpop.permute.xlu0 %13330  ;;  %v13329_v8 = vpop.permute.xlu1 %13328 }
 0x76d   :  { %v13346_v5 = vsel %vm469_vm2, %v13329_v8, %v32107_v43  ;;  %v13345_v0 = vsel %vm469_vm2, %v13327_v63, %v13329_v8  ;;  %v32270_v34 = vmax.f32 %v31953_v56, %v32107_v43 }
 0x76e   :  { %v32124_v7 = vmax.f32 %v31950_v17, %v13346_v5  ;;  %v32150_v44 = vmax.f32 %v31942_v52, %v13345_v0 }
 0x770   :  { %15305 = vrot.lane.b32.xlu1 %v31985_v27, %s27950_s3  ;;  %14649 = vrot.lane.b32.xlu0 %v31993_v36, %s27949_s25 }
 0x774   :  { %15965 = vrot.lane.b32.xlu1 %v31985_v27, %s27951_s26  ;;  %15309 = vrot.lane.b32.xlu0 %v31993_v36, %s27950_s3 }
 0x778   :  { %16625 = vrot.lane.b32.xlu1 %v31985_v27, %s35131_s2  ;;  %15969 = vrot.lane.b32.xlu0 %v31993_v36, %s27951_s26 }
 0x77c   :  { %13407 = vrot.lane.b32.xlu1 %v32013_v22, %s27948_s24  ;;  %16629 = vrot.lane.b32.xlu0 %v31993_v36, %s35131_s2 }
 0x780   :  { %14651 = vrot.lane.b32.xlu1 %v32013_v22, %s27949_s25  ;;  %13411 = vrot.lane.b32.xlu0 %v32021_v37, %s27948_s24 }
 0x784   :  { %15311 = vrot.lane.b32.xlu1 %v32013_v22, %s27950_s3  ;;  %14655 = vrot.lane.b32.xlu0 %v32021_v37, %s27949_s25 }
 0x788   :  { %15971 = vrot.lane.b32.xlu1 %v32013_v22, %s27951_s26  ;;  %15315 = vrot.lane.b32.xlu0 %v32021_v37, %s27950_s3 }
 0x78c   :  { %16631 = vrot.lane.b32.xlu1 %v32013_v22, %s35131_s2  ;;  %15975 = vrot.lane.b32.xlu0 %v32021_v37, %s27951_s26 }
 0x790   :  { %16635 = vrot.lane.b32.xlu0 %v32021_v37, %s35131_s2  ;;  %13409 = vrot.lane.b32.xlu1 %v32041_v54, %s27948_s24 }
 0x794   :  { %14653 = vrot.lane.b32.xlu1 %v32041_v54, %s27949_s25  ;;  %13415 = vrot.lane.b32.xlu0 %v32049_v38, %s27948_s24 }
 0x798   :  { %15313 = vrot.lane.b32.xlu1 %v32041_v54, %s27950_s3  ;;  %14659 = vrot.lane.b32.xlu0 %v32049_v38, %s27949_s25 }
 0x79c   :  { %15973 = vrot.lane.b32.xlu1 %v32041_v54, %s27951_s26  ;;  %15319 = vrot.lane.b32.xlu0 %v32049_v38, %s27950_s3 }
 0x7a0   :  { %16633 = vrot.lane.b32.xlu1 %v32041_v54, %s35131_s2  ;;  %15979 = vrot.lane.b32.xlu0 %v32049_v38, %s27951_s26 }
 0x7a4   :  { %13413 = vrot.lane.b32.xlu1 %v32070_v15, %s27948_s24  ;;  %13419 = vrot.lane.b32.xlu0 %v32073_v25, %s27948_s24 }
 0x7a8   :  { %14657 = vrot.lane.b32.xlu1 %v32070_v15, %s27949_s25  ;;  %14663 = vrot.lane.b32.xlu0 %v32073_v25, %s27949_s25 }
 0x7ac   :  { %15317 = vrot.lane.b32.xlu1 %v32070_v15, %s27950_s3  ;;  %15323 = vrot.lane.b32.xlu0 %v32073_v25, %s27950_s3 }
 0x7b0   :  { %15977 = vrot.lane.b32.xlu1 %v32070_v15, %s27951_s26  ;;  %15983 = vrot.lane.b32.xlu0 %v32073_v25, %s27951_s26 }
 0x7b4   :  { %13417 = vrot.lane.b32.xlu1 %v32094_v26, %s27948_s24  ;;  %13423 = vrot.lane.b32.xlu0 %v32097_v13, %s27948_s24 }
 0x7b8   :  { %14661 = vrot.lane.b32.xlu1 %v32094_v26, %s27949_s25  ;;  %14667 = vrot.lane.b32.xlu0 %v32097_v13, %s27949_s25 }
 0x7bc   :  { %15321 = vrot.lane.b32.xlu1 %v32094_v26, %s27950_s3  ;;  %15327 = vrot.lane.b32.xlu0 %v32097_v13, %s27950_s3 }
 0x7c0   :  { %15981 = vrot.lane.b32.xlu1 %v32094_v26, %s27951_s26  ;;  %15987 = vrot.lane.b32.xlu0 %v32097_v13, %s27951_s26 }
 0x7c4   :  { %13421 = vrot.lane.b32.xlu1 %v32121_v58, %s27948_s24  ;;  %13427 = vrot.lane.b32.xlu0 %v32124_v7, %s27948_s24 }
 0x7c6   :  { %v13400_v60 = vpop.permute.xlu1 %13399 }
 0x7c8   :  { %14665 = vrot.lane.b32.xlu1 %v32121_v58, %s27949_s25  ;;  %16639 = vrot.lane.b32.xlu0 %v32049_v38, %s35131_s2 }
 0x7ca   :  { %v13404_v21 = vpop.permute.xlu0 %13403  ;;  %v32134_v46 = vpop.permute.xlu1 %14643 }
 0x7cc   :  { %15325 = vrot.lane.b32.xlu1 %v32121_v58, %s27950_s3  ;;  %16643 = vrot.lane.b32.xlu0 %v32073_v25, %s35131_s2 }
 0x7ce   :  { %v32140_v33 = vpop.permute.xlu0 %14647  ;;  %v32142_v45 = vpop.permute.xlu1 %15303 }
 0x7d0   :  { %15985 = vrot.lane.b32.xlu1 %v32121_v58, %s27951_s26  ;;  %16647 = vrot.lane.b32.xlu0 %v32097_v13, %s35131_s2 }
 0x7d2   :  { %v32152_v31 = vpop.permute.xlu0 %15307  ;;  %v32154_v47 = vpop.permute.xlu1 %15963 }
 0x7d4   :  { %17288 = vrot.lane.b32.xlu0 %v31965_v48, %s27953_s28  ;;  %13425 = vrot.lane.b32.xlu1 %v32150_v44, %s27948_s24 }
 0x7d6   :  { %v32160_v53 = vpop.permute.xlu0 %15967  ;;  %v32162_v49 = vpop.permute.xlu1 %16623 }
 0x7d7   :  { %35260 = vst [vmem:[#allocation19_spill] sm:$0xff] %v32162_v49 }
 0x7d8   :  { %17290 = vrot.lane.b32.xlu0 %v31993_v36, %s27953_s28  ;;  %16637 = vrot.lane.b32.xlu1 %v32070_v15, %s35131_s2 }
 0x7da   :  { %v32168_v52 = vpop.permute.xlu0 %16627  ;;  %v13402_v41 = vpop.permute.xlu1 %13401 }
 0x7db   :  { %35261 = vst [vmem:[#allocation31_spill] sm:$0xff] %v32168_v52  ;;  %v13429_v17 = vsel %vm237_vm0, %v13400_v60, %v13402_v41  ;;  %v13430_v9 = vsel %vm237_vm0, %v13402_v41, %v13404_v21 }
 0x7dc   :  { %17281 = vrot.lane.b32.xlu0 %v32175_v24, %s35169_s1  ;;  %16641 = vrot.lane.b32.xlu1 %v32094_v26, %s35131_s2 }
 0x7dd   :  { %27183 = vmatprep.subr.msk.mxu0 %vm1238_vm8, %v13430_v9 }
 0x7de   :  { %27184 = vmatpush1.msk.msra.mxu0 %vm1238_vm8, %v13429_v17  ;;  %v13406_v10 = vpop.permute.xlu0 %13405  ;;  %v32183_v20 = vpop.permute.xlu1 %14645 }
 0x7df   :  { %27185 = vmatmul.mubr.msk.f32.vlgmr.msra.gmra.mxu0 %vm1235_vm9, %v31860_v23  ;;  %v13431_v14 = vsel %vm237_vm0, %v13404_v21, %v13406_v10 }
 0x7e0   :  { %17296 = vrot.lane.b32.xlu0 %v32021_v37, %s27953_s28  ;;  %16645 = vrot.lane.b32.xlu1 %v32121_v58, %s35131_s2 }
 0x7e1   :  { %13681 = vmatprep.mubr.f32.mxu0 %v35262_v1 }
 0x7e2   :  { %v32192_v35 = vpop.permute.xlu0 %14649  ;;  %v32194_v18 = vpop.permute.xlu1 %15305 }
 0x7e4   :  { %14671 = vrot.lane.b32.xlu0 %v32124_v7, %s27949_s25  ;;  %17286 = vrot.lane.b32.xlu1 %v31985_v27, %s27953_s28 }
 0x7e6   :  { %v32200_v19 = vpop.permute.xlu0 %15309  ;;  %v32202_v12 = vpop.permute.xlu1 %15965 }
 0x7e8   :  { %17300 = vrot.lane.b32.xlu0 %v32049_v38, %s27953_s28  ;;  %17284 = vrot.lane.b32.xlu1 %v31960_v39, %s27953_s28 }
 0x7ea   :  { %v32208_v42 = vpop.permute.xlu0 %15969  ;;  %v32210_v32 = vpop.permute.xlu1 %16625 }
 0x7eb   :  { %35263 = vst [vmem:[#allocation22_spill] sm:$0xff] %v32210_v32 }
 0x7ec   :  { %17304 = vrot.lane.b32.xlu0 %v32073_v25, %s27953_s28  ;;  %17292 = vrot.lane.b32.xlu1 %v32013_v22, %s27953_s28 }
 0x7ee   :  { %v32216_v6 = vpop.permute.xlu0 %16629  ;;  %v13408_v29 = vpop.permute.xlu1 %13407 }
 0x7ef   :  { %35264 = vst [vmem:[#allocation27_spill] sm:$0xff] %v32216_v6  ;;  %v13432_v30 = vsel %vm237_vm0, %v13406_v10, %v13408_v29 }
 0x7f0   :  { %17308 = vrot.lane.b32.xlu0 %v32097_v13, %s27953_s28  ;;  %17294 = vrot.lane.b32.xlu1 %v32041_v54, %s27953_s28 }
 0x7f1   :  { %27186 = vmatprep.subr.msk.mxu1 %vm1238_vm8, %v13432_v30 }
 0x7f2   :  { %27187 = vmatpush1.msk.msra.mxu1 %vm1238_vm8, %v13431_v14  ;;  %v13412_v51 = vpop.permute.xlu0 %13411  ;;  %v32226_v59 = vpop.permute.xlu1 %14651 }
 0x7f3   :  { %27188 = vmatmul.mubr.msk.f32.vlgmr.msra.gmra.mxu1 %vm1235_vm9, %v31860_v23 }
 0x7f4   :  { %15331 = vrot.lane.b32.xlu0 %v32124_v7, %s27950_s3  ;;  %14669 = vrot.lane.b32.xlu1 %v32150_v44, %s27949_s25 }
 0x7f5   :  { %13752 = vmatprep.mubr.f32.mxu1 %v35262_v1 }
 0x7f6   :  { %v32235_v57 = vpop.permute.xlu0 %14655  ;;  %v32237_v16 = vpop.permute.xlu1 %15311 }
 0x7f8   :  { %17949 = vrot.lane.b32.xlu0 %v31985_v27, %s27954_s29  ;;  %17298 = vrot.lane.b32.xlu1 %v32070_v15, %s27953_s28 }
 0x7fa   :  { %v32243_v2 = vpop.permute.xlu0 %15315  ;;  %v32245_v61 = vpop.permute.xlu1 %15971 }
 0x7fc   :  { %17947 = vrot.lane.b32.xlu0 %v31960_v39, %s27954_s29  ;;  %17302 = vrot.lane.b32.xlu1 %v32094_v26, %s27953_s28 }
 0x7fe   :  { %v32251_v28 = vpop.permute.xlu0 %15975  ;;  %v32253_v63 = vpop.permute.xlu1 %16631 }
 0x7ff   :  { %35265 = vst [vmem:[#allocation37_spill] sm:$0xff] %v32253_v63 }
 0x800   :  { %17955 = vrot.lane.b32.xlu0 %v32013_v22, %s27954_s29  ;;  %17306 = vrot.lane.b32.xlu1 %v32121_v58, %s27953_s28 }
 0x802   :  { %v32259_v3 = vpop.permute.xlu0 %16635  ;;  %v13410_v55 = vpop.permute.xlu1 %13409 }
 0x803   :  { %35266 = vst [vmem:[#allocation43_spill] sm:$0xff] %v32259_v3  ;;  %v13433_v4 = vsel %vm237_vm0, %v13408_v29, %v13410_v55  ;;  %v13434_v8 = vsel %vm237_vm0, %v13410_v55, %v13412_v51 }
 0x804   :  { %15991 = vrot.lane.b32.xlu0 %v32124_v7, %s27951_s26  ;;  %15329 = vrot.lane.b32.xlu1 %v32150_v44, %s27950_s3 }
 0x805   :  { %27189 = vmatprep.subr.msk.mxu0 %vm1238_vm8, %v13434_v8 }
 0x806   :  { %27190 = vmatpush1.msk.msra.mxu0 %vm1238_vm8, %v13433_v4  ;;  %v13416_v5 = vpop.permute.xlu0 %13415  ;;  %v32273_v60 = vpop.permute.xlu1 %14653 }
 0x807   :  { %27191 = vmatmul.mubr.msk.f32.vlgmr.msra.gmra.mxu0 %vm1235_vm9, %v31860_v23 }
 0x808   :  { %17957 = vrot.lane.b32.xlu0 %v32041_v54, %s27954_s29  ;;  %17314 = vrot.lane.b32.xlu1 %v32270_v34, %s27953_s28 }
 0x809   :  { %13823 = vmatprep.mubr.f32.mxu0 %v35262_v1 }
 0x80a   :  { %v32282_v21 = vpop.permute.xlu0 %14659  ;;  %v32284_v56 = vpop.permute.xlu1 %15313 }
 0x80c   :  { %17961 = vrot.lane.b32.xlu0 %v32070_v15, %s27954_s29  ;;  %17951 = vrot.lane.b32.xlu1 %v31965_v48, %s27954_s29 }
 0x80e   :  { %v32290_v43 = vpop.permute.xlu0 %15319  ;;  %v32292_v0 = vpop.permute.xlu1 %15973 }
 0x80f   :  { %35267 = vst [vmem:[#allocation36_spill] sm:$0xff] %v32292_v0 }
 0x810   :  { %17965 = vrot.lane.b32.xlu0 %v32094_v26, %s27954_s29  ;;  %17953 = vrot.lane.b32.xlu1 %v31993_v36, %s27954_s29 }
 0x812   :  { %v32298_v41 = vpop.permute.xlu0 %15979  ;;  %v32300_v17 = vpop.permute.xlu1 %16633 }
 0x813   :  { %35268 = vst [vmem:[#allocation45_spill] sm:$0xff] %v32300_v17 }
 0x814   :  { %16651 = vrot.lane.b32.xlu0 %v32124_v7, %s35131_s2  ;;  %15989 = vrot.lane.b32.xlu1 %v32150_v44, %s27951_s26 }
 0x816   :  { %v13420_v9 = vpop.permute.xlu0 %13419  ;;  %v13414_v10 = vpop.permute.xlu1 %13413 }
 0x817   :  { %v13435_v29 = vsel %vm237_vm0, %v13412_v51, %v13414_v10  ;;  %v13436_v30 = vsel %vm237_vm0, %v13414_v10, %v13416_v5 }
 0x818   :  { %17969 = vrot.lane.b32.xlu0 %v32121_v58, %s27954_s29  ;;  %17945 = vrot.lane.b32.xlu1 %v32175_v24, %s27962_s27 }
 0x819   :  { %27192 = vmatprep.subr.msk.mxu1 %vm1238_vm8, %v13436_v30 }
 0x81a   :  { %27193 = vmatpush1.msk.msra.mxu1 %vm1238_vm8, %v13435_v29  ;;  %v32314_v14 = vpop.permute.xlu0 %14663  ;;  %v32316_v55 = vpop.permute.xlu1 %14657 }
 0x81b   :  { %27194 = vmatmul.mubr.msk.f32.vlgmr.msra.gmra.mxu1 %vm1235_vm9, %v31860_v23 }
 0x81c   :  { %17977 = vrot.lane.b32.xlu0 %v32270_v34, %s27954_s29  ;;  %17959 = vrot.lane.b32.xlu1 %v32021_v37, %s27954_s29 }
 0x81d   :  { %13894 = vmatprep.mubr.f32.mxu1 %v35262_v1 }
 0x81e   :  { %v32325_v51 = vpop.permute.xlu0 %15323  ;;  %v32327_v4 = vpop.permute.xlu1 %15317 }
 0x820   :  { %18614 = vrot.lane.b32.xlu0 %v31965_v48, %s27955_s21  ;;  %17963 = vrot.lane.b32.xlu1 %v32049_v38, %s27954_s29 }
 0x822   :  { %v32333_v8 = vpop.permute.xlu0 %15983  ;;  %v32335_v10 = vpop.permute.xlu1 %15977 }
 0x824   :  { %17312 = vrot.lane.b32.xlu0 %v32124_v7, %s27953_s28  ;;  %16649 = vrot.lane.b32.xlu1 %v32150_v44, %s35131_s2 }
 0x826   :  { %v13424_v29 = vpop.permute.xlu0 %13423  ;;  %v13418_v30 = vpop.permute.xlu1 %13417 }
 0x827   :  { %v13437_v17 = vsel %vm237_vm0, %v13416_v5, %v13418_v30  ;;  %v13438_v49 = vsel %vm237_vm0, %v13418_v30, %v13420_v9 }
 0x828   :  { %18616 = vrot.lane.b32.xlu0 %v31993_v36, %s27955_s21  ;;  %17967 = vrot.lane.b32.xlu1 %v32073_v25, %s27954_s29 }
 0x829   :  { %27195 = vmatprep.subr.msk.mxu0 %vm1238_vm8, %v13438_v49 }
 0x82a   :  { %27196 = vmatpush1.msk.msra.mxu0 %vm1238_vm8, %v13437_v17  ;;  %v32349_v32 = vpop.permute.xlu0 %14667  ;;  %v32351_v62 = vpop.permute.xlu1 %14661 }
 0x82b   :  { %27197 = vmatmul.mubr.msk.f32.vlgmr.msra.gmra.mxu0 %vm1235_vm9, %v31860_v23 }
 0x82c   :  { %18608 = vrot.lane.b32.xlu0 %v32175_v24, %s27953_s28  ;;  %17971 = vrot.lane.b32.xlu1 %v32097_v13, %s27954_s29 }
 0x82d   :  { %13965 = vmatprep.mubr.f32.mxu0 %v35262_v1 }
 0x82e   :  { %v32360_v5 = vpop.permute.xlu0 %15327  ;;  %v32362_v49 = vpop.permute.xlu1 %15321 }
 0x830   :  { %18622 = vrot.lane.b32.xlu0 %v32021_v37, %s27955_s21  ;;  %18612 = vrot.lane.b32.xlu1 %v31985_v27, %s27955_s21 }
 0x832   :  { %v32368_v17 = vpop.permute.xlu0 %15987  ;;  %v32370_v30 = vpop.permute.xlu1 %15981 }
 0x833   :  { %35269 = vst [vmem:[#allocation39_spill] sm:$0xff] %v32370_v30 }
 0x834   :  { %17973 = vrot.lane.b32.xlu0 %v32150_v44, %s27954_s29  ;;  %17310 = vrot.lane.b32.xlu1 %v32150_v44, %s27953_s28 }
 0x836   :  { %v13428_v3 = vpop.permute.xlu0 %13427  ;;  %v13422_v52 = vpop.permute.xlu1 %13421 }
 0x837   :  { %v13439_v0 = vsel %vm237_vm0, %v13420_v9, %v13422_v52  ;;  %v13440_v6 = vsel %vm237_vm0, %v13422_v52, %v13424_v29 }
 0x838   :  { %18626 = vrot.lane.b32.xlu0 %v32049_v38, %s27955_s21  ;;  %18610 = vrot.lane.b32.xlu1 %v31960_v39, %s27955_s21 }
 0x839   :  { %27198 = vmatprep.subr.msk.mxu1 %vm1238_vm8, %v13440_v6 }
 0x83a   :  { %27199 = vmatpush1.msk.msra.mxu1 %vm1238_vm8, %v13439_v0  ;;  %v32384_v30 = vpop.permute.xlu0 %16639  ;;  %v32386_v63 = vpop.permute.xlu1 %14665 }
 0x83b   :  { %35270 = vst [vmem:[#allocation40_spill] sm:$0xff] %v32384_v30  ;;  %27200 = vmatmul.mubr.msk.f32.vlgmr.msra.gmra.mxu1 %vm1235_vm9, %v31860_v23  ;;  %27577 = vmatprep.subr.mxu1 %v35262_v1 }
 0x83c   :  { %27578 = vmatpush3.msk.msra.mxu1 %vm1238_vm8, %v13428_v3  ;;  %18630 = vrot.lane.b32.xlu0 %v32073_v25, %s27955_s21 }
 0x83d   :  { %18618 = vrot.lane.b32.xlu1 %v32013_v22, %s27955_s21  ;;  %27209 = vmatprep.subr.msk.mxu1 %vm1238_vm8, %v31993_v36 }
 0x83e   :  { %27579 = vmatprep.mubr.msk.f32.mxu1 %vm27963_vm12, %v35262_v1  ;;  %v32400_v52 = vpop.permute.xlu0 %16643  ;;  %v32402_v6 = vpop.permute.xlu1 %15325 }
 0x83f   :  { %35271 = vst [vmem:[#allocation47_spill] sm:$0xff] %v32400_v52  ;;  %27580 = vmatmul.mubr.msk.f32.vlgmr.msra.gmra.mxu1 %vm1235_vm9, %v31860_v23 }
 0x840   :  { %27210 = vmatpush1.msk.msra.mxu1 %vm1238_vm8, %v31965_v48  ;;  %18634 = vrot.lane.b32.xlu0 %v32097_v13, %s27955_s21  ;;  %v13380_v48 = vld [vmem:[%s34880_s8] sm:$0xff] }
 0x841   :  { %27215 = vmatprep.subr.msk.mxu1 %vm1238_vm8, %v32070_v15  ;;  %18620 = vrot.lane.b32.xlu1 %v32041_v54, %s27955_s21 }
 0x842   :  { %14209 = vmatprep.mubr.f32.mxu1 %v35262_v1  ;;  %v32415_v36 = vpop.permute.xlu0 %16647  ;;  %v32417_v0 = vpop.permute.xlu1 %15985 }
 0x843   :  { %35272 = vst [vmem:[#allocation34_spill] sm:$0xff] %v32415_v36  ;;  %27211 = vmatmul.mubr.msk.f32.vlgmr.msra.gmra.mxu1 %vm1235_vm9, %v32175_v24 }
 0x844   :  { %27216 = vmatpush1.msk.msra.mxu1 %vm1238_vm8, %v32021_v37  ;;  %18638 = vrot.lane.b32.xlu0 %v32124_v7, %s27955_s21 }
 0x845   :  { %27221 = vmatprep.subr.msk.mxu1 %vm1238_vm8, %v32121_v58  ;;  %17975 = vrot.lane.b32.xlu1 %v32124_v7, %s27954_s29 }
 0x846   :  { %14351 = vmatprep.mubr.f32.mxu1 %v35262_v1  ;;  %v32433_v9 = vpop.permute.xlu0 %17288  ;;  %v13426_v52 = vpop.permute.xlu1 %13425 }
 0x847   :  { %35273 = vst [vmem:[#allocation8_spill] sm:$0xff] %v32433_v9  ;;  %27217 = vmatmul.mubr.msk.f32.vlgmr.msra.gmra.mxu1 %vm1235_vm9, %v32175_v24  ;;  %v13441_v37 = vsel %vm237_vm0, %v13424_v29, %v13426_v52  ;;  %v13442_v36 = vsel %vm237_vm0, %v13426_v52, %v13428_v3 }
 0x848   :  { %27222 = vmatpush1.msk.msra.mxu1 %vm1238_vm8, %v32073_v25  ;;  %19273 = vperm.xlu0 %27847, %v13380_v48  }
 0x849   :  { %18624 = vrot.lane.b32.xlu1 %v32070_v15, %s27955_s21  ;;  %27201 = vmatprep.subr.msk.mxu0 %vm1238_vm8, %v13442_v36  ;;  %v14676_v15 = vsel %vm353_vm1, %v32192_v35, %v32226_v59 }
 0x84a   :  { %27202 = vmatpush1.msk.msra.mxu0 %vm1238_vm8, %v13441_v37  ;;  %14493 = vmatprep.mubr.f32.mxu1 %v35262_v1  ;;  %v32446_v9 = vpop.permute.xlu0 %17290  ;;  %v32448_v30 = vpop.permute.xlu1 %16637 }
 0x84b   :  { %27582 = vmatprep.subr.mxu1 %v35262_v1  ;;  %27203 = vmatmul.mubr.msk.f32.vlgmr.msra.gmra.mxu0 %vm1235_vm9, %v31860_v23 }
 0x84c   :  { %27206 = vmatprep.subr.msk.mxu0 %vm1238_vm8, %v31985_v27  ;;  %27223 = vmatmul.mubr.msk.f32.vlgmr.msra.gmra.mxu1 %vm1235_vm9, %v32175_v24 }
 0x84d   :  { %27583 = vmatpush3.msk.msra.mxu1 %vm1238_vm8, %v32124_v7  ;;  %27207 = vmatpush1.msk.msra.mxu0 %vm1238_vm8, %v31960_v39  ;;  %v14675_v39 = vsel %vm353_vm1, %v32140_v33, %v32192_v35 }
 0x84e   :  { %27232 = vmatprep.subr.msk.mxu1 %vm1238_vm8, %v14676_v15  ;;  %18628 = vrot.lane.b32.xlu1 %v32094_v26, %s27955_s21  ;;  %v32467_v23 = vpop.permute.xlu0 %17281  ;;  %v32469_v27 = vpop.permute.xlu1 %16641 }
 0x84f   :  { %27212 = vmatprep.subr.msk.mxu0 %vm1238_vm8, %v32041_v54  ;;  %14138 = vmatprep.mubr.f32.mxu0 %v35262_v1  ;;  %v14680_v54 = vsel %vm353_vm1, %v32316_v55, %v32282_v21 }
 0x850   :  { %27584 = vmatprep.mubr.msk.f32.mxu1 %vm27963_vm12, %v35262_v1  ;;  %27208 = vmatmul.mubr.msk.f32.vlgmr.msra.gmra.mxu0 %vm1235_vm9, %v32175_v24 }
 0x851   :  { %27213 = vmatpush1.msk.msra.mxu0 %vm1238_vm8, %v32013_v22  ;;  %27585 = vmatmul.mubr.msk.f32.vlgmr.msra.gmra.mxu1 %vm1235_vm9, %v32175_v24  ;;  %v14679_v22 = vsel %vm353_vm1, %v32235_v57, %v32316_v55 }
 0x852   :  { %27233 = vmatpush1.msk.msra.mxu1 %vm1238_vm8, %v14675_v39  ;;  %27218 = vmatprep.subr.msk.mxu0 %vm1238_vm8, %v32094_v26  ;;  %v32491_v25 = vpop.permute.xlu0 %17296  ;;  %v32493_v7 = vpop.permute.xlu1 %16645  ;;  %v14684_v26 = vsel %vm353_vm1, %v32386_v63, %v32349_v32 }
 0x853   :  { %27238 = vmatprep.subr.msk.mxu1 %vm1238_vm8, %v14680_v54  ;;  %18632 = vrot.lane.b32.xlu1 %v32121_v58, %s27955_s21 }
 0x854   :  { %14280 = vmatprep.mubr.f32.mxu0 %v35262_v1  ;;  %14854 = vmatprep.mubr.f32.mxu1 %v35262_v1 }
 0x855   :  { %27214 = vmatmul.mubr.msk.f32.vlgmr.msra.gmra.mxu0 %vm1235_vm9, %v32175_v24  ;;  %27234 = vmatmul.mubr.msk.f32.vlgmr.msra.gmra.mxu1 %vm1235_vm9, %v31862_v40 }
 0x856   :  { %27219 = vmatpush1.msk.msra.mxu0 %vm1238_vm8, %v32049_v38  ;;  %27239 = vmatpush1.msk.msra.mxu1 %vm1238_vm8, %v14679_v22  ;;  %v14672_v58 = vpop.permute.xlu0 %14671  ;;  %v32513_v35 = vpop.permute.xlu1 %17286  ;;  %v14683_v38 = vsel %vm353_vm1, %v32314_v14, %v32386_v63 }
 0x857   :  { %27224 = vmatprep.subr.msk.mxu0 %vm1238_vm8, %v32150_v44  ;;  %27244 = vmatprep.subr.msk.mxu1 %vm1238_vm8, %v14684_v26 }
 0x858   :  { %18636 = vrot.lane.b32.xlu1 %v32150_v44, %s27955_s21  ;;  %14422 = vmatprep.mubr.f32.mxu0 %v35262_v1  ;;  %v14674_v44 = vsel %vm353_vm1, %v32183_v20, %v32140_v33 }
 0x859   :  { %14996 = vmatprep.mubr.f32.mxu1 %v35262_v1  ;;  %27220 = vmatmul.mubr.msk.f32.vlgmr.msra.gmra.mxu0 %vm1235_vm9, %v32175_v24 }
 0x85a   :  { %27225 = vmatpush1.msk.msra.mxu0 %vm1238_vm8, %v32097_v13  ;;  %27240 = vmatmul.mubr.msk.f32.vlgmr.msra.gmra.mxu1 %vm1235_vm9, %v31862_v40  ;;  %v32534_v3 = vpop.permute.xlu0 %17300  ;;  %v32536_v55 = vpop.permute.xlu1 %17284  ;;  %v14673_v13 = vsel %vm353_vm1, %v32134_v46, %v32183_v20  ;;  %v15336_v46 = vsel %vm469_vm2, %v32200_v19, %v32237_v16  ;;  %v14677_v20 = vsel %vm353_vm1, %v32226_v59, %v32273_v60 }
 0x85b   :  { %27245 = vmatpush1.msk.msra.mxu1 %vm1238_vm8, %v14683_v38  ;;  %27229 = vmatprep.subr.msk.mxu0 %vm1238_vm8, %v14674_v44  ;;  %v15340_v59 = vsel %vm469_vm2, %v32327_v4, %v32290_v43 }
 0x85c   :  { %18640 = vrot.lane.b32.xlu1 %v32270_v34, %s27955_s21  ;;  %14564 = vmatprep.mubr.f32.mxu0 %v35262_v1  ;;  %v14678_v34 = vsel %vm353_vm1, %v32273_v60, %v32235_v57  ;;  %v15339_v60 = vsel %vm469_vm2, %v32243_v2, %v32327_v4  ;;  %v15344_v4 = vsel %vm469_vm2, %v32402_v6, %v32360_v5 }
 0x85d   :  { %15138 = vmatprep.mubr.f32.mxu1 %v35262_v1  ;;  %27587 = vmatprep.subr.mxu1 %v35262_v1 }
 0x85e   :  { %27226 = vmatmul.mubr.msk.f32.vlgmr.msra.gmra.mxu0 %vm1235_vm9, %v32175_v24  ;;  %27246 = vmatmul.mubr.msk.f32.vlgmr.msra.gmra.mxu1 %vm1235_vm9, %v31862_v40  ;;  %v32552_v33 = vpop.permute.xlu0 %17304  ;;  %v32554_v63 = vpop.permute.xlu1 %17292  ;;  %v15335_v24 = vsel %vm469_vm2, %v32152_v31, %v32200_v19  ;;  %v14682_v19 = vsel %vm353_vm1, %v32351_v62, %v32314_v14  ;;  %v14681_v14 = vsel %vm353_vm1, %v32282_v21, %v32351_v62 }
 0x85f   :  { %27230 = vmatpush1.msk.msra.mxu0 %vm1238_vm8, %v14673_v13  ;;  %27588 = vmatpush3.msk.msra.mxu1 %vm1238_vm8, %v14672_v58  ;;  %v15343_v21 = vsel %vm469_vm2, %v32325_v51, %v32402_v6  ;;  %v15333_v6 = vsel %vm469_vm2, %v32142_v45, %v32194_v18  ;;  %v15338_v45 = vsel %vm469_vm2, %v32284_v56, %v32243_v2 }
 0x860   :  { %27235 = vmatprep.subr.msk.mxu0 %vm1238_vm8, %v14678_v34  ;;  %27255 = vmatprep.subr.msk.mxu1 %vm1238_vm8, %v15336_v46 }
 0x861   :  { %14783 = vmatprep.mubr.f32.mxu0 %v35262_v1  ;;  %27589 = vmatprep.mubr.msk.f32.mxu1 %vm27963_vm12, %v35262_v1 }
 0x862   :  { %27231 = vmatmul.mubr.msk.f32.vlgmr.msra.gmra.mxu0 %vm1235_vm9, %v31862_v40  ;;  %27590 = vmatmul.mubr.msk.f32.vlgmr.msra.gmra.mxu1 %vm1235_vm9, %v31862_v40  ;;  %v32579_v57 = vpop.permute.xlu0 %17308  ;;  %v32581_v29 = vpop.permute.xlu1 %17294 }
 0x863   :  { %27236 = vmatpush1.msk.msra.mxu0 %vm1238_vm8, %v14677_v20  ;;  %27256 = vmatpush1.msk.msra.mxu1 %vm1238_vm8, %v15335_v24  ;;  %v35275_v24 = vld [vmem:[#allocation27_spill] sm:$0xff] }
 0x864   :  { %27241 = vmatprep.subr.msk.mxu0 %vm1238_vm8, %v14682_v19  ;;  %27261 = vmatprep.subr.msk.mxu1 %vm1238_vm8, %v15340_v59 }
 0x865   :  { %14925 = vmatprep.mubr.f32.mxu0 %v35262_v1  ;;  %15514 = vmatprep.mubr.f32.mxu1 %v35262_v1 }
 0x866   :  { %27237 = vmatmul.mubr.msk.f32.vlgmr.msra.gmra.mxu0 %vm1235_vm9, %v31862_v40  ;;  %27257 = vmatmul.mubr.msk.f32.vlgmr.msra.gmra.mxu1 %vm1235_vm9, %v31864_v11  ;;  %v15332_v52 = vpop.permute.xlu0 %15331  ;;  %v14670_v36 = vpop.permute.xlu1 %14669 }
 0x867   :  { %27242 = vmatpush1.msk.msra.mxu0 %vm1238_vm8, %v14681_v14  ;;  %27262 = vmatpush1.msk.msra.mxu1 %vm1238_vm8, %v15339_v60  ;;  %v14686_v48 = vsel %vm353_vm1, %v14670_v36, %v14672_v58  ;;  %v14685_v62 = vsel %vm353_vm1, %v32349_v32, %v14670_v36  ;;  %v15334_v32 = vsel %vm469_vm2, %v32194_v18, %v32152_v31  ;;  %v35278_v14 = vld [vmem:[#allocation39_spill] sm:$0xff]  ;;  %v35279_v36 = vld [vmem:[#allocation40_spill] sm:$0xff] }
 0x868   :  { %27267 = vmatprep.subr.msk.mxu1 %vm1238_vm8, %v15344_v4  ;;  %15067 = vmatprep.mubr.f32.mxu0 %v35262_v1  ;;  %v15996_v31 = vsel %vm585_vm3, %v32208_v42, %v32245_v61  ;;  %v15337_v18 = vsel %vm469_vm2, %v32237_v16, %v32284_v56  ;;  %v16000_v16 = vsel %vm585_vm3, %v32335_v10, %v32298_v41 }
 0x869   :  { %15656 = vmatprep.mubr.f32.mxu1 %v35262_v1  ;;  %27247 = vmatprep.subr.msk.mxu0 %vm1238_vm8, %v14686_v48  ;;  %v15999_v56 = vsel %vm585_vm3, %v32251_v28, %v32335_v10  ;;  %v16004_v10 = vsel %vm585_vm3, %v32417_v0, %v32368_v17  ;;  %v16001_v4 = vsel %vm585_vm3, %v32298_v41, %v35278_v14  ;;  %v35280_v48 = vld [vmem:[#allocation43_spill] sm:$0xff] }
 0x86a   :  { %27243 = vmatmul.mubr.msk.f32.vlgmr.msra.gmra.mxu0 %vm1235_vm9, %v31862_v40  ;;  %27263 = vmatmul.mubr.msk.f32.vlgmr.msra.gmra.mxu1 %vm1235_vm9, %v31864_v11  ;;  %v32624_v37 = vpop.permute.xlu0 %17949  ;;  %v32626_v15 = vpop.permute.xlu1 %17298 }
 0x86b   :  { %27268 = vmatpush1.msk.msra.mxu1 %vm1238_vm8, %v15343_v21  ;;  %27248 = vmatpush1.msk.msra.mxu0 %vm1238_vm8, %v14685_v62  ;;  %v35281_v62 = vld [vmem:[#allocation16_spill] sm:$0xff] }
 0x86c   :  { %15209 = vmatprep.mubr.f32.mxu0 %v35262_v1  ;;  %15798 = vmatprep.mubr.f32.mxu1 %v35262_v1 }
 0x86d   :  { %27592 = vmatprep.subr.mxu1 %v35262_v1  ;;  %27252 = vmatprep.subr.msk.mxu0 %vm1238_vm8, %v15334_v32 }
 0x86e   :  { %27249 = vmatmul.mubr.msk.f32.vlgmr.msra.gmra.mxu0 %vm1235_vm9, %v31862_v40  ;;  %27269 = vmatmul.mubr.msk.f32.vlgmr.msra.gmra.mxu1 %vm1235_vm9, %v31864_v11  ;;  %v32644_v39 = vpop.permute.xlu0 %17947  ;;  %v32646_v54 = vpop.permute.xlu1 %17302  ;;  %v15995_v40 = vsel %vm585_vm3, %v32160_v53, %v32208_v42  ;;  %v15342_v42 = vsel %vm469_vm2, %v32362_v49, %v32325_v51  ;;  %v15341_v51 = vsel %vm469_vm2, %v32290_v43, %v32362_v49 }
 0x86f   :  { %27593 = vmatpush3.msk.msra.mxu1 %vm1238_vm8, %v15332_v52  ;;  %27253 = vmatpush1.msk.msra.mxu0 %vm1238_vm8, %v15333_v6  ;;  %v16003_v49 = vsel %vm585_vm3, %v32333_v8, %v32417_v0  ;;  %v15993_v0 = vsel %vm585_vm3, %v32154_v47, %v32202_v12  ;;  %v35276_v47 = vld [vmem:[#allocation36_spill] sm:$0xff]  ;;  %v35282_v6 = vld [vmem:[#allocation34_spill] sm:$0xff] }
 0x870   :  { %27278 = vmatprep.subr.msk.mxu1 %vm1238_vm8, %v15996_v31  ;;  %27258 = vmatprep.subr.msk.mxu0 %vm1238_vm8, %v15338_v45  ;;  %v15997_v59 = vsel %vm585_vm3, %v32245_v61, %v35276_v47  ;;  %v16660_v61 = vsel %vm701_vm4, %v32448_v30, %v35279_v36  ;;  %v16664_v41 = vsel %vm701_vm4, %v32493_v7, %v35282_v6  ;;  %v35283_v45 = vld [vmem:[#allocation47_spill] sm:$0xff] }
 0x871   :  { %15443 = vmatprep.mubr.f32.mxu0 %v35262_v1  ;;  %27594 = vmatprep.mubr.msk.f32.mxu1 %vm27963_vm12, %v35262_v1 }
 0x872   :  { %27254 = vmatmul.mubr.msk.f32.vlgmr.msra.gmra.mxu0 %vm1235_vm9, %v31864_v11  ;;  %27595 = vmatmul.mubr.msk.f32.vlgmr.msra.gmra.mxu1 %vm1235_vm9, %v31864_v11  ;;  %v32671_v2 = vpop.permute.xlu0 %17955  ;;  %v32673_v22 = vpop.permute.xlu1 %17306 }
 0x873   :  { %27259 = vmatpush1.msk.msra.mxu0 %vm1238_vm8, %v15337_v18  ;;  %27279 = vmatpush1.msk.msra.mxu1 %vm1238_vm8, %v15995_v40  ;;  %v16663_v40 = vsel %vm701_vm4, %v35283_v45, %v32493_v7 }
 0x874   :  { %27264 = vmatprep.subr.msk.mxu0 %vm1238_vm8, %v15342_v42  ;;  %27284 = vmatprep.subr.msk.mxu1 %vm1238_vm8, %v16000_v16  ;;  %v35285_v16 = vld [vmem:[#allocation19_spill] sm:$0xff] }
 0x875   :  { %15585 = vmatprep.mubr.f32.mxu0 %v35262_v1  ;;  %16174 = vmatprep.mubr.f32.mxu1 %v35262_v1 }
 0x876   :  { %27260 = vmatmul.mubr.msk.f32.vlgmr.msra.gmra.mxu0 %vm1235_vm9, %v31864_v11  ;;  %27280 = vmatmul.mubr.msk.f32.vlgmr.msra.gmra.mxu1 %vm1235_vm9, %v31866_v50  ;;  %v15992_v26 = vpop.permute.xlu0 %15991  ;;  %v15330_v58 = vpop.permute.xlu1 %15329 }
 0x877   :  { %27265 = vmatpush1.msk.msra.mxu0 %vm1238_vm8, %v15341_v51  ;;  %27285 = vmatpush1.msk.msra.mxu1 %vm1238_vm8, %v15999_v56  ;;  %v15346_v38 = vsel %vm469_vm2, %v15330_v58, %v15332_v52  ;;  %v15345_v43 = vsel %vm469_vm2, %v32360_v5, %v15330_v58  ;;  %v15994_v5 = vsel %vm585_vm3, %v32202_v12, %v32160_v53  ;;  %v35274_v53 = vld [vmem:[#allocation37_spill] sm:$0xff] }
 0x878   :  { %27290 = vmatprep.subr.msk.mxu1 %vm1238_vm8, %v16004_v10  ;;  %15727 = vmatprep.mubr.f32.mxu0 %v35262_v1  ;;  %v16656_v20 = vsel %vm701_vm4, %v35275_v24, %v35274_v53  ;;  %v15998_v12 = vsel %vm585_vm3, %v35276_v47, %v32251_v28  ;;  %v16002_v52 = vsel %vm585_vm3, %v35278_v14, %v32333_v8  ;;  %v35286_v10 = vld [vmem:[#allocation45_spill] sm:$0xff] }
 0x879   :  { %16316 = vmatprep.mubr.f32.mxu1 %v35262_v1  ;;  %27270 = vmatprep.subr.msk.mxu0 %vm1238_vm8, %v15346_v38  ;;  %v16659_v8 = vsel %vm701_vm4, %v35280_v48, %v32448_v30  ;;  %v17319_v58 = vsel %vm817_vm5, %v32446_v9, %v32554_v63  ;;  %v16658_v38 = vsel %vm701_vm4, %v35286_v10, %v35280_v48 }
 0x87a   :  { %27266 = vmatmul.mubr.msk.f32.vlgmr.msra.gmra.mxu0 %vm1235_vm9, %v31864_v11  ;;  %27286 = vmatmul.mubr.msk.f32.vlgmr.msra.gmra.mxu1 %vm1235_vm9, %v31866_v50  ;;  %v32716_v44 = vpop.permute.xlu0 %17957  ;;  %v32718_v13 = vpop.permute.xlu1 %17314  ;;  %v17316_v14 = vsel %vm817_vm5, %v32536_v55, %v32513_v35 }
 0x87b   :  { %27291 = vmatpush1.msk.msra.mxu1 %vm1238_vm8, %v16003_v49  ;;  %27271 = vmatpush1.msk.msra.mxu0 %vm1238_vm8, %v15345_v43  ;;  %v35287_v43 = vld [vmem:[#allocation8_spill] sm:$0xff] }
 0x87c   :  { %15869 = vmatprep.mubr.f32.mxu0 %v35262_v1  ;;  %16458 = vmatprep.mubr.f32.mxu1 %v35262_v1  ;;  %v17318_v49 = vsel %vm817_vm5, %v35287_v43, %v32446_v9  ;;  %v17323_v9 = vsel %vm817_vm5, %v32626_v15, %v32534_v3 }
 0x87d   :  { %27597 = vmatprep.subr.mxu1 %v35262_v1  ;;  %27275 = vmatprep.subr.msk.mxu0 %vm1238_vm8, %v15994_v5 }
 0x87e   :  { %27272 = vmatmul.mubr.msk.f32.vlgmr.msra.gmra.mxu0 %vm1235_vm9, %v31864_v11  ;;  %27292 = vmatmul.mubr.msk.f32.vlgmr.msra.gmra.mxu1 %vm1235_vm9, %v31866_v50  ;;  %v32736_v34 = vpop.permute.xlu0 %17961  ;;  %v32738_v46 = vpop.permute.xlu1 %17951  ;;  %v35277_v11 = vld [vmem:[#allocation31_spill] sm:$0xff] }
 0x87f   :  { %27598 = vmatpush3.msk.msra.mxu1 %vm1238_vm8, %v15992_v26  ;;  %27276 = vmatpush1.msk.msra.mxu0 %vm1238_vm8, %v15993_v0  ;;  %v16655_v19 = vsel %vm701_vm4, %v35277_v11, %v35275_v24  ;;  %v16662_v0 = vsel %vm701_vm4, %v32469_v27, %v35283_v45  ;;  %v16661_v24 = vsel %vm701_vm4, %v35279_v36, %v32469_v27 }
 0x880   :  { %27301 = vmatprep.subr.msk.mxu1 %vm1238_vm8, %v16656_v20  ;;  %27281 = vmatprep.subr.msk.mxu0 %vm1238_vm8, %v15998_v12  ;;  %v17322_v20 = vsel %vm817_vm5, %v32491_v25, %v32626_v15  ;;  %v17327_v12 = vsel %vm817_vm5, %v32673_v22, %v32579_v57 }
 0x881   :  { %16103 = vmatprep.mubr.f32.mxu0 %v35262_v1  ;;  %27599 = vmatprep.mubr.msk.f32.mxu1 %vm27963_vm12, %v35262_v1 }
 0x882   :  { %27277 = vmatmul.mubr.msk.f32.vlgmr.msra.gmra.mxu0 %vm1235_vm9, %v31866_v50  ;;  %27600 = vmatmul.mubr.msk.f32.vlgmr.msra.gmra.mxu1 %vm1235_vm9, %v31866_v50  ;;  %v32763_v28 = vpop.permute.xlu0 %17965  ;;  %v32765_v60 = vpop.permute.xlu1 %17953 }
 0x883   :  { %27282 = vmatpush1.msk.msra.mxu0 %vm1238_vm8, %v15997_v59  ;;  %27302 = vmatpush1.msk.msra.mxu1 %vm1238_vm8, %v16655_v19 }
 0x884   :  { %27287 = vmatprep.subr.msk.mxu0 %vm1238_vm8, %v16002_v52  ;;  %27307 = vmatprep.subr.msk.mxu1 %vm1238_vm8, %v16660_v61  ;;  %v17982_v61 = vsel %vm933_vm6, %v32765_v60, %v32671_v2 }
 0x885   :  { %16245 = vmatprep.mubr.f32.mxu0 %v35262_v1  ;;  %16834 = vmatprep.mubr.f32.mxu1 %v35262_v1 }
 0x886   :  { %27283 = vmatmul.mubr.msk.f32.vlgmr.msra.gmra.mxu0 %vm1235_vm9, %v31866_v50  ;;  %27303 = vmatmul.mubr.msk.f32.vlgmr.msra.gmra.mxu1 %vm1235_vm9, %v35281_v62  ;;  %v16652_v21 = vpop.permute.xlu0 %16651  ;;  %v15990_v32 = vpop.permute.xlu1 %15989 }
 0x887   :  { %27288 = vmatpush1.msk.msra.mxu0 %vm1238_vm8, %v16001_v4  ;;  %27308 = vmatpush1.msk.msra.mxu1 %vm1238_vm8, %v16659_v8  ;;  %v16006_v31 = vsel %vm585_vm3, %v15990_v32, %v15992_v26  ;;  %v16005_v30 = vsel %vm585_vm3, %v32368_v17, %v15990_v32  ;;  %v35284_v17 = vld [vmem:[#allocation22_spill] sm:$0xff]  ;;  %v17981_v4 = vsel %vm933_vm6, %v32738_v46, %v32765_v60 }
 0x888   :  { %27313 = vmatprep.subr.msk.mxu1 %vm1238_vm8, %v16664_v41  ;;  %16387 = vmatprep.mubr.f32.mxu0 %v35262_v1  ;;  %v16654_v7 = vsel %vm701_vm4, %v35284_v17, %v35277_v11  ;;  %v16653_v56 = vsel %vm701_vm4, %v35285_v16, %v35284_v17  ;;  %v17326_v11 = vsel %vm817_vm5, %v32552_v33, %v32673_v22 }
 0x889   :  { %16976 = vmatprep.mubr.f32.mxu1 %v35262_v1  ;;  %27293 = vmatprep.subr.msk.mxu0 %vm1238_vm8, %v16006_v31  ;;  %v17317_v22 = vsel %vm817_vm5, %v32513_v35, %v35287_v43  ;;  %v17321_v35 = vsel %vm817_vm5, %v32581_v29, %v32491_v25  ;;  %v17324_v60 = vsel %vm817_vm5, %v32534_v3, %v32646_v54 }
 0x88a   :  { %27289 = vmatmul.mubr.msk.f32.vlgmr.msra.gmra.mxu0 %vm1235_vm9, %v31866_v50  ;;  %27309 = vmatmul.mubr.msk.f32.vlgmr.msra.gmra.mxu1 %vm1235_vm9, %v35281_v62  ;;  %v32808_v18 = vpop.permute.xlu0 %17969  ;;  %v32810_v42 = vpop.permute.xlu1 %17945  ;;  %v17980_v32 = vsel %vm933_vm6, %v32624_v37, %v32738_v46 }
 0x88b   :  { %27314 = vmatpush1.msk.msra.mxu1 %vm1238_vm8, %v16663_v40  ;;  %27294 = vmatpush1.msk.msra.mxu0 %vm1238_vm8, %v16005_v30 }
 0x88c   :  { %16529 = vmatprep.mubr.f32.mxu0 %v35262_v1  ;;  %17118 = vmatprep.mubr.f32.mxu1 %v35262_v1 }
 0x88d   :  { %27602 = vmatprep.subr.mxu1 %v35262_v1  ;;  %27298 = vmatprep.subr.msk.mxu0 %vm1238_vm8, %v16654_v7 }
 0x88e   :  { %27295 = vmatmul.mubr.msk.f32.vlgmr.msra.gmra.mxu0 %vm1235_vm9, %v31866_v50  ;;  %27315 = vmatmul.mubr.msk.f32.vlgmr.msra.gmra.mxu1 %vm1235_vm9, %v35281_v62  ;;  %v32828_v51 = vpop.permute.xlu0 %17977  ;;  %v32830_v26 = vpop.permute.xlu1 %17959  ;;  %v16657_v50 = vsel %vm701_vm4, %v35274_v53, %v35286_v10 }
 0x88f   :  { %27603 = vmatpush3.msk.msra.mxu1 %vm1238_vm8, %v16652_v21  ;;  %27299 = vmatpush1.msk.msra.mxu0 %vm1238_vm8, %v16653_v56  ;;  %v17984_v46 = vsel %vm933_vm6, %v32716_v44, %v32830_v26 }
 0x890   :  { %27324 = vmatprep.subr.msk.mxu1 %vm1238_vm8, %v17319_v58  ;;  %27304 = vmatprep.subr.msk.mxu0 %vm1238_vm8, %v16658_v38 }
 0x891   :  { %16763 = vmatprep.mubr.f32.mxu0 %v35262_v1  ;;  %27604 = vmatprep.mubr.msk.f32.mxu1 %vm27963_vm12, %v35262_v1 }
 0x892   :  { %27300 = vmatmul.mubr.msk.f32.vlgmr.msra.gmra.mxu0 %vm1235_vm9, %v35281_v62  ;;  %27605 = vmatmul.mubr.msk.f32.vlgmr.msra.gmra.mxu1 %vm1235_vm9, %v35281_v62  ;;  %v32855_v5 = vpop.permute.xlu1 %17963  ;;  %v32867_v53 = vpop.permute.xlu0 %18614 }
 0x893   :  { %27305 = vmatpush1.msk.msra.mxu0 %vm1238_vm8, %v16657_v50  ;;  %27325 = vmatpush1.msk.msra.mxu1 %vm1238_vm8, %v17318_v49  ;;  %v17987_v30 = vsel %vm933_vm6, %v32855_v5, %v32763_v28 }
 0x894   :  { %27310 = vmatprep.subr.msk.mxu0 %vm1238_vm8, %v16662_v0  ;;  %27330 = vmatprep.subr.msk.mxu1 %vm1238_vm8, %v17323_v9 }
 0x895   :  { %16905 = vmatprep.mubr.f32.mxu0 %v35262_v1  ;;  %17498 = vmatprep.mubr.f32.mxu1 %v35262_v1 }
 0x896   :  { %27306 = vmatmul.mubr.msk.f32.vlgmr.msra.gmra.mxu0 %vm1235_vm9, %v35281_v62  ;;  %27326 = vmatmul.mubr.msk.f32.vlgmr.msra.gmra.mxu1 %vm1235_vm9, %v32467_v23  ;;  %v16650_v47 = vpop.permute.xlu1 %16649  ;;  %v17313_v19 = vpop.permute.xlu0 %17312 }
 0x897   :  { %27311 = vmatpush1.msk.msra.mxu0 %vm1238_vm8, %v16661_v24  ;;  %27331 = vmatpush1.msk.msra.mxu1 %vm1238_vm8, %v17322_v20  ;;  %v16666_v27 = vsel %vm701_vm4, %v16650_v47, %v16652_v21  ;;  %v16665_v15 = vsel %vm701_vm4, %v35282_v6, %v16650_v47  ;;  %v17330_v52 = vsel %vm817_vm5, %v17313_v19, %v32718_v13 }
 0x898   :  { %27336 = vmatprep.subr.msk.mxu1 %vm1238_vm8, %v17327_v12  ;;  %17047 = vmatprep.mubr.f32.mxu0 %v35262_v1  ;;  %v17320_v13 = vsel %vm817_vm5, %v32554_v63, %v32581_v29  ;;  %v17325_v63 = vsel %vm817_vm5, %v32646_v54, %v32552_v33  ;;  %v17986_v29 = vsel %vm933_vm6, %v32736_v34, %v32855_v5 }
 0x899   :  { %17640 = vmatprep.mubr.f32.mxu1 %v35262_v1  ;;  %27316 = vmatprep.subr.msk.mxu0 %vm1238_vm8, %v16666_v27  ;;  %v17985_v33 = vsel %vm933_vm6, %v32830_v26, %v32736_v34  ;;  %v17979_v6 = vsel %vm933_vm6, %v32644_v39, %v32624_v37 }
 0x89a   :  { %27312 = vmatmul.mubr.msk.f32.vlgmr.msra.gmra.mxu0 %vm1235_vm9, %v35281_v62  ;;  %27332 = vmatmul.mubr.msk.f32.vlgmr.msra.gmra.mxu1 %vm1235_vm9, %v32467_v23  ;;  %v32900_v59 = vpop.permute.xlu1 %17967  ;;  %v32930_v55 = vpop.permute.xlu0 %18616 }
 0x89b   :  { %27337 = vmatpush1.msk.msra.mxu1 %vm1238_vm8, %v17326_v11  ;;  %27317 = vmatpush1.msk.msra.mxu0 %vm1238_vm8, %v16665_v15  ;;  %v17988_v39 = vsel %vm933_vm6, %v32763_v28, %v32900_v59  ;;  %v18644_v16 = vsel %vm1049_vm7, %v32867_v53, %v32930_v55 }
 0x89c   :  { %17189 = vmatprep.mubr.f32.mxu0 %v35262_v1  ;;  %17782 = vmatprep.mubr.f32.mxu1 %v35262_v1 }
 0x89d   :  { %27607 = vmatprep.subr.mxu1 %v35262_v1  ;;  %27321 = vmatprep.subr.msk.mxu0 %vm1238_vm8, %v17317_v22 }
 0x89e   :  { %27318 = vmatmul.mubr.msk.f32.vlgmr.msra.gmra.mxu0 %vm1235_vm9, %v35281_v62  ;;  %27338 = vmatmul.mubr.msk.f32.vlgmr.msra.gmra.mxu1 %vm1235_vm9, %v32467_v23  ;;  %v32920_v36 = vpop.permute.xlu1 %17971  ;;  %v32967_v48 = vpop.permute.xlu0 %18608  ;;  %v17989_v62 = vsel %vm933_vm6, %v32900_v59, %v32808_v18  ;;  %v33118_v59 = vld [vmem:[%s34881_s9] sm:$0xff] }
 0x89f   :  { %27608 = vmatpush3.msk.msra.mxu1 %vm1238_vm8, %v17330_v52  ;;  %27322 = vmatpush1.msk.msra.mxu0 %vm1238_vm8, %v17316_v14  ;;  %v17990_v3 = vsel %vm933_vm6, %v32808_v18, %v32920_v36  ;;  %35288 = vst [vmem:[#allocation24_spill] sm:$0xff] %v33118_v59  ;;  %v13541_v22 = vpop.f32.mrf.mxu0 }
 0x8a0   :  { %27347 = vmatprep.subr.msk.mxu1 %vm1238_vm8, %v17982_v61  ;;  %27327 = vmatprep.subr.msk.mxu0 %vm1238_vm8, %v17321_v35 }
 0x8a1   :  { %17427 = vmatprep.mubr.f32.mxu0 %v35262_v1  ;;  %27609 = vmatprep.mubr.msk.f32.mxu1 %vm27963_vm12, %v35262_v1 }
 0x8a2   :  { %27323 = vmatmul.mubr.msk.f32.vlgmr.msra.gmra.mxu0 %vm1235_vm9, %v32467_v23  ;;  %27610 = vmatmul.mubr.msk.f32.vlgmr.msra.gmra.mxu1 %vm1235_vm9, %v32467_v23  ;;  %v32947_v25 = vpop.permute.xlu1 %18612 }
 0x8a3   :  { %27328 = vmatpush1.msk.msra.mxu0 %vm1238_vm8, %v17320_v13  ;;  %27348 = vmatpush1.msk.msra.mxu1 %vm1238_vm8, %v17981_v4  ;;  %v18643_v17 = vsel %vm1049_vm7, %v32947_v25, %v32867_v53 }
 0x8a4   :  { %27333 = vmatprep.subr.msk.mxu0 %vm1238_vm8, %v17325_v63  ;;  %27353 = vmatprep.subr.msk.mxu1 %vm1238_vm8, %v17986_v29 }
 0x8a5   :  { %17569 = vmatprep.mubr.f32.mxu0 %v35262_v1  ;;  %18161 = vmatprep.mubr.f32.mxu1 %v35262_v1 }
 0x8a6   :  { %27329 = vmatmul.mubr.msk.f32.vlgmr.msra.gmra.mxu0 %vm1235_vm9, %v32467_v23  ;;  %27349 = vmatmul.mubr.msk.f32.vlgmr.msra.gmra.mxu1 %vm1235_vm9, %v32810_v42  ;;  %v17311_v8 = vpop.permute.xlu1 %17310 }
 0x8a7   :  { %27334 = vmatpush1.msk.msra.mxu0 %vm1238_vm8, %v17324_v60  ;;  %27354 = vmatpush1.msk.msra.mxu1 %vm1238_vm8, %v17985_v33  ;;  %v17329_v54 = vsel %vm817_vm5, %v17311_v8, %v17313_v19  ;;  %v17328_v34 = vsel %vm817_vm5, %v32579_v57, %v17311_v8  ;;  %v18623_v57 = vpop.permute.xlu0 %18622 }
 0x8a8   :  { %27359 = vmatprep.subr.msk.mxu1 %vm1238_vm8, %v17990_v3  ;;  %17711 = vmatprep.mubr.f32.mxu0 %v35262_v1 }
 0x8a9   :  { %18303 = vmatprep.mubr.f32.mxu1 %v35262_v1  ;;  %27339 = vmatprep.subr.msk.mxu0 %vm1238_vm8, %v17329_v54 }
 0x8aa   :  { %27335 = vmatmul.mubr.msk.f32.vlgmr.msra.gmra.mxu0 %vm1235_vm9, %v32467_v23  ;;  %27355 = vmatmul.mubr.msk.f32.vlgmr.msra.gmra.mxu1 %vm1235_vm9, %v32810_v42  ;;  %v18611_v21 = vpop.permute.xlu1 %18610 }
 0x8ab   :  { %27360 = vmatpush1.msk.msra.mxu1 %vm1238_vm8, %v17989_v62  ;;  %27340 = vmatpush1.msk.msra.mxu0 %vm1238_vm8, %v17328_v34  ;;  %v17974_v37 = vpop.permute.xlu0 %17973 }
 0x8ac   :  { %17853 = vmatprep.mubr.f32.mxu0 %v35262_v1  ;;  %18445 = vmatprep.mubr.f32.mxu1 %v35262_v1  ;;  %v17991_v28 = vsel %vm933_vm6, %v32920_v36, %v17974_v37  ;;  %v33126_v36 = vpop.f32.mrf.mxu0 }
 0x8ad   :  { %27344 = vmatprep.subr.msk.mxu0 %vm1238_vm8, %v17980_v32  ;;  %27612 = vmatprep.subr.mxu1 %v35262_v1 }
 0x8ae   :  { %27341 = vmatmul.mubr.msk.f32.vlgmr.msra.gmra.mxu0 %vm1235_vm9, %v32467_v23  ;;  %27361 = vmatmul.mubr.msk.f32.vlgmr.msra.gmra.mxu1 %vm1235_vm9, %v32810_v42  ;;  %v17983_v23 = vsel %vm933_vm6, %v32671_v2, %v32716_v44 }
 0x8af   :  { %27345 = vmatpush1.msk.msra.mxu0 %vm1238_vm8, %v17979_v6  ;;  %18090 = vmatprep.mubr.f32.mxu0 %v35262_v1  ;;  %v18619_v41 = vpop.permute.xlu1 %18618  ;;  %v18627_v44 = vpop.permute.xlu0 %18626 }
 0x8b0   :  { %27350 = vmatprep.subr.msk.mxu0 %vm1238_vm8, %v17984_v46  ;;  %27614 = vmatprep.mubr.msk.f32.mxu1 %vm27963_vm12, %v35262_v1  ;;  %v18645_v18 = vsel %vm1049_vm7, %v32930_v55, %v18619_v41 }
 0x8b1   :  { %19339 = vrot.lane.b32.xlu0 %v33118_v59, %s27958_s0  ;;  %s27964_s0 = smov 88  }
 0x8b2   :  { %27346 = vmatmul.mubr.msk.f32.vlgmr.msra.gmra.mxu0 %vm1235_vm9, %v32810_v42 }
 0x8b3   :  { %27351 = vmatpush1.msk.msra.mxu0 %vm1238_vm8, %v17983_v23  ;;  %18232 = vmatprep.mubr.f32.mxu0 %v35262_v1  ;;  %v18621_v31 = vpop.permute.xlu1 %18620  ;;  %v18631_v26 = vpop.permute.xlu0 %18630 }
 0x8b4   :  { %27356 = vmatprep.subr.msk.mxu0 %vm1238_vm8, %v17988_v39  ;;  %v18647_v10 = vsel %vm1049_vm7, %v18621_v31, %v18623_v57  ;;  %v18646_v50 = vsel %vm1049_vm7, %v18619_v41, %v18621_v31  ;;  %v13612_v15 = vpop.f32.mrf.mxu1 }
 0x8b5   :  { %20554 = vrot.lane.b32.xlu0 %v33118_v59, %s27950_s3 }
 0x8b6   :  { %27352 = vmatmul.mubr.msk.f32.vlgmr.msra.gmra.mxu0 %vm1235_vm9, %v32810_v42  ;;  %v33113_v11 = vpop.f32.mrf.mxu1 }
 0x8b7   :  { %27357 = vmatpush1.msk.msra.mxu0 %vm1238_vm8, %v17987_v30  ;;  %18374 = vmatprep.mubr.f32.mxu0 %v35262_v1  ;;  %v17976_v2 = vpop.permute.xlu1 %17975  ;;  %v18635_v43 = vpop.permute.xlu0 %18634 }
 0x8b8   :  { %v17993_v45 = vsel %vm933_vm6, %v17976_v2, %v32828_v51  ;;  %v17992_v40 = vsel %vm933_vm6, %v17974_v37, %v17976_v2  ;;  %v18642_v51 = vsel %vm1049_vm7, %v18611_v21, %v32947_v25 }
 0x8b9   :  { %27362 = vmatprep.subr.msk.mxu0 %vm1238_vm8, %v17992_v40  ;;  %27613 = vmatpush3.msk.msra.mxu1 %vm1238_vm8, %v17993_v45 }
 0x8ba   :  { %27358 = vmatmul.mubr.msk.f32.vlgmr.msra.gmra.mxu0 %vm1235_vm9, %v32810_v42  ;;  %27615 = vmatmul.mubr.msk.f32.vlgmr.msra.gmra.mxu1 %vm1235_vm9, %v32810_v42 }
 0x8bb   :  { %27363 = vmatpush1.msk.msra.mxu0 %vm1238_vm8, %v17991_v28  ;;  %18516 = vmatprep.mubr.f32.mxu0 %v35262_v1  ;;  %v18625_v7 = vpop.permute.xlu1 %18624  ;;  %v18639_v53 = vpop.permute.xlu0 %18638 }
 0x8bc   :  { %27370 = vmatprep.subr.msk.mxu1 %vm1238_vm8, %v18645_v18  ;;  %27367 = vmatprep.subr.msk.mxu0 %vm1238_vm8, %v18643_v17  ;;  %v18649_v56 = vsel %vm1049_vm7, %v18625_v7, %v18627_v44  ;;  %v18648_v58 = vsel %vm1049_vm7, %v18623_v57, %v18625_v7 }
 0x8bd   :  { %27371 = vmatpush1.msk.msra.mxu1 %vm1238_vm8, %v18644_v16  ;;  %18824 = vmatprep.mubr.f32.mxu1 %v35262_v1 }
 0x8be   :  { %27364 = vmatmul.mubr.msk.f32.vlgmr.msra.gmra.mxu0 %vm1235_vm9, %v32810_v42  ;;  %27376 = vmatprep.subr.msk.mxu1 %vm1238_vm8, %v18649_v56 }
 0x8bf   :  { %27368 = vmatpush1.msk.msra.mxu0 %vm1238_vm8, %v18642_v51  ;;  %18753 = vmatprep.mubr.f32.mxu0 %v35262_v1 }
 0x8c0   :  { %27373 = vmatprep.subr.msk.mxu0 %vm1238_vm8, %v18647_v10  ;;  %27372 = vmatmul.mubr.msk.f32.vlgmr.msra.gmra.mxu1 %vm1235_vm9, %v32967_v48  ;;  %v18629_v38 = vpop.permute.xlu1 %18628 }
 0x8c1   :  { %27377 = vmatpush1.msk.msra.mxu1 %vm1238_vm8, %v18648_v58  ;;  %18966 = vmatprep.mubr.f32.mxu1 %v35262_v1  ;;  %v18651_v42 = vsel %vm1049_vm7, %v18629_v38, %v18631_v26  ;;  %v18650_v5 = vsel %vm1049_vm7, %v18627_v44, %v18629_v38 }
 0x8c2   :  { %27369 = vmatmul.mubr.msk.f32.vlgmr.msra.gmra.mxu0 %vm1235_vm9, %v32967_v48  ;;  %21199 = vrot.lane.b32.xlu0 %v33118_v59, %s35169_s1  ;;  %s27965_s1 = smov 80  }
 0x8c3   :  { %27374 = vmatpush1.msk.msra.mxu0 %vm1238_vm8, %v18646_v50  ;;  %18895 = vmatprep.mubr.f32.mxu0 %v35262_v1 }
 0x8c4   :  { %27379 = vmatprep.subr.msk.mxu0 %vm1238_vm8, %v18651_v42  ;;  %27378 = vmatmul.mubr.msk.f32.vlgmr.msra.gmra.mxu1 %vm1235_vm9, %v32967_v48 }
 0x8c5   :  { %v18633_v49 = vpop.permute.xlu1 %18632  ;;  %19108 = vmatprep.mubr.f32.mxu1 %v35262_v1 }
 0x8c6   :  { %27375 = vmatmul.mubr.msk.f32.vlgmr.msra.gmra.mxu0 %vm1235_vm9, %v32967_v48  ;;  %v18652_v0 = vsel %vm1049_vm7, %v18631_v26, %v18633_v49  ;;  %v18653_v9 = vsel %vm1049_vm7, %v18633_v49, %v18635_v43  ;;  %21844 = vrot.lane.b32.xlu0 %v33118_v59, %s27953_s28 }
 0x8c7   :  { %27380 = vmatpush1.msk.msra.mxu0 %vm1238_vm8, %v18650_v5  ;;  %27382 = vmatprep.subr.msk.mxu1 %vm1238_vm8, %v18653_v9  ;;  %v13683_v35 = vpop.f32.mrf.mxu0 }
 0x8c8   :  { %19037 = vmatprep.mubr.f32.mxu0 %v35262_v1  ;;  %27383 = vmatpush1.msk.msra.mxu1 %vm1238_vm8, %v18652_v0 }
 0x8c9   :  { %27384 = vmatmul.mubr.msk.f32.vlgmr.msra.gmra.mxu1 %vm1235_vm9, %v32967_v48  ;;  %27617 = vmatprep.subr.mxu1 %v35262_v1  ;;  %v33134_v4 = vpop.f32.mrf.mxu0 }
 0x8ca   :  { %27381 = vmatmul.mubr.msk.f32.vlgmr.msra.gmra.mxu0 %vm1235_vm9, %v32967_v48  ;;  %v18637_v24 = vpop.permute.xlu1 %18636  ;;  %27619 = vmatprep.mubr.msk.f32.mxu1 %vm27963_vm12, %v35262_v1 }
 0x8cb   :  { %v18654_v20 = vsel %vm1049_vm7, %v18635_v43, %v18637_v24  ;;  %v18655_v47 = vsel %vm1049_vm7, %v18637_v24, %v18639_v53  ;;  %19179 = vmatprep.mubr.f32.mxu0 %v35262_v1  ;;  %22489 = vrot.lane.b32.xlu0 %v33118_v59, %s27964_s0 }
 0x8cc   :  { %27385 = vmatprep.subr.msk.mxu0 %vm1238_vm8, %v18655_v47 }
 0x8cd   :  { %27386 = vmatpush1.msk.msra.mxu0 %vm1238_vm8, %v18654_v20 }
 0x8ce   :  { %27387 = vmatmul.mubr.msk.f32.vlgmr.msra.gmra.mxu0 %vm1235_vm9, %v32967_v48  ;;  %v18641_v12 = vpop.permute.xlu1 %18640 }
 0x8cf   :  { %v18656_v27 = vsel %vm1049_vm7, %v18639_v53, %v18641_v12  ;;  %19482 = vmatprep.mubr.f32.mxu0 %v35262_v1 }
 0x8d0   :  { %27618 = vmatpush3.msk.msra.mxu1 %vm1238_vm8, %v18656_v27 }
 0x8d1   :  { %27620 = vmatmul.mubr.msk.f32.vlgmr.msra.gmra.mxu1 %vm1235_vm9, %v32967_v48 }
 0x8d2   :  { %19553 = vmatprep.mubr.f32.mxu1 %v35262_v1 }
 0x8db   :  { %v13754_v19 = vpop.f32.mrf.mxu1 }
 0x8dd   :  { %v33122_v14 = vpop.f32.mrf.mxu1 }
 0x8eb   :  { %v13825_v63 = vpop.f32.mrf.mxu0 }
 0x8ed   :  { %v33139_v48 = vpop.f32.mrf.mxu0 }
 0x8fb   :  { %v13896_v52 = vpop.f32.mrf.mxu1 }
 0x8fd   :  { %v33128_v61 = vpop.f32.mrf.mxu1 }
 0x8ff   :  { %v14038_v55 = vpop.f32.mrf.mxu1 }
 0x901   :  { %v27581_v13 = vpop.f32.mrf.mxu1 }
 0x903   :  { %v14211_v25 = vpop.f32.mrf.mxu1 }
 0x904   :  { %v14212_v23 = vadd.f32 %v14211_v25, %v13612_v15 }
 0x905   :  { %v33136_v29 = vpop.f32.mrf.mxu1 }
 0x907   :  { %v14353_v60 = vpop.f32.mrf.mxu1 }
 0x908   :  { %v14354_v33 = vadd.f32 %v14353_v60, %v13754_v19 }
 0x909   :  { %v33141_v8 = vpop.f32.mrf.mxu1 }
 0x90b   :  { %v13967_v3 = vpop.f32.mrf.mxu0 }
 0x90c   :  { %v14495_v54 = vpop.f32.mrf.mxu1 }
 0x90d   :  { %v14496_v34 = vadd.f32 %v14495_v54, %v13896_v52  ;;  %v33143_v62 = vpop.f32.mrf.mxu0 }
 0x90e   :  { %v33145_v21 = vpop.f32.mrf.mxu1 }
 0x910   :  { %v14140_v57 = vpop.f32.mrf.mxu0 }
 0x911   :  { %v14637_v32 = vpop.f32.mrf.mxu1  ;;  %v14141_v10 = vadd.f32 %v14140_v57, %v13541_v22 }
 0x912   :  { %v14638_v6 = vadd.f32 %v14637_v32, %v14038_v55  ;;  %v33147_v46 = vpop.f32.mrf.mxu0 }
 0x913   :  { %v27586_v41 = vpop.f32.mrf.mxu1 }
 0x915   :  { %v14282_v37 = vpop.f32.mrf.mxu0  ;;  %v14856_v39 = vpop.f32.mrf.mxu1 }
 0x916   :  { %v15288_v31 = vadd.f32 %v14856_v39, %v14212_v23  ;;  %v14283_v0 = vadd.f32 %v14282_v37, %v13683_v35 }
 0x917   :  { %v33149_v30 = vpop.f32.mrf.mxu0  ;;  %v33151_v2 = vpop.f32.mrf.mxu1 }
 0x919   :  { %v14424_v44 = vpop.f32.mrf.mxu0 }
 0x91a   :  { %v14425_v45 = vadd.f32 %v14424_v44, %v13825_v63  ;;  %v14998_v40 = vpop.f32.mrf.mxu1 }
 0x91b   :  { %v15292_v28 = vadd.f32 %v14998_v40, %v14354_v33  ;;  %v33153_v18 = vpop.f32.mrf.mxu0 }
 0x91c   :  { %v33155_v17 = vpop.f32.mrf.mxu1 }
 0x91e   :  { %v14566_v7 = vpop.f32.mrf.mxu0  ;;  %v15140_v16 = vpop.f32.mrf.mxu1 }
 0x91f   :  { %v14567_v56 = vadd.f32 %v14566_v7, %v13967_v3  ;;  %v15296_v51 = vadd.f32 %v15140_v16, %v14496_v34 }
 0x920   :  { %v33157_v26 = vpop.f32.mrf.mxu0  ;;  %v33159_v58 = vpop.f32.mrf.mxu1 }
 0x922   :  { %v14785_v38 = vpop.f32.mrf.mxu0  ;;  %v15282_v42 = vpop.f32.mrf.mxu1 }
 0x923   :  { %v15286_v50 = vadd.f32 %v14785_v38, %v14141_v10  ;;  %v15300_v43 = vadd.f32 %v15282_v42, %v14638_v6 }
 0x924   :  { %v33161_v49 = vpop.f32.mrf.mxu0  ;;  %v27591_v5 = vpop.f32.mrf.mxu1 }
 0x926   :  { %v14927_v9 = vpop.f32.mrf.mxu0  ;;  %v15516_v53 = vpop.f32.mrf.mxu1 }
 0x927   :  { %v15290_v24 = vadd.f32 %v14927_v9, %v14283_v0  ;;  %v15948_v20 = vadd.f32 %v15516_v53, %v15288_v31 }
 0x928   :  { %v33163_v47 = vpop.f32.mrf.mxu0  ;;  %v33165_v12 = vpop.f32.mrf.mxu1 }
 0x92a   :  { %v15069_v27 = vpop.f32.mrf.mxu0  ;;  %v15658_v15 = vpop.f32.mrf.mxu1 }
 0x92b   :  { %v15294_v19 = vadd.f32 %v15069_v27, %v14425_v45  ;;  %v15952_v22 = vadd.f32 %v15658_v15, %v15292_v28 }
 0x92c   :  { %v33167_v52 = vpop.f32.mrf.mxu0  ;;  %v33169_v55 = vpop.f32.mrf.mxu1 }
 0x92e   :  { %v15211_v13 = vpop.f32.mrf.mxu0  ;;  %v15800_v25 = vpop.f32.mrf.mxu1 }
 0x92f   :  { %v15298_v63 = vadd.f32 %v15211_v13, %v14567_v56  ;;  %v15956_v35 = vadd.f32 %v15800_v25, %v15296_v51 }
 0x930   :  { %v33171_v60 = vpop.f32.mrf.mxu0  ;;  %v33173_v33 = vpop.f32.mrf.mxu1 }
 0x932   :  { %v15445_v3 = vpop.f32.mrf.mxu0  ;;  %v15942_v54 = vpop.f32.mrf.mxu1 }
 0x933   :  { %v33175_v34 = vadd.f32 %v15445_v3, %v15286_v50  ;;  %v15960_v57 = vadd.f32 %v15942_v54, %v15300_v43 }
 0x934   :  { %v33177_v32 = vpop.f32.mrf.mxu0  ;;  %v27596_v6 = vpop.f32.mrf.mxu1 }
 0x935   :  { %35289 = vst [vmem:[#allocation18_spill] sm:$0xff] %v33177_v32 }
 0x936   :  { %v15587_v41 = vpop.f32.mrf.mxu0  ;;  %v16176_v23 = vpop.f32.mrf.mxu1 }
 0x937   :  { %v15950_v37 = vadd.f32 %v15587_v41, %v15290_v24  ;;  %v33179_v39 = vadd.f32 %v16176_v23, %v15948_v20 }
 0x938   :  { %v33181_v31 = vpop.f32.mrf.mxu0  ;;  %v33183_v44 = vpop.f32.mrf.mxu1 }
 0x939   :  { %35290 = vst [vmem:[#allocation17_spill] sm:$0xff] %v33183_v44 }
 0x93a   :  { %v15729_v45 = vpop.f32.mrf.mxu0  ;;  %v16318_v40 = vpop.f32.mrf.mxu1 }
 0x93b   :  { %v15954_v28 = vadd.f32 %v15729_v45, %v15294_v19  ;;  %v16612_v7 = vadd.f32 %v16318_v40, %v15952_v22 }
 0x93c   :  { %v33185_v16 = vpop.f32.mrf.mxu0  ;;  %v33187_v56 = vpop.f32.mrf.mxu1 }
 0x93e   :  { %v15871_v51 = vpop.f32.mrf.mxu0  ;;  %v16460_v10 = vpop.f32.mrf.mxu1 }
 0x93f   :  { %v15958_v38 = vadd.f32 %v15871_v51, %v15298_v63  ;;  %v16616_v42 = vadd.f32 %v16460_v10, %v15956_v35 }
 0x940   :  { %v33189_v50 = vpop.f32.mrf.mxu0  ;;  %v33191_v43 = vpop.f32.mrf.mxu1 }
 0x942   :  { %v33193_v5 = vpop.f32.mrf.mxu0  ;;  %v16602_v0 = vpop.f32.mrf.mxu1 }
 0x943   :  { %v16620_v9 = vadd.f32 %v16602_v0, %v15960_v57 }
 0x944   :  { %v33195_v53 = vpop.f32.mrf.mxu0  ;;  %v27601_v24 = vpop.f32.mrf.mxu1 }
 0x945   :  { %35291 = vst [vmem:[#allocation29_spill] sm:$0xff] %v33195_v53 }
 0x946   :  { %v16247_v20 = vpop.f32.mrf.mxu0  ;;  %v33197_v27 = vpop.f32.mrf.mxu1 }
 0x947   :  { %v16610_v15 = vadd.f32 %v16247_v20, %v15950_v37 }
 0x948   :  { %v33199_v19 = vpop.f32.mrf.mxu0  ;;  %v33201_v22 = vpop.f32.mrf.mxu1 }
 0x949   :  { %35292 = vst [vmem:[#allocation15_spill] sm:$0xff] %v33201_v22 }
 0x94a   :  { %v16389_v13 = vpop.f32.mrf.mxu0  ;;  %v16978_v25 = vpop.f32.mrf.mxu1 }
 0x94b   :  { %v16614_v63 = vadd.f32 %v16389_v13, %v15954_v28  ;;  %v17272_v35 = vadd.f32 %v16978_v25, %v16612_v7 }
 0x94c   :  { %v33203_v3 = vpop.f32.mrf.mxu0  ;;  %v16980_v54 = vpop.f32.mrf.mxu1 }
 0x94e   :  { %v16531_v6 = vpop.f32.mrf.mxu0  ;;  %v17120_v57 = vpop.f32.mrf.mxu1 }
 0x94f   :  { %v16618_v41 = vadd.f32 %v16531_v6, %v15958_v38  ;;  %v17276_v23 = vadd.f32 %v17120_v57, %v16616_v42 }
 0x950   :  { %v33205_v45 = vpop.f32.mrf.mxu0  ;;  %v17122_v40 = vpop.f32.mrf.mxu1 }
 0x952   :  { %v33207_v51 = vpop.f32.mrf.mxu0  ;;  %v17262_v37 = vpop.f32.mrf.mxu1 }
 0x953   :  { %v17280_v10 = vadd.f32 %v17262_v37, %v16620_v9 }
 0x954   :  { %v33209_v0 = vpop.f32.mrf.mxu0  ;;  %v27606_v24 = vpop.f32.mrf.mxu1 }
 0x955   :  { %35293 = vst [vmem:[#allocation6_spill] sm:$0xff] %v33209_v0 }
 0x956   :  { %v16907_v20 = vpop.f32.mrf.mxu0  ;;  %v33211_v28 = vpop.f32.mrf.mxu1 }
 0x957   :  { %v17270_v7 = vadd.f32 %v16907_v20, %v16610_v15  ;;  %v14356_v15 = vadd.f32 %v33141_v8, %v33122_v14 }
 0x958   :  { %v16909_v13 = vpop.f32.mrf.mxu0  ;;  %v33213_v25 = vpop.f32.mrf.mxu1 }
 0x959   :  { %35294 = vst [vmem:[#allocation42_spill] sm:$0xff] %v33213_v25  ;;  %v15293_v44 = vadd.f32 %v33155_v17, %v14356_v15 }
 0x95a   :  { %v17049_v1 = vpop.f32.mrf.mxu0  ;;  %v17642_v38 = vpop.f32.mrf.mxu1 }
 0x95b   :  { %v17274_v42 = vadd.f32 %v17049_v1, %v16614_v63  ;;  %v33215_v6 = vadd.f32 %v17642_v38, %v17272_v35  ;;  %v14498_v38 = vadd.f32 %v33145_v21, %v33128_v61 }
 0x95c   :  { %v17051_v57 = vpop.f32.mrf.mxu0  ;;  %v17644_v59 = vpop.f32.mrf.mxu1 }
 0x95d   :  { %35295 = vst [vmem:[#allocation28_spill] sm:$0xff] %v33215_v6 }
 0x95e   :  { %v17191_v22 = vpop.f32.mrf.mxu0  ;;  %v17784_v53 = vpop.f32.mrf.mxu1 }
 0x95f   :  { %v17278_v9 = vadd.f32 %v17191_v22, %v16618_v41  ;;  %v17940_v37 = vadd.f32 %v17784_v53, %v17276_v23  ;;  %v15953_v53 = vadd.f32 %v33169_v55, %v15293_v44  ;;  %v15297_v23 = vadd.f32 %v33159_v58, %v14498_v38 }
 0x960   :  { %v33217_v0 = vpop.f32.mrf.mxu0  ;;  %v17786_v24 = vpop.f32.mrf.mxu1 }
 0x961   :  { %v16613_v14 = vadd.f32 %v33187_v56, %v15953_v53  ;;  %v15957_v17 = vadd.f32 %v33173_v33, %v15297_v23  ;;  %v14285_v56 = vadd.f32 %v33149_v30, %v33134_v4 }
 0x962   :  { %v33221_v20 = vpop.f32.mrf.mxu0  ;;  %v17926_v25 = vpop.f32.mrf.mxu1 }
 0x963   :  { %v17944_v1 = vadd.f32 %v17926_v25, %v17280_v10  ;;  %v17273_v10 = vadd.f32 %v16980_v54, %v16613_v14  ;;  %v16617_v61 = vadd.f32 %v33191_v43, %v15957_v17  ;;  %v15291_v33 = vadd.f32 %v33163_v47, %v14285_v56 }
 0x964   :  { %v33224_v63 = vpop.f32.mrf.mxu0  ;;  %v27611_v35 = vpop.f32.mrf.mxu1  ;;  %v14569_v47 = vadd.f32 %v33157_v26, %v33143_v62 }
 0x965   :  { %v17937_v21 = vadd.f32 %v17644_v59, %v17273_v10  ;;  %v15951_v14 = vadd.f32 %v33181_v31, %v15291_v33  ;;  %v14143_v33 = vadd.f32 %v33147_v46, %v33126_v36  ;;  %v35297_v36 = vld [vmem:[#allocation17_spill] sm:$0xff] }
 0x966   :  { %v17571_v22 = vpop.f32.mrf.mxu0  ;;  %v18163_v41 = vpop.f32.mrf.mxu1 }
 0x967   :  { %v33231_v8 = vadd.f32 %v17571_v22, %v17270_v7  ;;  %v17277_v7 = vadd.f32 %v17122_v40, %v16617_v61  ;;  %v16611_v40 = vadd.f32 %v33199_v19, %v15951_v14 }
 0x968   :  { %v17573_v6 = vpop.f32.mrf.mxu0  ;;  %v33233_v32 = vpop.f32.mrf.mxu1 }
 0x969   :  { %v17941_v54 = vadd.f32 %v17786_v24, %v17277_v7 }
 0x96a   :  { %v17713_v25 = vpop.f32.mrf.mxu0  ;;  %v33236_v15 = vpop.f32.mrf.mxu1 }
 0x96b   :  { %v33239_v55 = vadd.f32 %v17713_v25, %v17274_v42  ;;  %v14427_v42 = vadd.f32 %v33153_v18, %v33139_v48  ;;  %v15299_v48 = vadd.f32 %v33171_v60, %v14569_v47 }
 0x96c   :  { %v17715_v44 = vpop.f32.mrf.mxu0  ;;  %v18307_v58 = vpop.f32.mrf.mxu1 }
 0x96d   :  { %v33243_v35 = vadd.f32 %v18307_v58, %v17937_v21  ;;  %v15295_v30 = vadd.f32 %v33167_v52, %v14427_v42  ;;  %v15959_v52 = vadd.f32 %v33189_v50, %v15299_v48  ;;  %v16606_v21 = vadd.f32 %v33193_v5, %v33175_v34 }
 0x96e   :  { %v17855_v38 = vpop.f32.mrf.mxu0  ;;  %v18447_v53 = vpop.f32.mrf.mxu1 }
 0x96f   :  { %v17942_v22 = vadd.f32 %v17855_v38, %v17278_v9  ;;  %v33246_v23 = vadd.f32 %v18447_v53, %v17940_v37  ;;  %v15955_v9 = vadd.f32 %v33185_v16, %v15295_v30  ;;  %v17271_v37 = vadd.f32 %v16909_v13, %v16611_v40 }
 0x970   :  { %v17857_v43 = vpop.f32.mrf.mxu0  ;;  %v18449_v59 = vpop.f32.mrf.mxu1  ;;  %v17268_v16 = vadd.f32 %v33197_v27, %v33179_v39  ;;  %v16619_v60 = vadd.f32 %v33205_v45, %v15959_v52  ;;  %v17266_v50 = vadd.f32 %v33207_v51, %v16606_v21  ;;  %v14214_v51 = vadd.f32 %v33136_v29, %v33113_v11 }
 0x971   :  { %v33251_v17 = vadd.f32 %v18449_v59, %v17941_v54  ;;  %v16615_v18 = vadd.f32 %v33203_v3, %v15955_v9  ;;  %v17935_v31 = vadd.f32 %v17573_v6, %v17271_v37  ;;  %v15287_v59 = vadd.f32 %v33161_v49, %v14143_v33  ;;  %v35298_v49 = vld [vmem:[#allocation29_spill] sm:$0xff]  ;;  %v35299_v37 = vld [vmem:[#allocation15_spill] sm:$0xff] }
 0x972   :  { %v18092_v4 = vpop.f32.mrf.mxu0  ;;  %v17279_v56 = vadd.f32 %v33217_v0, %v16619_v60  ;;  %v17930_v5 = vadd.f32 %v33221_v20, %v17266_v50 }
 0x973   :  { %v17275_v61 = vadd.f32 %v17051_v57, %v16615_v18  ;;  %v17932_v57 = vadd.f32 %v33211_v28, %v17268_v16 }
 0x974   :  { %v33255_v10 = vpop.f32.mrf.mxu0  ;;  %v17943_v53 = vadd.f32 %v17857_v43, %v17279_v56 }
 0x975   :  { %v17939_v13 = vadd.f32 %v17715_v44, %v17275_v61  ;;  %v18595_v38 = vadd.f32 %v18163_v41, %v17932_v57  ;;  %v18593_v44 = vadd.f32 %v18092_v4, %v17930_v5  ;;  %v15289_v41 = vadd.f32 %v33151_v2, %v14214_v51  ;;  %v35296_v4 = vld [vmem:[#allocation18_spill] sm:$0xff] }
 0x976   :  { %v33260_v24 = vpop.f32.mrf.mxu0  ;;  %v15947_v30 = vadd.f32 %v35296_v4, %v15287_v59  ;;  %v35301_v61 = vld [vmem:[#allocation42_spill] sm:$0xff] }
 0x977   :  { %v15949_v14 = vadd.f32 %v33165_v12, %v15289_v41 }
 0x978   :  { %v18236_v25 = vpop.f32.mrf.mxu0  ;;  %v16607_v9 = vadd.f32 %v35298_v49, %v15947_v30 }
 0x979   :  { %v33265_v19 = vadd.f32 %v18236_v25, %v17935_v31  ;;  %v16609_v46 = vadd.f32 %v35297_v36, %v15949_v14  ;;  %v35300_v25 = vld [vmem:[#allocation6_spill] sm:$0xff] }
 0x97a   :  { %v33269_v62 = vpop.f32.mrf.mxu0  ;;  %v18589_v26 = vpop.f32.mrf.mxu1  ;;  %v17267_v52 = vadd.f32 %v35300_v25, %v16607_v9 }
 0x97b   :  { %v18607_v3 = vadd.f32 %v18589_v26, %v17944_v1  ;;  %v33282_v1 = vpop.permute.xlu0 %19273  ;;  %v17269_v12 = vadd.f32 %v35299_v37, %v16609_v46  ;;  %v18601_v41 = vadd.f32 %v33269_v62, %v33239_v55 }
 0x97c   :  { %v18378_v6 = vpop.f32.mrf.mxu0  ;;  %v27616_v58 = vpop.f32.mrf.mxu1  ;;  %v17931_v60 = vadd.f32 %v33224_v63, %v17267_v52 }
 0x97d   :  { %v33277_v7 = vadd.f32 %v18378_v6, %v17939_v13  ;;  %v17933_v21 = vadd.f32 %v35301_v61, %v17269_v12 }
 0x97e   :  { %v18518_v34 = vpop.f32.mrf.mxu0  ;;  %v18594_v6 = vadd.f32 %v33255_v10, %v17931_v60 }
 0x97f   :  { %v33280_v39 = vadd.f32 %v18518_v34, %v17942_v22 }
 0x980   :  { %v18520_v27 = vpop.f32.mrf.mxu0  ;;  %v18826_v45 = vpop.f32.mrf.mxu1 }
 0x981   :  { %v33286_v28 = vadd.f32 %v18520_v27, %v17943_v53  ;;  %v19258_v0 = vadd.f32 %v18826_v45, %v18595_v38  ;;  %v35302_v38 = vld [vmem:[#allocation28_spill] sm:$0xff]  ;;  %v18597_v45 = vadd.f32 %v33260_v24, %v33231_v8 }
 0x982   :  { %v18755_v54 = vpop.f32.mrf.mxu0  ;;  %v18828_v20 = vpop.f32.mrf.mxu1  ;;  %v18599_v53 = vadd.f32 %v33236_v15, %v35302_v38 }
 0x983   :  { %v19278_v22 = vadd.f32 %v33282_v1, %v19258_v0  ;;  %v19256_v43 = vadd.f32 %v18755_v54, %v18593_v44 }
 0x984   :  { %v18968_v42 = vpop.f32.mrf.mxu1  ;;  %v18757_v13 = vpop.f32.mrf.mxu0 }
 0x985   :  { %vm19293_vm8 = vcmp.gt.f32.partialorder %v19278_v22, 0.0  ;;  %v19308_v11 = vmul.f32 0.01, %v19278_v22  ;;  %v19276_v29 = vadd.f32 %v33282_v1, %v19256_v43  ;;  %v19257_v50 = vadd.f32 %v18757_v13, %v18594_v6 }
 0x986   :  { %v18970_v40 = vpop.f32.mrf.mxu1  ;;  %v18897_v27 = vpop.f32.mrf.mxu0  ;;  %v19262_v51 = vadd.f32 %v18968_v42, %v18599_v53 }
 0x987   :  { %v33297_v47 = vsel %vm19293_vm8, %v19278_v22, %v19308_v11  ;;  %vm19291_vm9 = vcmp.gt.f32.partialorder %v19276_v29, 0.0  ;;  %v19306_v2 = vmul.f32 0.01, %v19276_v29  ;;  %v33306_v18 = vadd.f32 %v18970_v40, %v33243_v35 }
 0x988   :  { %19360 = vrot.lane.b32.xlu0 %v33297_v47, %s27948_s24  ;;  %v18596_v35 = vadd.f32 %v33233_v32, %v17933_v21  ;;  %v19277_v56 = vadd.f32 %v33282_v1, %v19257_v50  ;;  %v19260_v44 = vadd.f32 %v18897_v27, %v18597_v45  ;;  %v19282_v0 = vadd.f32 %v33282_v1, %v19262_v51  ;;  %v18899_v8 = vpop.f32.mrf.mxu0 }
 0x989   :  { %v33303_v48 = vsel %vm19291_vm9, %v19276_v29, %v19306_v2  ;;  %v33308_v31 = vpop.f32.mrf.mxu1  ;;  %v19261_v42 = vadd.f32 %v18899_v8, %v33265_v19 }
 0x98a   :  { %19356 = vrot.lane.b32.xlu1 %v33303_v48, %s27948_s24  ;;  %v19259_v58 = vadd.f32 %v18828_v20, %v18596_v35  ;;  %v19307_v34 = vmul.f32 0.01, %v19277_v56  ;;  %vm19292_vm14 = vcmp.gt.f32.partialorder %v19277_v56, 0.0  ;;  %v19280_v15 = vadd.f32 %v33282_v1, %v19260_v44  ;;  %v19039_v20 = vpop.f32.mrf.mxu0 }
 0x98b   :  { %v19112_v26 = vpop.f32.mrf.mxu1  ;;  %v19312_v33 = vmul.f32 0.01, %v19282_v0  ;;  %vm19297_vm15 = vcmp.gt.f32.partialorder %v19282_v0, 0.0  ;;  %v19264_v43 = vadd.f32 %v19039_v20, %v18601_v41  ;;  %v19281_v62 = vadd.f32 %v33282_v1, %v19261_v42 }
 0x98c   :  { %v33315_v16 = vadd.f32 %v19112_v26, %v33251_v17  ;;  %20560 = vrot.lane.b32.xlu0 %v33297_v47, %s27949_s25  ;;  %v19279_v57 = vadd.f32 %v33282_v1, %v19259_v58  ;;  %v33344_v5 = vsel %vm19292_vm14, %v19277_v56, %v19307_v34  ;;  %v19310_v24 = vmul.f32 0.01, %v19280_v15  ;;  %v19041_v40 = vpop.f32.mrf.mxu0 }
 0x98d   :  { %vm19295_vm10 = vcmp.gt.f32.partialorder %v19280_v15, 0.0  ;;  %v33370_v54 = vsel %vm19297_vm15, %v19282_v0, %v19312_v33  ;;  %v19284_v59 = vadd.f32 %v33282_v1, %v19264_v43  ;;  %v19311_v11 = vmul.f32 0.01, %v19281_v62  ;;  %v35306_v0 = vld [vmem:[#allocation24_spill] sm:$0xff] }
 0x98e   :  { %20556 = vrot.lane.b32.xlu1 %v33303_v48, %s27949_s25  ;;  %v19309_v10 = vmul.f32 0.01, %v19279_v57  ;;  %vm19294_vm13 = vcmp.gt.f32.partialorder %v19279_v57, 0.0  ;;  %v33376_v22 = vsel %vm19295_vm10, %v19280_v15, %v19310_v24  ;;  %vm19296_vm8 = vcmp.gt.f32.partialorder %v19281_v62, 0.0  ;;  %v19181_v46 = vpop.f32.mrf.mxu0 }
 0x98f   :  { %v19314_v55 = vmul.f32 0.01, %v19284_v59  ;;  %vm19299_vm11 = vcmp.gt.f32.partialorder %v19284_v59, 0.0  ;;  %v19266_v19 = vadd.f32 %v33308_v31, %v33246_v23  ;;  %v33405_v29 = vsel %vm19296_vm8, %v19281_v62, %v19311_v11 }
 0x990   :  { %21205 = vrot.lane.b32.xlu0 %v33297_v47, %s27950_s3  ;;  %v19283_v23 = vadd.f32 %v33282_v1, %v33306_v18  ;;  %v19268_v49 = vadd.f32 %v19181_v46, %v33280_v39  ;;  %v19265_v12 = vadd.f32 %v19041_v40, %v33277_v7  ;;  %v33441_v39 = vpop.permute.xlu0 %19339  ;;  %v19287_v35 = vadd.f32 %v33282_v1, %v33315_v16 }
 0x991   :  { %v19252_v17 = vpop.f32.mrf.mxu1  ;;  %v33395_v14 = vsel %vm19299_vm11, %v19284_v59, %v19314_v55  ;;  %v19286_v4 = vadd.f32 %v33282_v1, %v19266_v19  ;;  %v35307_v43 = vmov 0.0  }
 0x992   :  { %21201 = vrot.lane.b32.xlu1 %v33303_v48, %s27950_s3  ;;  %v33329_v63 = vadd.f32 %v19252_v17, %v18607_v3  ;;  %v33340_v3 = vsel %vm19294_vm13, %v19279_v57, %v19309_v10  ;;  %v19313_v2 = vmul.f32 0.01, %v19283_v23  ;;  %vm19298_vm13 = vcmp.gt.f32.partialorder %v19283_v23, 0.0  ;;  %v19183_v17 = vpop.f32.mrf.mxu0 }
 0x993   :  { %v27621_v32 = vpop.f32.mrf.mxu1  ;;  %v19316_v30 = vmul.f32 0.01, %v19286_v4  ;;  %vm19301_vm9 = vcmp.gt.f32.partialorder %v19286_v4, 0.0  ;;  %v19288_v37 = vadd.f32 %v33282_v1, %v19268_v49  ;;  %v19285_v31 = vadd.f32 %v33282_v1, %v19265_v12 }
 0x994   :  { %21850 = vrot.lane.b32.xlu0 %v33297_v47, %s27951_s26  ;;  %v33429_v9 = vsel %vm19298_vm13, %v19283_v23, %v19313_v2  ;;  %v33452_v52 = vpop.permute.xlu0 %20554  ;;  %v19290_v21 = vadd.f32 %v33282_v1, %v33329_v63  ;;  %v19317_v58 = vmul.f32 0.01, %v19287_v35  ;;  %vm19302_vm11 = vcmp.gt.f32.partialorder %v19287_v35, 0.0 }
 0x995   :  { %v33420_v36 = vsel %vm19301_vm9, %v19286_v4, %v19316_v30  ;;  %v19318_v18 = vmul.f32 0.01, %v19288_v37  ;;  %vm19303_vm14 = vcmp.gt.f32.partialorder %v19288_v37, 0.0  ;;  %v19315_v7 = vmul.f32 0.01, %v19285_v31 }
 0x996   :  { %21846 = vrot.lane.b32.xlu1 %v33303_v48, %s27951_s26  ;;  %vm19300_vm15 = vcmp.gt.f32.partialorder %v19285_v31, 0.0  ;;  %v19320_v60 = vmul.f32 0.01, %v19290_v21  ;;  %vm19305_vm10 = vcmp.gt.f32.partialorder %v19290_v21, 0.0  ;;  %v33486_v16 = vsel %vm19302_vm11, %v19287_v35, %v19317_v58 }
 0x997   :  { %v33446_v25 = vsel %vm19303_vm14, %v19288_v37, %v19318_v18  ;;  %v33456_v61 = vsel %vm19300_vm15, %v19285_v31, %v19315_v7  ;;  %v19269_v57 = vadd.f32 %v19183_v17, %v33286_v28  ;;  %vm19415_vm9 = vcmask 64512  }
 0x998   :  { %22495 = vrot.lane.b32.xlu0 %v33297_v47, %s35131_s2  ;;  %v33464_v26 = vpop.permute.xlu0 %21199  ;;  %v33476_v6 = vsel %vm19305_vm10, %v19290_v21, %v19320_v60 }
 0x999   :  { %v19289_v56 = vadd.f32 %v33282_v1, %v19269_v57 }
 0x99a   :  { %22491 = vrot.lane.b32.xlu1 %v33303_v48, %s35131_s2 }
 0x99b   :  { %v19319_v28 = vmul.f32 0.01, %v19289_v56  ;;  %vm19304_vm8 = vcmp.gt.f32.partialorder %v19289_v56, 0.0 }
 0x99c   :  { %19362 = vrot.lane.b32.xlu0 %v33340_v3, %s27948_s24  ;;  %v33474_v13 = vpop.permute.xlu0 %21844 }
 0x99d   :  { %v33514_v1 = vsel %vm19304_vm8, %v19289_v56, %v19319_v28 }
 0x99e   :  { %19358 = vrot.lane.b32.xlu1 %v33344_v5, %s27948_s24 }
 0x9a0   :  { %20562 = vrot.lane.b32.xlu0 %v33340_v3, %s27949_s25  ;;  %v33484_v50 = vpop.permute.xlu0 %22489 }
 0x9a1   :  { %35303 = vst [vmem:[#allocation11_spill] sm:$0xff] %v33484_v50 }
 0x9a2   :  { %20558 = vrot.lane.b32.xlu1 %v33344_v5, %s27949_s25 }
 0x9a4   :  { %21207 = vrot.lane.b32.xlu0 %v33340_v3, %s27950_s3 }
 0x9a6   :  { %21203 = vrot.lane.b32.xlu1 %v33344_v5, %s27950_s3 }
 0x9a8   :  { %21852 = vrot.lane.b32.xlu0 %v33340_v3, %s27951_s26 }
 0x9aa   :  { %21848 = vrot.lane.b32.xlu1 %v33344_v5, %s27951_s26 }
 0x9ac   :  { %22497 = vrot.lane.b32.xlu0 %v33340_v3, %s35131_s2 }
 0x9ae   :  { %22493 = vrot.lane.b32.xlu1 %v33344_v5, %s35131_s2 }
 0x9b0   :  { %19368 = vrot.lane.b32.xlu0 %v33370_v54, %s27948_s24 }
 0x9b2   :  { %19364 = vrot.lane.b32.xlu1 %v33376_v22, %s27948_s24 }
 0x9b4   :  { %20568 = vrot.lane.b32.xlu0 %v33370_v54, %s27949_s25 }
 0x9b6   :  { %20564 = vrot.lane.b32.xlu1 %v33376_v22, %s27949_s25 }
 0x9b8   :  { %21213 = vrot.lane.b32.xlu0 %v33370_v54, %s27950_s3 }
 0x9ba   :  { %21209 = vrot.lane.b32.xlu1 %v33376_v22, %s27950_s3 }
 0x9bc   :  { %21858 = vrot.lane.b32.xlu0 %v33370_v54, %s27951_s26 }
 0x9be   :  { %21854 = vrot.lane.b32.xlu1 %v33376_v22, %s27951_s26 }
 0x9c0   :  { %19372 = vrot.lane.b32.xlu0 %v33395_v14, %s27948_s24 }
 0x9c2   :  { %22499 = vrot.lane.b32.xlu1 %v33376_v22, %s35131_s2 }
 0x9c4   :  { %20572 = vrot.lane.b32.xlu0 %v33395_v14, %s27949_s25 }
 0x9c6   :  { %19366 = vrot.lane.b32.xlu1 %v33405_v29, %s27948_s24 }
 0x9c8   :  { %21217 = vrot.lane.b32.xlu0 %v33395_v14, %s27950_s3 }
 0x9ca   :  { %20566 = vrot.lane.b32.xlu1 %v33405_v29, %s27949_s25 }
 0x9cc   :  { %21862 = vrot.lane.b32.xlu0 %v33395_v14, %s27951_s26 }
 0x9ce   :  { %21211 = vrot.lane.b32.xlu1 %v33405_v29, %s27950_s3 }
 0x9d0   :  { %19376 = vrot.lane.b32.xlu0 %v33420_v36, %s27948_s24 }
 0x9d2   :  { %21856 = vrot.lane.b32.xlu1 %v33405_v29, %s27951_s26 }
 0x9d4   :  { %20576 = vrot.lane.b32.xlu0 %v33420_v36, %s27949_s25 }
 0x9d6   :  { %19370 = vrot.lane.b32.xlu1 %v33429_v9, %s27948_s24 }
 0x9d8   :  { %21221 = vrot.lane.b32.xlu0 %v33420_v36, %s27950_s3 }
 0x9da   :  { %20570 = vrot.lane.b32.xlu1 %v33429_v9, %s27949_s25 }
 0x9dc   :  { %21866 = vrot.lane.b32.xlu0 %v33420_v36, %s27951_s26 }
 0x9de   :  { %21215 = vrot.lane.b32.xlu1 %v33429_v9, %s27950_s3 }
 0x9e0   :  { %19380 = vrot.lane.b32.xlu0 %v33446_v25, %s27948_s24 }
 0x9e2   :  { %21860 = vrot.lane.b32.xlu1 %v33429_v9, %s27951_s26 }
 0x9e4   :  { %20580 = vrot.lane.b32.xlu0 %v33446_v25, %s27949_s25 }
 0x9e6   :  { %19374 = vrot.lane.b32.xlu1 %v33456_v61, %s27948_s24 }
 0x9e8   :  { %21225 = vrot.lane.b32.xlu0 %v33446_v25, %s27950_s3 }
 0x9ea   :  { %20574 = vrot.lane.b32.xlu1 %v33456_v61, %s27949_s25 }
 0x9ec   :  { %21870 = vrot.lane.b32.xlu0 %v33446_v25, %s27951_s26 }
 0x9ee   :  { %21219 = vrot.lane.b32.xlu1 %v33456_v61, %s27950_s3 }
 0x9f0   :  { %19384 = vrot.lane.b32.xlu0 %v33476_v6, %s27948_s24 }
 0x9f2   :  { %21864 = vrot.lane.b32.xlu1 %v33456_v61, %s27951_s26 }
 0x9f4   :  { %22503 = vrot.lane.b32.xlu0 %v33370_v54, %s35131_s2 }
 0x9f6   :  { %19378 = vrot.lane.b32.xlu1 %v33486_v16, %s27948_s24 }
 0x9f8   :  { %22507 = vrot.lane.b32.xlu0 %v33395_v14, %s35131_s2 }
 0x9fa   :  { %20578 = vrot.lane.b32.xlu1 %v33486_v16, %s27949_s25  ;;  %v19361_v63 = vpop.permute.xlu0 %19360 }
 0x9fc   :  { %v19357_v32 = vpop.permute.xlu1 %19356  ;;  %22511 = vrot.lane.b32.xlu0 %v33420_v36, %s35131_s2 }
 0x9fe   :  { %21223 = vrot.lane.b32.xlu1 %v33486_v16, %s27950_s3  ;;  %v33500_v10 = vpop.permute.xlu0 %20560 }
 0xa00   :  { %v33502_v34 = vpop.permute.xlu1 %20556  ;;  %22515 = vrot.lane.b32.xlu0 %v33446_v25, %s35131_s2 }
 0xa02   :  { %21868 = vrot.lane.b32.xlu1 %v33486_v16, %s27951_s26  ;;  %v33508_v38 = vpop.permute.xlu0 %21205 }
 0xa04   :  { %v33510_v53 = vpop.permute.xlu1 %21201  ;;  %23140 = vrot.lane.b32.xlu0 %v33297_v47, %s27953_s28 }
 0xa06   :  { %19382 = vrot.lane.b32.xlu1 %v33514_v1, %s27948_s24  ;;  %v33518_v27 = vpop.permute.xlu0 %21850  ;;  %s27966_s24 = smov 72  }
 0xa08   :  { %v33520_v45 = vpop.permute.xlu1 %21846  ;;  %23142 = vrot.lane.b32.xlu0 %v33340_v3, %s27953_s28 }
 0xa0a   :  { %22501 = vrot.lane.b32.xlu1 %v33405_v29, %s35131_s2  ;;  %v33526_v51 = vpop.permute.xlu0 %22495 }
 0xa0b   :  { %35304 = vst [vmem:[#allocation21_spill] sm:$0xff] %v33526_v51 }
 0xa0c   :  { %v33528_v44 = vpop.permute.xlu1 %22491  ;;  %23134 = vrot.lane.b32.xlu0 %v35306_v0, %s27965_s1 }
 0xa0d   :  { %35305 = vst [vmem:[#allocation44_spill] sm:$0xff] %v33528_v44 }
 0xa0e   :  { %22505 = vrot.lane.b32.xlu1 %v33429_v9, %s35131_s2  ;;  %v19363_v15 = vpop.permute.xlu0 %19362 }
 0xa0f   :  { %v19388_v46 = vsel %vm237_vm0, %v19361_v63, %v19363_v15 }
 0xa10   :  { %v19359_v33 = vpop.permute.xlu1 %19358  ;;  %20584 = vrot.lane.b32.xlu0 %v33476_v6, %s27949_s25 }
 0xa11   :  { %v19387_v8 = vsel %vm237_vm0, %v19359_v33, %v19361_v63  ;;  %v19386_v24 = vsel %vm237_vm0, %v19357_v32, %v19359_v33 }
 0xa12   :  { %22509 = vrot.lane.b32.xlu1 %v33456_v61, %s35131_s2  ;;  %19448 = vmatprep.subr.mxu0 %v19387_v8  ;;  %v33539_v20 = vpop.permute.xlu0 %20562 }
 0xa13   :  { %19449 = vmatpush1.msra.mxu0 %v19386_v24 }
 0xa14   :  { %27390 = vmatmul.mubr.msk.f32.vlgmr.msra.gmra.mxu0 %vm19415_vm9, %v33441_v39  ;;  %v33543_v41 = vpop.permute.xlu1 %20558  ;;  %23148 = vrot.lane.b32.xlu0 %v33370_v54, %s27953_s28 }
 0xa15   :  { %19624 = vmatprep.mubr.f32.mxu0 %v35307_v43 }
 0xa16   :  { %22513 = vrot.lane.b32.xlu1 %v33486_v16, %s35131_s2  ;;  %v33550_v59 = vpop.permute.xlu0 %21207 }
 0xa18   :  { %v33552_v42 = vpop.permute.xlu1 %21203  ;;  %23152 = vrot.lane.b32.xlu0 %v33395_v14, %s27953_s28 }
 0xa1a   :  { %23138 = vrot.lane.b32.xlu1 %v33344_v5, %s27953_s28  ;;  %v33558_v55 = vpop.permute.xlu0 %21852 }
 0xa1c   :  { %v33560_v62 = vpop.permute.xlu1 %21848  ;;  %23156 = vrot.lane.b32.xlu0 %v33420_v36, %s27953_s28 }
 0xa1e   :  { %23136 = vrot.lane.b32.xlu1 %v33303_v48, %s27953_s28  ;;  %v33566_v11 = vpop.permute.xlu0 %22497 }
 0xa1f   :  { %35308 = vst [vmem:[#allocation32_spill] sm:$0xff] %v33566_v11 }
 0xa20   :  { %v33568_v19 = vpop.permute.xlu1 %22493  ;;  %21229 = vrot.lane.b32.xlu0 %v33476_v6, %s27950_s3 }
 0xa21   :  { %35309 = vst [vmem:[#allocation20_spill] sm:$0xff] %v33568_v19 }
 0xa22   :  { %23144 = vrot.lane.b32.xlu1 %v33376_v22, %s27953_s28  ;;  %v19369_v4 = vpop.permute.xlu0 %19368 }
 0xa24   :  { %v19365_v30 = vpop.permute.xlu1 %19364  ;;  %23160 = vrot.lane.b32.xlu0 %v33446_v25, %s27953_s28 }
 0xa25   :  { %v19389_v40 = vsel %vm237_vm0, %v19363_v15, %v19365_v30 }
 0xa26   :  { %20582 = vrot.lane.b32.xlu1 %v33514_v1, %s27949_s25  ;;  %19519 = vmatprep.subr.mxu1 %v19389_v40  ;;  %v33579_v23 = vpop.permute.xlu0 %20568 }
 0xa27   :  { %19520 = vmatpush1.msra.mxu1 %v19388_v46 }
 0xa28   :  { %27391 = vmatmul.mubr.msk.f32.vlgmr.msra.gmra.mxu1 %vm19415_vm9, %v33441_v39  ;;  %v33584_v2 = vpop.permute.xlu1 %20564  ;;  %23785 = vrot.lane.b32.xlu0 %v33297_v47, %s27954_s29 }
 0xa29   :  { %19695 = vmatprep.mubr.f32.mxu1 %v35307_v43 }
 0xa2a   :  { %23146 = vrot.lane.b32.xlu1 %v33405_v29, %s27953_s28  ;;  %v33591_v49 = vpop.permute.xlu0 %21213 }
 0xa2c   :  { %v33593_v37 = vpop.permute.xlu1 %21209  ;;  %23787 = vrot.lane.b32.xlu0 %v33340_v3, %s27954_s29 }
 0xa2e   :  { %23150 = vrot.lane.b32.xlu1 %v33429_v9, %s27953_s28  ;;  %v33599_v12 = vpop.permute.xlu0 %21858 }
 0xa30   :  { %v33601_v18 = vpop.permute.xlu1 %21854  ;;  %21874 = vrot.lane.b32.xlu0 %v33476_v6, %s27951_s26 }
 0xa32   :  { %23154 = vrot.lane.b32.xlu1 %v33456_v61, %s27953_s28  ;;  %v19373_v31 = vpop.permute.xlu0 %19372 }
 0xa34   :  { %v33607_v7 = vpop.permute.xlu1 %22499  ;;  %23779 = vrot.lane.b32.xlu0 %v35306_v0, %s27966_s24 }
 0xa35   :  { %35310 = vst [vmem:[#allocation30_spill] sm:$0xff] %v33607_v7 }
 0xa36   :  { %21227 = vrot.lane.b32.xlu1 %v33514_v1, %s27950_s3  ;;  %v33612_v21 = vpop.permute.xlu0 %20572 }
 0xa38   :  { %v19367_v60 = vpop.permute.xlu1 %19366  ;;  %23793 = vrot.lane.b32.xlu0 %v33370_v54, %s27954_s29 }
 0xa39   :  { %v19391_v35 = vsel %vm237_vm0, %v19367_v60, %v19369_v4  ;;  %v19390_v58 = vsel %vm237_vm0, %v19365_v30, %v19367_v60 }
 0xa3a   :  { %23158 = vrot.lane.b32.xlu1 %v33486_v16, %s27953_s28  ;;  %19590 = vmatprep.subr.mxu0 %v19391_v35  ;;  %v33620_v17 = vpop.permute.xlu0 %21217 }
 0xa3b   :  { %19591 = vmatpush1.msra.mxu0 %v19390_v58 }
 0xa3c   :  { %27392 = vmatmul.mubr.msk.f32.vlgmr.msra.gmra.mxu0 %vm19415_vm9, %v33441_v39  ;;  %v33624_v57 = vpop.permute.xlu1 %20566  ;;  %23797 = vrot.lane.b32.xlu0 %v33395_v14, %s27954_s29 }
 0xa3d   :  { %19766 = vmatprep.mubr.f32.mxu0 %v35307_v43 }
 0xa3e   :  { %23783 = vrot.lane.b32.xlu1 %v33344_v5, %s27954_s29  ;;  %v33631_v63 = vpop.permute.xlu0 %21862 }
 0xa40   :  { %v33633_v32 = vpop.permute.xlu1 %21211  ;;  %22519 = vrot.lane.b32.xlu0 %v33476_v6, %s35131_s2 }
 0xa42   :  { %23781 = vrot.lane.b32.xlu1 %v33303_v48, %s27954_s29  ;;  %v19377_v56 = vpop.permute.xlu0 %19376 }
 0xa44   :  { %v33639_v28 = vpop.permute.xlu1 %21856  ;;  %23801 = vrot.lane.b32.xlu0 %v33420_v36, %s27954_s29 }
 0xa46   :  { %21872 = vrot.lane.b32.xlu1 %v33514_v1, %s27951_s26  ;;  %v33645_v0 = vpop.permute.xlu0 %20576  ;;  %s27967_s26 = smov 64  }
 0xa48   :  { %v19371_v15 = vpop.permute.xlu1 %19370  ;;  %23805 = vrot.lane.b32.xlu0 %v33446_v25, %s27954_s29 }
 0xa49   :  { %v19393_v33 = vsel %vm237_vm0, %v19371_v15, %v19373_v31  ;;  %v19392_v8 = vsel %vm237_vm0, %v19369_v4, %v19371_v15  ;;  %v33685_v15 = vld [vmem:[%s34881_s9] sm:$0xff] }
 0xa4a   :  { %23789 = vrot.lane.b32.xlu1 %v33376_v22, %s27954_s29  ;;  %19661 = vmatprep.subr.mxu1 %v19393_v33  ;;  %v33653_v24 = vpop.permute.xlu0 %21221 }
 0xa4b   :  { %19662 = vmatpush1.msra.mxu1 %v19392_v8 }
 0xa4c   :  { %27393 = vmatmul.mubr.msk.f32.vlgmr.msra.gmra.mxu1 %vm19415_vm9, %v33441_v39  ;;  %v33657_v30 = vpop.permute.xlu1 %20570  ;;  %24430 = vrot.lane.b32.xlu0 %v33297_v47, %s27955_s21 }
 0xa4d   :  { %19837 = vmatprep.mubr.f32.mxu1 %v35307_v43 }
 0xa4e   :  { %23791 = vrot.lane.b32.xlu1 %v33405_v29, %s27954_s29  ;;  %v33664_v4 = vpop.permute.xlu0 %21866 }
 0xa50   :  { %v33666_v40 = vpop.permute.xlu1 %21215  ;;  %23164 = vrot.lane.b32.xlu0 %v33476_v6, %s27953_s28 }
 0xa52   :  { %23795 = vrot.lane.b32.xlu1 %v33429_v9, %s27954_s29  ;;  %v33672_v46 = vpop.permute.xlu0 %19380 }
 0xa54   :  { %v33674_v60 = vpop.permute.xlu1 %21860  ;;  %24432 = vrot.lane.b32.xlu0 %v33340_v3, %s27955_s21 }
 0xa56   :  { %22517 = vrot.lane.b32.xlu1 %v33514_v1, %s35131_s2  ;;  %v33680_v35 = vpop.permute.xlu0 %20580 }
 0xa58   :  { %v19375_v58 = vpop.permute.xlu1 %19374  ;;  %24424 = vrot.lane.b32.xlu0 %v33685_v15, %s27967_s26 }
 0xa59   :  { %v19395_v33 = vsel %vm237_vm0, %v19375_v58, %v19377_v56  ;;  %v19394_v8 = vsel %vm237_vm0, %v19373_v31, %v19375_v58 }
 0xa5a   :  { %23799 = vrot.lane.b32.xlu1 %v33456_v61, %s27954_s29  ;;  %19732 = vmatprep.subr.mxu0 %v19395_v33  ;;  %v33693_v44 = vpop.permute.xlu0 %21225 }
 0xa5b   :  { %19733 = vmatpush1.msra.mxu0 %v19394_v8 }
 0xa5c   :  { %27394 = vmatmul.mubr.msk.f32.vlgmr.msra.gmra.mxu0 %vm19415_vm9, %v33441_v39  ;;  %v33697_v19 = vpop.permute.xlu1 %20574  ;;  %24438 = vrot.lane.b32.xlu0 %v33370_v54, %s27955_s21 }
 0xa5d   :  { %19908 = vmatprep.mubr.f32.mxu0 %v35307_v43 }
 0xa5e   :  { %23803 = vrot.lane.b32.xlu1 %v33486_v16, %s27954_s29  ;;  %v33704_v31 = vpop.permute.xlu0 %21870 }
 0xa60   :  { %v33706_v58 = vpop.permute.xlu1 %21219  ;;  %23809 = vrot.lane.b32.xlu0 %v33476_v6, %s27954_s29 }
 0xa62   :  { %24428 = vrot.lane.b32.xlu1 %v33344_v5, %s27955_s21  ;;  %v19385_v33 = vpop.permute.xlu0 %19384 }
 0xa64   :  { %v33712_v8 = vpop.permute.xlu1 %21864  ;;  %24442 = vrot.lane.b32.xlu0 %v33395_v14, %s27955_s21 }
 0xa65   :  { %35311 = vst [vmem:[#allocation13_spill] sm:$0xff] %v33712_v8 }
 0xa66   :  { %23162 = vrot.lane.b32.xlu1 %v33514_v1, %s27953_s28  ;;  %v33718_v50 = vpop.permute.xlu0 %22503  ;;  %s27969_s28 = smov [#allocation2]  }
 0xa67   :  { %35312 = vst [vmem:[#allocation25_spill] sm:$0xff] %v33718_v50 }
 0xa68   :  { %v19379_v51 = vpop.permute.xlu1 %19378  ;;  %24446 = vrot.lane.b32.xlu0 %v33420_v36, %s27955_s21 }
 0xa69   :  { %v19397_v11 = vsel %vm237_vm0, %v19379_v51, %v33672_v46  ;;  %v19396_v7 = vsel %vm237_vm0, %v19377_v56, %v19379_v51 }
 0xa6a   :  { %24426 = vrot.lane.b32.xlu1 %v33303_v48, %s27955_s21  ;;  %19803 = vmatprep.subr.mxu1 %v19397_v11  ;;  %v33727_v8 = vpop.permute.xlu0 %22507 }
 0xa6b   :  { %19804 = vmatpush1.msra.mxu1 %v19396_v7 }
 0xa6c   :  { %27395 = vmatmul.mubr.msk.f32.vlgmr.msra.gmra.mxu1 %vm19415_vm9, %v33441_v39  ;;  %27622 = vmatprep.subr.mxu1 %v35307_v43  ;;  %v33732_v50 = vpop.permute.xlu1 %20578 }
 0xa6d   :  { %24450 = vrot.lane.b32.xlu0 %v33446_v25, %s27955_s21  ;;  %27623 = vmatpush3.msra.mxu1 %v19385_v33 }
 0xa6e   :  { %24434 = vrot.lane.b32.xlu1 %v33376_v22, %s27955_s21  ;;  %20088 = vmatprep.subr.mxu1 %v33340_v3  ;;  %v33739_v51 = vpop.permute.xlu0 %22511 }
 0xa6f   :  { %35313 = vst [vmem:[#allocation9_spill] sm:$0xff] %v33739_v51  ;;  %27624 = vmatprep.mubr.msk.f32.mxu1 %vm27963_vm12, %v35307_v43 }
 0xa70   :  { %27625 = vmatmul.mubr.msk.f32.vlgmr.msra.gmra.mxu1 %vm19415_vm9, %v33441_v39  ;;  %v33745_v11 = vpop.permute.xlu1 %21223 }
 0xa71   :  { %20089 = vmatpush1.msra.mxu1 %v33297_v47  ;;  %24454 = vrot.lane.b32.xlu0 %v33476_v6, %s27955_s21 }
 0xa72   :  { %20230 = vmatprep.subr.mxu1 %v33429_v9  ;;  %24436 = vrot.lane.b32.xlu1 %v33405_v29, %s27955_s21  ;;  %v33753_v3 = vpop.permute.xlu0 %22515 }
 0xa73   :  { %35314 = vst [vmem:[#allocation23_spill] sm:$0xff] %v33753_v3  ;;  %20122 = vmatprep.mubr.f32.mxu1 %v35307_v43 }
 0xa74   :  { %27399 = vmatmul.mubr.msk.f32.vlgmr.msra.gmra.mxu1 %vm19415_vm9, %v33685_v15  ;;  %v33758_v7 = vpop.permute.xlu1 %21868 }
 0xa75   :  { %20231 = vmatpush1.msra.mxu1 %v33370_v54  ;;  %20264 = vmatprep.mubr.f32.mxu1 %v35307_v43 }
 0xa76   :  { %20372 = vmatprep.subr.mxu1 %v33486_v16  ;;  %23807 = vrot.lane.b32.xlu1 %v33514_v1, %s27954_s29  ;;  %v33765_v47 = vpop.permute.xlu0 %23140 }
 0xa78   :  { %27401 = vmatmul.mubr.msk.f32.vlgmr.msra.gmra.mxu1 %vm19415_vm9, %v33685_v15  ;;  %v19383_v56 = vpop.permute.xlu1 %19382 }
 0xa79   :  { %20373 = vmatpush1.msra.mxu1 %v33420_v36  ;;  %v19399_v51 = vsel %vm237_vm0, %v19383_v56, %v19385_v33  ;;  %v19398_v54 = vsel %vm237_vm0, %v33672_v46, %v19383_v56  ;;  %20406 = vmatprep.mubr.f32.mxu1 %v35307_v43 }
 0xa7a   :  { %24440 = vrot.lane.b32.xlu1 %v33429_v9, %s27955_s21  ;;  %19874 = vmatprep.subr.mxu0 %v19399_v51  ;;  %v33776_v3 = vpop.permute.xlu0 %23142  ;;  %v20589_v9 = vsel %vm353_vm1, %v33539_v20, %v33584_v2  ;;  %v20587_v51 = vsel %vm353_vm1, %v33543_v41, %v33500_v10 }
 0xa7b   :  { %19875 = vmatpush1.msra.mxu0 %v19398_v54  ;;  %27627 = vmatprep.subr.mxu1 %v35307_v43  ;;  %v20591_v54 = vsel %vm353_vm1, %v33624_v57, %v33579_v23 }
 0xa7c   :  { %27396 = vmatmul.mubr.msk.f32.vlgmr.msra.gmra.mxu0 %vm19415_vm9, %v33441_v39  ;;  %20017 = vmatprep.subr.mxu0 %v33344_v5  ;;  %v33782_v36 = vpop.permute.xlu1 %22501  ;;  %v20588_v5 = vsel %vm353_vm1, %v33500_v10, %v33539_v20  ;;  %v20597_v20 = vsel %vm353_vm1, %v33732_v50, %v33680_v35 }
 0xa7d   :  { %27403 = vmatmul.mubr.msk.f32.vlgmr.msra.gmra.mxu1 %vm19415_vm9, %v33685_v15  ;;  %20018 = vmatpush1.msra.mxu0 %v33303_v48 }
 0xa7e   :  { %27628 = vmatpush3.msra.mxu1 %v33476_v6  ;;  %24444 = vrot.lane.b32.xlu1 %v33456_v61, %s27955_s21  ;;  %v33793_v46 = vpop.permute.xlu0 %23134 }
 0xa7f   :  { %20718 = vmatprep.subr.mxu1 %v20589_v9  ;;  %20159 = vmatprep.subr.mxu0 %v33405_v29  ;;  %v20593_v29 = vsel %vm353_vm1, %v33657_v30, %v33612_v21 }
 0xa80   :  { %20051 = vmatprep.mubr.f32.mxu0 %v35307_v43  ;;  %27629 = vmatprep.mubr.msk.f32.mxu1 %vm27963_vm12, %v35307_v43  ;;  %v33799_v48 = vpop.permute.xlu1 %22505 }
 0xa81   :  { %27398 = vmatmul.mubr.msk.f32.vlgmr.msra.gmra.mxu0 %vm19415_vm9, %v33685_v15  ;;  %27630 = vmatmul.mubr.msk.f32.vlgmr.msra.gmra.mxu1 %vm19415_vm9, %v33685_v15 }
 0xa82   :  { %20160 = vmatpush1.msra.mxu0 %v33376_v22  ;;  %20719 = vmatpush1.msra.mxu1 %v20588_v5  ;;  %v33812_v39 = vpop.permute.xlu0 %20584  ;;  %v20595_v5 = vsel %vm353_vm1, %v33697_v19, %v33645_v0 }
 0xa83   :  { %20301 = vmatprep.subr.mxu0 %v33456_v61  ;;  %20860 = vmatprep.subr.mxu1 %v20593_v29  ;;  %v20592_v61 = vsel %vm353_vm1, %v33579_v23, %v33657_v30  ;;  %v19337_v30 = vld [vmem:[%s34882_s10] sm:$0xff]  ;;  %v21233_v23 = vsel %vm469_vm2, %v33508_v38, %v33550_v59  ;;  %v21237_v29 = vsel %vm469_vm2, %v33591_v49, %v33666_v40 }
 0xa84   :  { %24448 = vrot.lane.b32.xlu1 %v33486_v16, %s27955_s21  ;;  %20193 = vmatprep.mubr.f32.mxu0 %v35307_v43  ;;  %v33818_v6 = vpop.permute.xlu1 %22509 }
 0xa85   :  { %20752 = vmatprep.mubr.f32.mxu1 %v35307_v43  ;;  %27400 = vmatmul.mubr.msk.f32.vlgmr.msra.gmra.mxu0 %vm19415_vm9, %v33685_v15  ;;  %v33826_v22 = vsel %vm701_vm4, %v33727_v8, %v33818_v6 }
 0xa86   :  { %20302 = vmatpush1.msra.mxu0 %v33395_v14  ;;  %27407 = vmatmul.mubr.msk.f32.vlgmr.msra.gmra.mxu1 %vm19415_vm9, %v33452_v52  ;;  %v33834_v16 = vpop.permute.xlu0 %23148 }
 0xa87   :  { %20861 = vmatpush1.msra.mxu1 %v20592_v61  ;;  %20443 = vmatprep.subr.mxu0 %v33514_v1  ;;  %v21242_v61 = vsel %vm469_vm2, %v33745_v11, %v33693_v44 }
 0xa88   :  { %21002 = vmatprep.subr.mxu1 %v20597_v20  ;;  %24452 = vrot.lane.b32.xlu1 %v33514_v1, %s27955_s21  ;;  %v33842_v14 = vpop.permute.xlu1 %22513  ;;  %v20596_v1 = vsel %vm353_vm1, %v33645_v0, %v33732_v50 }
 0xa89   :  { %20335 = vmatprep.mubr.f32.mxu0 %v35307_v43  ;;  %20894 = vmatprep.mubr.f32.mxu1 %v35307_v43 }
 0xa8a   :  { %27402 = vmatmul.mubr.msk.f32.vlgmr.msra.gmra.mxu0 %vm19415_vm9, %v33685_v15  ;;  %27409 = vmatmul.mubr.msk.f32.vlgmr.msra.gmra.mxu1 %vm19415_vm9, %v33452_v52  ;;  %v33856_v33 = vpop.permute.xlu0 %23152 }
 0xa8b   :  { %20444 = vmatpush1.msra.mxu0 %v33446_v25  ;;  %21003 = vmatpush1.msra.mxu1 %v20596_v1  ;;  %v20586_v25 = vsel %vm353_vm1, %v33502_v34, %v33543_v41  ;;  %v20590_v34 = vsel %vm353_vm1, %v33584_v2, %v33624_v57  ;;  %v21238_v2 = vsel %vm469_vm2, %v33666_v40, %v33620_v17 }
 0xa8c   :  { %20647 = vmatprep.subr.mxu0 %v20587_v51  ;;  %25071 = vperm.xlu1 %27848, %v19337_v30   ;;  %v33862_v56 = vpop.permute.xlu1 %23138  ;;  %v21241_v30 = vsel %vm469_vm2, %v33653_v24, %v33745_v11  ;;  %v21231_v11 = vsel %vm469_vm2, %v33510_v53, %v33552_v42  ;;  %v21236_v51 = vsel %vm469_vm2, %v33633_v32, %v33591_v49 }
 0xa8d   :  { %20477 = vmatprep.mubr.f32.mxu0 %v35307_v43  ;;  %21036 = vmatprep.mubr.f32.mxu1 %v35307_v43  ;;  %v33869_v50 = vsel %vm817_vm5, %v33862_v56, %v33765_v47  ;;  %v21235_v53 = vsel %vm469_vm2, %v33593_v37, %v33633_v32  ;;  %v21878_v49 = vsel %vm585_vm3, %v33518_v27, %v33558_v55 }
 0xa8e   :  { %27632 = vmatprep.subr.mxu1 %v35307_v43  ;;  %27404 = vmatmul.mubr.msk.f32.vlgmr.msra.gmra.mxu0 %vm19415_vm9, %v33685_v15  ;;  %v33877_v10 = vpop.permute.xlu0 %23156  ;;  %v21234_v15 = vsel %vm469_vm2, %v33550_v59, %v33593_v37  ;;  %v20594_v59 = vsel %vm353_vm1, %v33612_v21, %v33697_v19  ;;  %v21883_v37 = vsel %vm585_vm3, %v33674_v60, %v33631_v63 }
 0xa8f   :  { %20648 = vmatpush1.msra.mxu0 %v20586_v25  ;;  %27411 = vmatmul.mubr.msk.f32.vlgmr.msra.gmra.mxu1 %vm19415_vm9, %v33452_v52  ;;  %v21240_v25 = vsel %vm469_vm2, %v33706_v58, %v33653_v24 }
 0xa90   :  { %27633 = vmatpush3.msra.mxu1 %v33812_v39  ;;  %20789 = vmatprep.subr.mxu0 %v20591_v54  ;;  %v33888_v9 = vpop.permute.xlu1 %23136  ;;  %v21882_v54 = vsel %vm585_vm3, %v33599_v12, %v33674_v60 }
 0xa91   :  { %21363 = vmatprep.subr.mxu1 %v21234_v15  ;;  %20681 = vmatprep.mubr.f32.mxu0 %v35307_v43  ;;  %v21887_v15 = vsel %vm585_vm3, %v33758_v7, %v33704_v31 }
 0xa92   :  { %27634 = vmatprep.mubr.msk.f32.mxu1 %vm27963_vm12, %v35307_v43  ;;  %27406 = vmatmul.mubr.msk.f32.vlgmr.msra.gmra.mxu0 %vm19415_vm9, %v33452_v52  ;;  %v33898_v41 = vpop.permute.xlu0 %21229 }
 0xa93   :  { %20790 = vmatpush1.msra.mxu0 %v20590_v34  ;;  %27635 = vmatmul.mubr.msk.f32.vlgmr.msra.gmra.mxu1 %vm19415_vm9, %v33452_v52 }
 0xa94   :  { %21364 = vmatpush1.msra.mxu1 %v21233_v23  ;;  %20931 = vmatprep.subr.mxu0 %v20595_v5  ;;  %v33911_v57 = vpop.permute.xlu1 %23144  ;;  %v21886_v23 = vsel %vm585_vm3, %v33664_v4, %v33758_v7  ;;  %v21876_v7 = vsel %vm585_vm3, %v33520_v45, %v33560_v62  ;;  %v21880_v45 = vsel %vm585_vm3, %v33601_v18, %v33639_v28 }
 0xa95   :  { %21505 = vmatprep.subr.mxu1 %v21238_v2  ;;  %20823 = vmatprep.mubr.f32.mxu0 %v35307_v43  ;;  %v21881_v2 = vsel %vm585_vm3, %v33639_v28, %v33599_v12  ;;  %v35317_v12 = vld [vmem:[#allocation21_spill] sm:$0xff] }
 0xa96   :  { %21397 = vmatprep.mubr.f32.mxu1 %v35307_v43  ;;  %27408 = vmatmul.mubr.msk.f32.vlgmr.msra.gmra.mxu0 %vm19415_vm9, %v33452_v52  ;;  %v33920_v0 = vpop.permute.xlu0 %23160 }
 0xa97   :  { %20932 = vmatpush1.msra.mxu0 %v20594_v59  ;;  %27415 = vmatmul.mubr.msk.f32.vlgmr.msra.gmra.mxu1 %vm19415_vm9, %v33464_v26  ;;  %v35316_v59 = vld [vmem:[#allocation32_spill] sm:$0xff] }
 0xa98   :  { %21506 = vmatpush1.msra.mxu1 %v21237_v29  ;;  %20965 = vmatprep.mubr.f32.mxu0 %v35307_v43  ;;  %v20583_v20 = vpop.permute.xlu1 %20582 }
 0xa99   :  { %21647 = vmatprep.subr.mxu1 %v21242_v61  ;;  %21539 = vmatprep.mubr.f32.mxu1 %v35307_v43  ;;  %v20598_v19 = vsel %vm353_vm1, %v33680_v35, %v20583_v20  ;;  %v20599_v21 = vsel %vm353_vm1, %v20583_v20, %v33812_v39  ;;  %v21232_v39 = vsel %vm469_vm2, %v33552_v42, %v33508_v38  ;;  %v35318_v20 = vld [vmem:[#allocation13_spill] sm:$0xff] }
 0xa9a   :  { %27410 = vmatmul.mubr.msk.f32.vlgmr.msra.gmra.mxu0 %vm19415_vm9, %v33452_v52  ;;  %21073 = vmatprep.subr.mxu0 %v20599_v21  ;;  %v33938_v40 = vpop.permute.xlu0 %23785  ;;  %v22523_v61 = vsel %vm701_vm4, %v35317_v12, %v35316_v59 }
 0xa9b   :  { %27417 = vmatmul.mubr.msk.f32.vlgmr.msra.gmra.mxu1 %vm19415_vm9, %v33464_v26  ;;  %21074 = vmatpush1.msra.mxu0 %v20598_v19  ;;  %v21885_v19 = vsel %vm585_vm3, %v35318_v20, %v33664_v4  ;;  %v21884_v4 = vsel %vm585_vm3, %v33631_v63, %v35318_v20 }
 0xa9c   :  { %21648 = vmatpush1.msra.mxu1 %v21241_v30  ;;  %21107 = vmatprep.mubr.f32.mxu0 %v35307_v43  ;;  %v33946_v35 = vpop.permute.xlu1 %23146  ;;  %v35319_v30 = vld [vmem:[#allocation25_spill] sm:$0xff] }
 0xa9d   :  { %21681 = vmatprep.mubr.f32.mxu1 %v35307_v43  ;;  %27637 = vmatprep.subr.mxu1 %v35307_v43 }
 0xa9e   :  { %27412 = vmatmul.mubr.msk.f32.vlgmr.msra.gmra.mxu0 %vm19415_vm9, %v33452_v52  ;;  %21292 = vmatprep.subr.mxu0 %v21232_v39  ;;  %v33958_v1 = vpop.permute.xlu0 %23787  ;;  %v21879_v52 = vsel %vm585_vm3, %v33558_v55, %v33601_v18  ;;  %v21239_v55 = vsel %vm469_vm2, %v33620_v17, %v33706_v58  ;;  %v22528_v18 = vsel %vm701_vm4, %v33799_v48, %v33727_v8  ;;  %v35320_v39 = vld [vmem:[#allocation11_spill] sm:$0xff] }
 0xa9f   :  { %27419 = vmatmul.mubr.msk.f32.vlgmr.msra.gmra.mxu1 %vm19415_vm9, %v33464_v26  ;;  %21293 = vmatpush1.msra.mxu0 %v21231_v11  ;;  %v22527_v8 = vsel %vm701_vm4, %v35319_v30, %v33799_v48  ;;  %v35321_v11 = vld [vmem:[#allocation23_spill] sm:$0xff] }
 0xaa0   :  { %27638 = vmatpush3.msra.mxu1 %v33898_v41  ;;  %21434 = vmatprep.subr.mxu0 %v21236_v51  ;;  %v33969_v38 = vpop.permute.xlu1 %23150  ;;  %v22532_v51 = vsel %vm701_vm4, %v33842_v14, %v35321_v11 }
 0xaa1   :  { %22008 = vmatprep.subr.mxu1 %v21879_v52  ;;  %21326 = vmatprep.mubr.f32.mxu0 %v35307_v43 }
 0xaa2   :  { %27639 = vmatprep.mubr.msk.f32.mxu1 %vm27963_vm12, %v35307_v43  ;;  %27414 = vmatmul.mubr.msk.f32.vlgmr.msra.gmra.mxu0 %vm19415_vm9, %v33464_v26  ;;  %v33979_v42 = vpop.permute.xlu0 %21874 }
 0xaa3   :  { %21435 = vmatpush1.msra.mxu0 %v21235_v53  ;;  %27640 = vmatmul.mubr.msk.f32.vlgmr.msra.gmra.mxu1 %vm19415_vm9, %v33464_v26  ;;  %v35322_v53 = vld [vmem:[#allocation9_spill] sm:$0xff] }
 0xaa4   :  { %22009 = vmatpush1.msra.mxu1 %v21878_v49  ;;  %21576 = vmatprep.subr.mxu0 %v21240_v25  ;;  %v33992_v32 = vpop.permute.xlu1 %23154  ;;  %v22531_v49 = vsel %vm701_vm4, %v35322_v53, %v33842_v14  ;;  %v35324_v14 = vld [vmem:[#allocation44_spill] sm:$0xff] }
 0xaa5   :  { %22150 = vmatprep.subr.mxu1 %v21883_v37  ;;  %21468 = vmatprep.mubr.f32.mxu0 %v35307_v43 }
 0xaa6   :  { %22042 = vmatprep.mubr.f32.mxu1 %v35307_v43  ;;  %27416 = vmatmul.mubr.msk.f32.vlgmr.msra.gmra.mxu0 %vm19415_vm9, %v33464_v26  ;;  %v34001_v24 = vpop.permute.xlu0 %23779 }
 0xaa7   :  { %21577 = vmatpush1.msra.mxu0 %v21239_v55  ;;  %27423 = vmatmul.mubr.msk.f32.vlgmr.msra.gmra.mxu1 %vm19415_vm9, %v33474_v13 }
 0xaa8   :  { %22151 = vmatpush1.msra.mxu1 %v21882_v54  ;;  %21610 = vmatprep.mubr.f32.mxu0 %v35307_v43  ;;  %v21228_v34 = vpop.permute.xlu1 %21227  ;;  %v22526_v54 = vsel %vm701_vm4, %v33782_v36, %v35319_v30 }
 0xaa9   :  { %22292 = vmatprep.subr.mxu1 %v21887_v15  ;;  %22184 = vmatprep.mubr.f32.mxu1 %v35307_v43  ;;  %v21243_v17 = vsel %vm469_vm2, %v33693_v44, %v21228_v34  ;;  %v21244_v58 = vsel %vm469_vm2, %v21228_v34, %v33898_v41  ;;  %v21877_v41 = vsel %vm585_vm3, %v33560_v62, %v33518_v27  ;;  %v35315_v27 = vld [vmem:[#allocation30_spill] sm:$0xff] }
 0xaaa   :  { %27418 = vmatmul.mubr.msk.f32.vlgmr.msra.gmra.mxu0 %vm19415_vm9, %v33464_v26  ;;  %21718 = vmatprep.subr.mxu0 %v21244_v58  ;;  %v34019_v60 = vpop.permute.xlu0 %23793  ;;  %v23169_v15 = vsel %vm817_vm5, %v33776_v3, %v33911_v57  ;;  %v23168_v58 = vsel %vm817_vm5, %v33765_v47, %v33776_v3  ;;  %v23172_v3 = vsel %vm817_vm5, %v33834_v16, %v33969_v38 }
 0xaab   :  { %27425 = vmatmul.mubr.msk.f32.vlgmr.msra.gmra.mxu1 %vm19415_vm9, %v33474_v13  ;;  %21719 = vmatpush1.msra.mxu0 %v21243_v17  ;;  %v22525_v17 = vsel %vm701_vm4, %v35315_v27, %v33782_v36 }
 0xaac   :  { %22293 = vmatpush1.msra.mxu1 %v21886_v23  ;;  %21752 = vmatprep.mubr.f32.mxu0 %v35307_v43  ;;  %v34027_v44 = vpop.permute.xlu1 %23158  ;;  %v22530_v23 = vsel %vm701_vm4, %v33818_v6, %v35322_v53 }
 0xaad   :  { %22326 = vmatprep.mubr.f32.mxu1 %v35307_v43  ;;  %27642 = vmatprep.subr.mxu1 %v35307_v43  ;;  %v23177_v36 = vsel %vm817_vm5, %v34027_v44, %v33920_v0 }
 0xaae   :  { %27420 = vmatmul.mubr.msk.f32.vlgmr.msra.gmra.mxu0 %vm19415_vm9, %v33464_v26  ;;  %21937 = vmatprep.subr.mxu0 %v21877_v41  ;;  %v34039_v5 = vpop.permute.xlu0 %23797  ;;  %v22524_v26 = vsel %vm701_vm4, %v35316_v59, %v35315_v27  ;;  %v23173_v41 = vsel %vm817_vm5, %v33969_v38, %v33856_v33 }
 0xaaf   :  { %27427 = vmatmul.mubr.msk.f32.vlgmr.msra.gmra.mxu1 %vm19415_vm9, %v33474_v13  ;;  %21938 = vmatpush1.msra.mxu0 %v21876_v7 }
 0xab0   :  { %27643 = vmatpush3.msra.mxu1 %v33979_v42  ;;  %22079 = vmatprep.subr.mxu0 %v21881_v2  ;;  %v34050_v29 = vpop.permute.xlu1 %23783  ;;  %v23176_v2 = vsel %vm817_vm5, %v33877_v10, %v34027_v44  ;;  %v23171_v44 = vsel %vm817_vm5, %v33946_v35, %v33834_v16  ;;  %v23813_v16 = vsel %vm933_vm6, %v33938_v40, %v33958_v1 }
 0xab1   :  { %22653 = vmatprep.subr.mxu1 %v22524_v26  ;;  %21971 = vmatprep.mubr.f32.mxu0 %v35307_v43  ;;  %v23166_v26 = vsel %vm817_vm5, %v33888_v9, %v33862_v56 }
 0xab2   :  { %27644 = vmatprep.mubr.msk.f32.mxu1 %vm27963_vm12, %v35307_v43  ;;  %27422 = vmatmul.mubr.msk.f32.vlgmr.msra.gmra.mxu0 %vm19415_vm9, %v33474_v13  ;;  %v34060_v62 = vpop.permute.xlu0 %22519 }
 0xab3   :  { %22080 = vmatpush1.msra.mxu0 %v21880_v45  ;;  %27645 = vmatmul.mubr.msk.f32.vlgmr.msra.gmra.mxu1 %vm19415_vm9, %v33474_v13 }
 0xab4   :  { %22654 = vmatpush1.msra.mxu1 %v22523_v61  ;;  %22221 = vmatprep.subr.mxu0 %v21885_v19  ;;  %v34073_v28 = vpop.permute.xlu1 %23781 }
 0xab5   :  { %22795 = vmatprep.subr.mxu1 %v22528_v18  ;;  %22113 = vmatprep.mubr.f32.mxu0 %v35307_v43 }
 0xab6   :  { %22687 = vmatprep.mubr.f32.mxu1 %v35307_v43  ;;  %27424 = vmatmul.mubr.msk.f32.vlgmr.msra.gmra.mxu0 %vm19415_vm9, %v33474_v13  ;;  %v34082_v21 = vpop.permute.xlu0 %23801 }
 0xab7   :  { %22222 = vmatpush1.msra.mxu0 %v21884_v4  ;;  %27431 = vmatmul.mubr.msk.f32.vlgmr.msra.gmra.mxu1 %vm19415_vm9, %v35320_v39  ;;  %v23811_v4 = vsel %vm933_vm6, %v34073_v28, %v34050_v29 }
 0xab8   :  { %22796 = vmatpush1.msra.mxu1 %v22527_v8  ;;  %22255 = vmatprep.mubr.f32.mxu0 %v35307_v43  ;;  %v21873_v52 = vpop.permute.xlu1 %21872 }
 0xab9   :  { %22937 = vmatprep.subr.mxu1 %v22532_v51  ;;  %22829 = vmatprep.mubr.f32.mxu1 %v35307_v43  ;;  %v21888_v63 = vsel %vm585_vm3, %v33704_v31, %v21873_v52  ;;  %v21889_v48 = vsel %vm585_vm3, %v21873_v52, %v33979_v42  ;;  %v35323_v42 = vld [vmem:[#allocation20_spill] sm:$0xff] }
 0xaba   :  { %27426 = vmatmul.mubr.msk.f32.vlgmr.msra.gmra.mxu0 %vm19415_vm9, %v33474_v13  ;;  %22363 = vmatprep.subr.mxu0 %v21889_v48  ;;  %v34105_v25 = vpop.permute.xlu0 %23805  ;;  %v22522_v37 = vsel %vm701_vm4, %v35323_v42, %v35317_v12  ;;  %v22521_v55 = vsel %vm701_vm4, %v35324_v14, %v35323_v42 }
 0xabb   :  { %27433 = vmatmul.mubr.msk.f32.vlgmr.msra.gmra.mxu1 %vm19415_vm9, %v35320_v39  ;;  %22364 = vmatpush1.msra.mxu0 %v21888_v63 }
 0xabc   :  { %22938 = vmatpush1.msra.mxu1 %v22531_v49  ;;  %22397 = vmatprep.mubr.f32.mxu0 %v35307_v43  ;;  %v34108_v31 = vpop.permute.xlu1 %23789 }
 0xabd   :  { %22971 = vmatprep.mubr.f32.mxu1 %v35307_v43  ;;  %27647 = vmatprep.subr.mxu1 %v35307_v43  ;;  %v23814_v45 = vsel %vm933_vm6, %v33958_v1, %v34108_v31  ;;  %v23174_v1 = vsel %vm817_vm5, %v33856_v33, %v33992_v32 }
 0xabe   :  { %27428 = vmatmul.mubr.msk.f32.vlgmr.msra.gmra.mxu0 %vm19415_vm9, %v33474_v13  ;;  %22582 = vmatprep.subr.mxu0 %v22522_v37  ;;  %v34131_v34 = vpop.permute.xlu0 %24430 }
 0xabf   :  { %27435 = vmatmul.mubr.msk.f32.vlgmr.msra.gmra.mxu1 %vm19415_vm9, %v35320_v39  ;;  %22583 = vmatpush1.msra.mxu0 %v22521_v55 }
 0xac0   :  { %27648 = vmatpush3.msra.mxu1 %v34060_v62  ;;  %22724 = vmatprep.subr.mxu0 %v22526_v54  ;;  %v34129_v13 = vpop.permute.xlu1 %23791 }
 0xac1   :  { %23298 = vmatprep.subr.mxu1 %v23169_v15  ;;  %22616 = vmatprep.mubr.f32.mxu0 %v35307_v43  ;;  %v23816_v8 = vsel %vm933_vm6, %v34129_v13, %v34019_v60 }
 0xac2   :  { %27649 = vmatprep.mubr.msk.f32.mxu1 %vm27963_vm12, %v35307_v43  ;;  %27430 = vmatmul.mubr.msk.f32.vlgmr.msra.gmra.mxu0 %vm19415_vm9, %v35320_v39  ;;  %v34159_v47 = vpop.permute.xlu0 %23164 }
 0xac3   :  { %22725 = vmatpush1.msra.mxu0 %v22525_v17  ;;  %27650 = vmatmul.mubr.msk.f32.vlgmr.msra.gmra.mxu1 %vm19415_vm9, %v35320_v39 }
 0xac4   :  { %23299 = vmatpush1.msra.mxu1 %v23168_v58  ;;  %22866 = vmatprep.subr.mxu0 %v22530_v23  ;;  %v23796_v7 = vpop.permute.xlu1 %23795 }
 0xac5   :  { %23440 = vmatprep.subr.mxu1 %v23173_v41  ;;  %22758 = vmatprep.mubr.f32.mxu0 %v35307_v43 }
 0xac6   :  { %23332 = vmatprep.mubr.f32.mxu1 %v35307_v43  ;;  %27432 = vmatmul.mubr.msk.f32.vlgmr.msra.gmra.mxu0 %vm19415_vm9, %v35320_v39  ;;  %v34183_v59 = vpop.permute.xlu0 %24432 }
 0xac7   :  { %22867 = vmatpush1.msra.mxu0 %v33826_v22  ;;  %27439 = vmatmul.mubr.msk.f32.vlgmr.msra.gmra.mxu1 %vm19415_vm9, %v33793_v46  ;;  %v24458_v28 = vsel %vm1049_vm7, %v34131_v34, %v34183_v59 }
 0xac8   :  { %23441 = vmatpush1.msra.mxu1 %v23172_v3  ;;  %22900 = vmatprep.mubr.f32.mxu0 %v35307_v43  ;;  %v22518_v6 = vpop.permute.xlu1 %22517 }
 0xac9   :  { %23582 = vmatprep.subr.mxu1 %v23177_v36  ;;  %23474 = vmatprep.mubr.f32.mxu1 %v35307_v43  ;;  %v22533_v38 = vsel %vm701_vm4, %v35321_v11, %v22518_v6  ;;  %v22534_v22 = vsel %vm701_vm4, %v22518_v6, %v34060_v62 }
 0xaca   :  { %27434 = vmatmul.mubr.msk.f32.vlgmr.msra.gmra.mxu0 %vm19415_vm9, %v35320_v39  ;;  %23008 = vmatprep.subr.mxu0 %v22534_v22  ;;  %v34213_v9 = vpop.permute.xlu0 %24424 }
 0xacb   :  { %27441 = vmatmul.mubr.msk.f32.vlgmr.msra.gmra.mxu1 %vm19415_vm9, %v33793_v46  ;;  %23009 = vmatpush1.msra.mxu0 %v22533_v38 }
 0xacc   :  { %23583 = vmatpush1.msra.mxu1 %v23176_v2  ;;  %23042 = vmatprep.mubr.f32.mxu0 %v35307_v43  ;;  %v34181_v27 = vpop.permute.xlu1 %23799 }
 0xacd   :  { %23616 = vmatprep.mubr.f32.mxu1 %v35307_v43  ;;  %27652 = vmatprep.subr.mxu1 %v35307_v43  ;;  %v23819_v11 = vsel %vm933_vm6, %v34039_v5, %v34181_v27 }
 0xace   :  { %27436 = vmatmul.mubr.msk.f32.vlgmr.msra.gmra.mxu0 %vm19415_vm9, %v35320_v39  ;;  %23227 = vmatprep.subr.mxu0 %v33869_v50  ;;  %v23170_v50 = vsel %vm817_vm5, %v33911_v57, %v33946_v35  ;;  %v23175_v57 = vsel %vm817_vm5, %v33992_v32, %v33877_v10  ;;  %v23818_v35 = vsel %vm933_vm6, %v23796_v7, %v34039_v5  ;;  %v34238_v33 = vpop.permute.xlu0 %24438 }
 0xacf   :  { %27443 = vmatmul.mubr.msk.f32.vlgmr.msra.gmra.mxu1 %vm19415_vm9, %v33793_v46  ;;  %23228 = vmatpush1.msra.mxu0 %v23166_v26  ;;  %v23817_v10 = vsel %vm933_vm6, %v34019_v60, %v23796_v7  ;;  %v23820_v60 = vsel %vm933_vm6, %v34181_v27, %v34082_v21 }
 0xad0   :  { %27653 = vmatpush3.msra.mxu1 %v34159_v47  ;;  %23369 = vmatprep.subr.mxu0 %v23171_v44  ;;  %v23804_v56 = vpop.permute.xlu1 %23803 }
 0xad1   :  { %23943 = vmatprep.subr.mxu1 %v23814_v45  ;;  %23261 = vmatprep.mubr.f32.mxu0 %v35307_v43  ;;  %v23822_v12 = vsel %vm933_vm6, %v23804_v56, %v34105_v25  ;;  %v23821_v19 = vsel %vm933_vm6, %v34082_v21, %v23804_v56 }
 0xad2   :  { %27654 = vmatprep.mubr.msk.f32.mxu1 %vm27963_vm12, %v35307_v43  ;;  %27438 = vmatmul.mubr.msk.f32.vlgmr.msra.gmra.mxu0 %vm19415_vm9, %v33793_v46  ;;  %v23810_v30 = vpop.permute.xlu0 %23809 }
 0xad3   :  { %23370 = vmatpush1.msra.mxu0 %v23170_v50  ;;  %27655 = vmatmul.mubr.msk.f32.vlgmr.msra.gmra.mxu1 %vm19415_vm9, %v33793_v46 }
 0xad4   :  { %23944 = vmatpush1.msra.mxu1 %v23813_v16  ;;  %23511 = vmatprep.subr.mxu0 %v23175_v57  ;;  %v34222_v62 = vpop.permute.xlu1 %24428  ;;  %v19484_v36 = vpop.f32.mrf.mxu0 }
 0xad5   :  { %24085 = vmatprep.subr.mxu1 %v23818_v35  ;;  %23403 = vmatprep.mubr.f32.mxu0 %v35307_v43  ;;  %v24457_v5 = vsel %vm1049_vm7, %v34222_v62, %v34131_v34 }
 0xad6   :  { %23977 = vmatprep.mubr.f32.mxu1 %v35307_v43  ;;  %27440 = vmatmul.mubr.msk.f32.vlgmr.msra.gmra.mxu0 %vm19415_vm9, %v33793_v46  ;;  %v24443_v21 = vpop.permute.xlu0 %24442  ;;  %v19486_v22 = vpop.f32.mrf.mxu0 }
 0xad7   :  { %23512 = vmatpush1.msra.mxu0 %v23174_v1  ;;  %27447 = vmatmul.mubr.msk.f32.vlgmr.msra.gmra.mxu1 %vm19415_vm9, %v34001_v24 }
 0xad8   :  { %24086 = vmatpush1.msra.mxu1 %v23817_v10  ;;  %23545 = vmatprep.mubr.f32.mxu0 %v35307_v43  ;;  %v23163_v61 = vpop.permute.xlu1 %23162 }
 0xad9   :  { %24227 = vmatprep.subr.mxu1 %v23822_v12  ;;  %24119 = vmatprep.mubr.f32.mxu1 %v35307_v43  ;;  %v23178_v32 = vsel %vm817_vm5, %v33920_v0, %v23163_v61  ;;  %v23179_v20 = vsel %vm817_vm5, %v23163_v61, %v34159_v47  ;;  %v23812_v0 = vsel %vm933_vm6, %v34050_v29, %v33938_v40  ;;  %v25137_v61 = vld [vmem:[%s34883_s11 + $0x18] sm:$0xff] }
 0xada   :  { %27442 = vmatmul.mubr.msk.f32.vlgmr.msra.gmra.mxu0 %vm19415_vm9, %v33793_v46  ;;  %23653 = vmatprep.subr.mxu0 %v23179_v20  ;;  %v23815_v29 = vsel %vm933_vm6, %v34108_v31, %v34129_v13 }
 0xadb   :  { %27449 = vmatmul.mubr.msk.f32.vlgmr.msra.gmra.mxu1 %vm19415_vm9, %v34001_v24  ;;  %23654 = vmatpush1.msra.mxu0 %v23178_v32 }
 0xadc   :  { %24228 = vmatpush1.msra.mxu1 %v23821_v19  ;;  %23687 = vmatprep.mubr.f32.mxu0 %v35307_v43  ;;  %v24427_v18 = vpop.permute.xlu1 %24426 }
 0xadd   :  { %24261 = vmatprep.mubr.f32.mxu1 %v35307_v43  ;;  %27657 = vmatprep.subr.mxu1 %v35307_v43  ;;  %v24456_v31 = vsel %vm1049_vm7, %v24427_v18, %v34222_v62  ;;  %v25135_v18 = vld [vmem:[%s34883_s11 + $0x8] sm:$0xff] }
 0xade   :  { %27444 = vmatmul.mubr.msk.f32.vlgmr.msra.gmra.mxu0 %vm19415_vm9, %v33793_v46  ;;  %23872 = vmatprep.subr.mxu0 %v23812_v0 }
 0xadf   :  { %27451 = vmatmul.mubr.msk.f32.vlgmr.msra.gmra.mxu1 %vm19415_vm9, %v34001_v24  ;;  %23873 = vmatpush1.msra.mxu0 %v23811_v4 }
 0xae0   :  { %27658 = vmatpush3.msra.mxu1 %v23810_v30  ;;  %24014 = vmatprep.subr.mxu0 %v23816_v8  ;;  %v24435_v40 = vpop.permute.xlu1 %24434 }
 0xae1   :  { %23906 = vmatprep.mubr.f32.mxu0 %v35307_v43  ;;  %27659 = vmatprep.mubr.msk.f32.mxu1 %vm27963_vm12, %v35307_v43  ;;  %v24459_v46 = vsel %vm1049_vm7, %v34183_v59, %v24435_v40 }
 0xae2   :  { %27446 = vmatmul.mubr.msk.f32.vlgmr.msra.gmra.mxu0 %vm19415_vm9, %v34001_v24  ;;  %24588 = vmatprep.subr.mxu1 %v24459_v46 }
 0xae3   :  { %24015 = vmatpush1.msra.mxu0 %v23815_v29  ;;  %27660 = vmatmul.mubr.msk.f32.vlgmr.msra.gmra.mxu1 %vm19415_vm9, %v34001_v24 }
 0xae4   :  { %24156 = vmatprep.subr.mxu0 %v23820_v60  ;;  %24048 = vmatprep.mubr.f32.mxu0 %v35307_v43  ;;  %v24437_v39 = vpop.permute.xlu1 %24436 }
 0xae5   :  { %24589 = vmatpush1.msra.mxu1 %v24458_v28  ;;  %24622 = vmatprep.mubr.f32.mxu1 %v35307_v43  ;;  %v24461_v42 = vsel %vm1049_vm7, %v24437_v39, %v34238_v33  ;;  %v24460_v55 = vsel %vm1049_vm7, %v24435_v40, %v24437_v39 }
 0xae6   :  { %27448 = vmatmul.mubr.msk.f32.vlgmr.msra.gmra.mxu0 %vm19415_vm9, %v34001_v24 }
 0xae7   :  { %24157 = vmatpush1.msra.mxu0 %v23819_v11  ;;  %27455 = vmatmul.mubr.msk.f32.vlgmr.msra.gmra.mxu1 %vm19415_vm9, %v34213_v9 }
 0xae8   :  { %24190 = vmatprep.mubr.f32.mxu0 %v35307_v43  ;;  %v23808_v51 = vpop.permute.xlu1 %23807  ;;  %24764 = vmatprep.mubr.f32.mxu1 %v35307_v43  ;;  %v19555_v7 = vpop.f32.mrf.mxu1 }
 0xae9   :  { %v23823_v52 = vsel %vm933_vm6, %v34105_v25, %v23808_v51  ;;  %v23824_v63 = vsel %vm933_vm6, %v23808_v51, %v23810_v30  ;;  %v24447_v25 = vpop.permute.xlu0 %24446 }
 0xaea   :  { %27450 = vmatmul.mubr.msk.f32.vlgmr.msra.gmra.mxu0 %vm19415_vm9, %v34001_v24  ;;  %24298 = vmatprep.subr.mxu0 %v23824_v63  ;;  %v19557_v3 = vpop.f32.mrf.mxu1 }
 0xaeb   :  { %24299 = vmatpush1.msra.mxu0 %v23823_v52  ;;  %24332 = vmatprep.mubr.f32.mxu0 %v35307_v43 }
 0xaec   :  { %24517 = vmatprep.subr.mxu0 %v24457_v5  ;;  %v24441_v48 = vpop.permute.xlu1 %24440 }
 0xaed   :  { %v24462_v53 = vsel %vm1049_vm7, %v34238_v33, %v24441_v48  ;;  %v24463_v49 = vsel %vm1049_vm7, %v24441_v48, %v24443_v21 }
 0xaee   :  { %27452 = vmatmul.mubr.msk.f32.vlgmr.msra.gmra.mxu0 %vm19415_vm9, %v34001_v24  ;;  %24730 = vmatprep.subr.mxu1 %v24463_v49  ;;  %v24451_v24 = vpop.permute.xlu0 %24450 }
 0xaef   :  { %24518 = vmatpush1.msra.mxu0 %v24456_v31  ;;  %24551 = vmatprep.mubr.f32.mxu0 %v35307_v43 }
 0xaf0   :  { %24659 = vmatprep.subr.mxu0 %v24461_v42  ;;  %24731 = vmatpush1.msra.mxu1 %v24462_v53  ;;  %v24445_v37 = vpop.permute.xlu1 %24444 }
 0xaf1   :  { %27457 = vmatmul.mubr.msk.f32.vlgmr.msra.gmra.mxu1 %vm19415_vm9, %v34213_v9  ;;  %v24465_v14 = vsel %vm1049_vm7, %v24445_v37, %v24447_v25  ;;  %v24464_v54 = vsel %vm1049_vm7, %v24443_v21, %v24445_v37 }
 0xaf2   :  { %27454 = vmatmul.mubr.msk.f32.vlgmr.msra.gmra.mxu0 %vm19415_vm9, %v34213_v9  ;;  %24906 = vmatprep.mubr.f32.mxu1 %v35307_v43  ;;  %v24455_v17 = vpop.permute.xlu0 %24454 }
 0xaf3   :  { %24660 = vmatpush1.msra.mxu0 %v24460_v55  ;;  %24693 = vmatprep.mubr.f32.mxu0 %v35307_v43 }
 0xaf4   :  { %24801 = vmatprep.subr.mxu0 %v24465_v14 }
 0xaf6   :  { %27456 = vmatmul.mubr.msk.f32.vlgmr.msra.gmra.mxu0 %vm19415_vm9, %v34213_v9  ;;  %v24449_v15 = vpop.permute.xlu1 %24448 }
 0xaf7   :  { %24802 = vmatpush1.msra.mxu0 %v24464_v54  ;;  %v24466_v13 = vsel %vm1049_vm7, %v24447_v25, %v24449_v15  ;;  %v24467_v34 = vsel %vm1049_vm7, %v24449_v15, %v24451_v24  ;;  %24835 = vmatprep.mubr.f32.mxu0 %v35307_v43 }
 0xaf8   :  { %24872 = vmatprep.subr.mxu1 %v24467_v34 }
 0xaf9   :  { %24873 = vmatpush1.msra.mxu1 %v24466_v13 }
 0xafa   :  { %27458 = vmatmul.mubr.msk.f32.vlgmr.msra.gmra.mxu0 %vm19415_vm9, %v34213_v9  ;;  %27459 = vmatmul.mubr.msk.f32.vlgmr.msra.gmra.mxu1 %vm19415_vm9, %v34213_v9  ;;  %v24453_v58 = vpop.permute.xlu1 %24452 }
 0xafb   :  { %27662 = vmatprep.subr.mxu1 %v35307_v43  ;;  %v24468_v23 = vsel %vm1049_vm7, %v24451_v24, %v24453_v58  ;;  %v24469_v41 = vsel %vm1049_vm7, %v24453_v58, %v24455_v17  ;;  %24977 = vmatprep.mubr.f32.mxu0 %v35307_v43 }
 0xafc   :  { %27663 = vmatpush3.msra.mxu1 %v24455_v17  ;;  %24943 = vmatprep.subr.mxu0 %v24469_v41  ;;  %v19626_v27 = vpop.f32.mrf.mxu0 }
 0xafd   :  { %24944 = vmatpush1.msra.mxu0 %v24468_v23  ;;  %27664 = vmatprep.mubr.msk.f32.mxu1 %vm27963_vm12, %v35307_v43 }
 0xafe   :  { %27460 = vmatmul.mubr.msk.f32.vlgmr.msra.gmra.mxu0 %vm19415_vm9, %v34213_v9  ;;  %27665 = vmatmul.mubr.msk.f32.vlgmr.msra.gmra.mxu1 %vm19415_vm9, %v34213_v9  ;;  %v19628_v44 = vpop.f32.mrf.mxu0 }
 0xaff   :  { %25290 = vmatprep.mubr.f32.mxu1 %v25137_v61  ;;  %25220 = vmatprep.mubr.f32.mxu0 %v25135_v18 }
 0xb0c   :  { %v19697_v47 = vpop.f32.mrf.mxu1 }
 0xb0e   :  { %v19699_v6 = vpop.f32.mrf.mxu1 }
 0xb1c   :  { %v19768_v56 = vpop.f32.mrf.mxu0 }
 0xb1e   :  { %v19770_v62 = vpop.f32.mrf.mxu0 }
 0xb2c   :  { %v19839_v38 = vpop.f32.mrf.mxu1 }
 0xb2e   :  { %v19841_v2 = vpop.f32.mrf.mxu1 }
 0xb30   :  { %v19981_v59 = vpop.f32.mrf.mxu1 }
 0xb32   :  { %v27626_v26 = vpop.f32.mrf.mxu1 }
 0xb34   :  { %v20124_v45 = vpop.f32.mrf.mxu1 }
 0xb35   :  { %v20125_v46 = vadd.f32 %v20124_v45, %v19555_v7 }
 0xb36   :  { %v20126_v50 = vpop.f32.mrf.mxu1 }
 0xb37   :  { %v20127_v16 = vadd.f32 %v20126_v50, %v19557_v3 }
 0xb38   :  { %v20266_v57 = vpop.f32.mrf.mxu1 }
 0xb39   :  { %v20267_v35 = vadd.f32 %v20266_v57, %v19697_v47 }
 0xb3a   :  { %v20268_v9 = vpop.f32.mrf.mxu1 }
 0xb3b   :  { %v20269_v1 = vadd.f32 %v20268_v9, %v19699_v6 }
 0xb3c   :  { %v19910_v10 = vpop.f32.mrf.mxu0 }
 0xb3d   :  { %v20408_v12 = vpop.f32.mrf.mxu1 }
 0xb3e   :  { %v20409_v33 = vadd.f32 %v20408_v12, %v19839_v38  ;;  %v19912_v32 = vpop.f32.mrf.mxu0 }
 0xb3f   :  { %v20410_v20 = vpop.f32.mrf.mxu1 }
 0xb40   :  { %v20411_v19 = vadd.f32 %v20410_v20, %v19841_v2 }
 0xb41   :  { %v20053_v0 = vpop.f32.mrf.mxu0  ;;  %v20550_v4 = vpop.f32.mrf.mxu1 }
 0xb42   :  { %v20551_v30 = vadd.f32 %v20550_v4, %v19981_v59  ;;  %v20054_v54 = vadd.f32 %v20053_v0, %v19484_v36 }
 0xb43   :  { %v20055_v8 = vpop.f32.mrf.mxu0  ;;  %v27631_v40 = vpop.f32.mrf.mxu1 }
 0xb44   :  { %v20056_v58 = vadd.f32 %v20055_v8, %v19486_v22 }
 0xb45   :  { %v20195_v29 = vpop.f32.mrf.mxu0 }
 0xb46   :  { %v20754_v60 = vpop.f32.mrf.mxu1  ;;  %v20196_v47 = vadd.f32 %v20195_v29, %v19626_v27 }
 0xb47   :  { %v21186_v28 = vadd.f32 %v20754_v60, %v20125_v46  ;;  %v20197_v39 = vpop.f32.mrf.mxu0 }
 0xb48   :  { %v20198_v11 = vadd.f32 %v20197_v39, %v19628_v44  ;;  %v20756_v21 = vpop.f32.mrf.mxu1 }
 0xb49   :  { %v21187_v51 = vadd.f32 %v20756_v21, %v20127_v16 }
 0xb4a   :  { %v20337_v52 = vpop.f32.mrf.mxu0  ;;  %v20896_v63 = vpop.f32.mrf.mxu1 }
 0xb4b   :  { %v20338_v5 = vadd.f32 %v20337_v52, %v19768_v56  ;;  %v21190_v48 = vadd.f32 %v20896_v63, %v20267_v35 }
 0xb4c   :  { %v20339_v53 = vpop.f32.mrf.mxu0  ;;  %v20898_v49 = vpop.f32.mrf.mxu1 }
 0xb4d   :  { %v20340_v25 = vadd.f32 %v20339_v53, %v19770_v62  ;;  %v21191_v31 = vadd.f32 %v20898_v49, %v20269_v1 }
 0xb4e   :  { %v20479_v42 = vpop.f32.mrf.mxu0 }
 0xb4f   :  { %v20480_v37 = vadd.f32 %v20479_v42, %v19910_v10  ;;  %v21038_v14 = vpop.f32.mrf.mxu1 }
 0xb50   :  { %v21194_v55 = vadd.f32 %v21038_v14, %v20409_v33  ;;  %v20481_v24 = vpop.f32.mrf.mxu0 }
 0xb51   :  { %v20482_v15 = vadd.f32 %v20481_v24, %v19912_v32  ;;  %v21040_v13 = vpop.f32.mrf.mxu1 }
 0xb52   :  { %v21195_v34 = vadd.f32 %v21040_v13, %v20411_v19  ;;  %v20683_v17 = vpop.f32.mrf.mxu0 }
 0xb53   :  { %v21184_v23 = vadd.f32 %v20683_v17, %v20054_v54  ;;  %v21180_v41 = vpop.f32.mrf.mxu1 }
 0xb54   :  { %v21198_v7 = vadd.f32 %v21180_v41, %v20551_v30  ;;  %v20685_v3 = vpop.f32.mrf.mxu0 }
 0xb55   :  { %v21185_v6 = vadd.f32 %v20685_v3, %v20056_v58  ;;  %v27636_v38 = vpop.f32.mrf.mxu1 }
 0xb56   :  { %v20825_v2 = vpop.f32.mrf.mxu0 }
 0xb57   :  { %v21188_v59 = vadd.f32 %v20825_v2, %v20196_v47  ;;  %v21399_v26 = vpop.f32.mrf.mxu1 }
 0xb58   :  { %v34349_v44 = vadd.f32 %v21399_v26, %v21186_v28  ;;  %v20827_v45 = vpop.f32.mrf.mxu0 }
 0xb59   :  { %v21189_v56 = vadd.f32 %v20827_v45, %v20198_v11  ;;  %v21401_v36 = vpop.f32.mrf.mxu1 }
 0xb5a   :  { %v34351_v50 = vadd.f32 %v21401_v36, %v21187_v51  ;;  %v20967_v16 = vpop.f32.mrf.mxu0 }
 0xb5b   :  { %v21192_v57 = vadd.f32 %v20967_v16, %v20338_v5  ;;  %v21541_v22 = vpop.f32.mrf.mxu1 }
 0xb5c   :  { %v21835_v35 = vadd.f32 %v21541_v22, %v21190_v48  ;;  %v20969_v62 = vpop.f32.mrf.mxu0 }
 0xb5d   :  { %v21193_v9 = vadd.f32 %v20969_v62, %v20340_v25  ;;  %v21543_v1 = vpop.f32.mrf.mxu1 }
 0xb5e   :  { %v34353_v27 = vadd.f32 %v21543_v1, %v21191_v31  ;;  %v21109_v10 = vpop.f32.mrf.mxu0 }
 0xb5f   :  { %v21196_v12 = vadd.f32 %v21109_v10, %v20480_v37  ;;  %v21683_v61 = vpop.f32.mrf.mxu1 }
 0xb60   :  { %v21839_v33 = vadd.f32 %v21683_v61, %v21194_v55  ;;  %v21111_v32 = vpop.f32.mrf.mxu0 }
 0xb61   :  { %v21197_v20 = vadd.f32 %v21111_v32, %v20482_v15  ;;  %v21685_v19 = vpop.f32.mrf.mxu1 }
 0xb62   :  { %v21840_v18 = vadd.f32 %v21685_v19, %v21195_v34  ;;  %v21328_v0 = vpop.f32.mrf.mxu0 }
 0xb63   :  { %v34355_v4 = vadd.f32 %v21328_v0, %v21184_v23  ;;  %v21825_v30 = vpop.f32.mrf.mxu1 }
 0xb64   :  { %v21843_v8 = vadd.f32 %v21825_v30, %v21198_v7  ;;  %v21330_v40 = vpop.f32.mrf.mxu0 }
 0xb65   :  { %v34357_v46 = vadd.f32 %v21330_v40, %v21185_v6  ;;  %v27641_v29 = vpop.f32.mrf.mxu1 }
 0xb66   :  { %v21470_v60 = vpop.f32.mrf.mxu0 }
 0xb67   :  { %v34359_v28 = vadd.f32 %v21470_v60, %v21188_v59  ;;  %v34361_v39 = vpop.f32.mrf.mxu1 }
 0xb68   :  { %v21472_v11 = vpop.f32.mrf.mxu0 }
 0xb69   :  { %v34363_v21 = vadd.f32 %v21472_v11, %v21189_v56  ;;  %v34365_v51 = vpop.f32.mrf.mxu1 }
 0xb6a   :  { %v21612_v52 = vpop.f32.mrf.mxu0  ;;  %v22477_v43 = vadd.f32 %v34365_v51, %v34351_v50 }
 0xb6b   :  { %v34367_v63 = vadd.f32 %v21612_v52, %v21192_v57  ;;  %v22186_v5 = vpop.f32.mrf.mxu1 }
 0xb6c   :  { %v34369_v48 = vadd.f32 %v22186_v5, %v21835_v35  ;;  %v21614_v53 = vpop.f32.mrf.mxu0 }
 0xb6d   :  { %v34371_v49 = vadd.f32 %v21614_v53, %v21193_v9  ;;  %v34373_v25 = vpop.f32.mrf.mxu1 }
 0xb6e   :  { %v21754_v31 = vpop.f32.mrf.mxu0 }
 0xb6f   :  { %v34375_v42 = vadd.f32 %v21754_v31, %v21196_v12  ;;  %v22328_v37 = vpop.f32.mrf.mxu1 }
 0xb70   :  { %v34377_v14 = vadd.f32 %v22328_v37, %v21839_v33  ;;  %v21756_v55 = vpop.f32.mrf.mxu0 }
 0xb71   :  { %v34379_v24 = vadd.f32 %v21756_v55, %v21197_v20  ;;  %v22330_v54 = vpop.f32.mrf.mxu1 }
 0xb72   :  { %v34381_v15 = vadd.f32 %v22330_v54, %v21840_v18  ;;  %v21973_v13 = vpop.f32.mrf.mxu0 }
 0xb73   :  { %v22470_v34 = vpop.f32.mrf.mxu1 }
 0xb74   :  { %v34383_v17 = vadd.f32 %v22470_v34, %v21843_v8  ;;  %v21975_v58 = vpop.f32.mrf.mxu0 }
 0xb75   :  { %v27646_v23 = vpop.f32.mrf.mxu1  ;;  %v22475_v50 = vadd.f32 %v21975_v58, %v34357_v46 }
 0xb76   :  { %v22115_v41 = vpop.f32.mrf.mxu0  ;;  %v22476_v23 = vadd.f32 %v34361_v39, %v34349_v44  ;;  %v22481_v44 = vadd.f32 %v34373_v25, %v34353_v27  ;;  %v22474_v39 = vadd.f32 %v21973_v13, %v34355_v4 }
 0xb77   :  { %v22689_v7 = vpop.f32.mrf.mxu1  ;;  %v22478_v51 = vadd.f32 %v22115_v41, %v34359_v28 }
 0xb78   :  { %v34385_v3 = vpop.f32.mrf.mxu0 }
 0xb79   :  { %v22691_v47 = vpop.f32.mrf.mxu1 }
 0xb7a   :  { %v22257_v6 = vpop.f32.mrf.mxu0 }
 0xb7b   :  { %v22831_v38 = vpop.f32.mrf.mxu1 }
 0xb7c   :  { %v22259_v2 = vpop.f32.mrf.mxu0  ;;  %v23125_v27 = vadd.f32 %v22831_v38, %v34369_v48 }
 0xb7d   :  { %v34387_v59 = vpop.f32.mrf.mxu1  ;;  %v22483_v4 = vadd.f32 %v22259_v2, %v34371_v49 }
 0xb7e   :  { %v34389_v26 = vpop.f32.mrf.mxu0  ;;  %v23126_v46 = vadd.f32 %v34387_v59, %v22481_v44  ;;  %v25136_v44 = vld [vmem:[%s34883_s11 + $0x10] sm:$0xff] }
 0xb7f   :  { %v34391_v45 = vpop.f32.mrf.mxu1  ;;  %v22486_v28 = vadd.f32 %v34389_v26, %v34375_v42 }
 0xb80   :  { %v34393_v56 = vpop.f32.mrf.mxu0 }
 0xb81   :  { %v34395_v36 = vpop.f32.mrf.mxu1 }
 0xb82   :  { %v34397_v16 = vpop.f32.mrf.mxu0  ;;  %v23130_v48 = vadd.f32 %v34395_v36, %v34381_v15 }
 0xb83   :  { %v34399_v57 = vpop.f32.mrf.mxu1  ;;  %v23119_v49 = vadd.f32 %v34397_v16, %v22474_v39 }
 0xb84   :  { %v34401_v22 = vpop.f32.mrf.mxu0 }
 0xb85   :  { %v27651_v35 = vpop.f32.mrf.mxu1  ;;  %v23120_v42 = vadd.f32 %v34401_v22, %v22475_v50 }
 0xb86   :  { %v34403_v62 = vpop.f32.mrf.mxu0 }
 0xb87   :  { %v23334_v9 = vpop.f32.mrf.mxu1 }
 0xb88   :  { %v34405_v1 = vpop.f32.mrf.mxu0 }
 0xb89   :  { %v23336_v10 = vpop.f32.mrf.mxu1 }
 0xb8a   :  { %v34407_v12 = vpop.f32.mrf.mxu0 }
 0xb8b   :  { %v34409_v61 = vpop.f32.mrf.mxu1 }
 0xb8c   :  { %v34411_v33 = vpop.f32.mrf.mxu0  ;;  %v23770_v59 = vadd.f32 %v34409_v61, %v23125_v27 }
 0xb8d   :  { %v34413_v32 = vpop.f32.mrf.mxu1  ;;  %v23128_v26 = vadd.f32 %v34411_v33, %v22483_v4 }
 0xb8e   :  { %v34415_v20 = vpop.f32.mrf.mxu0 }
 0xb8f   :  { %v34417_v19 = vpop.f32.mrf.mxu1  ;;  %v23131_v36 = vadd.f32 %v34415_v20, %v22486_v28 }
 0xb90   :  { %v34419_v18 = vpop.f32.mrf.mxu0 }
 0xb91   :  { %v34421_v0 = vpop.f32.mrf.mxu1 }
 0xb92   :  { %35325 = vst [vmem:[#allocation35_spill] sm:$0xff] %v34421_v0  ;;  %v34423_v30 = vpop.f32.mrf.mxu0 }
 0xb93   :  { %v34425_v8 = vpop.f32.mrf.mxu1 }
 0xb94   :  { %35326 = vst [vmem:[#allocation26_spill] sm:$0xff] %v34425_v8  ;;  %v34427_v40 = vpop.f32.mrf.mxu0 }
 0xb95   :  { %35327 = vst [vmem:[#allocation38_spill] sm:$0xff] %v34427_v40  ;;  %v27656_v29 = vpop.f32.mrf.mxu1 }
 0xb96   :  { %v34429_v60 = vpop.f32.mrf.mxu0 }
 0xb97   :  { %35328 = vst [vmem:[#allocation14_spill] sm:$0xff] %v34429_v60  ;;  %v23979_v11 = vpop.f32.mrf.mxu1 }
 0xb98   :  { %v34431_v52 = vpop.f32.mrf.mxu0 }
 0xb99   :  { %35329 = vst [vmem:[#allocation12_spill] sm:$0xff] %v34431_v52  ;;  %v23981_v5 = vpop.f32.mrf.mxu1 }
 0xb9a   :  { %v34433_v53 = vpop.f32.mrf.mxu0 }
 0xb9b   :  { %35330 = vst [vmem:[#allocation7_spill] sm:$0xff] %v34433_v53  ;;  %v24121_v31 = vpop.f32.mrf.mxu1  ;;  %v23121_v53 = vadd.f32 %v22689_v7, %v22476_v23 }
 0xb9c   :  { %v34435_v37 = vpop.f32.mrf.mxu0 }
 0xb9d   :  { %35331 = vst [vmem:[#allocation5_spill] sm:$0xff] %v34435_v37  ;;  %v34437_v55 = vpop.f32.mrf.mxu1  ;;  %v23122_v37 = vadd.f32 %v22691_v47, %v22477_v43 }
 0xb9e   :  { %35332 = vst [vmem:[#allocation46_spill] sm:$0xff] %v34437_v55  ;;  %v34439_v54 = vpop.f32.mrf.mxu0  ;;  %v23766_v55 = vadd.f32 %v23334_v9, %v23121_v53  ;;  %v34464_v9 = vpop.permute.xlu1 %25071  ;;  %v35338_v53 = vld [vmem:[#allocation38_spill] sm:$0xff] }
 0xb9f   :  { %35333 = vst [vmem:[#allocation10_spill] sm:$0xff] %v34439_v54  ;;  %v34441_v34 = vpop.f32.mrf.mxu1 }
 0xba0   :  { %35334 = vst [vmem:[#allocation33_spill] sm:$0xff] %v34441_v34  ;;  %v34445_v35 = vpop.f32.mrf.mxu0  ;;  %v23767_v34 = vadd.f32 %v23336_v10, %v23122_v37  ;;  %v24411_v8 = vadd.f32 %v23979_v11, %v23766_v55  ;;  %v22479_v10 = vadd.f32 %v34385_v3, %v34363_v21  ;;  %v22482_v11 = vadd.f32 %v22257_v6, %v34367_v63 }
 0xba1   :  { %v34447_v29 = vpop.f32.mrf.mxu1  ;;  %v23129_v21 = vadd.f32 %v34391_v45, %v34377_v14  ;;  %v22487_v63 = vadd.f32 %v34393_v56, %v34379_v24  ;;  %v23133_v3 = vadd.f32 %v34399_v57, %v34383_v17  ;;  %v23123_v6 = vadd.f32 %v34403_v62, %v22478_v51  ;;  %v35336_v62 = vld [vmem:[#allocation35_spill] sm:$0xff] }
 0xba2   :  { %35335 = vst [vmem:[#allocation48_spill] sm:$0xff] %v34447_v29  ;;  %v23908_v52 = vpop.f32.mrf.mxu0  ;;  %v24412_v7 = vadd.f32 %v23981_v5, %v23767_v34  ;;  %v23124_v14 = vadd.f32 %v34405_v1, %v22479_v10  ;;  %v23127_v24 = vadd.f32 %v34407_v12, %v22482_v11  ;;  %v23771_v56 = vadd.f32 %v34413_v32, %v23126_v46  ;;  %v35340_v34 = vld [vmem:[#allocation12_spill] sm:$0xff]  ;;  %v35342_v39 = vld [vmem:[#allocation7_spill] sm:$0xff] }
 0xba3   :  { %v34451_v60 = vpop.f32.mrf.mxu1  ;;  %v23774_v16 = vadd.f32 %v34417_v19, %v23129_v21  ;;  %v23764_v57 = vadd.f32 %v34423_v30, %v23119_v49  ;;  %v23132_v22 = vadd.f32 %v34419_v18, %v22487_v63  ;;  %v23775_v1 = vadd.f32 %v35336_v62, %v23130_v48  ;;  %v25141_v11 = vld [vmem:[%s34883_s11 + $0x38] sm:$0xff] }
 0xba4   :  { %v34453_v40 = vpop.f32.mrf.mxu0  ;;  %v24415_v12 = vadd.f32 %v24121_v31, %v23770_v59  ;;  %v23765_v37 = vadd.f32 %v35338_v53, %v23120_v42  ;;  %v23769_v30 = vadd.f32 %v35340_v34, %v23124_v14  ;;  %v23772_v50 = vadd.f32 %v35342_v39, %v23127_v24  ;;  %v35343_v51 = vld [vmem:[#allocation5_spill] sm:$0xff] }
 0xba5   :  { %v27661_v54 = vpop.f32.mrf.mxu1  ;;  %v24409_v55 = vadd.f32 %v23908_v52, %v23764_v57  ;;  %v35341_v23 = vld [vmem:[#allocation46_spill] sm:$0xff]  ;;  %v23773_v52 = vadd.f32 %v35343_v51, %v23128_v26  ;;  %v23777_v21 = vadd.f32 %v34445_v35, %v23132_v22 }
 0xba6   :  { %v34455_v0 = vpop.f32.mrf.mxu0  ;;  %v35339_v54 = vld [vmem:[#allocation14_spill] sm:$0xff]  ;;  %v24416_v18 = vadd.f32 %v35341_v23, %v23771_v56 }
 0xba7   :  { %v24624_v29 = vpop.f32.mrf.mxu1  ;;  %v23768_v19 = vadd.f32 %v35339_v54, %v23123_v6  ;;  %v35344_v27 = vld [vmem:[#allocation10_spill] sm:$0xff] }
 0xba8   :  { %v25056_v43 = vadd.f32 %v24624_v29, %v24411_v8  ;;  %v34462_v47 = vpop.f32.mrf.mxu0  ;;  %v35337_v8 = vld [vmem:[#allocation26_spill] sm:$0xff]  ;;  %v23776_v4 = vadd.f32 %v35344_v27, %v23131_v36 }
 0xba9   :  { %v24626_v25 = vpop.f32.mrf.mxu1  ;;  %v23778_v5 = vadd.f32 %v35337_v8, %v23133_v3  ;;  %v24413_v63 = vadd.f32 %v34455_v0, %v23768_v19  ;;  %v35346_v49 = vld [vmem:[#allocation48_spill] sm:$0xff]  ;;  %v24414_v42 = vadd.f32 %v34462_v47, %v23769_v30 }
 0xbaa   :  { %v25076_v13 = vadd.f32 %v34464_v9, %v25056_v43  ;;  %v25057_v58 = vadd.f32 %v24626_v25, %v24412_v7  ;;  %v34475_v41 = vpop.f32.mrf.mxu0  ;;  %v24410_v7 = vadd.f32 %v34453_v40, %v23765_v37  ;;  %v35345_v25 = vld [vmem:[#allocation33_spill] sm:$0xff]  ;;  %v24420_v3 = vadd.f32 %v35346_v49, %v23775_v1 }
 0xbab   :  { %v24419_v46 = vadd.f32 %v35345_v25, %v23774_v16  ;;  %v24417_v24 = vadd.f32 %v34475_v41, %v23772_v50  ;;  %v24423_v36 = vadd.f32 %v34451_v60, %v23778_v5  ;;  %v25143_v49 = vld [vmem:[%s34883_s11 + $0x48] sm:$0xff] }
 0xbac   :  { %v25077_v38 = vadd.f32 %v34464_v9, %v25057_v58  ;;  %v34489_v2 = vpop.f32.mrf.mxu0  ;;  %v25106_v15 = vmul.f32 0.01, %v25076_v13  ;;  %vm25091_vm1 = vcmp.gt.f32.partialorder %v25076_v13, 0.0 }
 0xbad   :  { %v24418_v16 = vadd.f32 %v34489_v2, %v23773_v52  ;;  %v25140_v2 = vld [vmem:[%s34883_s11 + $0x30] sm:$0xff] }
 0xbae   :  { %v34495_v45 = vpop.f32.mrf.mxu0  ;;  %vm25092_vm0 = vcmp.gt.f32.partialorder %v25077_v38, 0.0  ;;  %v25107_v17 = vmul.f32 0.01, %v25077_v38  ;;  %v25121_v32 = vsel %vm25091_vm1, %v25076_v13, %v25106_v15  ;;  %vm25149_vm1 = vcmask 564224  }
 0xbaf   :  { %v24421_v53 = vadd.f32 %v34495_v45, %v23776_v4  ;;  %v25145_v45 = vld [vmem:[%s34883_s11 + $0x58] sm:$0xff] }
 0xbb0   :  { %v34503_v61 = vpop.f32.mrf.mxu0  ;;  %v25122_v33 = vsel %vm25092_vm0, %v25077_v38, %v25107_v17 }
 0xbb1   :  { %25256 = vmatprep.subr.mxu1 %v25122_v33  ;;  %v24766_v20 = vpop.f32.mrf.mxu1  ;;  %v24422_v34 = vadd.f32 %v34503_v61, %v23777_v21  ;;  %v25139_v61 = vld [vmem:[%s34883_s11 + $0x28] sm:$0xff] }
 0xbb2   :  { %25257 = vmatpush1.xpose.msra.mxu1 %v25121_v32  ;;  %v24553_v29 = vpop.f32.mrf.mxu0  ;;  %v25060_v31 = vadd.f32 %v24766_v20, %v24415_v12 }
 0xbb3   :  { %v25054_v43 = vadd.f32 %v24553_v29, %v24409_v55  ;;  %v24768_v10 = vpop.f32.mrf.mxu1 }
 0xbb4   :  { %v25080_v28 = vadd.f32 %v34464_v9, %v25060_v31  ;;  %v24555_v13 = vpop.f32.mrf.mxu0  ;;  %v25061_v58 = vadd.f32 %v24768_v10, %v24416_v18  ;;  %v25134_v18 = vld [vmem:[%s34883_s11] sm:$0xff] }
 0xbb5   :  { %v25074_v40 = vadd.f32 %v34464_v9, %v25054_v43  ;;  %v25055_v48 = vadd.f32 %v24555_v13, %v24410_v7  ;;  %25291 = vmatmul.mubr.f32.vlgmr.msra.gmra.mxu1 %v25136_v44 }
 0xbb6   :  { %v25110_v6 = vmul.f32 0.01, %v25080_v28  ;;  %v25081_v38 = vadd.f32 %v34464_v9, %v25061_v58  ;;  %v24695_v14 = vpop.f32.mrf.mxu0  ;;  %25430 = vmatprep.mubr.f32.mxu1 %v25141_v11  ;;  %vm25095_vm2 = vcmp.gt.f32.partialorder %v25080_v28, 0.0 }
 0xbb7   :  { %v25075_v59 = vadd.f32 %v34464_v9, %v25055_v48  ;;  %v25058_v35 = vadd.f32 %v24695_v14, %v24413_v63  ;;  %v25104_v0 = vmul.f32 0.01, %v25074_v40  ;;  %vm25089_vm4 = vcmp.gt.f32.partialorder %v25074_v40, 0.0 }
 0xbb8   :  { %v24697_v15 = vpop.f32.mrf.mxu0  ;;  %vm25096_vm3 = vcmp.gt.f32.partialorder %v25081_v38, 0.0  ;;  %v25111_v26 = vmul.f32 0.01, %v25081_v38  ;;  %v25125_v62 = vsel %vm25095_vm2, %v25080_v28, %v25110_v6  ;;  %v25138_v28 = vld [vmem:[%s34883_s11 + $0x20] sm:$0xff]  ;;  %vm25919_vm2 = vcmask 523264  }
 0xbb9   :  { %v25078_v17 = vadd.f32 %v34464_v9, %v25058_v35  ;;  %v25059_v56 = vadd.f32 %v24697_v15, %v24414_v42  ;;  %vm25090_vm5 = vcmp.gt.f32.partialorder %v25075_v59, 0.0  ;;  %v25105_v47 = vmul.f32 0.01, %v25075_v59  ;;  %v25146_v15 = vld [vmem:[%s34883_s11 + $0x60] sm:$0xff] }
 0xbba   :  { %v24837_v57 = vpop.f32.mrf.mxu0  ;;  %v24908_v41 = vpop.f32.mrf.mxu1  ;;  %v25126_v22 = vsel %vm25096_vm3, %v25081_v38, %v25111_v26  ;;  %v25119_v60 = vsel %vm25089_vm4, %v25074_v40, %v25104_v0  ;;  %v25144_v38 = vld [vmem:[%s34883_s11 + $0x50] sm:$0xff] }
 0xbbb   :  { %v25108_v1 = vmul.f32 0.01, %v25078_v17  ;;  %v25079_v12 = vadd.f32 %v34464_v9, %v25059_v56  ;;  %v25062_v33 = vadd.f32 %v24837_v57, %v24417_v24  ;;  %v25064_v8 = vadd.f32 %v24908_v41, %v24419_v46  ;;  %25396 = vmatprep.subr.mxu1 %v25126_v22  ;;  %v25148_v26 = vld [vmem:[%s34883_s11 + $0x70] sm:$0xff] }
 0xbbc   :  { %v24839_v37 = vpop.f32.mrf.mxu0  ;;  %v24910_v55 = vpop.f32.mrf.mxu1  ;;  %v25120_v32 = vsel %vm25090_vm5, %v25075_v59, %v25105_v47  ;;  %25397 = vmatpush1.xpose.msra.mxu1 %v25125_v62  ;;  %vm25093_vm6 = vcmp.gt.f32.partialorder %v25078_v17, 0.0  ;;  %v35347_v24 = vmov 0.0   ;;  %v25147_v59 = vld [vmem:[%s34883_s11 + $0x68] sm:$0xff]  ;;  %v34600_v56 = vld [vmem:[%s34885_s13 + $0x10] sm:$0xff]  ;;  %v25716_v47 = vld [vmem:[%s34884_s12] sm:$0xff] }
 0xbbd   :  { %v25082_v5 = vadd.f32 %v34464_v9, %v25062_v33  ;;  %v25084_v20 = vadd.f32 %v34464_v9, %v25064_v8  ;;  %v25063_v54 = vadd.f32 %v24839_v37, %v24418_v16  ;;  %v25065_v19 = vadd.f32 %v24910_v55, %v24420_v3  ;;  %25186 = vmatprep.subr.mxu0 %v25120_v32  ;;  %v34616_v16 = vld [vmem:[%s34885_s13] sm:$0xff] }
 0xbbe   :  { %25187 = vmatpush1.xpose.msra.mxu0 %v25119_v60  ;;  %v24979_v30 = vpop.f32.mrf.mxu0  ;;  %v25050_v23 = vpop.f32.mrf.mxu1  ;;  %vm25094_vm7 = vcmp.gt.f32.partialorder %v25079_v12, 0.0  ;;  %v25109_v29 = vmul.f32 0.01, %v25079_v12  ;;  %v25123_v31 = vsel %vm25093_vm6, %v25078_v17, %v25108_v1  ;;  %v34593_v17 = vld [vmem:[%s34885_s13 + $0x18] sm:$0xff] }
 0xbbf   :  { %v25112_v44 = vmul.f32 0.01, %v25082_v5  ;;  %v25114_v39 = vmul.f32 0.01, %v25084_v20  ;;  %v25083_v50 = vadd.f32 %v34464_v9, %v25063_v54  ;;  %v25085_v51 = vadd.f32 %v34464_v9, %v25065_v19  ;;  %25431 = vmatmul.mubr.f32.vlgmr.msra.gmra.mxu1 %v25140_v2 }
 0xbc0   :  { %v25066_v52 = vadd.f32 %v24979_v30, %v24421_v53  ;;  %v25068_v7 = vadd.f32 %v25050_v23, %v24423_v36  ;;  %v24981_v43 = vpop.f32.mrf.mxu0  ;;  %v27666_v10 = vpop.f32.mrf.mxu1  ;;  %v25124_v11 = vsel %vm25094_vm7, %v25079_v12, %v25109_v29  ;;  %vm25097_vm13 = vcmp.gt.f32.partialorder %v25082_v5, 0.0  ;;  %25570 = vmatprep.mubr.f32.mxu1 %v25145_v45  ;;  %v34609_v36 = vld [vmem:[%s34885_s13 + $0x8] sm:$0xff] }
 0xbc1   :  { %v25067_v27 = vadd.f32 %v24981_v43, %v24422_v34  ;;  %25221 = vmatmul.mubr.f32.vlgmr.msra.gmra.mxu0 %v25134_v18  ;;  %25326 = vmatprep.subr.mxu0 %v25124_v11  ;;  %vm25098_vm14 = vcmp.gt.f32.partialorder %v25083_v50, 0.0  ;;  %v25113_v4 = vmul.f32 0.01, %v25083_v50  ;;  %vm25100_vm15 = vcmp.gt.f32.partialorder %v25085_v51, 0.0 }
 0xbc2   :  { %v25086_v25 = vadd.f32 %v34464_v9, %v25066_v52  ;;  %v25088_v46 = vadd.f32 %v34464_v9, %v25068_v7  ;;  %25327 = vmatpush1.xpose.msra.mxu0 %v25123_v31  ;;  %25360 = vmatprep.mubr.f32.mxu0 %v25139_v61  ;;  %v25115_v13 = vmul.f32 0.01, %v25085_v51  ;;  %vm25099_vm10 = vcmp.gt.f32.partialorder %v25084_v20, 0.0 }
 0xbc3   :  { %v25087_v58 = vadd.f32 %v34464_v9, %v25067_v27  ;;  %v25128_v21 = vsel %vm25098_vm14, %v25083_v50, %v25113_v4  ;;  %v25127_v48 = vsel %vm25097_vm13, %v25082_v5, %v25112_v44  ;;  %v25129_v42 = vsel %vm25099_vm10, %v25084_v20, %v25114_v39  ;;  %v25142_v9 = vld [vmem:[%s34883_s11 + $0x40] sm:$0xff] }
 0xbc4   :  { %v25116_v63 = vmul.f32 0.01, %v25086_v25  ;;  %25466 = vmatprep.subr.mxu0 %v25128_v21  ;;  %v25130_v40 = vsel %vm25100_vm15, %v25085_v51, %v25115_v13  ;;  %v25118_v3 = vmul.f32 0.01, %v25088_v46  ;;  %vm25103_vm8 = vcmp.gt.f32.partialorder %v25088_v46, 0.0  ;;  %v34655_v21 = vld [vmem:[%s34887_s15 + $0x30] sm:$0xff] }
 0xbc5   :  { %25361 = vmatmul.mubr.f32.vlgmr.msra.gmra.mxu0 %v25138_v28  ;;  %25536 = vmatprep.subr.mxu1 %v25130_v40  ;;  %vm25102_vm11 = vcmp.gt.f32.partialorder %v25087_v58, 0.0  ;;  %v25117_v6 = vmul.f32 0.01, %v25087_v58  ;;  %vm25101_vm0 = vcmp.gt.f32.partialorder %v25086_v25, 0.0  ;;  %v27464_v44 = vld [vmem:[%s34886_s14] ss:$0 sm:$0xff] }
 0xbc6   :  { %25467 = vmatpush1.xpose.msra.mxu0 %v25127_v48  ;;  %25537 = vmatpush1.xpose.msra.mxu1 %v25129_v42  ;;  %v25131_v35 = vsel %vm25101_vm0, %v25086_v25, %v25116_v63  ;;  %v25133_v0 = vsel %vm25103_vm8, %v25088_v46, %v25118_v3  ;;  %s27968_s14 = smov 32   ;;  %v34662_v63 = vld [vmem:[%s34887_s15 + $0x28] sm:$0xff]  ;;  %v34669_v40 = vld [vmem:[%s34887_s15 + $0x20] sm:$0xff]  ;;  %v34676_v48 = vld [vmem:[%s34887_s15 + $0x18] sm:$0xff] }
 0xbc7   :  { %25500 = vmatprep.mubr.f32.mxu0 %v25143_v49  ;;  %v25132_v14 = vsel %vm25102_vm11, %v25087_v58, %v25117_v6  ;;  %27667 = vmatprep.subr.mxu1 %v35347_v24  ;;  %v34650_v58 = vld [vmem:[%s34887_s15 + $0x38] sm:$0xff]  ;;  %v34683_v49 = vld [vmem:[%s34887_s15 + $0x10] sm:$0xff]  ;;  %v34690_v42 = vld [vmem:[%s34887_s15 + $0x8] sm:$0xff] }
 0xbc8   :  { %25606 = vmatprep.subr.mxu0 %v25132_v14  ;;  %v34700_v6 = vld [vmem:[%s34887_s15] sm:$0xff] }
 0xbc9   :  { %25501 = vmatmul.mubr.f32.vlgmr.msra.gmra.mxu0 %v25142_v9  ;;  %25571 = vmatmul.mubr.f32.vlgmr.msra.gmra.mxu1 %v25144_v38 }
 0xbca   :  { %25607 = vmatpush1.xpose.msra.mxu0 %v25131_v35  ;;  %27668 = vmatpush3.xpose.msk.msra.mxu1 %vm25149_vm1, %v25133_v0  ;;  %v34739_v35 = vld [vmem:[%s34888_s16] ss:$0 sm:$0xff] }
 0xbcb   :  { %25640 = vmatprep.mubr.f32.mxu0 %v25147_v59  ;;  %27669 = vmatprep.mubr.msk.f32.mxu1 %vm27963_vm12, %v35347_v24 }
 0xbcc   :  { %27677 = vmatprep.subr.mxu1 %v35347_v24  ;;  %27672 = vmatprep.subr.mxu0 %v35347_v24 }
 0xbcd   :  { %25641 = vmatmul.mubr.f32.vlgmr.msra.gmra.mxu0 %v25146_v15  ;;  %27670 = vmatmul.mubr.msk.f32.vlgmr.msra.gmra.mxu1 %vm25149_vm1, %v25148_v26 }
 0xbce   :  { %27674 = vmatprep.mubr.msk.f32.mxu0 %vm27963_vm12, %v35347_v24  ;;  %27685 = vmatprep.mubr.msk.f32.mxu1 %vm27963_vm12, %v35347_v24 }
 0xbcf   :  { %27678 = vmatpush3.msra.mxu1 %v34593_v17  ;;  %27673 = vmatpush3.msra.mxu0 %v25716_v47 }
 0xbd0   :  { %27679 = vmatprep.subr.mxu1 %v35347_v24  ;;  %27688 = vmatprep.subr.mxu0 %v35347_v24 }
 0xbd1   :  { %27680 = vmatpush3.msra.mxu1 %v34600_v56 }
 0xbd2   :  { %27681 = vmatprep.subr.mxu1 %v35347_v24 }
 0xbd3   :  { %27682 = vmatpush3.msra.mxu1 %v34609_v36 }
 0xbd4   :  { %27683 = vmatprep.subr.mxu1 %v35347_v24 }
 0xbd5   :  { %27684 = vmatpush3.msra.mxu1 %v34616_v16 }
 0xbd6   :  { %27686 = vmatmul.mubr.f32.vlgmr.msra.gmra.mxu1 %v35347_v24  ;;  %27707 = vmatprep.subr.mxu1 %v35347_v24 }
 0xbd7   :  { %27708 = vmatpush3.msra.mxu1 %v34593_v17  ;;  %27715 = vmatprep.mubr.msk.f32.mxu1 %vm27963_vm12, %v35347_v24 }
 0xbd8   :  { %27709 = vmatprep.subr.mxu1 %v35347_v24 }
 0xbd9   :  { %27710 = vmatpush3.msra.mxu1 %v34600_v56 }
 0xbda   :  { %27711 = vmatprep.subr.mxu1 %v35347_v24 }
 0xbdb   :  { %27712 = vmatpush3.msra.mxu1 %v34609_v36 }
 0xbdc   :  { %27713 = vmatprep.subr.mxu1 %v35347_v24 }
 0xbdd   :  { %27714 = vmatpush3.msra.mxu1 %v34616_v16 }
 0xbde   :  { %27718 = vmatprep.subr.mxu1 %v35347_v24 }
 0xc75   :  { %v25292_v57 = vpop.f32.mrf.mxu1 }
 0xc77   :  { %v25294_v41 = vpop.f32.mrf.mxu1 }
 0xc7f   :  { %v25432_v22 = vpop.f32.mrf.mxu1 }
 0xc81   :  { %v25222_v62 = vpop.f32.mrf.mxu0  ;;  %v25434_v1 = vpop.f32.mrf.mxu1 }
 0xc82   :  { %v25293_v33 = vadd.f32 %v25292_v57, %v25222_v62 }
 0xc83   :  { %v25224_v12 = vpop.f32.mrf.mxu0 }
 0xc85   :  { %v25362_v8 = vpop.f32.mrf.mxu0 }
 0xc86   :  { %v25363_v53 = vadd.f32 %v25362_v8, %v25293_v33 }
 0xc87   :  { %v25364_v37 = vpop.f32.mrf.mxu0 }
 0xc88   :  { %v25433_v55 = vadd.f32 %v25432_v22, %v25363_v53 }
 0xc89   :  { %v25502_v32 = vpop.f32.mrf.mxu0  ;;  %v25572_v60 = vpop.f32.mrf.mxu1 }
 0xc8a   :  { %v25503_v2 = vadd.f32 %v25502_v32, %v25433_v55 }
 0xc8b   :  { %v25504_v5 = vpop.f32.mrf.mxu0  ;;  %v25574_v20 = vpop.f32.mrf.mxu1 }
 0xc8c   :  { %v25573_v54 = vadd.f32 %v25572_v60, %v25503_v2 }
 0xc8d   :  { %v25642_v19 = vpop.f32.mrf.mxu0  ;;  %v25712_v45 = vpop.f32.mrf.mxu1 }
 0xc8e   :  { %v25643_v34 = vadd.f32 %v25642_v19, %v25573_v54 }
 0xc8f   :  { %v25644_v30 = vpop.f32.mrf.mxu0  ;;  %v27671_v23 = vpop.f32.mrf.mxu1 }
 0xc90   :  { %v25713_v18 = vadd.f32 %v25712_v45, %v25643_v34 }
 0xc92   :  { %27675 = vmatmul.mubr.msk.f32.vlgmr.msra.gmra.mxu0 %vm19415_vm9, %v25713_v18  ;;  %vm25801_vm9 = vcmask 261120  }
 0xc93   :  { %27704 = vmatprep.mubr.msk.f32.mxu0 %vm27963_vm12, %v35347_v24  ;;  %27689 = vmatpush3.msra.mxu0 %v34650_v58 }
 0xc94   :  { %27690 = vmatprep.subr.mxu0 %v35347_v24 }
 0xc95   :  { %27691 = vmatpush3.msra.mxu0 %v34655_v21 }
 0xc96   :  { %v25871_v29 = vpop.f32.mrf.mxu1  ;;  %27692 = vmatprep.subr.mxu0 %v35347_v24 }
 0xc97   :  { %27693 = vmatpush3.msra.mxu0 %v34662_v63 }
 0xc98   :  { %v27687_v31 = vpop.f32.mrf.mxu1  ;;  %27694 = vmatprep.subr.mxu0 %v35347_v24 }
 0xc99   :  { %27695 = vmatpush3.msra.mxu0 %v34669_v40 }
 0xc9a   :  { %27696 = vmatprep.subr.mxu0 %v35347_v24 }
 0xc9b   :  { %27697 = vmatpush3.msra.mxu0 %v34676_v48 }
 0xc9c   :  { %27698 = vmatprep.subr.mxu0 %v35347_v24 }
 0xc9d   :  { %27699 = vmatpush3.msra.mxu0 %v34683_v49 }
 0xc9e   :  { %27700 = vmatprep.subr.mxu0 %v35347_v24 }
 0xc9f   :  { %27701 = vmatpush3.msra.mxu0 %v34690_v42 }
 0xca0   :  { %27702 = vmatprep.subr.mxu0 %v35347_v24 }
 0xca1   :  { %27703 = vmatpush3.msra.mxu0 %v34700_v6 }
 0xca2   :  { %27737 = vmatprep.subr.mxu0 %v35347_v24 }
 0xd52   :  { %v25793_v39 = vpop.f32.mrf.mxu0 }
 0xd53   :  { %v34639_v50 = vadd.f32 %v27464_v44, %v25793_v39 }
 0xd54   :  { %v27676_v51 = vpop.f32.mrf.mxu0 }
 0xd55   :  { %v25875_v61 = vadd.f32 %v25871_v29, %v34639_v50 }
 0xd57   :  { %27849 = vtanh.f32 %v25875_v61  ;;  %v25876_v7 = vsub.f32 0.0, %v25875_v61 }
 0xd59   :  { %v25877_v43 = vmul.f32 1.442695, %v25876_v7 }
 0xd5b   :  { %27851 = vpow2.f32 %v25877_v43 }
 0xd64   :  { %v27850_v52 = vpop.eup %27849 }
 0xd65   :  { %25884 = vrot.lane.b32.xlu0 %v27850_v52, %s27967_s26 }
 0xd68   :  { %v27852_v10 = vpop.eup %27851 }
 0xd69   :  { %v25879_v11 = vadd.f32 1.0, %v27852_v10 }
 0xd6b   :  { %27853 = vrcp.f32 %v25879_v11 }
 0xd78   :  { %v27854_v27 = vpop.eup %27853 }
 0xd79   :  { %v25882_v46 = vmul.f32 0.0, %v27854_v27 }
 0xdd7   :  { %v25885_v4 = vpop.permute.xlu0 %25884 }
 0xdd8   :  { %v25887_v25 = vmul.f32 %v27854_v27, %v25885_v4 }
 0xdda   :  { %25889 = vrot.lane.b32.xlu1 %v25887_v25, %s27968_s14 }
 0xe4c   :  { %v25890_v28 = vpop.permute.xlu1 %25889 }
 0xe4d   :  { %v34644_v13 = vadd.f32 %v25890_v28, %v25882_v46 }
 0xe4f   :  { %27855 = vtanh.f32 %v34644_v13  ;;  %v26099_v34 = vrot.slane %v34644_v13, 6 }
 0xe5c   :  { %v27856_v3 = vpop.eup %27855 }
 0xe5d   :  { %25895 = vrot.lane.b32.xlu0 %v27856_v3, %s27967_s26 }
 0xecf   :  { %v25896_v9 = vpop.permute.xlu0 %25895 }
 0xed0   :  { %v25898_v38 = vmul.f32 %v27854_v27, %v25896_v9 }
 0xed2   :  { %25900 = vrot.lane.b32.xlu1 %v25898_v38, %s27968_s14 }
 0xf44   :  { %v25901_v14 = vpop.permute.xlu1 %25900 }
 0xf45   :  { %v25903_v59 = vsel %vm25801_vm9, %v25901_v14, 0.0  ;;  %27716 = vmatmul.mubr.msk.f32.vlgmr.msra.gmra.mxu1 %vm25801_vm9, %v25901_v14 }
 0xf46   :  { %27705 = vmatmul.mubr.msk.f32.vlgmr.msra.gmra.mxu0 %vm25919_vm2, %v25903_v59  ;;  %27719 = vmatpush3.msra.mxu1 %v34650_v58 }
 0xf47   :  { %27720 = vmatprep.subr.mxu1 %v35347_v24  ;;  %27738 = vmatpush3.msra.mxu0 %v34593_v17 }
 0xf48   :  { %27721 = vmatpush3.msra.mxu1 %v34655_v21  ;;  %27739 = vmatprep.subr.mxu0 %v35347_v24 }
 0xf49   :  { %27722 = vmatprep.subr.mxu1 %v35347_v24  ;;  %27740 = vmatpush3.msra.mxu0 %v34600_v56 }
 0xf4a   :  { %27723 = vmatpush3.msra.mxu1 %v34662_v63  ;;  %27741 = vmatprep.subr.mxu0 %v35347_v24 }
 0xf4b   :  { %27724 = vmatprep.subr.mxu1 %v35347_v24  ;;  %27742 = vmatpush3.msra.mxu0 %v34609_v36 }
 0xf4c   :  { %27725 = vmatpush3.msra.mxu1 %v34669_v40  ;;  %27743 = vmatprep.subr.mxu0 %v35347_v24 }
 0xf4d   :  { %27726 = vmatprep.subr.mxu1 %v35347_v24  ;;  %27734 = vmatprep.mubr.msk.f32.mxu1 %vm27963_vm12, %v35347_v24 }
 0xf4e   :  { %27727 = vmatpush3.msra.mxu1 %v34676_v48  ;;  %27744 = vmatpush3.msra.mxu0 %v34616_v16 }
 0xf4f   :  { %27728 = vmatprep.subr.mxu1 %v35347_v24  ;;  %27745 = vmatprep.mubr.msk.f32.mxu0 %vm27963_vm12, %v35347_v24 }
 0xf50   :  { %27729 = vmatpush3.msra.mxu1 %v34683_v49  ;;  %27748 = vmatprep.subr.mxu0 %v35347_v24 }
 0xf51   :  { %27730 = vmatprep.subr.mxu1 %v35347_v24 }
 0xf52   :  { %27731 = vmatpush3.msra.mxu1 %v34690_v42 }
 0xf53   :  { %27732 = vmatprep.subr.mxu1 %v35347_v24 }
 0xf54   :  { %27733 = vmatpush3.msra.mxu1 %v34700_v6 }
 0xf55   :  { %27767 = vmatprep.subr.mxu1 %v35347_v24 }
0x1005   :  { %v26084_v0 = vpop.f32.mrf.mxu1 }
0x1006   :  { %v26089_v15 = vrot.slane %v26084_v0, 6  ;;  %v25989_v26 = vpop.f32.mrf.mxu0 }
0x1007   :  { %v25990_v47 = vadd.f32 %v34739_v35, %v25989_v26  ;;  %v27717_v57 = vpop.f32.mrf.mxu1 }
0x1008   :  { %v26091_v41 = vadd.f32 %v26089_v15, %v34639_v50  ;;  %v27706_v22 = vpop.f32.mrf.mxu0 }
0x1009   :  { %27857 = vtanh.f32 %v25990_v47  ;;  %v25993_v12 = vsub.f32 0.0, %v25990_v47 }
0x100a   :  { %27859 = vtanh.f32 %v26091_v41  ;;  %v26092_v33 = vsub.f32 0.0, %v26091_v41 }
0x100b   :  { %v25994_v8 = vmul.f32 1.442695, %v25993_v12 }
0x100c   :  { %v26093_v53 = vmul.f32 1.442695, %v26092_v33 }
0x100d   :  { %27861 = vpow2.f32 %v25994_v8 }
0x100e   :  { %27863 = vpow2.f32 %v26093_v53 }
0x1016   :  { %v27858_v62 = vpop.eup %27857 }
0x1017   :  { %v27860_v1 = vpop.eup %27859  ;;  %26001 = vrot.lane.b32.xlu0 %v27858_v62, %s27967_s26 }
0x1018   :  { %26103 = vrot.lane.b32.xlu1 %v27860_v1, %s27967_s26 }
0x101a   :  { %v27862_v37 = vpop.eup %27861 }
0x101b   :  { %v27864_v55 = vpop.eup %27863  ;;  %v25996_v32 = vadd.f32 1.0, %v27862_v37 }
0x101c   :  { %v26095_v60 = vadd.f32 1.0, %v27864_v55 }
0x101d   :  { %27865 = vrcp.f32 %v25996_v32 }
0x101e   :  { %27867 = vrcp.f32 %v26095_v60 }
0x102a   :  { %v27866_v2 = vpop.eup %27865 }
0x102b   :  { %v27868_v20 = vpop.eup %27867  ;;  %v25999_v30 = vmul.f32 0.0, %v27866_v2 }
0x102c   :  { %v26101_v18 = vmul.f32 %v27868_v20, %v26099_v34 }
0x1089   :  { %v26002_v5 = vpop.permute.xlu0 %26001 }
0x108a   :  { %v26004_v54 = vmul.f32 %v27866_v2, %v26002_v5  ;;  %v26104_v19 = vpop.permute.xlu1 %26103 }
0x108b   :  { %v26106_v45 = vmul.f32 %v27868_v20, %v26104_v19 }
0x108c   :  { %26006 = vrot.lane.b32.xlu0 %v26004_v54, %s27968_s14 }
0x108d   :  { %26108 = vrot.lane.b32.xlu1 %v26106_v45, %s27968_s14 }
0x10fe   :  { %v26007_v23 = vpop.permute.xlu0 %26006 }
0x10ff   :  { %v34748_v29 = vadd.f32 %v26007_v23, %v25999_v30  ;;  %v26109_v31 = vpop.permute.xlu1 %26108 }
0x1100   :  { %v34750_v44 = vadd.f32 %v26109_v31, %v26101_v18 }
0x1101   :  { %27869 = vtanh.f32 %v34748_v29 }
0x1102   :  { %27871 = vtanh.f32 %v34750_v44  ;;  %v26311_v37 = vrot.slane %v34750_v44, 6 }
0x110e   :  { %v27870_v39 = vpop.eup %27869 }
0x110f   :  { %v27872_v51 = vpop.eup %27871  ;;  %26012 = vrot.lane.b32.xlu0 %v27870_v39, %s27967_s26 }
0x1110   :  { %26114 = vrot.lane.b32.xlu1 %v27872_v51, %s27967_s26 }
0x1181   :  { %v26013_v61 = vpop.permute.xlu0 %26012 }
0x1182   :  { %v26015_v52 = vmul.f32 %v27866_v2, %v26013_v61  ;;  %v26115_v7 = vpop.permute.xlu1 %26114 }
0x1183   :  { %v26117_v43 = vmul.f32 %v27868_v20, %v26115_v7 }
0x1184   :  { %v26123_v10 = vrot.slane %v26015_v52, 6 }
0x1185   :  { %26119 = vrot.lane.b32.xlu0 %v26117_v43, %s27968_s14  ;;  %v26225_v11 = vrot.slane %v26117_v43, 2 }
0x1186   :  { %26124 = vrot.lane.b32.xlu1 %v26123_v10, %s27967_s26 }
0x1189   :  { %26226 = vrot.lane.b32.xlu0 %v26225_v11, %s27968_s14 }
0x11f7   :  { %v26120_v27 = vpop.permute.xlu0 %26119 }
0x11f8   :  { %v26125_v4 = vpop.permute.xlu1 %26124 }
0x11f9   :  { %v26127_v25 = vsel %vm25801_vm9, %v26120_v27, %v26125_v4 }
0x11fa   :  { %v26129_v46 = vrot.slane %v26127_v25, 2 }
0x11fb   :  { %v26227_v28 = vpop.permute.xlu0 %26226 }
0x11fc   :  { %27735 = vmatmul.mubr.msk.f32.vlgmr.msra.gmra.mxu1 %vm25919_vm2, %v26129_v46  ;;  %27746 = vmatmul.mubr.msk.f32.vlgmr.msra.gmra.mxu0 %vm25801_vm9, %v26227_v28 }
0x11fd   :  { %27749 = vmatpush3.msra.mxu0 %v34650_v58  ;;  %27768 = vmatpush3.msra.mxu1 %v34593_v17 }
0x11fe   :  { %27750 = vmatprep.subr.mxu0 %v35347_v24  ;;  %27769 = vmatprep.subr.mxu1 %v35347_v24 }
0x11ff   :  { %27751 = vmatpush3.msra.mxu0 %v34655_v21  ;;  %27770 = vmatpush3.msra.mxu1 %v34600_v56 }
0x1200   :  { %27752 = vmatprep.subr.mxu0 %v35347_v24  ;;  %27771 = vmatprep.subr.mxu1 %v35347_v24 }
0x1201   :  { %27753 = vmatpush3.msra.mxu0 %v34662_v63  ;;  %27772 = vmatpush3.msra.mxu1 %v34609_v36 }
0x1202   :  { %27754 = vmatprep.subr.mxu0 %v35347_v24  ;;  %27764 = vmatprep.mubr.msk.f32.mxu0 %vm27963_vm12, %v35347_v24 }
0x1203   :  { %27755 = vmatpush3.msra.mxu0 %v34669_v40  ;;  %27773 = vmatprep.subr.mxu1 %v35347_v24 }
0x1204   :  { %27756 = vmatprep.subr.mxu0 %v35347_v24  ;;  %27774 = vmatpush3.msra.mxu1 %v34616_v16 }
0x1205   :  { %27757 = vmatpush3.msra.mxu0 %v34676_v48  ;;  %27775 = vmatprep.mubr.msk.f32.mxu1 %vm27963_vm12, %v35347_v24 }
0x1206   :  { %27758 = vmatprep.subr.mxu0 %v35347_v24  ;;  %27778 = vmatprep.subr.mxu1 %v35347_v24 }
0x1207   :  { %27759 = vmatpush3.msra.mxu0 %v34683_v49 }
0x1208   :  { %27760 = vmatprep.subr.mxu0 %v35347_v24 }
0x1209   :  { %27761 = vmatpush3.msra.mxu0 %v34690_v42 }
0x120a   :  { %27762 = vmatprep.subr.mxu0 %v35347_v24 }
0x120b   :  { %27763 = vmatpush3.msra.mxu0 %v34700_v6 }
0x120c   :  { %27797 = vmatprep.subr.mxu0 %v35347_v24 }
0x12bc   :  { %v26198_v17 = vpop.f32.mrf.mxu1  ;;  %v26296_v56 = vpop.f32.mrf.mxu0 }
0x12bd   :  { %v26199_v36 = vadd.f32 %v34739_v35, %v26198_v17  ;;  %v26301_v16 = vrot.slane %v26296_v56, 4 }
0x12be   :  { %v27736_v13 = vpop.f32.mrf.mxu1  ;;  %v27747_v3 = vpop.f32.mrf.mxu0 }
0x12bf   :  { %27873 = vtanh.f32 %v26199_v36  ;;  %v26303_v9 = vadd.f32 %v26301_v16, %v34639_v50  ;;  %v26202_v59 = vsub.f32 0.0, %v26199_v36 }
0x12c1   :  { %27875 = vtanh.f32 %v26303_v9  ;;  %v26304_v0 = vsub.f32 0.0, %v26303_v9  ;;  %v26203_v15 = vmul.f32 1.442695, %v26202_v59 }
0x12c3   :  { %v26305_v26 = vmul.f32 1.442695, %v26304_v0  ;;  %27877 = vpow2.f32 %v26203_v15 }
0x12c5   :  { %27879 = vpow2.f32 %v26305_v26 }
0x12cc   :  { %v27874_v38 = vpop.eup %27873 }
0x12cd   :  { %26210 = vrot.lane.b32.xlu1 %v27874_v38, %s27967_s26 }
0x12ce   :  { %v27876_v14 = vpop.eup %27875 }
0x12cf   :  { %26315 = vrot.lane.b32.xlu0 %v27876_v14, %s27967_s26 }
0x12d0   :  { %v27878_v47 = vpop.eup %27877 }
0x12d1   :  { %v26205_v41 = vadd.f32 1.0, %v27878_v47 }
0x12d2   :  { %v27880_v57 = vpop.eup %27879 }
0x12d3   :  { %v26307_v22 = vadd.f32 1.0, %v27880_v57  ;;  %27881 = vrcp.f32 %v26205_v41 }
0x12d5   :  { %27883 = vrcp.f32 %v26307_v22 }
0x12e0   :  { %v27882_v62 = vpop.eup %27881 }
0x12e1   :  { %v26208_v55 = vmul.f32 %v27882_v62, %v34748_v29 }
0x12e2   :  { %v27884_v33 = vpop.eup %27883 }
0x12e3   :  { %v26313_v2 = vmul.f32 %v27884_v33, %v26311_v37 }
0x133f   :  { %v26211_v1 = vpop.permute.xlu1 %26210 }
0x1340   :  { %v26213_v12 = vmul.f32 %v27882_v62, %v26211_v1 }
0x1341   :  { %v26316_v8 = vpop.permute.xlu0 %26315 }
0x1342   :  { %v26318_v53 = vmul.f32 %v27884_v33, %v26316_v8  ;;  %26215 = vrot.lane.b32.xlu1 %v26213_v12, %s27968_s14 }
0x1344   :  { %26320 = vrot.lane.b32.xlu0 %v26318_v53, %s27968_s14 }
0x13b4   :  { %v26216_v32 = vpop.permute.xlu1 %26215 }
0x13b5   :  { %v34798_v60 = vadd.f32 %v26216_v32, %v26208_v55 }
0x13b6   :  { %v26321_v5 = vpop.permute.xlu0 %26320 }
0x13b7   :  { %27885 = vtanh.f32 %v34798_v60  ;;  %v34801_v20 = vadd.f32 %v26321_v5, %v26313_v2 }
0x13b9   :  { %27887 = vtanh.f32 %v34801_v20  ;;  %v26523_v3 = vrot.slane %v34801_v20, 6 }
0x13c4   :  { %v27886_v54 = vpop.eup %27885 }
0x13c5   :  { %26221 = vrot.lane.b32.xlu1 %v27886_v54, %s27967_s26 }
0x13c6   :  { %v27888_v19 = vpop.eup %27887 }
0x13c7   :  { %26326 = vrot.lane.b32.xlu0 %v27888_v19, %s27967_s26 }
0x1437   :  { %v26222_v45 = vpop.permute.xlu1 %26221 }
0x1438   :  { %v26224_v34 = vmul.f32 %v27882_v62, %v26222_v45 }
0x1439   :  { %v26327_v30 = vpop.permute.xlu0 %26326 }
0x143a   :  { %v26335_v23 = vrot.slane %v26224_v34, 4  ;;  %v26329_v18 = vmul.f32 %v27884_v33, %v26327_v30 }
0x143c   :  { %26336 = vrot.lane.b32.xlu0 %v26335_v23, %s27967_s26  ;;  %26331 = vrot.lane.b32.xlu1 %v26329_v18, %s27968_s14  ;;  %v26437_v29 = vrot.slane %v26329_v18, 4  ;;  %v26651_v18 = vld [vmem:[%s34889_s17 + $0x10] sm:$0xff] }
0x1440   :  { %26438 = vrot.lane.b32.xlu1 %v26437_v29, %s27968_s14  ;;  %v26650_v29 = vld [vmem:[%s34889_s17 + $0x8] sm:$0xff] }
0x14ae   :  { %v26332_v31 = vpop.permute.xlu1 %26331  ;;  %v26337_v44 = vpop.permute.xlu0 %26336 }
0x14af   :  { %v26339_v39 = vsel %vm25801_vm9, %v26332_v31, %v26337_v44  ;;  %v26649_v31 = vld [vmem:[%s34889_s17] sm:$0xff] }
0x14b0   :  { %v26341_v51 = vrot.slane %v26339_v39, 4 }
0x14b2   :  { %v26439_v61 = vpop.permute.xlu1 %26438  ;;  %27765 = vmatmul.mubr.msk.f32.vlgmr.msra.gmra.mxu0 %vm25919_vm2, %v26341_v51 }
0x14b3   :  { %27776 = vmatmul.mubr.msk.f32.vlgmr.msra.gmra.mxu1 %vm25801_vm9, %v26439_v61  ;;  %27805 = vmatprep.mubr.msk.f32.mxu0 %vm27963_vm12, %v35347_v24 }
0x14b4   :  { %27779 = vmatpush3.msra.mxu1 %v34650_v58  ;;  %27794 = vmatprep.mubr.msk.f32.mxu1 %vm27963_vm12, %v35347_v24  ;;  %vm26735_vm12 = vcmask 33792  }
0x14b5   :  { %27780 = vmatprep.subr.mxu1 %v35347_v24 }
0x14b6   :  { %27781 = vmatpush3.msra.mxu1 %v34655_v21 }
0x14b7   :  { %27782 = vmatprep.subr.mxu1 %v35347_v24 }
0x14b8   :  { %27783 = vmatpush3.msra.mxu1 %v34662_v63 }
0x14b9   :  { %27784 = vmatprep.subr.mxu1 %v35347_v24 }
0x14ba   :  { %27785 = vmatpush3.msra.mxu1 %v34669_v40 }
0x14bb   :  { %27786 = vmatprep.subr.mxu1 %v35347_v24 }
0x14bc   :  { %27787 = vmatpush3.msra.mxu1 %v34676_v48 }
0x14bd   :  { %27788 = vmatprep.subr.mxu1 %v35347_v24 }
0x14be   :  { %27789 = vmatpush3.msra.mxu1 %v34683_v49 }
0x14bf   :  { %27790 = vmatprep.subr.mxu1 %v35347_v24 }
0x14c0   :  { %27791 = vmatpush3.msra.mxu1 %v34690_v42 }
0x14c1   :  { %27792 = vmatprep.subr.mxu1 %v35347_v24 }
0x14c2   :  { %27793 = vmatpush3.msra.mxu1 %v34700_v6 }
0x1572   :  { %v26410_v58 = vpop.f32.mrf.mxu0 }
0x1573   :  { %v26411_v21 = vadd.f32 %v34739_v35, %v26410_v58  ;;  %v26508_v63 = vpop.f32.mrf.mxu1  ;;  %v27474_v58 = vld [vmem:[%s34890_s18] ss:$0 sm:$0xff] }
0x1574   :  { %v26513_v40 = vrot.slane %v26508_v63, 2  ;;  %v27766_v52 = vpop.f32.mrf.mxu0 }
0x1575   :  { %27889 = vtanh.f32 %v26411_v21  ;;  %v27777_v48 = vpop.f32.mrf.mxu1  ;;  %v26414_v42 = vsub.f32 0.0, %v26411_v21 }
0x1576   :  { %v26515_v7 = vadd.f32 %v26513_v40, %v34639_v50 }
0x1577   :  { %v26415_v6 = vmul.f32 1.442695, %v26414_v42 }
0x1578   :  { %27891 = vtanh.f32 %v26515_v7  ;;  %v26516_v10 = vsub.f32 0.0, %v26515_v7 }
0x1579   :  { %27893 = vpow2.f32 %v26415_v6 }
0x157a   :  { %v26517_v11 = vmul.f32 1.442695, %v26516_v10 }
0x157c   :  { %27895 = vpow2.f32 %v26517_v11 }
0x1582   :  { %v27890_v49 = vpop.eup %27889 }
0x1583   :  { %26422 = vrot.lane.b32.xlu0 %v27890_v49, %s27967_s26 }
0x1585   :  { %v27892_v43 = vpop.eup %27891 }
0x1586   :  { %26527 = vrot.lane.b32.xlu1 %v27892_v43, %s27967_s26  ;;  %v27894_v27 = vpop.eup %27893 }
0x1587   :  { %v26417_v25 = vadd.f32 1.0, %v27894_v27 }
0x1589   :  { %v27896_v4 = vpop.eup %27895  ;;  %27897 = vrcp.f32 %v26417_v25 }
0x158a   :  { %v26519_v46 = vadd.f32 1.0, %v27896_v4 }
0x158c   :  { %27899 = vrcp.f32 %v26519_v46 }
0x1596   :  { %v27898_v50 = vpop.eup %27897 }
0x1597   :  { %v26420_v13 = vmul.f32 %v27898_v50, %v34798_v60 }
0x1599   :  { %v27900_v56 = vpop.eup %27899 }
0x159a   :  { %v26525_v14 = vmul.f32 %v27900_v56, %v26523_v3 }
0x15f5   :  { %v26423_v28 = vpop.permute.xlu0 %26422 }
0x15f6   :  { %v26425_v17 = vmul.f32 %v27898_v50, %v26423_v28 }
0x15f8   :  { %v26528_v36 = vpop.permute.xlu1 %26527  ;;  %26427 = vrot.lane.b32.xlu0 %v26425_v17, %s27968_s14 }
0x15f9   :  { %v26530_v16 = vmul.f32 %v27900_v56, %v26528_v36 }
0x15fb   :  { %26532 = vrot.lane.b32.xlu1 %v26530_v16, %s27968_s14 }
0x166a   :  { %v26428_v9 = vpop.permute.xlu0 %26427 }
0x166b   :  { %v26430_v38 = vadd.f32 %v26428_v9, %v26420_v13 }
0x166d   :  { %27901 = vtanh.f32 %v26430_v38  ;;  %v26533_v59 = vpop.permute.xlu1 %26532 }
0x166e   :  { %v26535_v0 = vadd.f32 %v26533_v59, %v26525_v14 }
0x1670   :  { %27903 = vtanh.f32 %v26535_v0 }
0x167a   :  { %v27902_v15 = vpop.eup %27901 }
0x167b   :  { %26433 = vrot.lane.b32.xlu0 %v27902_v15, %s27967_s26 }
0x167d   :  { %v27904_v26 = vpop.eup %27903 }
0x167e   :  { %26538 = vrot.lane.b32.xlu1 %v27904_v26, %s27967_s26 }
0x16ed   :  { %v26434_v47 = vpop.permute.xlu0 %26433 }
0x16ee   :  { %v26436_v57 = vmul.f32 %v27898_v50, %v26434_v47 }
0x16f0   :  { %v26547_v41 = vrot.slane %v26436_v57, 2  ;;  %v26539_v22 = vpop.permute.xlu1 %26538 }
0x16f1   :  { %v26541_v62 = vmul.f32 %v27900_v56, %v26539_v22 }
0x16f2   :  { %26548 = vrot.lane.b32.xlu1 %v26547_v41, %s27967_s26 }
0x16f3   :  { %26543 = vrot.lane.b32.xlu0 %v26541_v62, %s27968_s14 }
0x1764   :  { %v26549_v1 = vpop.permute.xlu1 %26548 }
0x1765   :  { %v26544_v12 = vpop.permute.xlu0 %26543 }
0x1766   :  { %v26551_v33 = vsel %vm25801_vm9, %v26544_v12, %v26549_v1 }
0x1767   :  { %v26553_v8 = vrot.slane %v26551_v33, 6 }
0x1769   :  { %27795 = vmatmul.mubr.msk.f32.vlgmr.msra.gmra.mxu1 %vm25919_vm2, %v26553_v8 }
0x1829   :  { %v26622_v53 = vpop.f32.mrf.mxu1 }
0x182a   :  { %v26623_v37 = vadd.f32 %v34739_v35, %v26622_v53  ;;  %v26652_v35 = vld [vmem:[%s34889_s17 + $0x18] sm:$0xff]  ;;  %s26743_s17 = sshll.u32 %s27969_s28, 4  ;;  %s26744_s17 = int_to_ptr.vmem [resolvable:$true] %s26743_s17 }
0x182b   :  { %v27796_v55 = vpop.f32.mrf.mxu1  ;;  %27798 = vmatpush3.msra.mxu0 %v26652_v35  ;;  %p27922_p1 = scmp.lt.s32.totalorder %s26744_s17, %s26744_s17 }
0x182c   :  { %27905 = vtanh.f32 %v26623_v37  ;;  %v26626_v60 = vsub.f32 0.0, %v26623_v37  ;;  %27799 = vmatprep.subr.mxu0 %v35347_v24 }
0x182d   :  { %27800 = vmatpush3.msra.mxu0 %v26651_v18 }
0x182e   :  { %v26627_v2 = vmul.f32 1.442695, %v26626_v60  ;;  %27801 = vmatprep.subr.mxu0 %v35347_v24 }
0x182f   :  { %27802 = vmatpush3.msra.mxu0 %v26650_v29 }
0x1830   :  { %27907 = vpow2.f32 %v26627_v2  ;;  %27803 = vmatprep.subr.mxu0 %v35347_v24 }
0x1831   :  { %27804 = vmatpush3.msra.mxu0 %v26649_v31 }
0x1839   :  { %v27906_v32 = vpop.eup %27905 }
0x183a   :  { %26634 = vrot.lane.b32.xlu0 %v27906_v32, %s27967_s26 }
0x183d   :  { %v27908_v5 = vpop.eup %27907 }
0x183e   :  { %v26629_v20 = vadd.f32 1.0, %v27908_v5 }
0x1840   :  { %27909 = vrcp.f32 %v26629_v20 }
0x184d   :  { %v27910_v54 = vpop.eup %27909 }
0x184e   :  { %v26632_v34 = vmul.f32 %v27910_v54, %v26430_v38 }
0x18ac   :  { %v26635_v19 = vpop.permute.xlu0 %26634 }
0x18ad   :  { %v26637_v45 = vmul.f32 %v27910_v54, %v26635_v19 }
0x18af   :  { %26639 = vrot.lane.b32.xlu1 %v26637_v45, %s27968_s14 }
0x1921   :  { %v26640_v30 = vpop.permute.xlu1 %26639 }
0x1922   :  { %v26642_v23 = vadd.f32 %v26640_v30, %v26632_v34 }
0x1924   :  { %27911 = vtanh.f32 %v26642_v23 }
0x1931   :  { %v27912_v44 = vpop.eup %27911 }
0x1932   :  { %26645 = vrot.lane.b32.xlu0 %v27912_v44, %s27967_s26  ;;  %s27917_s26 = scalar_lea.vmem %s26744_s17, 32 }
0x1933   :  { %p27918_p0 = scmp.ne.s32.totalorder %s26744_s17, %s27917_s26  ;;  %p27923_p2 = scmp.lt.s32.totalorder %s27917_s26, %s27917_s26 }
0x1935   :  { %p27924_p3 = por %p27923_p2, %p27922_p1 }
0x1937   :  { %p27925_p4 = pnand %p27924_p3, %p27918_p0 }
0x19a4   :  { %v26646_v39 = vpop.permute.xlu0 %26645 }
0x19a5   :  { %v26648_v51 = vmul.f32 %v27910_v54, %v26646_v39 }
0x19a7   :  { %26661 = vrot.lane.b32.xlu1 %v26648_v51, %s27968_s14 }
0x1a19   :  { %v26662_v61 = vpop.permute.xlu1 %26661 }
0x1a1a   :  { %27806 = vmatmul.mubr.msk.f32.vlgmr.msra.gmra.mxu0 %vm25801_vm9, %v26662_v61 }
0x1ada   :  { %v26731_v21 = vpop.f32.mrf.mxu0 }
0x1adb   :  { %v26732_v24 = vadd.f32 %v27474_v58, %v26731_v21 }
0x1adc   :  { %v27807_v63 = vpop.f32.mrf.mxu0 }
0x1add   :  { %26736 = vst.msk [vmem:[#allocation2] sm:$0x3] %vm26735_vm12, %v26732_v24 }
0x1ade   :  { %27928 = shalt.err (!%p27925_p4)
}
0x1adf   :  { %26746 = dma.vmem_to_hbm [thread:$0]  %s26744_s17, 32, %s34891_s19, [#allocation3]  }
0x1ae0   :  { %27937 = dma.done.wait [#allocation3], 32  }
0x1ae1   :  { %27938 = vsyncadd [#allocation3], 4294967264 }
0x1ae2   :  { %26750 = vsyncpa [#allocation3], 1 }

</bundles_post_ra>
